<compile_context>
chip_gen: v5e
topology: v5e:2x2
jax: 0.10.0
libtpu: 0.0.40
codegen_flags: <defaults>
</compile_context>

<pallas_src>
import functools

import jax
import jax.numpy as jnp
from jax.experimental import pallas as pl
from jax.experimental.pallas import tpu as pltpu

ACT_DTYPE = jnp.bfloat16      # inter-layer activation storage dtype
M_TILE = 512                  # in-kernel spatial tile (lanes, multiple of 128)
CHAN_ALIGN = 16               # bf16 packs 16 rows per 32-bit sublane group


def _round_up(x, m):
    return (x + m - 1) // m * m


def _make_tiles(total, tile):
    """Static (start, size) chunks; total and tile are multiples of 128."""
    tiles, pos = [], 0
    while pos < total:
        size = min(tile, total - pos)
        tiles.append((pos, size))
        pos += size
    return tuple(tiles)


# ----------------------------------------------------------------------------
# Pallas kernel: K-folded multi-tap conv on a flattened spatial slab.
#
#   x_ref : (1, Cin_p, S_pad)   bf16  one padded image, channels on sublanes
#   w_ref : (R, T*Cin_p)        bf16  R = Cout_p (conv) or 4*Cout_p (convT)
#   b_ref : (R, 1)              f32
#   o_ref : (1, R, M_pad)       f32 / bf16
#
#   For each static M tile: patch = concat_t x[:, start+off_t : +size]  (T*Cin, M)
#                           out   = relu?( W @ patch + b )              one MXU dot
# ----------------------------------------------------------------------------
def _tap_conv_kernel(x_ref, w_ref, b_ref, o_ref, *, offsets, tiles, relu):
    w = w_ref[...]
    b = b_ref[...]
    for start, size in tiles:                       # statically unrolled
        patch = jnp.concatenate(
            [x_ref[0, :, start + off:start + off + size] for off in offsets],
            axis=0)                                 # (T*Cin_p, size) bf16
        acc = jnp.dot(w, patch, preferred_element_type=jnp.float32) + b
        if relu:
            acc = jnp.maximum(acc, 0.0)
        o_ref[0, :, start:start + size] = acc.astype(o_ref.dtype)


def _run_tap_conv(x_flat, w2d, b2d, *, offsets, m_pad, relu, out_dtype):
    """x_flat: (N, Cin_p, S_pad) bf16; w2d: (R, T*Cin_p) bf16; b2d: (R,1) f32."""
    n, cin_p, s_pad = x_flat.shape
    rows, kdepth = w2d.shape
    kernel = functools.partial(
        _tap_conv_kernel,
        offsets=tuple(int(o) for o in offsets),
        tiles=_make_tiles(int(m_pad), M_TILE),
        relu=bool(relu))
    return pl.pallas_call(
        kernel,
        out_shape=jax.ShapeDtypeStruct((n, rows, m_pad), out_dtype),
        grid=(n,),
        in_specs=[
            pl.BlockSpec((1, cin_p, s_pad), lambda i: (i, 0, 0)),
            pl.BlockSpec((rows, kdepth), lambda i: (0, 0)),   # resident weights
            pl.BlockSpec((rows, 1), lambda i: (0, 0)),
        ],
        out_specs=pl.BlockSpec((1, rows, m_pad), lambda i: (i, 0, 0)),
        compiler_params=pltpu.CompilerParams(
            dimension_semantics=("parallel",),
            vmem_limit_bytes=48 * 1024 * 1024,      # safe on v5e/v6e/v7x
        ),
    )(x_flat, w2d, b2d)


# ----------------------------------------------------------------------------
# Conv / ConvTranspose wrappers (layout glue in JAX, matmuls in Pallas)
# ----------------------------------------------------------------------------
def _prep_slab(x, cin_p, pad_spec, s_pad):
    """channel-pad -> spatial-pad -> flatten -> bf16 (one fused XLA write)."""
    n, c = x.shape[:2]
    if cin_p != c:
        x = jnp.pad(x, ((0, 0), (0, cin_p - c), (0, 0), (0, 0)))
    xp = jnp.pad(x, ((0, 0), (0, 0)) + pad_spec)
    s = xp.shape[2] * xp.shape[3]
    x_flat = xp.reshape(n, cin_p, s)
    if s_pad > s:
        x_flat = jnp.pad(x_flat, ((0, 0), (0, 0), (0, s_pad - s)))
    return x_flat.astype(jnp.bfloat16)


def conv3x3(x, pack, *, relu, out_dtype, in_scale=None, in_shift=None):
    """3x3 conv, padding=1, stride=1 on an NCHW tensor.

    (in_scale, in_shift): per-channel affine from the preceding BatchNorm,
    applied *before* the zero padding (exact PyTorch ordering); XLA fuses it
    with the pad/reshape/bf16 cast the conv needs anyway.
    """
    n, c, h, w = x.shape
    w2d, b2d = pack["w2d"], pack["b_packed"]
    cout = pack["b"].shape[0]
    cin_p = w2d.shape[1] // 9

    if in_scale is not None:
        x = x.astype(jnp.float32) * in_scale[None, :, None, None] \
            + in_shift[None, :, None, None]

    offsets = tuple(ky * (w + 2) + kx for ky in range(3) for kx in range(3))
    m_out = h * (w + 2)
    m_pad = _round_up(m_out, 128)
    s = (h + 2) * (w + 2)
    s_pad = _round_up(max(s, m_pad + max(offsets)), 128)

    x_flat = _prep_slab(x, cin_p, ((1, 1), (1, 1)), s_pad)
    out = _run_tap_conv(x_flat, w2d, b2d, offsets=offsets, m_pad=m_pad,
                        relu=relu, out_dtype=out_dtype)
    return out[:, :cout, :m_out].reshape(n, cout, h, w + 2)[..., :w]


def conv_transpose3x3(x, pack, *, out_dtype, in_scale=None, in_shift=None):
    """ConvTranspose2d(k=3, stride=2, padding=1, output_padding=1), NCHW.

    2x2 sub-pixel phase decomposition: one K-folded tap conv with 4 offsets and
    a (4*Cout, 4*Cin) block weight, followed by a cheap pixel shuffle.  No
    zero-stuffed 4x intermediate is built.
    """
    n, c, h, w = x.shape
    w2d, b2d = pack["w2d"], pack["b_packed"]
    cout = pack["b"].shape[0]
    cout_p = w2d.shape[0] // 4
    cin_p = w2d.shape[1] // 4

    if in_scale is not None:
        x = x.astype(jnp.float32) * in_scale[None, :, None, None] \
            + in_shift[None, :, None, None]

    offsets = (0, 1, w + 1, w + 2)
    m_out = h * (w + 1)
    m_pad = _round_up(m_out, 128)
    s = (h + 1) * (w + 1)
    s_pad = _round_up(max(s, m_pad + max(offsets)), 128)

    x_flat = _prep_slab(x, cin_p, ((0, 1), (0, 1)), s_pad)   # right/bottom halo
    out = _run_tap_conv(x_flat, w2d, b2d, offsets=offsets, m_pad=m_pad,
                        relu=False, out_dtype=out_dtype)

    # pixel shuffle: rows are [phase p = ry*2+rx] x [cout_p]
    out = out[:, :, :m_out].reshape(n, 4, cout_p, h, w + 1)
    out = out[:, :, :cout, :, :w].reshape(n, 2, 2, cout, h, w)
    out = jnp.transpose(out, (0, 3, 4, 1, 5, 2)).reshape(n, cout, 2 * h, 2 * w)
    return out


# ----------------------------------------------------------------------------
# Cheap glue ops (memory-bound) in plain JAX
# ----------------------------------------------------------------------------
def bn_scale_shift(x, gamma, beta, eps=1e-5):
    # PyTorch BatchNorm2d in training mode: batch stats, biased variance.
    xf = x.astype(jnp.float32)
    mean = jnp.mean(xf, axis=(0, 2, 3))
    var = jnp.var(xf, axis=(0, 2, 3))
    s = gamma / jnp.sqrt(var + eps)
    t = beta - mean * s
    return s, t


def apply_affine(x, s, t, out_dtype):
    y = x.astype(jnp.float32) * s[None, :, None, None] + t[None, :, None, None]
    return y.astype(out_dtype)


def maxpool2(x):
    n, c, h, w = x.shape
    return x.reshape(n, c, h // 2, 2, w // 2, 2).max(axis=(3, 5))


# ----------------------------------------------------------------------------
# Parameter construction (deterministic, synthetic) + one-time weight packing
# ----------------------------------------------------------------------------
def _make_conv(key, cin, cout):
    k1, k2 = jax.random.split(key)
    w = 0.1 * jax.random.normal(k1, (cout, cin, 3, 3), jnp.float32)
    b = 0.1 * jax.random.normal(k2, (cout,), jnp.float32)
    return w, b


def _make_convT(key, cin, cout):
    k1, k2 = jax.random.split(key)
    w = 0.1 * jax.random.normal(k1, (cin, cout, 3, 3), jnp.float32)
    b = 0.1 * jax.random.normal(k2, (cout,), jnp.float32)
    return w, b


def _make_bn(key, c):
    k1, k2 = jax.random.split(key)
    gamma = 1.0 + 0.1 * jax.random.normal(k1, (c,), jnp.float32)
    beta = 0.1 * jax.random.normal(k2, (c,), jnp.float32)
    return gamma, beta


def init_unet_params(key, in_channel=1, out_channel=1):
    keys = iter(jax.random.split(key, 64))
    p = {}

    def contract(cin, cout):
        w1, b1 = _make_conv(next(keys), cin, cout)
        g1, be1 = _make_bn(next(keys), cout)
        w2, b2 = _make_conv(next(keys), cout, cout)
        g2, be2 = _make_bn(next(keys), cout)
        return dict(w1=w1, b1=b1, g1=g1, be1=be1, w2=w2, b2=b2, g2=g2, be2=be2)

    def expans(cin, cmid, cout):
        d = contract(cin, cmid)
        wt, bt = _make_convT(next(keys), cmid, cout)
        d.update(wt=wt, bt=bt)
        return d

    def bottleneck(cin):
        w1, b1 = _make_conv(next(keys), cin, 2 * cin)
        w2, b2 = _make_conv(next(keys), 2 * cin, cin)
        return dict(w1=w1, b1=b1, w2=w2, b2=b2)

    def final(cin, cmid, cout):
        d = contract(cin, cmid)
        w3, b3 = _make_conv(next(keys), cmid, cout)
        d.update(w3=w3, b3=b3)
        return d

    p["enc1"] = contract(in_channel, 16)
    p["enc2"] = contract(16, 32)
    p["enc3"] = contract(32, 64)
    p["bottleneck"] = bottleneck(64)
    p["dec4"] = expans(64, 64, 64)
    p["dec3"] = expans(128, 64, 32)
    p["dec2"] = expans(64, 32, 16)
    p["final"] = final(32, 16, out_channel)
    return p


def _pack_conv(w, b):
    """(Cout,Cin,3,3) torch conv -> K-folded bf16 (Cout_p, 9*Cin_p) weight."""
    cout, cin = w.shape[:2]
    cin_p = _round_up(cin, CHAN_ALIGN)
    cout_p = _round_up(cout, CHAN_ALIGN)
    wp = jnp.pad(w, ((0, cout_p - cout), (0, cin_p - cin), (0, 0), (0, 0)))
    # column index = (ky*3+kx)*Cin_p + ci  == tap-major, matches kernel concat
    w2d = jnp.transpose(wp, (0, 2, 3, 1)).reshape(cout_p, 9 * cin_p)
    bp = jnp.pad(b, (0, cout_p - cout)).reshape(cout_p, 1)
    return {"w2d": w2d.astype(jnp.bfloat16),
            "b_packed": bp.astype(jnp.float32),
            "b": b.astype(jnp.float32)}


def _pack_convT(wt, b):
    """(Cin,Cout,3,3) torch convT -> phase-fused bf16 (4*Cout_p, 4*Cin_p)."""
    cin, cout = wt.shape[:2]
    cin_p = _round_up(cin, CHAN_ALIGN)
    cout_p = _round_up(cout, CHAN_ALIGN)
    # equivalent correlation kernel
    wf = jnp.flip(jnp.transpose(wt, (1, 0, 2, 3)), axis=(2, 3))   # (Cout,Cin,3,3)
    wf = jnp.pad(wf, ((0, cout_p - cout), (0, cin_p - cin), (0, 0), (0, 0)))

    big = jnp.zeros((4, 4 * cout_p, cin_p), jnp.float32)   # [tap, phase*Cout_p, Cin_p]

    def seg(p):
        return slice(p * cout_p, (p + 1) * cout_p)

    # taps: 0 -> x[i,j], 1 -> x[i,j+1], 2 -> x[i+1,j], 3 -> x[i+1,j+1]
    big = big.at[0, seg(0)].set(wf[:, :, 1, 1])
    big = big.at[0, seg(1)].set(wf[:, :, 1, 0])
    big = big.at[1, seg(1)].set(wf[:, :, 1, 2])
    big = big.at[0, seg(2)].set(wf[:, :, 0, 1])
    big = big.at[2, seg(2)].set(wf[:, :, 2, 1])
    big = big.at[0, seg(3)].set(wf[:, :, 0, 0])
    big = big.at[1, seg(3)].set(wf[:, :, 0, 2])
    big = big.at[2, seg(3)].set(wf[:, :, 2, 0])
    big = big.at[3, seg(3)].set(wf[:, :, 2, 2])

    w2d = jnp.transpose(big, (1, 0, 2)).reshape(4 * cout_p, 4 * cin_p)
    bp = jnp.tile(jnp.pad(b, (0, cout_p - cout)), 4).reshape(4 * cout_p, 1)
    return {"w2d": w2d.astype(jnp.bfloat16),
            "b_packed": bp.astype(jnp.float32),
            "b": b.astype(jnp.float32)}


def pack_unet_params(p):
    """One-time weight relayout/cast OUTSIDE the jitted forward."""
    def conv_bn(b):
        return dict(c1=_pack_conv(b["w1"], b["b1"]),
                    c2=_pack_conv(b["w2"], b["b2"]),
                    g1=b["g1"], be1=b["be1"], g2=b["g2"], be2=b["be2"])

    q = {}
    q["enc1"] = conv_bn(p["enc1"])
    q["enc2"] = conv_bn(p["enc2"])
    q["enc3"] = conv_bn(p["enc3"])
    q["bottleneck"] = dict(c1=_pack_conv(p["bottleneck"]["w1"], p["bottleneck"]["b1"]),
                           c2=_pack_conv(p["bottleneck"]["w2"], p["bottleneck"]["b2"]))
    for name in ("dec4", "dec3", "dec2"):
        d = conv_bn(p[name])
        d["ct"] = _pack_convT(p[name]["wt"], p[name]["bt"])
        q[name] = d
    fin = conv_bn(p["final"])
    fin["c3"] = _pack_conv(p["final"]["w3"], p["final"]["b3"])
    q["final"] = fin
    return q


# ----------------------------------------------------------------------------
# U-Net blocks / forward (NCHW everywhere; Conv -> ReLU -> BN ordering)
# ----------------------------------------------------------------------------
def _contract_block(p, x):
    x = conv3x3(x, p["c1"], relu=True, out_dtype=ACT_DTYPE)
    s, t = bn_scale_shift(x, p["g1"], p["be1"])
    x = conv3x3(x, p["c2"], relu=True, out_dtype=ACT_DTYPE, in_scale=s, in_shift=t)
    s, t = bn_scale_shift(x, p["g2"], p["be2"])
    return apply_affine(x, s, t, ACT_DTYPE)     # materialized: feeds pool AND skip


def _expans_block(p, x):
    x = conv3x3(x, p["c1"], relu=True, out_dtype=ACT_DTYPE)
    s, t = bn_scale_shift(x, p["g1"], p["be1"])
    x = conv3x3(x, p["c2"], relu=True, out_dtype=ACT_DTYPE, in_scale=s, in_shift=t)
    s, t = bn_scale_shift(x, p["g2"], p["be2"])
    return conv_transpose3x3(x, p["ct"], out_dtype=ACT_DTYPE, in_scale=s, in_shift=t)


def _bottleneck_block(p, x):
    x = conv3x3(x, p["c1"], relu=True, out_dtype=ACT_DTYPE)
    return conv3x3(x, p["c2"], relu=True, out_dtype=ACT_DTYPE)


def _final_block(p, x):
    x = conv3x3(x, p["c1"], relu=True, out_dtype=ACT_DTYPE)
    s, t = bn_scale_shift(x, p["g1"], p["be1"])
    x = conv3x3(x, p["c2"], relu=True, out_dtype=ACT_DTYPE, in_scale=s, in_shift=t)
    s, t = bn_scale_shift(x, p["g2"], p["be2"])
    return conv3x3(x, p["c3"], relu=False, out_dtype=jnp.float32,
                   in_scale=s, in_shift=t)


def unet_forward(packed, x_nchw):
    x = x_nchw
    e1 = _contract_block(packed["enc1"], x)
    x = maxpool2(e1)
    e2 = _contract_block(packed["enc2"], x)
    x = maxpool2(e2)
    e3 = _contract_block(packed["enc3"], x)
    x = maxpool2(e3)
    x = _bottleneck_block(packed["bottleneck"], x)
    x = _expans_block(packed["dec4"], x)
    x = jnp.concatenate([x, e3], axis=1)        # torch.cat(dim=1)
    x = _expans_block(packed["dec3"], x)
    x = jnp.concatenate([x, e2], axis=1)
    x = _expans_block(packed["dec2"], x)
    x = jnp.concatenate([x, e1], axis=1)
    x = _final_block(packed["final"], x)
    return x                                    # NCHW, f32


if __name__ == "__main__":
    key = jax.random.PRNGKey(0)
    kp, kx = jax.random.split(key)

    in_channel, out_channel = 1, 1
    raw_params = init_unet_params(kp, in_channel, out_channel)
    packed = pack_unet_params(raw_params)       # one-time weight relayout

    # small input consistent with the module (H, W divisible by 8)
    x = jax.random.normal(kx, (2, in_channel, 16, 16), jnp.float32)

    fwd = jax.jit(unet_forward)
    y = jax.block_until_ready(fwd(packed, x))

    assert y.shape == (2, out_channel, 16, 16), y.shape
    assert y.dtype == jnp.float32
    assert jnp.all(jnp.isfinite(y))
    print("KERNEL_OK")
</pallas_src>

<mosaic_0001>
module attributes {stable_mosaic.version = 11 : i64} {
  func.func @_tap_conv_kernel(%arg0: i32, %arg1: memref<1x16x512xbf16, #tpu.memory_space<vmem>>, %arg2: memref<16x144xbf16, #tpu.memory_space<vmem>>, %arg3: memref<16x1xf32, #tpu.memory_space<vmem>>, %arg4: memref<1x16x384xbf16, #tpu.memory_space<vmem>>) attributes {dimension_semantics = [#tpu.dimension_semantics<parallel>], iteration_bounds = array<i64: 2>, scalar_prefetch = 0 : i64, scratch_operands = 0 : i64, tpu.core_type = #tpu.core_type<tc>, window_params = [{transform_indices = @transform_0, window_bounds = array<i64: 1, 16, 512>}, {pipeline_mode = #tpu.pipeline_mode<synchronous>, transform_indices = @transform_1, window_bounds = array<i64: 16, 144>}, {pipeline_mode = #tpu.pipeline_mode<synchronous>, transform_indices = @transform_2, window_bounds = array<i64: 16, 1>}, {transform_indices = @transform_3, window_bounds = array<i64: 1, 16, 384>}]} {
    %c0 = arith.constant 0 : index
    %c0_0 = arith.constant 0 : index
    %0 = vector.load %arg2[%c0, %c0_0] : memref<16x144xbf16, #tpu.memory_space<vmem>>, vector<16x144xbf16>
    %c0_1 = arith.constant 0 : index
    %c0_2 = arith.constant 0 : index
    %1 = vector.load %arg3[%c0_1, %c0_2] : memref<16x1xf32, #tpu.memory_space<vmem>>, vector<16x1xf32>
    %c0_3 = arith.constant 0 : index
    %c0_4 = arith.constant 0 : index
    %c0_5 = arith.constant 0 : index
    %2 = vector.load %arg1[%c0_3, %c0_4, %c0_5] : memref<1x16x512xbf16, #tpu.memory_space<vmem>>, vector<1x16x384xbf16>
    %3 = vector.shape_cast %2 : vector<1x16x384xbf16> to vector<16x384xbf16>
    %c0_6 = arith.constant 0 : index
    %c0_7 = arith.constant 0 : index
    %c1 = arith.constant 1 : index
    %4 = vector.load %arg1[%c0_6, %c0_7, %c1] : memref<1x16x512xbf16, #tpu.memory_space<vmem>>, vector<1x16x384xbf16>
    %5 = vector.shape_cast %4 : vector<1x16x384xbf16> to vector<16x384xbf16>
    %c0_8 = arith.constant 0 : index
    %c0_9 = arith.constant 0 : index
    %c2 = arith.constant 2 : index
    %6 = vector.load %arg1[%c0_8, %c0_9, %c2] : memref<1x16x512xbf16, #tpu.memory_space<vmem>>, vector<1x16x384xbf16>
    %7 = vector.shape_cast %6 : vector<1x16x384xbf16> to vector<16x384xbf16>
    %c0_10 = arith.constant 0 : index
    %c0_11 = arith.constant 0 : index
    %c18 = arith.constant 18 : index
    %8 = vector.load %arg1[%c0_10, %c0_11, %c18] : memref<1x16x512xbf16, #tpu.memory_space<vmem>>, vector<1x16x384xbf16>
    %9 = vector.shape_cast %8 : vector<1x16x384xbf16> to vector<16x384xbf16>
    %c0_12 = arith.constant 0 : index
    %c0_13 = arith.constant 0 : index
    %c19 = arith.constant 19 : index
    %10 = vector.load %arg1[%c0_12, %c0_13, %c19] : memref<1x16x512xbf16, #tpu.memory_space<vmem>>, vector<1x16x384xbf16>
    %11 = vector.shape_cast %10 : vector<1x16x384xbf16> to vector<16x384xbf16>
    %c0_14 = arith.constant 0 : index
    %c0_15 = arith.constant 0 : index
    %c20 = arith.constant 20 : index
    %12 = vector.load %arg1[%c0_14, %c0_15, %c20] : memref<1x16x512xbf16, #tpu.memory_space<vmem>>, vector<1x16x384xbf16>
    %13 = vector.shape_cast %12 : vector<1x16x384xbf16> to vector<16x384xbf16>
    %c0_16 = arith.constant 0 : index
    %c0_17 = arith.constant 0 : index
    %c36 = arith.constant 36 : index
    %14 = vector.load %arg1[%c0_16, %c0_17, %c36] : memref<1x16x512xbf16, #tpu.memory_space<vmem>>, vector<1x16x384xbf16>
    %15 = vector.shape_cast %14 : vector<1x16x384xbf16> to vector<16x384xbf16>
    %c0_18 = arith.constant 0 : index
    %c0_19 = arith.constant 0 : index
    %c37 = arith.constant 37 : index
    %16 = vector.load %arg1[%c0_18, %c0_19, %c37] : memref<1x16x512xbf16, #tpu.memory_space<vmem>>, vector<1x16x384xbf16>
    %17 = vector.shape_cast %16 : vector<1x16x384xbf16> to vector<16x384xbf16>
    %c0_20 = arith.constant 0 : index
    %c0_21 = arith.constant 0 : index
    %c38 = arith.constant 38 : index
    %18 = vector.load %arg1[%c0_20, %c0_21, %c38] : memref<1x16x512xbf16, #tpu.memory_space<vmem>>, vector<1x16x384xbf16>
    %19 = vector.shape_cast %18 : vector<1x16x384xbf16> to vector<16x384xbf16>
    %20 = tpu.concatenate %3, %5, %7, %9, %11, %13, %15, %17, %19 in 0 : vector<16x384xbf16>, vector<16x384xbf16>, vector<16x384xbf16>, vector<16x384xbf16>, vector<16x384xbf16>, vector<16x384xbf16>, vector<16x384xbf16>, vector<16x384xbf16>, vector<16x384xbf16> -> vector<144x384xbf16>
    %cst = arith.constant dense<0.000000e+00> : vector<16x384xf32>
    %21 = tpu.matmul %0, %20, %cst {dimension_numbers = #tpu.dot_dimension_numbers<[1], [0], [0], [1], [0, 0, 1, 1], [], []>} : vector<16x144xbf16>, vector<144x384xbf16>, vector<16x384xf32> -> vector<16x384xf32>
    %22 = vector.broadcast %1 : vector<16x1xf32> to vector<16x384xf32>
    %23 = arith.addf %21, %22 : vector<16x384xf32>
    %cst_22 = arith.constant 0.000000e+00 : f32
    %24 = vector.broadcast %cst_22 : f32 to vector<16x384xf32>
    %25 = arith.maximumf %23, %24 : vector<16x384xf32>
    %26 = arith.truncf %25 : vector<16x384xf32> to vector<16x384xbf16>
    %c0_23 = arith.constant 0 : index
    %c0_24 = arith.constant 0 : index
    %c0_25 = arith.constant 0 : index
    %27 = vector.load %arg4[%c0_23, %c0_24, %c0_25] : memref<1x16x384xbf16, #tpu.memory_space<vmem>>, vector<1x16x384xbf16>
    %28 = vector.shape_cast %27 : vector<1x16x384xbf16> to vector<16x384xbf16>
    %29 = vector.shape_cast %26 : vector<16x384xbf16> to vector<1x16x384xbf16>
    tpu.vector_store %arg4[%c0_23, %c0_24, %c0_25], %29 {strides = array<i32>} : memref<1x16x384xbf16, #tpu.memory_space<vmem>>, vector<1x16x384xbf16>,
    return
  }
  func.func @transform_0(%arg0: i32) -> (i32, i32, i32) {
    %c0_i32 = arith.constant 0 : i32
    %c0_i32_0 = arith.constant 0 : i32
    %c0_i32_1 = arith.constant 0 : i32
    return %arg0, %c0_i32, %c0_i32_0 : i32, i32, i32
  }
  func.func @transform_1(%arg0: i32) -> (i32, i32) {
    %c0_i32 = arith.constant 0 : i32
    %c0_i32_0 = arith.constant 0 : i32
    %c0_i32_1 = arith.constant 0 : i32
    return %c0_i32, %c0_i32_0 : i32, i32
  }
  func.func @transform_2(%arg0: i32) -> (i32, i32) {
    %c0_i32 = arith.constant 0 : i32
    %c0_i32_0 = arith.constant 0 : i32
    %c0_i32_1 = arith.constant 0 : i32
    return %c0_i32, %c0_i32_0 : i32, i32
  }
  func.func @transform_3(%arg0: i32) -> (i32, i32, i32) {
    %c0_i32 = arith.constant 0 : i32
    %c0_i32_0 = arith.constant 0 : i32
    %c0_i32_1 = arith.constant 0 : i32
    return %arg0, %c0_i32, %c0_i32_0 : i32, i32, i32
  }
}

module attributes {stable_mosaic.version = 11 : i64} {
  func.func @_tap_conv_kernel(%arg0: i32, %arg1: memref<1x16x256xbf16, #tpu.memory_space<vmem>>, %arg2: memref<32x144xbf16, #tpu.memory_space<vmem>>, %arg3: memref<32x1xf32, #tpu.memory_space<vmem>>, %arg4: memref<1x32x128xbf16, #tpu.memory_space<vmem>>) attributes {dimension_semantics = [#tpu.dimension_semantics<parallel>], iteration_bounds = array<i64: 2>, scalar_prefetch = 0 : i64, scratch_operands = 0 : i64, tpu.core_type = #tpu.core_type<tc>, window_params = [{transform_indices = @transform_0, window_bounds = array<i64: 1, 16, 256>}, {pipeline_mode = #tpu.pipeline_mode<synchronous>, transform_indices = @transform_1, window_bounds = array<i64: 32, 144>}, {pipeline_mode = #tpu.pipeline_mode<synchronous>, transform_indices = @transform_2, window_bounds = array<i64: 32, 1>}, {transform_indices = @transform_3, window_bounds = array<i64: 1, 32, 128>}]} {
    %c0 = arith.constant 0 : index
    %c0_0 = arith.constant 0 : index
    %0 = vector.load %arg2[%c0, %c0_0] : memref<32x144xbf16, #tpu.memory_space<vmem>>, vector<32x144xbf16>
    %c0_1 = arith.constant 0 : index
    %c0_2 = arith.constant 0 : index
    %1 = vector.load %arg3[%c0_1, %c0_2] : memref<32x1xf32, #tpu.memory_space<vmem>>, vector<32x1xf32>
    %c0_3 = arith.constant 0 : index
    %c0_4 = arith.constant 0 : index
    %c0_5 = arith.constant 0 : index
    %2 = vector.load %arg1[%c0_3, %c0_4, %c0_5] : memref<1x16x256xbf16, #tpu.memory_space<vmem>>, vector<1x16x128xbf16>
    %3 = vector.shape_cast %2 : vector<1x16x128xbf16> to vector<16x128xbf16>
    %c0_6 = arith.constant 0 : index
    %c0_7 = arith.constant 0 : index
    %c1 = arith.constant 1 : index
    %4 = vector.load %arg1[%c0_6, %c0_7, %c1] : memref<1x16x256xbf16, #tpu.memory_space<vmem>>, vector<1x16x128xbf16>
    %5 = vector.shape_cast %4 : vector<1x16x128xbf16> to vector<16x128xbf16>
    %c0_8 = arith.constant 0 : index
    %c0_9 = arith.constant 0 : index
    %c2 = arith.constant 2 : index
    %6 = vector.load %arg1[%c0_8, %c0_9, %c2] : memref<1x16x256xbf16, #tpu.memory_space<vmem>>, vector<1x16x128xbf16>
    %7 = vector.shape_cast %6 : vector<1x16x128xbf16> to vector<16x128xbf16>
    %c0_10 = arith.constant 0 : index
    %c0_11 = arith.constant 0 : index
    %c10 = arith.constant 10 : index
    %8 = vector.load %arg1[%c0_10, %c0_11, %c10] : memref<1x16x256xbf16, #tpu.memory_space<vmem>>, vector<1x16x128xbf16>
    %9 = vector.shape_cast %8 : vector<1x16x128xbf16> to vector<16x128xbf16>
    %c0_12 = arith.constant 0 : index
    %c0_13 = arith.constant 0 : index
    %c11 = arith.constant 11 : index
    %10 = vector.load %arg1[%c0_12, %c0_13, %c11] : memref<1x16x256xbf16, #tpu.memory_space<vmem>>, vector<1x16x128xbf16>
    %11 = vector.shape_cast %10 : vector<1x16x128xbf16> to vector<16x128xbf16>
    %c0_14 = arith.constant 0 : index
    %c0_15 = arith.constant 0 : index
    %c12 = arith.constant 12 : index
    %12 = vector.load %arg1[%c0_14, %c0_15, %c12] : memref<1x16x256xbf16, #tpu.memory_space<vmem>>, vector<1x16x128xbf16>
    %13 = vector.shape_cast %12 : vector<1x16x128xbf16> to vector<16x128xbf16>
    %c0_16 = arith.constant 0 : index
    %c0_17 = arith.constant 0 : index
    %c20 = arith.constant 20 : index
    %14 = vector.load %arg1[%c0_16, %c0_17, %c20] : memref<1x16x256xbf16, #tpu.memory_space<vmem>>, vector<1x16x128xbf16>
    %15 = vector.shape_cast %14 : vector<1x16x128xbf16> to vector<16x128xbf16>
    %c0_18 = arith.constant 0 : index
    %c0_19 = arith.constant 0 : index
    %c21 = arith.constant 21 : index
    %16 = vector.load %arg1[%c0_18, %c0_19, %c21] : memref<1x16x256xbf16, #tpu.memory_space<vmem>>, vector<1x16x128xbf16>
    %17 = vector.shape_cast %16 : vector<1x16x128xbf16> to vector<16x128xbf16>
    %c0_20 = arith.constant 0 : index
    %c0_21 = arith.constant 0 : index
    %c22 = arith.constant 22 : index
    %18 = vector.load %arg1[%c0_20, %c0_21, %c22] : memref<1x16x256xbf16, #tpu.memory_space<vmem>>, vector<1x16x128xbf16>
    %19 = vector.shape_cast %18 : vector<1x16x128xbf16> to vector<16x128xbf16>
    %20 = tpu.concatenate %3, %5, %7, %9, %11, %13, %15, %17, %19 in 0 : vector<16x128xbf16>, vector<16x128xbf16>, vector<16x128xbf16>, vector<16x128xbf16>, vector<16x128xbf16>, vector<16x128xbf16>, vector<16x128xbf16>, vector<16x128xbf16>, vector<16x128xbf16> -> vector<144x128xbf16>
    %cst = arith.constant dense<0.000000e+00> : vector<32x128xf32>
    %21 = tpu.matmul %0, %20, %cst {dimension_numbers = #tpu.dot_dimension_numbers<[1], [0], [0], [1], [0, 0, 1, 1], [], []>} : vector<32x144xbf16>, vector<144x128xbf16>, vector<32x128xf32> -> vector<32x128xf32>
    %22 = vector.broadcast %1 : vector<32x1xf32> to vector<32x128xf32>
    %23 = arith.addf %21, %22 : vector<32x128xf32>
    %cst_22 = arith.constant 0.000000e+00 : f32
    %24 = vector.broadcast %cst_22 : f32 to vector<32x128xf32>
    %25 = arith.maximumf %23, %24 : vector<32x128xf32>
    %26 = arith.truncf %25 : vector<32x128xf32> to vector<32x128xbf16>
    %c0_23 = arith.constant 0 : index
    %c0_24 = arith.constant 0 : index
    %c0_25 = arith.constant 0 : index
    %27 = vector.load %arg4[%c0_23, %c0_24, %c0_25] : memref<1x32x128xbf16, #tpu.memory_space<vmem>>, vector<1x32x128xbf16>
    %28 = vector.shape_cast %27 : vector<1x32x128xbf16> to vector<32x128xbf16>
    %29 = vector.shape_cast %26 : vector<32x128xbf16> to vector<1x32x128xbf16>
    tpu.vector_store %arg4[%c0_23, %c0_24, %c0_25], %29 {strides = array<i32>} : memref<1x32x128xbf16, #tpu.memory_space<vmem>>, vector<1x32x128xbf16>,
    return
  }
  func.func @transform_0(%arg0: i32) -> (i32, i32, i32) {
    %c0_i32 = arith.constant 0 : i32
    %c0_i32_0 = arith.constant 0 : i32
    %c0_i32_1 = arith.constant 0 : i32
    return %arg0, %c0_i32, %c0_i32_0 : i32, i32, i32
  }
  func.func @transform_1(%arg0: i32) -> (i32, i32) {
    %c0_i32 = arith.constant 0 : i32
    %c0_i32_0 = arith.constant 0 : i32
    %c0_i32_1 = arith.constant 0 : i32
    return %c0_i32, %c0_i32_0 : i32, i32
  }
  func.func @transform_2(%arg0: i32) -> (i32, i32) {
    %c0_i32 = arith.constant 0 : i32
    %c0_i32_0 = arith.constant 0 : i32
    %c0_i32_1 = arith.constant 0 : i32
    return %c0_i32, %c0_i32_0 : i32, i32
  }
  func.func @transform_3(%arg0: i32) -> (i32, i32, i32) {
    %c0_i32 = arith.constant 0 : i32
    %c0_i32_0 = arith.constant 0 : i32
    %c0_i32_1 = arith.constant 0 : i32
    return %arg0, %c0_i32, %c0_i32_0 : i32, i32, i32
  }
}

module attributes {stable_mosaic.version = 11 : i64} {
  func.func @_tap_conv_kernel(%arg0: i32, %arg1: memref<1x32x256xbf16, #tpu.memory_space<vmem>>, %arg2: memref<32x288xbf16, #tpu.memory_space<vmem>>, %arg3: memref<32x1xf32, #tpu.memory_space<vmem>>, %arg4: memref<1x32x128xbf16, #tpu.memory_space<vmem>>) attributes {dimension_semantics = [#tpu.dimension_semantics<parallel>], iteration_bounds = array<i64: 2>, scalar_prefetch = 0 : i64, scratch_operands = 0 : i64, tpu.core_type = #tpu.core_type<tc>, window_params = [{transform_indices = @transform_0, window_bounds = array<i64: 1, 32, 256>}, {pipeline_mode = #tpu.pipeline_mode<synchronous>, transform_indices = @transform_1, window_bounds = array<i64: 32, 288>}, {pipeline_mode = #tpu.pipeline_mode<synchronous>, transform_indices = @transform_2, window_bounds = array<i64: 32, 1>}, {transform_indices = @transform_3, window_bounds = array<i64: 1, 32, 128>}]} {
    %c0 = arith.constant 0 : index
    %c0_0 = arith.constant 0 : index
    %0 = vector.load %arg2[%c0, %c0_0] : memref<32x288xbf16, #tpu.memory_space<vmem>>, vector<32x288xbf16>
    %c0_1 = arith.constant 0 : index
    %c0_2 = arith.constant 0 : index
    %1 = vector.load %arg3[%c0_1, %c0_2] : memref<32x1xf32, #tpu.memory_space<vmem>>, vector<32x1xf32>
    %c0_3 = arith.constant 0 : index
    %c0_4 = arith.constant 0 : index
    %c0_5 = arith.constant 0 : index
    %2 = vector.load %arg1[%c0_3, %c0_4, %c0_5] : memref<1x32x256xbf16, #tpu.memory_space<vmem>>, vector<1x32x128xbf16>
    %3 = vector.shape_cast %2 : vector<1x32x128xbf16> to vector<32x128xbf16>
    %c0_6 = arith.constant 0 : index
    %c0_7 = arith.constant 0 : index
    %c1 = arith.constant 1 : index
    %4 = vector.load %arg1[%c0_6, %c0_7, %c1] : memref<1x32x256xbf16, #tpu.memory_space<vmem>>, vector<1x32x128xbf16>
    %5 = vector.shape_cast %4 : vector<1x32x128xbf16> to vector<32x128xbf16>
    %c0_8 = arith.constant 0 : index
    %c0_9 = arith.constant 0 : index
    %c2 = arith.constant 2 : index
    %6 = vector.load %arg1[%c0_8, %c0_9, %c2] : memref<1x32x256xbf16, #tpu.memory_space<vmem>>, vector<1x32x128xbf16>
    %7 = vector.shape_cast %6 : vector<1x32x128xbf16> to vector<32x128xbf16>
    %c0_10 = arith.constant 0 : index
    %c0_11 = arith.constant 0 : index
    %c10 = arith.constant 10 : index
    %8 = vector.load %arg1[%c0_10, %c0_11, %c10] : memref<1x32x256xbf16, #tpu.memory_space<vmem>>, vector<1x32x128xbf16>
    %9 = vector.shape_cast %8 : vector<1x32x128xbf16> to vector<32x128xbf16>
    %c0_12 = arith.constant 0 : index
    %c0_13 = arith.constant 0 : index
    %c11 = arith.constant 11 : index
    %10 = vector.load %arg1[%c0_12, %c0_13, %c11] : memref<1x32x256xbf16, #tpu.memory_space<vmem>>, vector<1x32x128xbf16>
    %11 = vector.shape_cast %10 : vector<1x32x128xbf16> to vector<32x128xbf16>
    %c0_14 = arith.constant 0 : index
    %c0_15 = arith.constant 0 : index
    %c12 = arith.constant 12 : index
    %12 = vector.load %arg1[%c0_14, %c0_15, %c12] : memref<1x32x256xbf16, #tpu.memory_space<vmem>>, vector<1x32x128xbf16>
    %13 = vector.shape_cast %12 : vector<1x32x128xbf16> to vector<32x128xbf16>
    %c0_16 = arith.constant 0 : index
    %c0_17 = arith.constant 0 : index
    %c20 = arith.constant 20 : index
    %14 = vector.load %arg1[%c0_16, %c0_17, %c20] : memref<1x32x256xbf16, #tpu.memory_space<vmem>>, vector<1x32x128xbf16>
    %15 = vector.shape_cast %14 : vector<1x32x128xbf16> to vector<32x128xbf16>
    %c0_18 = arith.constant 0 : index
    %c0_19 = arith.constant 0 : index
    %c21 = arith.constant 21 : index
    %16 = vector.load %arg1[%c0_18, %c0_19, %c21] : memref<1x32x256xbf16, #tpu.memory_space<vmem>>, vector<1x32x128xbf16>
    %17 = vector.shape_cast %16 : vector<1x32x128xbf16> to vector<32x128xbf16>
    %c0_20 = arith.constant 0 : index
    %c0_21 = arith.constant 0 : index
    %c22 = arith.constant 22 : index
    %18 = vector.load %arg1[%c0_20, %c0_21, %c22] : memref<1x32x256xbf16, #tpu.memory_space<vmem>>, vector<1x32x128xbf16>
    %19 = vector.shape_cast %18 : vector<1x32x128xbf16> to vector<32x128xbf16>
    %20 = tpu.concatenate %3, %5, %7, %9, %11, %13, %15, %17, %19 in 0 : vector<32x128xbf16>, vector<32x128xbf16>, vector<32x128xbf16>, vector<32x128xbf16>, vector<32x128xbf16>, vector<32x128xbf16>, vector<32x128xbf16>, vector<32x128xbf16>, vector<32x128xbf16> -> vector<288x128xbf16>
    %cst = arith.constant dense<0.000000e+00> : vector<32x128xf32>
    %21 = tpu.matmul %0, %20, %cst {dimension_numbers = #tpu.dot_dimension_numbers<[1], [0], [0], [1], [0, 0, 1, 1], [], []>} : vector<32x288xbf16>, vector<288x128xbf16>, vector<32x128xf32> -> vector<32x128xf32>
    %22 = vector.broadcast %1 : vector<32x1xf32> to vector<32x128xf32>
    %23 = arith.addf %21, %22 : vector<32x128xf32>
    %cst_22 = arith.constant 0.000000e+00 : f32
    %24 = vector.broadcast %cst_22 : f32 to vector<32x128xf32>
    %25 = arith.maximumf %23, %24 : vector<32x128xf32>
    %26 = arith.truncf %25 : vector<32x128xf32> to vector<32x128xbf16>
    %c0_23 = arith.constant 0 : index
    %c0_24 = arith.constant 0 : index
    %c0_25 = arith.constant 0 : index
    %27 = vector.load %arg4[%c0_23, %c0_24, %c0_25] : memref<1x32x128xbf16, #tpu.memory_space<vmem>>, vector<1x32x128xbf16>
    %28 = vector.shape_cast %27 : vector<1x32x128xbf16> to vector<32x128xbf16>
    %29 = vector.shape_cast %26 : vector<32x128xbf16> to vector<1x32x128xbf16>
    tpu.vector_store %arg4[%c0_23, %c0_24, %c0_25], %29 {strides = array<i32>} : memref<1x32x128xbf16, #tpu.memory_space<vmem>>, vector<1x32x128xbf16>,
    return
  }
  func.func @transform_0(%arg0: i32) -> (i32, i32, i32) {
    %c0_i32 = arith.constant 0 : i32
    %c0_i32_0 = arith.constant 0 : i32
    %c0_i32_1 = arith.constant 0 : i32
    return %arg0, %c0_i32, %c0_i32_0 : i32, i32, i32
  }
  func.func @transform_1(%arg0: i32) -> (i32, i32) {
    %c0_i32 = arith.constant 0 : i32
    %c0_i32_0 = arith.constant 0 : i32
    %c0_i32_1 = arith.constant 0 : i32
    return %c0_i32, %c0_i32_0 : i32, i32
  }
  func.func @transform_2(%arg0: i32) -> (i32, i32) {
    %c0_i32 = arith.constant 0 : i32
    %c0_i32_0 = arith.constant 0 : i32
    %c0_i32_1 = arith.constant 0 : i32
    return %c0_i32, %c0_i32_0 : i32, i32
  }
  func.func @transform_3(%arg0: i32) -> (i32, i32, i32) {
    %c0_i32 = arith.constant 0 : i32
    %c0_i32_0 = arith.constant 0 : i32
    %c0_i32_1 = arith.constant 0 : i32
    return %arg0, %c0_i32, %c0_i32_0 : i32, i32, i32
  }
}

module attributes {stable_mosaic.version = 11 : i64} {
  func.func @_tap_conv_kernel(%arg0: i32, %arg1: memref<1x32x256xbf16, #tpu.memory_space<vmem>>, %arg2: memref<64x288xbf16, #tpu.memory_space<vmem>>, %arg3: memref<64x1xf32, #tpu.memory_space<vmem>>, %arg4: memref<1x64x128xbf16, #tpu.memory_space<vmem>>) attributes {dimension_semantics = [#tpu.dimension_semantics<parallel>], iteration_bounds = array<i64: 2>, scalar_prefetch = 0 : i64, scratch_operands = 0 : i64, tpu.core_type = #tpu.core_type<tc>, window_params = [{transform_indices = @transform_0, window_bounds = array<i64: 1, 32, 256>}, {pipeline_mode = #tpu.pipeline_mode<synchronous>, transform_indices = @transform_1, window_bounds = array<i64: 64, 288>}, {pipeline_mode = #tpu.pipeline_mode<synchronous>, transform_indices = @transform_2, window_bounds = array<i64: 64, 1>}, {transform_indices = @transform_3, window_bounds = array<i64: 1, 64, 128>}]} {
    %c0 = arith.constant 0 : index
    %c0_0 = arith.constant 0 : index
    %0 = vector.load %arg2[%c0, %c0_0] : memref<64x288xbf16, #tpu.memory_space<vmem>>, vector<64x288xbf16>
    %c0_1 = arith.constant 0 : index
    %c0_2 = arith.constant 0 : index
    %1 = vector.load %arg3[%c0_1, %c0_2] : memref<64x1xf32, #tpu.memory_space<vmem>>, vector<64x1xf32>
    %c0_3 = arith.constant 0 : index
    %c0_4 = arith.constant 0 : index
    %c0_5 = arith.constant 0 : index
    %2 = vector.load %arg1[%c0_3, %c0_4, %c0_5] : memref<1x32x256xbf16, #tpu.memory_space<vmem>>, vector<1x32x128xbf16>
    %3 = vector.shape_cast %2 : vector<1x32x128xbf16> to vector<32x128xbf16>
    %c0_6 = arith.constant 0 : index
    %c0_7 = arith.constant 0 : index
    %c1 = arith.constant 1 : index
    %4 = vector.load %arg1[%c0_6, %c0_7, %c1] : memref<1x32x256xbf16, #tpu.memory_space<vmem>>, vector<1x32x128xbf16>
    %5 = vector.shape_cast %4 : vector<1x32x128xbf16> to vector<32x128xbf16>
    %c0_8 = arith.constant 0 : index
    %c0_9 = arith.constant 0 : index
    %c2 = arith.constant 2 : index
    %6 = vector.load %arg1[%c0_8, %c0_9, %c2] : memref<1x32x256xbf16, #tpu.memory_space<vmem>>, vector<1x32x128xbf16>
    %7 = vector.shape_cast %6 : vector<1x32x128xbf16> to vector<32x128xbf16>
    %c0_10 = arith.constant 0 : index
    %c0_11 = arith.constant 0 : index
    %c6 = arith.constant 6 : index
    %8 = vector.load %arg1[%c0_10, %c0_11, %c6] : memref<1x32x256xbf16, #tpu.memory_space<vmem>>, vector<1x32x128xbf16>
    %9 = vector.shape_cast %8 : vector<1x32x128xbf16> to vector<32x128xbf16>
    %c0_12 = arith.constant 0 : index
    %c0_13 = arith.constant 0 : index
    %c7 = arith.constant 7 : index
    %10 = vector.load %arg1[%c0_12, %c0_13, %c7] : memref<1x32x256xbf16, #tpu.memory_space<vmem>>, vector<1x32x128xbf16>
    %11 = vector.shape_cast %10 : vector<1x32x128xbf16> to vector<32x128xbf16>
    %c0_14 = arith.constant 0 : index
    %c0_15 = arith.constant 0 : index
    %c8 = arith.constant 8 : index
    %12 = vector.load %arg1[%c0_14, %c0_15, %c8] : memref<1x32x256xbf16, #tpu.memory_space<vmem>>, vector<1x32x128xbf16>
    %13 = vector.shape_cast %12 : vector<1x32x128xbf16> to vector<32x128xbf16>
    %c0_16 = arith.constant 0 : index
    %c0_17 = arith.constant 0 : index
    %c12 = arith.constant 12 : index
    %14 = vector.load %arg1[%c0_16, %c0_17, %c12] : memref<1x32x256xbf16, #tpu.memory_space<vmem>>, vector<1x32x128xbf16>
    %15 = vector.shape_cast %14 : vector<1x32x128xbf16> to vector<32x128xbf16>
    %c0_18 = arith.constant 0 : index
    %c0_19 = arith.constant 0 : index
    %c13 = arith.constant 13 : index
    %16 = vector.load %arg1[%c0_18, %c0_19, %c13] : memref<1x32x256xbf16, #tpu.memory_space<vmem>>, vector<1x32x128xbf16>
    %17 = vector.shape_cast %16 : vector<1x32x128xbf16> to vector<32x128xbf16>
    %c0_20 = arith.constant 0 : index
    %c0_21 = arith.constant 0 : index
    %c14 = arith.constant 14 : index
    %18 = vector.load %arg1[%c0_20, %c0_21, %c14] : memref<1x32x256xbf16, #tpu.memory_space<vmem>>, vector<1x32x128xbf16>
    %19 = vector.shape_cast %18 : vector<1x32x128xbf16> to vector<32x128xbf16>
    %20 = tpu.concatenate %3, %5, %7, %9, %11, %13, %15, %17, %19 in 0 : vector<32x128xbf16>, vector<32x128xbf16>, vector<32x128xbf16>, vector<32x128xbf16>, vector<32x128xbf16>, vector<32x128xbf16>, vector<32x128xbf16>, vector<32x128xbf16>, vector<32x128xbf16> -> vector<288x128xbf16>
    %cst = arith.constant dense<0.000000e+00> : vector<64x128xf32>
    %21 = tpu.matmul %0, %20, %cst {dimension_numbers = #tpu.dot_dimension_numbers<[1], [0], [0], [1], [0, 0, 1, 1], [], []>} : vector<64x288xbf16>, vector<288x128xbf16>, vector<64x128xf32> -> vector<64x128xf32>
    %22 = vector.broadcast %1 : vector<64x1xf32> to vector<64x128xf32>
    %23 = arith.addf %21, %22 : vector<64x128xf32>
    %cst_22 = arith.constant 0.000000e+00 : f32
    %24 = vector.broadcast %cst_22 : f32 to vector<64x128xf32>
    %25 = arith.maximumf %23, %24 : vector<64x128xf32>
    %26 = arith.truncf %25 : vector<64x128xf32> to vector<64x128xbf16>
    %c0_23 = arith.constant 0 : index
    %c0_24 = arith.constant 0 : index
    %c0_25 = arith.constant 0 : index
    %27 = vector.load %arg4[%c0_23, %c0_24, %c0_25] : memref<1x64x128xbf16, #tpu.memory_space<vmem>>, vector<1x64x128xbf16>
    %28 = vector.shape_cast %27 : vector<1x64x128xbf16> to vector<64x128xbf16>
    %29 = vector.shape_cast %26 : vector<64x128xbf16> to vector<1x64x128xbf16>
    tpu.vector_store %arg4[%c0_23, %c0_24, %c0_25], %29 {strides = array<i32>} : memref<1x64x128xbf16, #tpu.memory_space<vmem>>, vector<1x64x128xbf16>,
    return
  }
  func.func @transform_0(%arg0: i32) -> (i32, i32, i32) {
    %c0_i32 = arith.constant 0 : i32
    %c0_i32_0 = arith.constant 0 : i32
    %c0_i32_1 = arith.constant 0 : i32
    return %arg0, %c0_i32, %c0_i32_0 : i32, i32, i32
  }
  func.func @transform_1(%arg0: i32) -> (i32, i32) {
    %c0_i32 = arith.constant 0 : i32
    %c0_i32_0 = arith.constant 0 : i32
    %c0_i32_1 = arith.constant 0 : i32
    return %c0_i32, %c0_i32_0 : i32, i32
  }
  func.func @transform_2(%arg0: i32) -> (i32, i32) {
    %c0_i32 = arith.constant 0 : i32
    %c0_i32_0 = arith.constant 0 : i32
    %c0_i32_1 = arith.constant 0 : i32
    return %c0_i32, %c0_i32_0 : i32, i32
  }
  func.func @transform_3(%arg0: i32) -> (i32, i32, i32) {
    %c0_i32 = arith.constant 0 : i32
    %c0_i32_0 = arith.constant 0 : i32
    %c0_i32_1 = arith.constant 0 : i32
    return %arg0, %c0_i32, %c0_i32_0 : i32, i32, i32
  }
}

module attributes {stable_mosaic.version = 11 : i64} {
  func.func @_tap_conv_kernel(%arg0: i32, %arg1: memref<1x64x256xbf16, #tpu.memory_space<vmem>>, %arg2: memref<64x576xbf16, #tpu.memory_space<vmem>>, %arg3: memref<64x1xf32, #tpu.memory_space<vmem>>, %arg4: memref<1x64x128xbf16, #tpu.memory_space<vmem>>) attributes {dimension_semantics = [#tpu.dimension_semantics<parallel>], iteration_bounds = array<i64: 2>, scalar_prefetch = 0 : i64, scratch_operands = 0 : i64, tpu.core_type = #tpu.core_type<tc>, window_params = [{transform_indices = @transform_0, window_bounds = array<i64: 1, 64, 256>}, {pipeline_mode = #tpu.pipeline_mode<synchronous>, transform_indices = @transform_1, window_bounds = array<i64: 64, 576>}, {pipeline_mode = #tpu.pipeline_mode<synchronous>, transform_indices = @transform_2, window_bounds = array<i64: 64, 1>}, {transform_indices = @transform_3, window_bounds = array<i64: 1, 64, 128>}]} {
    %c0 = arith.constant 0 : index
    %c0_0 = arith.constant 0 : index
    %0 = vector.load %arg2[%c0, %c0_0] : memref<64x576xbf16, #tpu.memory_space<vmem>>, vector<64x576xbf16>
    %c0_1 = arith.constant 0 : index
    %c0_2 = arith.constant 0 : index
    %1 = vector.load %arg3[%c0_1, %c0_2] : memref<64x1xf32, #tpu.memory_space<vmem>>, vector<64x1xf32>
    %c0_3 = arith.constant 0 : index
    %c0_4 = arith.constant 0 : index
    %c0_5 = arith.constant 0 : index
    %2 = vector.load %arg1[%c0_3, %c0_4, %c0_5] : memref<1x64x256xbf16, #tpu.memory_space<vmem>>, vector<1x64x128xbf16>
    %3 = vector.shape_cast %2 : vector<1x64x128xbf16> to vector<64x128xbf16>
    %c0_6 = arith.constant 0 : index
    %c0_7 = arith.constant 0 : index
    %c1 = arith.constant 1 : index
    %4 = vector.load %arg1[%c0_6, %c0_7, %c1] : memref<1x64x256xbf16, #tpu.memory_space<vmem>>, vector<1x64x128xbf16>
    %5 = vector.shape_cast %4 : vector<1x64x128xbf16> to vector<64x128xbf16>
    %c0_8 = arith.constant 0 : index
    %c0_9 = arith.constant 0 : index
    %c2 = arith.constant 2 : index
    %6 = vector.load %arg1[%c0_8, %c0_9, %c2] : memref<1x64x256xbf16, #tpu.memory_space<vmem>>, vector<1x64x128xbf16>
    %7 = vector.shape_cast %6 : vector<1x64x128xbf16> to vector<64x128xbf16>
    %c0_10 = arith.constant 0 : index
    %c0_11 = arith.constant 0 : index
    %c6 = arith.constant 6 : index
    %8 = vector.load %arg1[%c0_10, %c0_11, %c6] : memref<1x64x256xbf16, #tpu.memory_space<vmem>>, vector<1x64x128xbf16>
    %9 = vector.shape_cast %8 : vector<1x64x128xbf16> to vector<64x128xbf16>
    %c0_12 = arith.constant 0 : index
    %c0_13 = arith.constant 0 : index
    %c7 = arith.constant 7 : index
    %10 = vector.load %arg1[%c0_12, %c0_13, %c7] : memref<1x64x256xbf16, #tpu.memory_space<vmem>>, vector<1x64x128xbf16>
    %11 = vector.shape_cast %10 : vector<1x64x128xbf16> to vector<64x128xbf16>
    %c0_14 = arith.constant 0 : index
    %c0_15 = arith.constant 0 : index
    %c8 = arith.constant 8 : index
    %12 = vector.load %arg1[%c0_14, %c0_15, %c8] : memref<1x64x256xbf16, #tpu.memory_space<vmem>>, vector<1x64x128xbf16>
    %13 = vector.shape_cast %12 : vector<1x64x128xbf16> to vector<64x128xbf16>
    %c0_16 = arith.constant 0 : index
    %c0_17 = arith.constant 0 : index
    %c12 = arith.constant 12 : index
    %14 = vector.load %arg1[%c0_16, %c0_17, %c12] : memref<1x64x256xbf16, #tpu.memory_space<vmem>>, vector<1x64x128xbf16>
    %15 = vector.shape_cast %14 : vector<1x64x128xbf16> to vector<64x128xbf16>
    %c0_18 = arith.constant 0 : index
    %c0_19 = arith.constant 0 : index
    %c13 = arith.constant 13 : index
    %16 = vector.load %arg1[%c0_18, %c0_19, %c13] : memref<1x64x256xbf16, #tpu.memory_space<vmem>>, vector<1x64x128xbf16>
    %17 = vector.shape_cast %16 : vector<1x64x128xbf16> to vector<64x128xbf16>
    %c0_20 = arith.constant 0 : index
    %c0_21 = arith.constant 0 : index
    %c14 = arith.constant 14 : index
    %18 = vector.load %arg1[%c0_20, %c0_21, %c14] : memref<1x64x256xbf16, #tpu.memory_space<vmem>>, vector<1x64x128xbf16>
    %19 = vector.shape_cast %18 : vector<1x64x128xbf16> to vector<64x128xbf16>
    %20 = tpu.concatenate %3, %5, %7, %9, %11, %13, %15, %17, %19 in 0 : vector<64x128xbf16>, vector<64x128xbf16>, vector<64x128xbf16>, vector<64x128xbf16>, vector<64x128xbf16>, vector<64x128xbf16>, vector<64x128xbf16>, vector<64x128xbf16>, vector<64x128xbf16> -> vector<576x128xbf16>
    %cst = arith.constant dense<0.000000e+00> : vector<64x128xf32>
    %21 = tpu.matmul %0, %20, %cst {dimension_numbers = #tpu.dot_dimension_numbers<[1], [0], [0], [1], [0, 0, 1, 1], [], []>} : vector<64x576xbf16>, vector<576x128xbf16>, vector<64x128xf32> -> vector<64x128xf32>
    %22 = vector.broadcast %1 : vector<64x1xf32> to vector<64x128xf32>
    %23 = arith.addf %21, %22 : vector<64x128xf32>
    %cst_22 = arith.constant 0.000000e+00 : f32
    %24 = vector.broadcast %cst_22 : f32 to vector<64x128xf32>
    %25 = arith.maximumf %23, %24 : vector<64x128xf32>
    %26 = arith.truncf %25 : vector<64x128xf32> to vector<64x128xbf16>
    %c0_23 = arith.constant 0 : index
    %c0_24 = arith.constant 0 : index
    %c0_25 = arith.constant 0 : index
    %27 = vector.load %arg4[%c0_23, %c0_24, %c0_25] : memref<1x64x128xbf16, #tpu.memory_space<vmem>>, vector<1x64x128xbf16>
    %28 = vector.shape_cast %27 : vector<1x64x128xbf16> to vector<64x128xbf16>
    %29 = vector.shape_cast %26 : vector<64x128xbf16> to vector<1x64x128xbf16>
    tpu.vector_store %arg4[%c0_23, %c0_24, %c0_25], %29 {strides = array<i32>} : memref<1x64x128xbf16, #tpu.memory_space<vmem>>, vector<1x64x128xbf16>,
    return
  }
  func.func @transform_0(%arg0: i32) -> (i32, i32, i32) {
    %c0_i32 = arith.constant 0 : i32
    %c0_i32_0 = arith.constant 0 : i32
    %c0_i32_1 = arith.constant 0 : i32
    return %arg0, %c0_i32, %c0_i32_0 : i32, i32, i32
  }
  func.func @transform_1(%arg0: i32) -> (i32, i32) {
    %c0_i32 = arith.constant 0 : i32
    %c0_i32_0 = arith.constant 0 : i32
    %c0_i32_1 = arith.constant 0 : i32
    return %c0_i32, %c0_i32_0 : i32, i32
  }
  func.func @transform_2(%arg0: i32) -> (i32, i32) {
    %c0_i32 = arith.constant 0 : i32
    %c0_i32_0 = arith.constant 0 : i32
    %c0_i32_1 = arith.constant 0 : i32
    return %c0_i32, %c0_i32_0 : i32, i32
  }
  func.func @transform_3(%arg0: i32) -> (i32, i32, i32) {
    %c0_i32 = arith.constant 0 : i32
    %c0_i32_0 = arith.constant 0 : i32
    %c0_i32_1 = arith.constant 0 : i32
    return %arg0, %c0_i32, %c0_i32_0 : i32, i32, i32
  }
}

module attributes {stable_mosaic.version = 11 : i64} {
  func.func @_tap_conv_kernel(%arg0: i32, %arg1: memref<1x64x256xbf16, #tpu.memory_space<vmem>>, %arg2: memref<128x576xbf16, #tpu.memory_space<vmem>>, %arg3: memref<128x1xf32, #tpu.memory_space<vmem>>, %arg4: memref<1x128x128xbf16, #tpu.memory_space<vmem>>) attributes {dimension_semantics = [#tpu.dimension_semantics<parallel>], iteration_bounds = array<i64: 2>, scalar_prefetch = 0 : i64, scratch_operands = 0 : i64, tpu.core_type = #tpu.core_type<tc>, window_params = [{transform_indices = @transform_0, window_bounds = array<i64: 1, 64, 256>}, {pipeline_mode = #tpu.pipeline_mode<synchronous>, transform_indices = @transform_1, window_bounds = array<i64: 128, 576>}, {pipeline_mode = #tpu.pipeline_mode<synchronous>, transform_indices = @transform_2, window_bounds = array<i64: 128, 1>}, {transform_indices = @transform_3, window_bounds = array<i64: 1, 128, 128>}]} {
    %c0 = arith.constant 0 : index
    %c0_0 = arith.constant 0 : index
    %0 = vector.load %arg2[%c0, %c0_0] : memref<128x576xbf16, #tpu.memory_space<vmem>>, vector<128x576xbf16>
    %c0_1 = arith.constant 0 : index
    %c0_2 = arith.constant 0 : index
    %1 = vector.load %arg3[%c0_1, %c0_2] : memref<128x1xf32, #tpu.memory_space<vmem>>, vector<128x1xf32>
    %c0_3 = arith.constant 0 : index
    %c0_4 = arith.constant 0 : index
    %c0_5 = arith.constant 0 : index
    %2 = vector.load %arg1[%c0_3, %c0_4, %c0_5] : memref<1x64x256xbf16, #tpu.memory_space<vmem>>, vector<1x64x128xbf16>
    %3 = vector.shape_cast %2 : vector<1x64x128xbf16> to vector<64x128xbf16>
    %c0_6 = arith.constant 0 : index
    %c0_7 = arith.constant 0 : index
    %c1 = arith.constant 1 : index
    %4 = vector.load %arg1[%c0_6, %c0_7, %c1] : memref<1x64x256xbf16, #tpu.memory_space<vmem>>, vector<1x64x128xbf16>
    %5 = vector.shape_cast %4 : vector<1x64x128xbf16> to vector<64x128xbf16>
    %c0_8 = arith.constant 0 : index
    %c0_9 = arith.constant 0 : index
    %c2 = arith.constant 2 : index
    %6 = vector.load %arg1[%c0_8, %c0_9, %c2] : memref<1x64x256xbf16, #tpu.memory_space<vmem>>, vector<1x64x128xbf16>
    %7 = vector.shape_cast %6 : vector<1x64x128xbf16> to vector<64x128xbf16>
    %c0_10 = arith.constant 0 : index
    %c0_11 = arith.constant 0 : index
    %c4 = arith.constant 4 : index
    %8 = vector.load %arg1[%c0_10, %c0_11, %c4] : memref<1x64x256xbf16, #tpu.memory_space<vmem>>, vector<1x64x128xbf16>
    %9 = vector.shape_cast %8 : vector<1x64x128xbf16> to vector<64x128xbf16>
    %c0_12 = arith.constant 0 : index
    %c0_13 = arith.constant 0 : index
    %c5 = arith.constant 5 : index
    %10 = vector.load %arg1[%c0_12, %c0_13, %c5] : memref<1x64x256xbf16, #tpu.memory_space<vmem>>, vector<1x64x128xbf16>
    %11 = vector.shape_cast %10 : vector<1x64x128xbf16> to vector<64x128xbf16>
    %c0_14 = arith.constant 0 : index
    %c0_15 = arith.constant 0 : index
    %c6 = arith.constant 6 : index
    %12 = vector.load %arg1[%c0_14, %c0_15, %c6] : memref<1x64x256xbf16, #tpu.memory_space<vmem>>, vector<1x64x128xbf16>
    %13 = vector.shape_cast %12 : vector<1x64x128xbf16> to vector<64x128xbf16>
    %c0_16 = arith.constant 0 : index
    %c0_17 = arith.constant 0 : index
    %c8 = arith.constant 8 : index
    %14 = vector.load %arg1[%c0_16, %c0_17, %c8] : memref<1x64x256xbf16, #tpu.memory_space<vmem>>, vector<1x64x128xbf16>
    %15 = vector.shape_cast %14 : vector<1x64x128xbf16> to vector<64x128xbf16>
    %c0_18 = arith.constant 0 : index
    %c0_19 = arith.constant 0 : index
    %c9 = arith.constant 9 : index
    %16 = vector.load %arg1[%c0_18, %c0_19, %c9] : memref<1x64x256xbf16, #tpu.memory_space<vmem>>, vector<1x64x128xbf16>
    %17 = vector.shape_cast %16 : vector<1x64x128xbf16> to vector<64x128xbf16>
    %c0_20 = arith.constant 0 : index
    %c0_21 = arith.constant 0 : index
    %c10 = arith.constant 10 : index
    %18 = vector.load %arg1[%c0_20, %c0_21, %c10] : memref<1x64x256xbf16, #tpu.memory_space<vmem>>, vector<1x64x128xbf16>
    %19 = vector.shape_cast %18 : vector<1x64x128xbf16> to vector<64x128xbf16>
    %20 = tpu.concatenate %3, %5, %7, %9, %11, %13, %15, %17, %19 in 0 : vector<64x128xbf16>, vector<64x128xbf16>, vector<64x128xbf16>, vector<64x128xbf16>, vector<64x128xbf16>, vector<64x128xbf16>, vector<64x128xbf16>, vector<64x128xbf16>, vector<64x128xbf16> -> vector<576x128xbf16>
    %cst = arith.constant dense<0.000000e+00> : vector<128x128xf32>
    %21 = tpu.matmul %0, %20, %cst {dimension_numbers = #tpu.dot_dimension_numbers<[1], [0], [0], [1], [0, 0, 1, 1], [], []>} : vector<128x576xbf16>, vector<576x128xbf16>, vector<128x128xf32> -> vector<128x128xf32>
    %22 = vector.broadcast %1 : vector<128x1xf32> to vector<128x128xf32>
    %23 = arith.addf %21, %22 : vector<128x128xf32>
    %cst_22 = arith.constant 0.000000e+00 : f32
    %24 = vector.broadcast %cst_22 : f32 to vector<128x128xf32>
    %25 = arith.maximumf %23, %24 : vector<128x128xf32>
    %26 = arith.truncf %25 : vector<128x128xf32> to vector<128x128xbf16>
    %c0_23 = arith.constant 0 : index
    %c0_24 = arith.constant 0 : index
    %c0_25 = arith.constant 0 : index
    %27 = vector.load %arg4[%c0_23, %c0_24, %c0_25] : memref<1x128x128xbf16, #tpu.memory_space<vmem>>, vector<1x128x128xbf16>
    %28 = vector.shape_cast %27 : vector<1x128x128xbf16> to vector<128x128xbf16>
    %29 = vector.shape_cast %26 : vector<128x128xbf16> to vector<1x128x128xbf16>
    tpu.vector_store %arg4[%c0_23, %c0_24, %c0_25], %29 {strides = array<i32>} : memref<1x128x128xbf16, #tpu.memory_space<vmem>>, vector<1x128x128xbf16>,
    return
  }
  func.func @transform_0(%arg0: i32) -> (i32, i32, i32) {
    %c0_i32 = arith.constant 0 : i32
    %c0_i32_0 = arith.constant 0 : i32
    %c0_i32_1 = arith.constant 0 : i32
    return %arg0, %c0_i32, %c0_i32_0 : i32, i32, i32
  }
  func.func @transform_1(%arg0: i32) -> (i32, i32) {
    %c0_i32 = arith.constant 0 : i32
    %c0_i32_0 = arith.constant 0 : i32
    %c0_i32_1 = arith.constant 0 : i32
    return %c0_i32, %c0_i32_0 : i32, i32
  }
  func.func @transform_2(%arg0: i32) -> (i32, i32) {
    %c0_i32 = arith.constant 0 : i32
    %c0_i32_0 = arith.constant 0 : i32
    %c0_i32_1 = arith.constant 0 : i32
    return %c0_i32, %c0_i32_0 : i32, i32
  }
  func.func @transform_3(%arg0: i32) -> (i32, i32, i32) {
    %c0_i32 = arith.constant 0 : i32
    %c0_i32_0 = arith.constant 0 : i32
    %c0_i32_1 = arith.constant 0 : i32
    return %arg0, %c0_i32, %c0_i32_0 : i32, i32, i32
  }
}

module attributes {stable_mosaic.version = 11 : i64} {
  func.func @_tap_conv_kernel(%arg0: i32, %arg1: memref<1x128x256xbf16, #tpu.memory_space<vmem>>, %arg2: memref<64x1152xbf16, #tpu.memory_space<vmem>>, %arg3: memref<64x1xf32, #tpu.memory_space<vmem>>, %arg4: memref<1x64x128xbf16, #tpu.memory_space<vmem>>) attributes {dimension_semantics = [#tpu.dimension_semantics<parallel>], iteration_bounds = array<i64: 2>, scalar_prefetch = 0 : i64, scratch_operands = 0 : i64, tpu.core_type = #tpu.core_type<tc>, window_params = [{transform_indices = @transform_0, window_bounds = array<i64: 1, 128, 256>}, {pipeline_mode = #tpu.pipeline_mode<synchronous>, transform_indices = @transform_1, window_bounds = array<i64: 64, 1152>}, {pipeline_mode = #tpu.pipeline_mode<synchronous>, transform_indices = @transform_2, window_bounds = array<i64: 64, 1>}, {transform_indices = @transform_3, window_bounds = array<i64: 1, 64, 128>}]} {
    %c0 = arith.constant 0 : index
    %c0_0 = arith.constant 0 : index
    %0 = vector.load %arg2[%c0, %c0_0] : memref<64x1152xbf16, #tpu.memory_space<vmem>>, vector<64x1152xbf16>
    %c0_1 = arith.constant 0 : index
    %c0_2 = arith.constant 0 : index
    %1 = vector.load %arg3[%c0_1, %c0_2] : memref<64x1xf32, #tpu.memory_space<vmem>>, vector<64x1xf32>
    %c0_3 = arith.constant 0 : index
    %c0_4 = arith.constant 0 : index
    %c0_5 = arith.constant 0 : index
    %2 = vector.load %arg1[%c0_3, %c0_4, %c0_5] : memref<1x128x256xbf16, #tpu.memory_space<vmem>>, vector<1x128x128xbf16>
    %3 = vector.shape_cast %2 : vector<1x128x128xbf16> to vector<128x128xbf16>
    %c0_6 = arith.constant 0 : index
    %c0_7 = arith.constant 0 : index
    %c1 = arith.constant 1 : index
    %4 = vector.load %arg1[%c0_6, %c0_7, %c1] : memref<1x128x256xbf16, #tpu.memory_space<vmem>>, vector<1x128x128xbf16>
    %5 = vector.shape_cast %4 : vector<1x128x128xbf16> to vector<128x128xbf16>
    %c0_8 = arith.constant 0 : index
    %c0_9 = arith.constant 0 : index
    %c2 = arith.constant 2 : index
    %6 = vector.load %arg1[%c0_8, %c0_9, %c2] : memref<1x128x256xbf16, #tpu.memory_space<vmem>>, vector<1x128x128xbf16>
    %7 = vector.shape_cast %6 : vector<1x128x128xbf16> to vector<128x128xbf16>
    %c0_10 = arith.constant 0 : index
    %c0_11 = arith.constant 0 : index
    %c4 = arith.constant 4 : index
    %8 = vector.load %arg1[%c0_10, %c0_11, %c4] : memref<1x128x256xbf16, #tpu.memory_space<vmem>>, vector<1x128x128xbf16>
    %9 = vector.shape_cast %8 : vector<1x128x128xbf16> to vector<128x128xbf16>
    %c0_12 = arith.constant 0 : index
    %c0_13 = arith.constant 0 : index
    %c5 = arith.constant 5 : index
    %10 = vector.load %arg1[%c0_12, %c0_13, %c5] : memref<1x128x256xbf16, #tpu.memory_space<vmem>>, vector<1x128x128xbf16>
    %11 = vector.shape_cast %10 : vector<1x128x128xbf16> to vector<128x128xbf16>
    %c0_14 = arith.constant 0 : index
    %c0_15 = arith.constant 0 : index
    %c6 = arith.constant 6 : index
    %12 = vector.load %arg1[%c0_14, %c0_15, %c6] : memref<1x128x256xbf16, #tpu.memory_space<vmem>>, vector<1x128x128xbf16>
    %13 = vector.shape_cast %12 : vector<1x128x128xbf16> to vector<128x128xbf16>
    %c0_16 = arith.constant 0 : index
    %c0_17 = arith.constant 0 : index
    %c8 = arith.constant 8 : index
    %14 = vector.load %arg1[%c0_16, %c0_17, %c8] : memref<1x128x256xbf16, #tpu.memory_space<vmem>>, vector<1x128x128xbf16>
    %15 = vector.shape_cast %14 : vector<1x128x128xbf16> to vector<128x128xbf16>
    %c0_18 = arith.constant 0 : index
    %c0_19 = arith.constant 0 : index
    %c9 = arith.constant 9 : index
    %16 = vector.load %arg1[%c0_18, %c0_19, %c9] : memref<1x128x256xbf16, #tpu.memory_space<vmem>>, vector<1x128x128xbf16>
    %17 = vector.shape_cast %16 : vector<1x128x128xbf16> to vector<128x128xbf16>
    %c0_20 = arith.constant 0 : index
    %c0_21 = arith.constant 0 : index
    %c10 = arith.constant 10 : index
    %18 = vector.load %arg1[%c0_20, %c0_21, %c10] : memref<1x128x256xbf16, #tpu.memory_space<vmem>>, vector<1x128x128xbf16>
    %19 = vector.shape_cast %18 : vector<1x128x128xbf16> to vector<128x128xbf16>
    %20 = tpu.concatenate %3, %5, %7, %9, %11, %13, %15, %17, %19 in 0 : vector<128x128xbf16>, vector<128x128xbf16>, vector<128x128xbf16>, vector<128x128xbf16>, vector<128x128xbf16>, vector<128x128xbf16>, vector<128x128xbf16>, vector<128x128xbf16>, vector<128x128xbf16> -> vector<1152x128xbf16>
    %cst = arith.constant dense<0.000000e+00> : vector<64x128xf32>
    %21 = tpu.matmul %0, %20, %cst {dimension_numbers = #tpu.dot_dimension_numbers<[1], [0], [0], [1], [0, 0, 1, 1], [], []>} : vector<64x1152xbf16>, vector<1152x128xbf16>, vector<64x128xf32> -> vector<64x128xf32>
    %22 = vector.broadcast %1 : vector<64x1xf32> to vector<64x128xf32>
    %23 = arith.addf %21, %22 : vector<64x128xf32>
    %cst_22 = arith.constant 0.000000e+00 : f32
    %24 = vector.broadcast %cst_22 : f32 to vector<64x128xf32>
    %25 = arith.maximumf %23, %24 : vector<64x128xf32>
    %26 = arith.truncf %25 : vector<64x128xf32> to vector<64x128xbf16>
    %c0_23 = arith.constant 0 : index
    %c0_24 = arith.constant 0 : index
    %c0_25 = arith.constant 0 : index
    %27 = vector.load %arg4[%c0_23, %c0_24, %c0_25] : memref<1x64x128xbf16, #tpu.memory_space<vmem>>, vector<1x64x128xbf16>
    %28 = vector.shape_cast %27 : vector<1x64x128xbf16> to vector<64x128xbf16>
    %29 = vector.shape_cast %26 : vector<64x128xbf16> to vector<1x64x128xbf16>
    tpu.vector_store %arg4[%c0_23, %c0_24, %c0_25], %29 {strides = array<i32>} : memref<1x64x128xbf16, #tpu.memory_space<vmem>>, vector<1x64x128xbf16>,
    return
  }
  func.func @transform_0(%arg0: i32) -> (i32, i32, i32) {
    %c0_i32 = arith.constant 0 : i32
    %c0_i32_0 = arith.constant 0 : i32
    %c0_i32_1 = arith.constant 0 : i32
    return %arg0, %c0_i32, %c0_i32_0 : i32, i32, i32
  }
  func.func @transform_1(%arg0: i32) -> (i32, i32) {
    %c0_i32 = arith.constant 0 : i32
    %c0_i32_0 = arith.constant 0 : i32
    %c0_i32_1 = arith.constant 0 : i32
    return %c0_i32, %c0_i32_0 : i32, i32
  }
  func.func @transform_2(%arg0: i32) -> (i32, i32) {
    %c0_i32 = arith.constant 0 : i32
    %c0_i32_0 = arith.constant 0 : i32
    %c0_i32_1 = arith.constant 0 : i32
    return %c0_i32, %c0_i32_0 : i32, i32
  }
  func.func @transform_3(%arg0: i32) -> (i32, i32, i32) {
    %c0_i32 = arith.constant 0 : i32
    %c0_i32_0 = arith.constant 0 : i32
    %c0_i32_1 = arith.constant 0 : i32
    return %arg0, %c0_i32, %c0_i32_0 : i32, i32, i32
  }
}

module attributes {stable_mosaic.version = 11 : i64} {
  func.func @_tap_conv_kernel(%arg0: i32, %arg1: memref<1x64x256xbf16, #tpu.memory_space<vmem>>, %arg2: memref<64x576xbf16, #tpu.memory_space<vmem>>, %arg3: memref<64x1xf32, #tpu.memory_space<vmem>>, %arg4: memref<1x64x128xbf16, #tpu.memory_space<vmem>>) attributes {dimension_semantics = [#tpu.dimension_semantics<parallel>], iteration_bounds = array<i64: 2>, scalar_prefetch = 0 : i64, scratch_operands = 0 : i64, tpu.core_type = #tpu.core_type<tc>, window_params = [{transform_indices = @transform_0, window_bounds = array<i64: 1, 64, 256>}, {pipeline_mode = #tpu.pipeline_mode<synchronous>, transform_indices = @transform_1, window_bounds = array<i64: 64, 576>}, {pipeline_mode = #tpu.pipeline_mode<synchronous>, transform_indices = @transform_2, window_bounds = array<i64: 64, 1>}, {transform_indices = @transform_3, window_bounds = array<i64: 1, 64, 128>}]} {
    %c0 = arith.constant 0 : index
    %c0_0 = arith.constant 0 : index
    %0 = vector.load %arg2[%c0, %c0_0] : memref<64x576xbf16, #tpu.memory_space<vmem>>, vector<64x576xbf16>
    %c0_1 = arith.constant 0 : index
    %c0_2 = arith.constant 0 : index
    %1 = vector.load %arg3[%c0_1, %c0_2] : memref<64x1xf32, #tpu.memory_space<vmem>>, vector<64x1xf32>
    %c0_3 = arith.constant 0 : index
    %c0_4 = arith.constant 0 : index
    %c0_5 = arith.constant 0 : index
    %2 = vector.load %arg1[%c0_3, %c0_4, %c0_5] : memref<1x64x256xbf16, #tpu.memory_space<vmem>>, vector<1x64x128xbf16>
    %3 = vector.shape_cast %2 : vector<1x64x128xbf16> to vector<64x128xbf16>
    %c0_6 = arith.constant 0 : index
    %c0_7 = arith.constant 0 : index
    %c1 = arith.constant 1 : index
    %4 = vector.load %arg1[%c0_6, %c0_7, %c1] : memref<1x64x256xbf16, #tpu.memory_space<vmem>>, vector<1x64x128xbf16>
    %5 = vector.shape_cast %4 : vector<1x64x128xbf16> to vector<64x128xbf16>
    %c0_8 = arith.constant 0 : index
    %c0_9 = arith.constant 0 : index
    %c2 = arith.constant 2 : index
    %6 = vector.load %arg1[%c0_8, %c0_9, %c2] : memref<1x64x256xbf16, #tpu.memory_space<vmem>>, vector<1x64x128xbf16>
    %7 = vector.shape_cast %6 : vector<1x64x128xbf16> to vector<64x128xbf16>
    %c0_10 = arith.constant 0 : index
    %c0_11 = arith.constant 0 : index
    %c4 = arith.constant 4 : index
    %8 = vector.load %arg1[%c0_10, %c0_11, %c4] : memref<1x64x256xbf16, #tpu.memory_space<vmem>>, vector<1x64x128xbf16>
    %9 = vector.shape_cast %8 : vector<1x64x128xbf16> to vector<64x128xbf16>
    %c0_12 = arith.constant 0 : index
    %c0_13 = arith.constant 0 : index
    %c5 = arith.constant 5 : index
    %10 = vector.load %arg1[%c0_12, %c0_13, %c5] : memref<1x64x256xbf16, #tpu.memory_space<vmem>>, vector<1x64x128xbf16>
    %11 = vector.shape_cast %10 : vector<1x64x128xbf16> to vector<64x128xbf16>
    %c0_14 = arith.constant 0 : index
    %c0_15 = arith.constant 0 : index
    %c6 = arith.constant 6 : index
    %12 = vector.load %arg1[%c0_14, %c0_15, %c6] : memref<1x64x256xbf16, #tpu.memory_space<vmem>>, vector<1x64x128xbf16>
    %13 = vector.shape_cast %12 : vector<1x64x128xbf16> to vector<64x128xbf16>
    %c0_16 = arith.constant 0 : index
    %c0_17 = arith.constant 0 : index
    %c8 = arith.constant 8 : index
    %14 = vector.load %arg1[%c0_16, %c0_17, %c8] : memref<1x64x256xbf16, #tpu.memory_space<vmem>>, vector<1x64x128xbf16>
    %15 = vector.shape_cast %14 : vector<1x64x128xbf16> to vector<64x128xbf16>
    %c0_18 = arith.constant 0 : index
    %c0_19 = arith.constant 0 : index
    %c9 = arith.constant 9 : index
    %16 = vector.load %arg1[%c0_18, %c0_19, %c9] : memref<1x64x256xbf16, #tpu.memory_space<vmem>>, vector<1x64x128xbf16>
    %17 = vector.shape_cast %16 : vector<1x64x128xbf16> to vector<64x128xbf16>
    %c0_20 = arith.constant 0 : index
    %c0_21 = arith.constant 0 : index
    %c10 = arith.constant 10 : index
    %18 = vector.load %arg1[%c0_20, %c0_21, %c10] : memref<1x64x256xbf16, #tpu.memory_space<vmem>>, vector<1x64x128xbf16>
    %19 = vector.shape_cast %18 : vector<1x64x128xbf16> to vector<64x128xbf16>
    %20 = tpu.concatenate %3, %5, %7, %9, %11, %13, %15, %17, %19 in 0 : vector<64x128xbf16>, vector<64x128xbf16>, vector<64x128xbf16>, vector<64x128xbf16>, vector<64x128xbf16>, vector<64x128xbf16>, vector<64x128xbf16>, vector<64x128xbf16>, vector<64x128xbf16> -> vector<576x128xbf16>
    %cst = arith.constant dense<0.000000e+00> : vector<64x128xf32>
    %21 = tpu.matmul %0, %20, %cst {dimension_numbers = #tpu.dot_dimension_numbers<[1], [0], [0], [1], [0, 0, 1, 1], [], []>} : vector<64x576xbf16>, vector<576x128xbf16>, vector<64x128xf32> -> vector<64x128xf32>
    %22 = vector.broadcast %1 : vector<64x1xf32> to vector<64x128xf32>
    %23 = arith.addf %21, %22 : vector<64x128xf32>
    %cst_22 = arith.constant 0.000000e+00 : f32
    %24 = vector.broadcast %cst_22 : f32 to vector<64x128xf32>
    %25 = arith.maximumf %23, %24 : vector<64x128xf32>
    %26 = arith.truncf %25 : vector<64x128xf32> to vector<64x128xbf16>
    %c0_23 = arith.constant 0 : index
    %c0_24 = arith.constant 0 : index
    %c0_25 = arith.constant 0 : index
    %27 = vector.load %arg4[%c0_23, %c0_24, %c0_25] : memref<1x64x128xbf16, #tpu.memory_space<vmem>>, vector<1x64x128xbf16>
    %28 = vector.shape_cast %27 : vector<1x64x128xbf16> to vector<64x128xbf16>
    %29 = vector.shape_cast %26 : vector<64x128xbf16> to vector<1x64x128xbf16>
    tpu.vector_store %arg4[%c0_23, %c0_24, %c0_25], %29 {strides = array<i32>} : memref<1x64x128xbf16, #tpu.memory_space<vmem>>, vector<1x64x128xbf16>,
    return
  }
  func.func @transform_0(%arg0: i32) -> (i32, i32, i32) {
    %c0_i32 = arith.constant 0 : i32
    %c0_i32_0 = arith.constant 0 : i32
    %c0_i32_1 = arith.constant 0 : i32
    return %arg0, %c0_i32, %c0_i32_0 : i32, i32, i32
  }
  func.func @transform_1(%arg0: i32) -> (i32, i32) {
    %c0_i32 = arith.constant 0 : i32
    %c0_i32_0 = arith.constant 0 : i32
    %c0_i32_1 = arith.constant 0 : i32
    return %c0_i32, %c0_i32_0 : i32, i32
  }
  func.func @transform_2(%arg0: i32) -> (i32, i32) {
    %c0_i32 = arith.constant 0 : i32
    %c0_i32_0 = arith.constant 0 : i32
    %c0_i32_1 = arith.constant 0 : i32
    return %c0_i32, %c0_i32_0 : i32, i32
  }
  func.func @transform_3(%arg0: i32) -> (i32, i32, i32) {
    %c0_i32 = arith.constant 0 : i32
    %c0_i32_0 = arith.constant 0 : i32
    %c0_i32_1 = arith.constant 0 : i32
    return %arg0, %c0_i32, %c0_i32_0 : i32, i32, i32
  }
}

module attributes {stable_mosaic.version = 11 : i64} {
  func.func @_tap_conv_kernel(%arg0: i32, %arg1: memref<1x64x256xbf16, #tpu.memory_space<vmem>>, %arg2: memref<256x256xbf16, #tpu.memory_space<vmem>>, %arg3: memref<256x1xf32, #tpu.memory_space<vmem>>, %arg4: memref<1x256x128xbf16, #tpu.memory_space<vmem>>) attributes {dimension_semantics = [#tpu.dimension_semantics<parallel>], iteration_bounds = array<i64: 2>, scalar_prefetch = 0 : i64, scratch_operands = 0 : i64, tpu.core_type = #tpu.core_type<tc>, window_params = [{transform_indices = @transform_0, window_bounds = array<i64: 1, 64, 256>}, {pipeline_mode = #tpu.pipeline_mode<synchronous>, transform_indices = @transform_1, window_bounds = array<i64: 256, 256>}, {pipeline_mode = #tpu.pipeline_mode<synchronous>, transform_indices = @transform_2, window_bounds = array<i64: 256, 1>}, {transform_indices = @transform_3, window_bounds = array<i64: 1, 256, 128>}]} {
    %c0 = arith.constant 0 : index
    %c0_0 = arith.constant 0 : index
    %0 = vector.load %arg2[%c0, %c0_0] : memref<256x256xbf16, #tpu.memory_space<vmem>>, vector<256x256xbf16>
    %c0_1 = arith.constant 0 : index
    %c0_2 = arith.constant 0 : index
    %1 = vector.load %arg3[%c0_1, %c0_2] : memref<256x1xf32, #tpu.memory_space<vmem>>, vector<256x1xf32>
    %c0_3 = arith.constant 0 : index
    %c0_4 = arith.constant 0 : index
    %c0_5 = arith.constant 0 : index
    %2 = vector.load %arg1[%c0_3, %c0_4, %c0_5] : memref<1x64x256xbf16, #tpu.memory_space<vmem>>, vector<1x64x128xbf16>
    %3 = vector.shape_cast %2 : vector<1x64x128xbf16> to vector<64x128xbf16>
    %c0_6 = arith.constant 0 : index
    %c0_7 = arith.constant 0 : index
    %c1 = arith.constant 1 : index
    %4 = vector.load %arg1[%c0_6, %c0_7, %c1] : memref<1x64x256xbf16, #tpu.memory_space<vmem>>, vector<1x64x128xbf16>
    %5 = vector.shape_cast %4 : vector<1x64x128xbf16> to vector<64x128xbf16>
    %c0_8 = arith.constant 0 : index
    %c0_9 = arith.constant 0 : index
    %c3 = arith.constant 3 : index
    %6 = vector.load %arg1[%c0_8, %c0_9, %c3] : memref<1x64x256xbf16, #tpu.memory_space<vmem>>, vector<1x64x128xbf16>
    %7 = vector.shape_cast %6 : vector<1x64x128xbf16> to vector<64x128xbf16>
    %c0_10 = arith.constant 0 : index
    %c0_11 = arith.constant 0 : index
    %c4 = arith.constant 4 : index
    %8 = vector.load %arg1[%c0_10, %c0_11, %c4] : memref<1x64x256xbf16, #tpu.memory_space<vmem>>, vector<1x64x128xbf16>
    %9 = vector.shape_cast %8 : vector<1x64x128xbf16> to vector<64x128xbf16>
    %10 = tpu.concatenate %3, %5, %7, %9 in 0 : vector<64x128xbf16>, vector<64x128xbf16>, vector<64x128xbf16>, vector<64x128xbf16> -> vector<256x128xbf16>
    %cst = arith.constant dense<0.000000e+00> : vector<256x128xf32>
    %11 = tpu.matmul %0, %10, %cst {dimension_numbers = #tpu.dot_dimension_numbers<[1], [0], [0], [1], [0, 0, 1, 1], [], []>} : vector<256x256xbf16>, vector<256x128xbf16>, vector<256x128xf32> -> vector<256x128xf32>
    %12 = vector.broadcast %1 : vector<256x1xf32> to vector<256x128xf32>
    %13 = arith.addf %11, %12 : vector<256x128xf32>
    %14 = arith.truncf %13 : vector<256x128xf32> to vector<256x128xbf16>
    %c0_12 = arith.constant 0 : index
    %c0_13 = arith.constant 0 : index
    %c0_14 = arith.constant 0 : index
    %15 = vector.load %arg4[%c0_12, %c0_13, %c0_14] : memref<1x256x128xbf16, #tpu.memory_space<vmem>>, vector<1x256x128xbf16>
    %16 = vector.shape_cast %15 : vector<1x256x128xbf16> to vector<256x128xbf16>
    %17 = vector.shape_cast %14 : vector<256x128xbf16> to vector<1x256x128xbf16>
    tpu.vector_store %arg4[%c0_12, %c0_13, %c0_14], %17 {strides = array<i32>} : memref<1x256x128xbf16, #tpu.memory_space<vmem>>, vector<1x256x128xbf16>,
    return
  }
  func.func @transform_0(%arg0: i32) -> (i32, i32, i32) {
    %c0_i32 = arith.constant 0 : i32
    %c0_i32_0 = arith.constant 0 : i32
    %c0_i32_1 = arith.constant 0 : i32
    return %arg0, %c0_i32, %c0_i32_0 : i32, i32, i32
  }
  func.func @transform_1(%arg0: i32) -> (i32, i32) {
    %c0_i32 = arith.constant 0 : i32
    %c0_i32_0 = arith.constant 0 : i32
    %c0_i32_1 = arith.constant 0 : i32
    return %c0_i32, %c0_i32_0 : i32, i32
  }
  func.func @transform_2(%arg0: i32) -> (i32, i32) {
    %c0_i32 = arith.constant 0 : i32
    %c0_i32_0 = arith.constant 0 : i32
    %c0_i32_1 = arith.constant 0 : i32
    return %c0_i32, %c0_i32_0 : i32, i32
  }
  func.func @transform_3(%arg0: i32) -> (i32, i32, i32) {
    %c0_i32 = arith.constant 0 : i32
    %c0_i32_0 = arith.constant 0 : i32
    %c0_i32_1 = arith.constant 0 : i32
    return %arg0, %c0_i32, %c0_i32_0 : i32, i32, i32
  }
}

module attributes {stable_mosaic.version = 11 : i64} {
  func.func @_tap_conv_kernel(%arg0: i32, %arg1: memref<1x128x256xbf16, #tpu.memory_space<vmem>>, %arg2: memref<64x1152xbf16, #tpu.memory_space<vmem>>, %arg3: memref<64x1xf32, #tpu.memory_space<vmem>>, %arg4: memref<1x64x128xbf16, #tpu.memory_space<vmem>>) attributes {dimension_semantics = [#tpu.dimension_semantics<parallel>], iteration_bounds = array<i64: 2>, scalar_prefetch = 0 : i64, scratch_operands = 0 : i64, tpu.core_type = #tpu.core_type<tc>, window_params = [{transform_indices = @transform_0, window_bounds = array<i64: 1, 128, 256>}, {pipeline_mode = #tpu.pipeline_mode<synchronous>, transform_indices = @transform_1, window_bounds = array<i64: 64, 1152>}, {pipeline_mode = #tpu.pipeline_mode<synchronous>, transform_indices = @transform_2, window_bounds = array<i64: 64, 1>}, {transform_indices = @transform_3, window_bounds = array<i64: 1, 64, 128>}]} {
    %c0 = arith.constant 0 : index
    %c0_0 = arith.constant 0 : index
    %0 = vector.load %arg2[%c0, %c0_0] : memref<64x1152xbf16, #tpu.memory_space<vmem>>, vector<64x1152xbf16>
    %c0_1 = arith.constant 0 : index
    %c0_2 = arith.constant 0 : index
    %1 = vector.load %arg3[%c0_1, %c0_2] : memref<64x1xf32, #tpu.memory_space<vmem>>, vector<64x1xf32>
    %c0_3 = arith.constant 0 : index
    %c0_4 = arith.constant 0 : index
    %c0_5 = arith.constant 0 : index
    %2 = vector.load %arg1[%c0_3, %c0_4, %c0_5] : memref<1x128x256xbf16, #tpu.memory_space<vmem>>, vector<1x128x128xbf16>
    %3 = vector.shape_cast %2 : vector<1x128x128xbf16> to vector<128x128xbf16>
    %c0_6 = arith.constant 0 : index
    %c0_7 = arith.constant 0 : index
    %c1 = arith.constant 1 : index
    %4 = vector.load %arg1[%c0_6, %c0_7, %c1] : memref<1x128x256xbf16, #tpu.memory_space<vmem>>, vector<1x128x128xbf16>
    %5 = vector.shape_cast %4 : vector<1x128x128xbf16> to vector<128x128xbf16>
    %c0_8 = arith.constant 0 : index
    %c0_9 = arith.constant 0 : index
    %c2 = arith.constant 2 : index
    %6 = vector.load %arg1[%c0_8, %c0_9, %c2] : memref<1x128x256xbf16, #tpu.memory_space<vmem>>, vector<1x128x128xbf16>
    %7 = vector.shape_cast %6 : vector<1x128x128xbf16> to vector<128x128xbf16>
    %c0_10 = arith.constant 0 : index
    %c0_11 = arith.constant 0 : index
    %c6 = arith.constant 6 : index
    %8 = vector.load %arg1[%c0_10, %c0_11, %c6] : memref<1x128x256xbf16, #tpu.memory_space<vmem>>, vector<1x128x128xbf16>
    %9 = vector.shape_cast %8 : vector<1x128x128xbf16> to vector<128x128xbf16>
    %c0_12 = arith.constant 0 : index
    %c0_13 = arith.constant 0 : index
    %c7 = arith.constant 7 : index
    %10 = vector.load %arg1[%c0_12, %c0_13, %c7] : memref<1x128x256xbf16, #tpu.memory_space<vmem>>, vector<1x128x128xbf16>
    %11 = vector.shape_cast %10 : vector<1x128x128xbf16> to vector<128x128xbf16>
    %c0_14 = arith.constant 0 : index
    %c0_15 = arith.constant 0 : index
    %c8 = arith.constant 8 : index
    %12 = vector.load %arg1[%c0_14, %c0_15, %c8] : memref<1x128x256xbf16, #tpu.memory_space<vmem>>, vector<1x128x128xbf16>
    %13 = vector.shape_cast %12 : vector<1x128x128xbf16> to vector<128x128xbf16>
    %c0_16 = arith.constant 0 : index
    %c0_17 = arith.constant 0 : index
    %c12 = arith.constant 12 : index
    %14 = vector.load %arg1[%c0_16, %c0_17, %c12] : memref<1x128x256xbf16, #tpu.memory_space<vmem>>, vector<1x128x128xbf16>
    %15 = vector.shape_cast %14 : vector<1x128x128xbf16> to vector<128x128xbf16>
    %c0_18 = arith.constant 0 : index
    %c0_19 = arith.constant 0 : index
    %c13 = arith.constant 13 : index
    %16 = vector.load %arg1[%c0_18, %c0_19, %c13] : memref<1x128x256xbf16, #tpu.memory_space<vmem>>, vector<1x128x128xbf16>
    %17 = vector.shape_cast %16 : vector<1x128x128xbf16> to vector<128x128xbf16>
    %c0_20 = arith.constant 0 : index
    %c0_21 = arith.constant 0 : index
    %c14 = arith.constant 14 : index
    %18 = vector.load %arg1[%c0_20, %c0_21, %c14] : memref<1x128x256xbf16, #tpu.memory_space<vmem>>, vector<1x128x128xbf16>
    %19 = vector.shape_cast %18 : vector<1x128x128xbf16> to vector<128x128xbf16>
    %20 = tpu.concatenate %3, %5, %7, %9, %11, %13, %15, %17, %19 in 0 : vector<128x128xbf16>, vector<128x128xbf16>, vector<128x128xbf16>, vector<128x128xbf16>, vector<128x128xbf16>, vector<128x128xbf16>, vector<128x128xbf16>, vector<128x128xbf16>, vector<128x128xbf16> -> vector<1152x128xbf16>
    %cst = arith.constant dense<0.000000e+00> : vector<64x128xf32>
    %21 = tpu.matmul %0, %20, %cst {dimension_numbers = #tpu.dot_dimension_numbers<[1], [0], [0], [1], [0, 0, 1, 1], [], []>} : vector<64x1152xbf16>, vector<1152x128xbf16>, vector<64x128xf32> -> vector<64x128xf32>
    %22 = vector.broadcast %1 : vector<64x1xf32> to vector<64x128xf32>
    %23 = arith.addf %21, %22 : vector<64x128xf32>
    %cst_22 = arith.constant 0.000000e+00 : f32
    %24 = vector.broadcast %cst_22 : f32 to vector<64x128xf32>
    %25 = arith.maximumf %23, %24 : vector<64x128xf32>
    %26 = arith.truncf %25 : vector<64x128xf32> to vector<64x128xbf16>
    %c0_23 = arith.constant 0 : index
    %c0_24 = arith.constant 0 : index
    %c0_25 = arith.constant 0 : index
    %27 = vector.load %arg4[%c0_23, %c0_24, %c0_25] : memref<1x64x128xbf16, #tpu.memory_space<vmem>>, vector<1x64x128xbf16>
    %28 = vector.shape_cast %27 : vector<1x64x128xbf16> to vector<64x128xbf16>
    %29 = vector.shape_cast %26 : vector<64x128xbf16> to vector<1x64x128xbf16>
    tpu.vector_store %arg4[%c0_23, %c0_24, %c0_25], %29 {strides = array<i32>} : memref<1x64x128xbf16, #tpu.memory_space<vmem>>, vector<1x64x128xbf16>,
    return
  }
  func.func @transform_0(%arg0: i32) -> (i32, i32, i32) {
    %c0_i32 = arith.constant 0 : i32
    %c0_i32_0 = arith.constant 0 : i32
    %c0_i32_1 = arith.constant 0 : i32
    return %arg0, %c0_i32, %c0_i32_0 : i32, i32, i32
  }
  func.func @transform_1(%arg0: i32) -> (i32, i32) {
    %c0_i32 = arith.constant 0 : i32
    %c0_i32_0 = arith.constant 0 : i32
    %c0_i32_1 = arith.constant 0 : i32
    return %c0_i32, %c0_i32_0 : i32, i32
  }
  func.func @transform_2(%arg0: i32) -> (i32, i32) {
    %c0_i32 = arith.constant 0 : i32
    %c0_i32_0 = arith.constant 0 : i32
    %c0_i32_1 = arith.constant 0 : i32
    return %c0_i32, %c0_i32_0 : i32, i32
  }
  func.func @transform_3(%arg0: i32) -> (i32, i32, i32) {
    %c0_i32 = arith.constant 0 : i32
    %c0_i32_0 = arith.constant 0 : i32
    %c0_i32_1 = arith.constant 0 : i32
    return %arg0, %c0_i32, %c0_i32_0 : i32, i32, i32
  }
}

module attributes {stable_mosaic.version = 11 : i64} {
  func.func @_tap_conv_kernel(%arg0: i32, %arg1: memref<1x64x256xbf16, #tpu.memory_space<vmem>>, %arg2: memref<128x256xbf16, #tpu.memory_space<vmem>>, %arg3: memref<128x1xf32, #tpu.memory_space<vmem>>, %arg4: memref<1x128x128xbf16, #tpu.memory_space<vmem>>) attributes {dimension_semantics = [#tpu.dimension_semantics<parallel>], iteration_bounds = array<i64: 2>, scalar_prefetch = 0 : i64, scratch_operands = 0 : i64, tpu.core_type = #tpu.core_type<tc>, window_params = [{transform_indices = @transform_0, window_bounds = array<i64: 1, 64, 256>}, {pipeline_mode = #tpu.pipeline_mode<synchronous>, transform_indices = @transform_1, window_bounds = array<i64: 128, 256>}, {pipeline_mode = #tpu.pipeline_mode<synchronous>, transform_indices = @transform_2, window_bounds = array<i64: 128, 1>}, {transform_indices = @transform_3, window_bounds = array<i64: 1, 128, 128>}]} {
    %c0 = arith.constant 0 : index
    %c0_0 = arith.constant 0 : index
    %0 = vector.load %arg2[%c0, %c0_0] : memref<128x256xbf16, #tpu.memory_space<vmem>>, vector<128x256xbf16>
    %c0_1 = arith.constant 0 : index
    %c0_2 = arith.constant 0 : index
    %1 = vector.load %arg3[%c0_1, %c0_2] : memref<128x1xf32, #tpu.memory_space<vmem>>, vector<128x1xf32>
    %c0_3 = arith.constant 0 : index
    %c0_4 = arith.constant 0 : index
    %c0_5 = arith.constant 0 : index
    %2 = vector.load %arg1[%c0_3, %c0_4, %c0_5] : memref<1x64x256xbf16, #tpu.memory_space<vmem>>, vector<1x64x128xbf16>
    %3 = vector.shape_cast %2 : vector<1x64x128xbf16> to vector<64x128xbf16>
    %c0_6 = arith.constant 0 : index
    %c0_7 = arith.constant 0 : index
    %c1 = arith.constant 1 : index
    %4 = vector.load %arg1[%c0_6, %c0_7, %c1] : memref<1x64x256xbf16, #tpu.memory_space<vmem>>, vector<1x64x128xbf16>
    %5 = vector.shape_cast %4 : vector<1x64x128xbf16> to vector<64x128xbf16>
    %c0_8 = arith.constant 0 : index
    %c0_9 = arith.constant 0 : index
    %c5 = arith.constant 5 : index
    %6 = vector.load %arg1[%c0_8, %c0_9, %c5] : memref<1x64x256xbf16, #tpu.memory_space<vmem>>, vector<1x64x128xbf16>
    %7 = vector.shape_cast %6 : vector<1x64x128xbf16> to vector<64x128xbf16>
    %c0_10 = arith.constant 0 : index
    %c0_11 = arith.constant 0 : index
    %c6 = arith.constant 6 : index
    %8 = vector.load %arg1[%c0_10, %c0_11, %c6] : memref<1x64x256xbf16, #tpu.memory_space<vmem>>, vector<1x64x128xbf16>
    %9 = vector.shape_cast %8 : vector<1x64x128xbf16> to vector<64x128xbf16>
    %10 = tpu.concatenate %3, %5, %7, %9 in 0 : vector<64x128xbf16>, vector<64x128xbf16>, vector<64x128xbf16>, vector<64x128xbf16> -> vector<256x128xbf16>
    %cst = arith.constant dense<0.000000e+00> : vector<128x128xf32>
    %11 = tpu.matmul %0, %10, %cst {dimension_numbers = #tpu.dot_dimension_numbers<[1], [0], [0], [1], [0, 0, 1, 1], [], []>} : vector<128x256xbf16>, vector<256x128xbf16>, vector<128x128xf32> -> vector<128x128xf32>
    %12 = vector.broadcast %1 : vector<128x1xf32> to vector<128x128xf32>
    %13 = arith.addf %11, %12 : vector<128x128xf32>
    %14 = arith.truncf %13 : vector<128x128xf32> to vector<128x128xbf16>
    %c0_12 = arith.constant 0 : index
    %c0_13 = arith.constant 0 : index
    %c0_14 = arith.constant 0 : index
    %15 = vector.load %arg4[%c0_12, %c0_13, %c0_14] : memref<1x128x128xbf16, #tpu.memory_space<vmem>>, vector<1x128x128xbf16>
    %16 = vector.shape_cast %15 : vector<1x128x128xbf16> to vector<128x128xbf16>
    %17 = vector.shape_cast %14 : vector<128x128xbf16> to vector<1x128x128xbf16>
    tpu.vector_store %arg4[%c0_12, %c0_13, %c0_14], %17 {strides = array<i32>} : memref<1x128x128xbf16, #tpu.memory_space<vmem>>, vector<1x128x128xbf16>,
    return
  }
  func.func @transform_0(%arg0: i32) -> (i32, i32, i32) {
    %c0_i32 = arith.constant 0 : i32
    %c0_i32_0 = arith.constant 0 : i32
    %c0_i32_1 = arith.constant 0 : i32
    return %arg0, %c0_i32, %c0_i32_0 : i32, i32, i32
  }
  func.func @transform_1(%arg0: i32) -> (i32, i32) {
    %c0_i32 = arith.constant 0 : i32
    %c0_i32_0 = arith.constant 0 : i32
    %c0_i32_1 = arith.constant 0 : i32
    return %c0_i32, %c0_i32_0 : i32, i32
  }
  func.func @transform_2(%arg0: i32) -> (i32, i32) {
    %c0_i32 = arith.constant 0 : i32
    %c0_i32_0 = arith.constant 0 : i32
    %c0_i32_1 = arith.constant 0 : i32
    return %c0_i32, %c0_i32_0 : i32, i32
  }
  func.func @transform_3(%arg0: i32) -> (i32, i32, i32) {
    %c0_i32 = arith.constant 0 : i32
    %c0_i32_0 = arith.constant 0 : i32
    %c0_i32_1 = arith.constant 0 : i32
    return %arg0, %c0_i32, %c0_i32_0 : i32, i32, i32
  }
}

module attributes {stable_mosaic.version = 11 : i64} {
  func.func @_tap_conv_kernel(%arg0: i32, %arg1: memref<1x64x256xbf16, #tpu.memory_space<vmem>>, %arg2: memref<32x576xbf16, #tpu.memory_space<vmem>>, %arg3: memref<32x1xf32, #tpu.memory_space<vmem>>, %arg4: memref<1x32x128xbf16, #tpu.memory_space<vmem>>) attributes {dimension_semantics = [#tpu.dimension_semantics<parallel>], iteration_bounds = array<i64: 2>, scalar_prefetch = 0 : i64, scratch_operands = 0 : i64, tpu.core_type = #tpu.core_type<tc>, window_params = [{transform_indices = @transform_0, window_bounds = array<i64: 1, 64, 256>}, {pipeline_mode = #tpu.pipeline_mode<synchronous>, transform_indices = @transform_1, window_bounds = array<i64: 32, 576>}, {pipeline_mode = #tpu.pipeline_mode<synchronous>, transform_indices = @transform_2, window_bounds = array<i64: 32, 1>}, {transform_indices = @transform_3, window_bounds = array<i64: 1, 32, 128>}]} {
    %c0 = arith.constant 0 : index
    %c0_0 = arith.constant 0 : index
    %0 = vector.load %arg2[%c0, %c0_0] : memref<32x576xbf16, #tpu.memory_space<vmem>>, vector<32x576xbf16>
    %c0_1 = arith.constant 0 : index
    %c0_2 = arith.constant 0 : index
    %1 = vector.load %arg3[%c0_1, %c0_2] : memref<32x1xf32, #tpu.memory_space<vmem>>, vector<32x1xf32>
    %c0_3 = arith.constant 0 : index
    %c0_4 = arith.constant 0 : index
    %c0_5 = arith.constant 0 : index
    %2 = vector.load %arg1[%c0_3, %c0_4, %c0_5] : memref<1x64x256xbf16, #tpu.memory_space<vmem>>, vector<1x64x128xbf16>
    %3 = vector.shape_cast %2 : vector<1x64x128xbf16> to vector<64x128xbf16>
    %c0_6 = arith.constant 0 : index
    %c0_7 = arith.constant 0 : index
    %c1 = arith.constant 1 : index
    %4 = vector.load %arg1[%c0_6, %c0_7, %c1] : memref<1x64x256xbf16, #tpu.memory_space<vmem>>, vector<1x64x128xbf16>
    %5 = vector.shape_cast %4 : vector<1x64x128xbf16> to vector<64x128xbf16>
    %c0_8 = arith.constant 0 : index
    %c0_9 = arith.constant 0 : index
    %c2 = arith.constant 2 : index
    %6 = vector.load %arg1[%c0_8, %c0_9, %c2] : memref<1x64x256xbf16, #tpu.memory_space<vmem>>, vector<1x64x128xbf16>
    %7 = vector.shape_cast %6 : vector<1x64x128xbf16> to vector<64x128xbf16>
    %c0_10 = arith.constant 0 : index
    %c0_11 = arith.constant 0 : index
    %c10 = arith.constant 10 : index
    %8 = vector.load %arg1[%c0_10, %c0_11, %c10] : memref<1x64x256xbf16, #tpu.memory_space<vmem>>, vector<1x64x128xbf16>
    %9 = vector.shape_cast %8 : vector<1x64x128xbf16> to vector<64x128xbf16>
    %c0_12 = arith.constant 0 : index
    %c0_13 = arith.constant 0 : index
    %c11 = arith.constant 11 : index
    %10 = vector.load %arg1[%c0_12, %c0_13, %c11] : memref<1x64x256xbf16, #tpu.memory_space<vmem>>, vector<1x64x128xbf16>
    %11 = vector.shape_cast %10 : vector<1x64x128xbf16> to vector<64x128xbf16>
    %c0_14 = arith.constant 0 : index
    %c0_15 = arith.constant 0 : index
    %c12 = arith.constant 12 : index
    %12 = vector.load %arg1[%c0_14, %c0_15, %c12] : memref<1x64x256xbf16, #tpu.memory_space<vmem>>, vector<1x64x128xbf16>
    %13 = vector.shape_cast %12 : vector<1x64x128xbf16> to vector<64x128xbf16>
    %c0_16 = arith.constant 0 : index
    %c0_17 = arith.constant 0 : index
    %c20 = arith.constant 20 : index
    %14 = vector.load %arg1[%c0_16, %c0_17, %c20] : memref<1x64x256xbf16, #tpu.memory_space<vmem>>, vector<1x64x128xbf16>
    %15 = vector.shape_cast %14 : vector<1x64x128xbf16> to vector<64x128xbf16>
    %c0_18 = arith.constant 0 : index
    %c0_19 = arith.constant 0 : index
    %c21 = arith.constant 21 : index
    %16 = vector.load %arg1[%c0_18, %c0_19, %c21] : memref<1x64x256xbf16, #tpu.memory_space<vmem>>, vector<1x64x128xbf16>
    %17 = vector.shape_cast %16 : vector<1x64x128xbf16> to vector<64x128xbf16>
    %c0_20 = arith.constant 0 : index
    %c0_21 = arith.constant 0 : index
    %c22 = arith.constant 22 : index
    %18 = vector.load %arg1[%c0_20, %c0_21, %c22] : memref<1x64x256xbf16, #tpu.memory_space<vmem>>, vector<1x64x128xbf16>
    %19 = vector.shape_cast %18 : vector<1x64x128xbf16> to vector<64x128xbf16>
    %20 = tpu.concatenate %3, %5, %7, %9, %11, %13, %15, %17, %19 in 0 : vector<64x128xbf16>, vector<64x128xbf16>, vector<64x128xbf16>, vector<64x128xbf16>, vector<64x128xbf16>, vector<64x128xbf16>, vector<64x128xbf16>, vector<64x128xbf16>, vector<64x128xbf16> -> vector<576x128xbf16>
    %cst = arith.constant dense<0.000000e+00> : vector<32x128xf32>
    %21 = tpu.matmul %0, %20, %cst {dimension_numbers = #tpu.dot_dimension_numbers<[1], [0], [0], [1], [0, 0, 1, 1], [], []>} : vector<32x576xbf16>, vector<576x128xbf16>, vector<32x128xf32> -> vector<32x128xf32>
    %22 = vector.broadcast %1 : vector<32x1xf32> to vector<32x128xf32>
    %23 = arith.addf %21, %22 : vector<32x128xf32>
    %cst_22 = arith.constant 0.000000e+00 : f32
    %24 = vector.broadcast %cst_22 : f32 to vector<32x128xf32>
    %25 = arith.maximumf %23, %24 : vector<32x128xf32>
    %26 = arith.truncf %25 : vector<32x128xf32> to vector<32x128xbf16>
    %c0_23 = arith.constant 0 : index
    %c0_24 = arith.constant 0 : index
    %c0_25 = arith.constant 0 : index
    %27 = vector.load %arg4[%c0_23, %c0_24, %c0_25] : memref<1x32x128xbf16, #tpu.memory_space<vmem>>, vector<1x32x128xbf16>
    %28 = vector.shape_cast %27 : vector<1x32x128xbf16> to vector<32x128xbf16>
    %29 = vector.shape_cast %26 : vector<32x128xbf16> to vector<1x32x128xbf16>
    tpu.vector_store %arg4[%c0_23, %c0_24, %c0_25], %29 {strides = array<i32>} : memref<1x32x128xbf16, #tpu.memory_space<vmem>>, vector<1x32x128xbf16>,
    return
  }
  func.func @transform_0(%arg0: i32) -> (i32, i32, i32) {
    %c0_i32 = arith.constant 0 : i32
    %c0_i32_0 = arith.constant 0 : i32
    %c0_i32_1 = arith.constant 0 : i32
    return %arg0, %c0_i32, %c0_i32_0 : i32, i32, i32
  }
  func.func @transform_1(%arg0: i32) -> (i32, i32) {
    %c0_i32 = arith.constant 0 : i32
    %c0_i32_0 = arith.constant 0 : i32
    %c0_i32_1 = arith.constant 0 : i32
    return %c0_i32, %c0_i32_0 : i32, i32
  }
  func.func @transform_2(%arg0: i32) -> (i32, i32) {
    %c0_i32 = arith.constant 0 : i32
    %c0_i32_0 = arith.constant 0 : i32
    %c0_i32_1 = arith.constant 0 : i32
    return %c0_i32, %c0_i32_0 : i32, i32
  }
  func.func @transform_3(%arg0: i32) -> (i32, i32, i32) {
    %c0_i32 = arith.constant 0 : i32
    %c0_i32_0 = arith.constant 0 : i32
    %c0_i32_1 = arith.constant 0 : i32
    return %arg0, %c0_i32, %c0_i32_0 : i32, i32, i32
  }
}

module attributes {stable_mosaic.version = 11 : i64} {
  func.func @_tap_conv_kernel(%arg0: i32, %arg1: memref<1x32x256xbf16, #tpu.memory_space<vmem>>, %arg2: memref<64x128xbf16, #tpu.memory_space<vmem>>, %arg3: memref<64x1xf32, #tpu.memory_space<vmem>>, %arg4: memref<1x64x128xbf16, #tpu.memory_space<vmem>>) attributes {dimension_semantics = [#tpu.dimension_semantics<parallel>], iteration_bounds = array<i64: 2>, scalar_prefetch = 0 : i64, scratch_operands = 0 : i64, tpu.core_type = #tpu.core_type<tc>, window_params = [{transform_indices = @transform_0, window_bounds = array<i64: 1, 32, 256>}, {pipeline_mode = #tpu.pipeline_mode<synchronous>, transform_indices = @transform_1, window_bounds = array<i64: 64, 128>}, {pipeline_mode = #tpu.pipeline_mode<synchronous>, transform_indices = @transform_2, window_bounds = array<i64: 64, 1>}, {transform_indices = @transform_3, window_bounds = array<i64: 1, 64, 128>}]} {
    %c0 = arith.constant 0 : index
    %c0_0 = arith.constant 0 : index
    %0 = vector.load %arg2[%c0, %c0_0] : memref<64x128xbf16, #tpu.memory_space<vmem>>, vector<64x128xbf16>
    %c0_1 = arith.constant 0 : index
    %c0_2 = arith.constant 0 : index
    %1 = vector.load %arg3[%c0_1, %c0_2] : memref<64x1xf32, #tpu.memory_space<vmem>>, vector<64x1xf32>
    %c0_3 = arith.constant 0 : index
    %c0_4 = arith.constant 0 : index
    %c0_5 = arith.constant 0 : index
    %2 = vector.load %arg1[%c0_3, %c0_4, %c0_5] : memref<1x32x256xbf16, #tpu.memory_space<vmem>>, vector<1x32x128xbf16>
    %3 = vector.shape_cast %2 : vector<1x32x128xbf16> to vector<32x128xbf16>
    %c0_6 = arith.constant 0 : index
    %c0_7 = arith.constant 0 : index
    %c1 = arith.constant 1 : index
    %4 = vector.load %arg1[%c0_6, %c0_7, %c1] : memref<1x32x256xbf16, #tpu.memory_space<vmem>>, vector<1x32x128xbf16>
    %5 = vector.shape_cast %4 : vector<1x32x128xbf16> to vector<32x128xbf16>
    %c0_8 = arith.constant 0 : index
    %c0_9 = arith.constant 0 : index
    %c9 = arith.constant 9 : index
    %6 = vector.load %arg1[%c0_8, %c0_9, %c9] : memref<1x32x256xbf16, #tpu.memory_space<vmem>>, vector<1x32x128xbf16>
    %7 = vector.shape_cast %6 : vector<1x32x128xbf16> to vector<32x128xbf16>
    %c0_10 = arith.constant 0 : index
    %c0_11 = arith.constant 0 : index
    %c10 = arith.constant 10 : index
    %8 = vector.load %arg1[%c0_10, %c0_11, %c10] : memref<1x32x256xbf16, #tpu.memory_space<vmem>>, vector<1x32x128xbf16>
    %9 = vector.shape_cast %8 : vector<1x32x128xbf16> to vector<32x128xbf16>
    %10 = tpu.concatenate %3, %5, %7, %9 in 0 : vector<32x128xbf16>, vector<32x128xbf16>, vector<32x128xbf16>, vector<32x128xbf16> -> vector<128x128xbf16>
    %cst = arith.constant dense<0.000000e+00> : vector<64x128xf32>
    %11 = tpu.matmul %0, %10, %cst {dimension_numbers = #tpu.dot_dimension_numbers<[1], [0], [0], [1], [0, 0, 1, 1], [], []>} : vector<64x128xbf16>, vector<128x128xbf16>, vector<64x128xf32> -> vector<64x128xf32>
    %12 = vector.broadcast %1 : vector<64x1xf32> to vector<64x128xf32>
    %13 = arith.addf %11, %12 : vector<64x128xf32>
    %14 = arith.truncf %13 : vector<64x128xf32> to vector<64x128xbf16>
    %c0_12 = arith.constant 0 : index
    %c0_13 = arith.constant 0 : index
    %c0_14 = arith.constant 0 : index
    %15 = vector.load %arg4[%c0_12, %c0_13, %c0_14] : memref<1x64x128xbf16, #tpu.memory_space<vmem>>, vector<1x64x128xbf16>
    %16 = vector.shape_cast %15 : vector<1x64x128xbf16> to vector<64x128xbf16>
    %17 = vector.shape_cast %14 : vector<64x128xbf16> to vector<1x64x128xbf16>
    tpu.vector_store %arg4[%c0_12, %c0_13, %c0_14], %17 {strides = array<i32>} : memref<1x64x128xbf16, #tpu.memory_space<vmem>>, vector<1x64x128xbf16>,
    return
  }
  func.func @transform_0(%arg0: i32) -> (i32, i32, i32) {
    %c0_i32 = arith.constant 0 : i32
    %c0_i32_0 = arith.constant 0 : i32
    %c0_i32_1 = arith.constant 0 : i32
    return %arg0, %c0_i32, %c0_i32_0 : i32, i32, i32
  }
  func.func @transform_1(%arg0: i32) -> (i32, i32) {
    %c0_i32 = arith.constant 0 : i32
    %c0_i32_0 = arith.constant 0 : i32
    %c0_i32_1 = arith.constant 0 : i32
    return %c0_i32, %c0_i32_0 : i32, i32
  }
  func.func @transform_2(%arg0: i32) -> (i32, i32) {
    %c0_i32 = arith.constant 0 : i32
    %c0_i32_0 = arith.constant 0 : i32
    %c0_i32_1 = arith.constant 0 : i32
    return %c0_i32, %c0_i32_0 : i32, i32
  }
  func.func @transform_3(%arg0: i32) -> (i32, i32, i32) {
    %c0_i32 = arith.constant 0 : i32
    %c0_i32_0 = arith.constant 0 : i32
    %c0_i32_1 = arith.constant 0 : i32
    return %arg0, %c0_i32, %c0_i32_0 : i32, i32, i32
  }
}

module attributes {stable_mosaic.version = 11 : i64} {
  func.func @_tap_conv_kernel(%arg0: i32, %arg1: memref<1x32x512xbf16, #tpu.memory_space<vmem>>, %arg2: memref<16x288xbf16, #tpu.memory_space<vmem>>, %arg3: memref<16x1xf32, #tpu.memory_space<vmem>>, %arg4: memref<1x16x384xbf16, #tpu.memory_space<vmem>>) attributes {dimension_semantics = [#tpu.dimension_semantics<parallel>], iteration_bounds = array<i64: 2>, scalar_prefetch = 0 : i64, scratch_operands = 0 : i64, tpu.core_type = #tpu.core_type<tc>, window_params = [{transform_indices = @transform_0, window_bounds = array<i64: 1, 32, 512>}, {pipeline_mode = #tpu.pipeline_mode<synchronous>, transform_indices = @transform_1, window_bounds = array<i64: 16, 288>}, {pipeline_mode = #tpu.pipeline_mode<synchronous>, transform_indices = @transform_2, window_bounds = array<i64: 16, 1>}, {transform_indices = @transform_3, window_bounds = array<i64: 1, 16, 384>}]} {
    %c0 = arith.constant 0 : index
    %c0_0 = arith.constant 0 : index
    %0 = vector.load %arg2[%c0, %c0_0] : memref<16x288xbf16, #tpu.memory_space<vmem>>, vector<16x288xbf16>
    %c0_1 = arith.constant 0 : index
    %c0_2 = arith.constant 0 : index
    %1 = vector.load %arg3[%c0_1, %c0_2] : memref<16x1xf32, #tpu.memory_space<vmem>>, vector<16x1xf32>
    %c0_3 = arith.constant 0 : index
    %c0_4 = arith.constant 0 : index
    %c0_5 = arith.constant 0 : index
    %2 = vector.load %arg1[%c0_3, %c0_4, %c0_5] : memref<1x32x512xbf16, #tpu.memory_space<vmem>>, vector<1x32x384xbf16>
    %3 = vector.shape_cast %2 : vector<1x32x384xbf16> to vector<32x384xbf16>
    %c0_6 = arith.constant 0 : index
    %c0_7 = arith.constant 0 : index
    %c1 = arith.constant 1 : index
    %4 = vector.load %arg1[%c0_6, %c0_7, %c1] : memref<1x32x512xbf16, #tpu.memory_space<vmem>>, vector<1x32x384xbf16>
    %5 = vector.shape_cast %4 : vector<1x32x384xbf16> to vector<32x384xbf16>
    %c0_8 = arith.constant 0 : index
    %c0_9 = arith.constant 0 : index
    %c2 = arith.constant 2 : index
    %6 = vector.load %arg1[%c0_8, %c0_9, %c2] : memref<1x32x512xbf16, #tpu.memory_space<vmem>>, vector<1x32x384xbf16>
    %7 = vector.shape_cast %6 : vector<1x32x384xbf16> to vector<32x384xbf16>
    %c0_10 = arith.constant 0 : index
    %c0_11 = arith.constant 0 : index
    %c18 = arith.constant 18 : index
    %8 = vector.load %arg1[%c0_10, %c0_11, %c18] : memref<1x32x512xbf16, #tpu.memory_space<vmem>>, vector<1x32x384xbf16>
    %9 = vector.shape_cast %8 : vector<1x32x384xbf16> to vector<32x384xbf16>
    %c0_12 = arith.constant 0 : index
    %c0_13 = arith.constant 0 : index
    %c19 = arith.constant 19 : index
    %10 = vector.load %arg1[%c0_12, %c0_13, %c19] : memref<1x32x512xbf16, #tpu.memory_space<vmem>>, vector<1x32x384xbf16>
    %11 = vector.shape_cast %10 : vector<1x32x384xbf16> to vector<32x384xbf16>
    %c0_14 = arith.constant 0 : index
    %c0_15 = arith.constant 0 : index
    %c20 = arith.constant 20 : index
    %12 = vector.load %arg1[%c0_14, %c0_15, %c20] : memref<1x32x512xbf16, #tpu.memory_space<vmem>>, vector<1x32x384xbf16>
    %13 = vector.shape_cast %12 : vector<1x32x384xbf16> to vector<32x384xbf16>
    %c0_16 = arith.constant 0 : index
    %c0_17 = arith.constant 0 : index
    %c36 = arith.constant 36 : index
    %14 = vector.load %arg1[%c0_16, %c0_17, %c36] : memref<1x32x512xbf16, #tpu.memory_space<vmem>>, vector<1x32x384xbf16>
    %15 = vector.shape_cast %14 : vector<1x32x384xbf16> to vector<32x384xbf16>
    %c0_18 = arith.constant 0 : index
    %c0_19 = arith.constant 0 : index
    %c37 = arith.constant 37 : index
    %16 = vector.load %arg1[%c0_18, %c0_19, %c37] : memref<1x32x512xbf16, #tpu.memory_space<vmem>>, vector<1x32x384xbf16>
    %17 = vector.shape_cast %16 : vector<1x32x384xbf16> to vector<32x384xbf16>
    %c0_20 = arith.constant 0 : index
    %c0_21 = arith.constant 0 : index
    %c38 = arith.constant 38 : index
    %18 = vector.load %arg1[%c0_20, %c0_21, %c38] : memref<1x32x512xbf16, #tpu.memory_space<vmem>>, vector<1x32x384xbf16>
    %19 = vector.shape_cast %18 : vector<1x32x384xbf16> to vector<32x384xbf16>
    %20 = tpu.concatenate %3, %5, %7, %9, %11, %13, %15, %17, %19 in 0 : vector<32x384xbf16>, vector<32x384xbf16>, vector<32x384xbf16>, vector<32x384xbf16>, vector<32x384xbf16>, vector<32x384xbf16>, vector<32x384xbf16>, vector<32x384xbf16>, vector<32x384xbf16> -> vector<288x384xbf16>
    %cst = arith.constant dense<0.000000e+00> : vector<16x384xf32>
    %21 = tpu.matmul %0, %20, %cst {dimension_numbers = #tpu.dot_dimension_numbers<[1], [0], [0], [1], [0, 0, 1, 1], [], []>} : vector<16x288xbf16>, vector<288x384xbf16>, vector<16x384xf32> -> vector<16x384xf32>
    %22 = vector.broadcast %1 : vector<16x1xf32> to vector<16x384xf32>
    %23 = arith.addf %21, %22 : vector<16x384xf32>
    %cst_22 = arith.constant 0.000000e+00 : f32
    %24 = vector.broadcast %cst_22 : f32 to vector<16x384xf32>
    %25 = arith.maximumf %23, %24 : vector<16x384xf32>
    %26 = arith.truncf %25 : vector<16x384xf32> to vector<16x384xbf16>
    %c0_23 = arith.constant 0 : index
    %c0_24 = arith.constant 0 : index
    %c0_25 = arith.constant 0 : index
    %27 = vector.load %arg4[%c0_23, %c0_24, %c0_25] : memref<1x16x384xbf16, #tpu.memory_space<vmem>>, vector<1x16x384xbf16>
    %28 = vector.shape_cast %27 : vector<1x16x384xbf16> to vector<16x384xbf16>
    %29 = vector.shape_cast %26 : vector<16x384xbf16> to vector<1x16x384xbf16>
    tpu.vector_store %arg4[%c0_23, %c0_24, %c0_25], %29 {strides = array<i32>} : memref<1x16x384xbf16, #tpu.memory_space<vmem>>, vector<1x16x384xbf16>,
    return
  }
  func.func @transform_0(%arg0: i32) -> (i32, i32, i32) {
    %c0_i32 = arith.constant 0 : i32
    %c0_i32_0 = arith.constant 0 : i32
    %c0_i32_1 = arith.constant 0 : i32
    return %arg0, %c0_i32, %c0_i32_0 : i32, i32, i32
  }
  func.func @transform_1(%arg0: i32) -> (i32, i32) {
    %c0_i32 = arith.constant 0 : i32
    %c0_i32_0 = arith.constant 0 : i32
    %c0_i32_1 = arith.constant 0 : i32
    return %c0_i32, %c0_i32_0 : i32, i32
  }
  func.func @transform_2(%arg0: i32) -> (i32, i32) {
    %c0_i32 = arith.constant 0 : i32
    %c0_i32_0 = arith.constant 0 : i32
    %c0_i32_1 = arith.constant 0 : i32
    return %c0_i32, %c0_i32_0 : i32, i32
  }
  func.func @transform_3(%arg0: i32) -> (i32, i32, i32) {
    %c0_i32 = arith.constant 0 : i32
    %c0_i32_0 = arith.constant 0 : i32
    %c0_i32_1 = arith.constant 0 : i32
    return %arg0, %c0_i32, %c0_i32_0 : i32, i32, i32
  }
}

module attributes {stable_mosaic.version = 11 : i64} {
  func.func @_tap_conv_kernel(%arg0: i32, %arg1: memref<1x16x512xbf16, #tpu.memory_space<vmem>>, %arg2: memref<16x144xbf16, #tpu.memory_space<vmem>>, %arg3: memref<16x1xf32, #tpu.memory_space<vmem>>, %arg4: memref<1x16x384xf32, #tpu.memory_space<vmem>>) attributes {dimension_semantics = [#tpu.dimension_semantics<parallel>], iteration_bounds = array<i64: 2>, scalar_prefetch = 0 : i64, scratch_operands = 0 : i64, tpu.core_type = #tpu.core_type<tc>, window_params = [{transform_indices = @transform_0, window_bounds = array<i64: 1, 16, 512>}, {pipeline_mode = #tpu.pipeline_mode<synchronous>, transform_indices = @transform_1, window_bounds = array<i64: 16, 144>}, {pipeline_mode = #tpu.pipeline_mode<synchronous>, transform_indices = @transform_2, window_bounds = array<i64: 16, 1>}, {transform_indices = @transform_3, window_bounds = array<i64: 1, 16, 384>}]} {
    %c0 = arith.constant 0 : index
    %c0_0 = arith.constant 0 : index
    %0 = vector.load %arg2[%c0, %c0_0] : memref<16x144xbf16, #tpu.memory_space<vmem>>, vector<16x144xbf16>
    %c0_1 = arith.constant 0 : index
    %c0_2 = arith.constant 0 : index
    %1 = vector.load %arg3[%c0_1, %c0_2] : memref<16x1xf32, #tpu.memory_space<vmem>>, vector<16x1xf32>
    %c0_3 = arith.constant 0 : index
    %c0_4 = arith.constant 0 : index
    %c0_5 = arith.constant 0 : index
    %2 = vector.load %arg1[%c0_3, %c0_4, %c0_5] : memref<1x16x512xbf16, #tpu.memory_space<vmem>>, vector<1x16x384xbf16>
    %3 = vector.shape_cast %2 : vector<1x16x384xbf16> to vector<16x384xbf16>
    %c0_6 = arith.constant 0 : index
    %c0_7 = arith.constant 0 : index
    %c1 = arith.constant 1 : index
    %4 = vector.load %arg1[%c0_6, %c0_7, %c1] : memref<1x16x512xbf16, #tpu.memory_space<vmem>>, vector<1x16x384xbf16>
    %5 = vector.shape_cast %4 : vector<1x16x384xbf16> to vector<16x384xbf16>
    %c0_8 = arith.constant 0 : index
    %c0_9 = arith.constant 0 : index
    %c2 = arith.constant 2 : index
    %6 = vector.load %arg1[%c0_8, %c0_9, %c2] : memref<1x16x512xbf16, #tpu.memory_space<vmem>>, vector<1x16x384xbf16>
    %7 = vector.shape_cast %6 : vector<1x16x384xbf16> to vector<16x384xbf16>
    %c0_10 = arith.constant 0 : index
    %c0_11 = arith.constant 0 : index
    %c18 = arith.constant 18 : index
    %8 = vector.load %arg1[%c0_10, %c0_11, %c18] : memref<1x16x512xbf16, #tpu.memory_space<vmem>>, vector<1x16x384xbf16>
    %9 = vector.shape_cast %8 : vector<1x16x384xbf16> to vector<16x384xbf16>
    %c0_12 = arith.constant 0 : index
    %c0_13 = arith.constant 0 : index
    %c19 = arith.constant 19 : index
    %10 = vector.load %arg1[%c0_12, %c0_13, %c19] : memref<1x16x512xbf16, #tpu.memory_space<vmem>>, vector<1x16x384xbf16>
    %11 = vector.shape_cast %10 : vector<1x16x384xbf16> to vector<16x384xbf16>
    %c0_14 = arith.constant 0 : index
    %c0_15 = arith.constant 0 : index
    %c20 = arith.constant 20 : index
    %12 = vector.load %arg1[%c0_14, %c0_15, %c20] : memref<1x16x512xbf16, #tpu.memory_space<vmem>>, vector<1x16x384xbf16>
    %13 = vector.shape_cast %12 : vector<1x16x384xbf16> to vector<16x384xbf16>
    %c0_16 = arith.constant 0 : index
    %c0_17 = arith.constant 0 : index
    %c36 = arith.constant 36 : index
    %14 = vector.load %arg1[%c0_16, %c0_17, %c36] : memref<1x16x512xbf16, #tpu.memory_space<vmem>>, vector<1x16x384xbf16>
    %15 = vector.shape_cast %14 : vector<1x16x384xbf16> to vector<16x384xbf16>
    %c0_18 = arith.constant 0 : index
    %c0_19 = arith.constant 0 : index
    %c37 = arith.constant 37 : index
    %16 = vector.load %arg1[%c0_18, %c0_19, %c37] : memref<1x16x512xbf16, #tpu.memory_space<vmem>>, vector<1x16x384xbf16>
    %17 = vector.shape_cast %16 : vector<1x16x384xbf16> to vector<16x384xbf16>
    %c0_20 = arith.constant 0 : index
    %c0_21 = arith.constant 0 : index
    %c38 = arith.constant 38 : index
    %18 = vector.load %arg1[%c0_20, %c0_21, %c38] : memref<1x16x512xbf16, #tpu.memory_space<vmem>>, vector<1x16x384xbf16>
    %19 = vector.shape_cast %18 : vector<1x16x384xbf16> to vector<16x384xbf16>
    %20 = tpu.concatenate %3, %5, %7, %9, %11, %13, %15, %17, %19 in 0 : vector<16x384xbf16>, vector<16x384xbf16>, vector<16x384xbf16>, vector<16x384xbf16>, vector<16x384xbf16>, vector<16x384xbf16>, vector<16x384xbf16>, vector<16x384xbf16>, vector<16x384xbf16> -> vector<144x384xbf16>
    %cst = arith.constant dense<0.000000e+00> : vector<16x384xf32>
    %21 = tpu.matmul %0, %20, %cst {dimension_numbers = #tpu.dot_dimension_numbers<[1], [0], [0], [1], [0, 0, 1, 1], [], []>} : vector<16x144xbf16>, vector<144x384xbf16>, vector<16x384xf32> -> vector<16x384xf32>
    %22 = vector.broadcast %1 : vector<16x1xf32> to vector<16x384xf32>
    %23 = arith.addf %21, %22 : vector<16x384xf32>
    %c0_22 = arith.constant 0 : index
    %c0_23 = arith.constant 0 : index
    %c0_24 = arith.constant 0 : index
    %24 = vector.load %arg4[%c0_22, %c0_23, %c0_24] : memref<1x16x384xf32, #tpu.memory_space<vmem>>, vector<1x16x384xf32>
    %25 = vector.shape_cast %24 : vector<1x16x384xf32> to vector<16x384xf32>
    %26 = vector.shape_cast %23 : vector<16x384xf32> to vector<1x16x384xf32>
    tpu.vector_store %arg4[%c0_22, %c0_23, %c0_24], %26 {strides = array<i32>} : memref<1x16x384xf32, #tpu.memory_space<vmem>>, vector<1x16x384xf32>,
    return
  }
  func.func @transform_0(%arg0: i32) -> (i32, i32, i32) {
    %c0_i32 = arith.constant 0 : i32
    %c0_i32_0 = arith.constant 0 : i32
    %c0_i32_1 = arith.constant 0 : i32
    return %arg0, %c0_i32, %c0_i32_0 : i32, i32, i32
  }
  func.func @transform_1(%arg0: i32) -> (i32, i32) {
    %c0_i32 = arith.constant 0 : i32
    %c0_i32_0 = arith.constant 0 : i32
    %c0_i32_1 = arith.constant 0 : i32
    return %c0_i32, %c0_i32_0 : i32, i32
  }
  func.func @transform_2(%arg0: i32) -> (i32, i32) {
    %c0_i32 = arith.constant 0 : i32
    %c0_i32_0 = arith.constant 0 : i32
    %c0_i32_1 = arith.constant 0 : i32
    return %c0_i32, %c0_i32_0 : i32, i32
  }
  func.func @transform_3(%arg0: i32) -> (i32, i32, i32) {
    %c0_i32 = arith.constant 0 : i32
    %c0_i32_0 = arith.constant 0 : i32
    %c0_i32_1 = arith.constant 0 : i32
    return %arg0, %c0_i32, %c0_i32_0 : i32, i32, i32
  }
}

</mosaic_0001>

<bundles_post_ra>
// kernel: unet_forward.20
= control target key start
LH: loop header
LB: loop body
LE: loop exit
PB: predicated region body
PF: predicated region fallthrough
CT: control target
= control target key end

     0   :  { %s628_s12 = smov 0   ;;  %s719_s0 = inlined_call_operand.vmem [shape: bf16[2,16,512], index: 0, kind: input, shape index: {}]   ;;  %s720_s1 = inlined_call_operand.vmem [shape: bf16[16,144], index: 1, kind: input, shape index: {}]   ;;  %s721_s2 = inlined_call_operand.vmem [shape: f32[16,1], index: 2, kind: input, shape index: {}]   ;;  %s722_s3 = inlined_call_operand.vmem [shape: bf16[2,16,384], index: 3, kind: output, shape index: {}]  }
   0x1 LB: > { %s512_s13 = sadd.s32 4294967295, %s597_s12   ;;  %p516_p0 = scmp.ge.s32.totalorder %s597_s12, 1  ;;  %s597_s12 = sphi %s628_s12, %s13_s12  }
   0x2   : > { %p137_p1 = scmp.lt.s32.totalorder %s597_s12, 3 }
   0x4   : > { %p138_p2 = pnand %p516_p0, %p137_p1 }
   0x5   : > { %p161_p3 = scmp.lt.s32.totalorder (!%p138_p2), %s512_s13, 1  ;;  %s599_s18 = smov (!%p138_p2), 91  }
   0x6   : > { %141 = sbr.rel (%p138_p2) target bundleno = 365 (0x16d), region = 32  ;;  %s600_s19 = smov (!%p138_p2), 92  }
   0x7   : > { %s601_s20 = smov (!%p138_p2), 108   ;;  %s602_s21 = smov (!%p138_p2), 109  }
   0x8   : > { %s603_s22 = smov (!%p138_p2), 90   ;;  %s604_s23 = smov (!%p138_p2), 110  }
   0x9   : > { %s605_s24 = smov (!%p138_p2), 126   ;;  %s606_s25 = smov (!%p138_p2), 127  }
   0xb   : > { %s724_s13 = smov (!%p161_p3, %s512_s13), 1  ;;  %vm314_vm0 = vcmask 744448   ;;  %vm299_vm1 = vcmask 752640   ;;  %vm284_vm2 = vcmask 883712   ;;  %vm329_vm3 = vcmask 736256   ;;  %v175_v56 = vld [vmem:[%s721_s2 + $0x8] sm:$0xff] }
   0xc   : > { %s561_s14 = sshll.u32 %s724_s13, 5  ;;  %vm269_vm4 = vcmask 891904   ;;  %v562_v35 = vld [vmem:[%s720_s1 + $0x4] sm:$0xf]  ;;  %v552_v36 = vld [vmem:[%s720_s1 + $0x8] sm:$0xf0] }
   0xd   : > { %s642_s17 = scalar_lea.vmem %s719_s0, %s561_s14  ;;  %v668_v37 = vor.u32 %v562_v35, %v552_v36  ;;  %vm355_vm5 = vcmask 130048   ;;  %vm254_vm6 = vcmask 900096   ;;  %vm239_vm7 = vcmask 1031168   ;;  %v174_v57 = vld [vmem:[%s721_s2] sm:$0xff]  ;;  %s571_s11 = smul.u32 24, %s724_s13 }
   0xe   : > { %v534_v0 = vld [vmem:[%s642_s17] sm:$0xf]  ;;  %v569_v1 = vld [vmem:[%s642_s17 + $0xc] sm:$0xf0]  ;;  %v567_v2 = vld [vmem:[%s642_s17 + $0x4] sm:$0xf] }
   0xf   : > { %v535_v3 = vor.u32 %v569_v1, %v534_v0  ;;  %v536_v4 = vld [vmem:[%s642_s17 + $0x10] sm:$0xf0]  ;;  %v568_v6 = vld [vmem:[%s642_s17 + $0xc] sm:$0xf]  ;;  %v544_v7 = vld [vmem:[%s642_s17 + $0x18] sm:$0xf0]  ;;  %s170_s16 = scalar_lea.vmem %s722_s3, %s571_s11 }
  0x10   : > { %v539_v5 = vor.u32 %v567_v2, %v536_v4  ;;  %v542_v8 = vld [vmem:[%s642_s17 + $0x8] sm:$0xf]  ;;  %v570_v9 = vld [vmem:[%s642_s17 + $0x14] sm:$0xf0]  ;;  %v547_v10 = vor.u32 %v568_v6, %v544_v7  ;;  %v607_v58 = vmov 0   ;;  %vm224_vm8 = vcmask 1039360  }
  0x11   : > { %306 = vrot.lane.b32.xlu2 %v535_v3, %s599_s18  ;;  %v543_v11 = vor.u32 %v570_v9, %v542_v8  ;;  %590 = vset.pattern.permute.xlu0 %v607_v58  ;;  %v564_v60 = vld [vmem:[%s642_s17 + $0x4] sm:$0xf]  ;;  %v524_v61 = vld [vmem:[%s642_s17 + $0x10] sm:$0xf0]  ;;  %v563_v4 = vld [vmem:[%s720_s1 + $0x4] sm:$0xf0] }
  0x12   : > { %293 = vrot.lane.b32.xlu1 %v539_v5, %s600_s19  ;;  %308 = vrot.lane.b32.xlu0 %v539_v5, %s599_s18  ;;  %v527_v2 = vor.u32 %v564_v60, %v524_v61 }
  0x13   : > { %589 = vset.pattern.permute.xlu2 %v607_v58 }
  0x19   : > { %312 = vrot.lane.b32.xlu2 %v547_v10, %s599_s18 }
  0x1a   : > { %295 = vrot.lane.b32.xlu1 %v543_v11, %s600_s19  ;;  %310 = vrot.lane.b32.xlu0 %v543_v11, %s599_s18 }
  0x21   : > { %291 = vrot.lane.b32.xlu2 %v535_v3, %s600_s19 }
  0x22   : > { %280 = vrot.lane.b32.xlu1 %v543_v11, %s601_s20  ;;  %278 = vrot.lane.b32.xlu0 %v539_v5, %s601_s20 }
  0x29   : > { %265 = vrot.lane.b32.xlu2 %v543_v11, %s602_s21 }
  0x2a   : > { %263 = vrot.lane.b32.xlu1 %v539_v5, %s602_s21  ;;  %297 = vrot.lane.b32.xlu0 %v547_v10, %s600_s19 }
  0x31   : > { %323 = vrot.lane.b32.xlu2 %v539_v5, %s603_s22 }
  0x32   : > { %282 = vrot.lane.b32.xlu1 %v547_v10, %s601_s20  ;;  %276 = vrot.lane.b32.xlu0 %v535_v3, %s601_s20 }
  0x39   : > { %250 = vrot.lane.b32.xlu2 %v543_v11, %s604_s23 }
  0x3a   : > { %248 = vrot.lane.b32.xlu1 %v539_v5, %s604_s23  ;;  %325 = vrot.lane.b32.xlu0 %v543_v11, %s603_s22 }
  0x41   : > { %321 = vrot.lane.b32.xlu2 %v535_v3, %s603_s22 }
  0x42   : > { %267 = vrot.lane.b32.xlu1 %v547_v10, %s602_s21  ;;  %261 = vrot.lane.b32.xlu0 %v535_v3, %s602_s21 }
  0x49   : > { %246 = vrot.lane.b32.xlu2 %v535_v3, %s604_s23 }
  0x4a   : > { %235 = vrot.lane.b32.xlu1 %v543_v11, %s605_s24  ;;  %233 = vrot.lane.b32.xlu0 %v539_v5, %s605_s24 }
  0x51   : > { %220 = vrot.lane.b32.xlu2 %v543_v11, %s606_s25  ;;  %v522_v11 = vld [vmem:[%s642_s17] sm:$0xf] }
  0x52   : > { %218 = vrot.lane.b32.xlu1 %v539_v5, %s606_s25  ;;  %252 = vrot.lane.b32.xlu0 %v547_v10, %s604_s23 }
  0x59   : > { %216 = vrot.lane.b32.xlu2 %v535_v3, %s606_s25 }
  0x5a   : > { %237 = vrot.lane.b32.xlu1 %v547_v10, %s605_s24  ;;  %231 = vrot.lane.b32.xlu0 %v535_v3, %s605_s24  ;;  %v550_v3 = vld [vmem:[%s720_s1] sm:$0xf] }
  0x5b   : > { %v551_v5 = vor.u32 %v563_v4, %v550_v3 }
  0x61   : > { %338 = vperm.xlu2 %589, %v174_v57  }
  0x62   : > { %327 = vrot.lane.b32.xlu1 %v547_v10, %s603_s22  ;;  %222 = vrot.lane.b32.xlu0 %v547_v10, %s606_s25 }
  0x6a   : > { %343 = vperm.xlu0 %590, %v175_v56  }
  0x6b   : > { %v307_v12 = vpop.permute.xlu2 %306 }
  0x73   : > { %v313_v13 = vpop.permute.xlu2 %312 }
  0x7b   : > { %v292_v14 = vpop.permute.xlu2 %291 }
  0x83   : > { %v266_v15 = vpop.permute.xlu2 %265 }
  0x84   : > { %v294_v16 = vpop.permute.xlu1 %293  ;;  %v309_v17 = vpop.permute.xlu0 %308 }
  0x85   : > { %v315_v18 = vsel %vm314_vm0, %v307_v12, %v309_v17  ;;  %v300_v19 = vsel %vm299_vm1, %v292_v14, %v294_v16  ;;  %v565_v12 = vld [vmem:[%s642_s17 + $0xc] sm:$0xf0] }
  0x86   : > { %359 = vmatpush.bf16.msra.mxu0 %v315_v18  ;;  %v523_v14 = vor.u32 %v565_v12, %v522_v11  ;;  %v566_v18 = vld [vmem:[%s642_s17 + $0x14] sm:$0xf0] }
  0x8a   : > { %360 = vmatpush.bf16.msra.mxu0 %v300_v19 }
  0x8b   : > { %v324_v20 = vpop.permute.xlu2 %323 }
  0x8c   : > { %v296_v21 = vpop.permute.xlu1 %295  ;;  %v311_v22 = vpop.permute.xlu0 %310 }
  0x8d   : > { %v316_v23 = vsel %vm314_vm0, %v309_v17, %v311_v22  ;;  %v301_v24 = vsel %vm299_vm1, %v294_v16, %v296_v21  ;;  %v317_v34 = vsel %vm314_vm0, %v311_v22, %v313_v13  ;;  %v530_v17 = vld [vmem:[%s642_s17 + $0x8] sm:$0xf] }
  0x8e   : > { %387 = vmatpush.bf16.msra.mxu2 %v316_v23 }
  0x92   : > { %388 = vmatpush.bf16.msra.mxu2 %v301_v24 }
  0x93   : > { %v656_v25 = vpop.permute.xlu2 %250 }
  0x94   : > { %v281_v26 = vpop.permute.xlu1 %280  ;;  %v279_v27 = vpop.permute.xlu0 %278 }
  0x95   : > { %v286_v28 = vsel %vm284_vm2, %v279_v27, %v281_v26 }
  0x96   : > { %389 = vmatpush.bf16.msra.mxu2 %v286_v28 }
  0x9b   : > { %v322_v29 = vpop.permute.xlu2 %321 }
  0x9c   : > { %v264_v30 = vpop.permute.xlu1 %263  ;;  %v298_v31 = vpop.permute.xlu0 %297  ;;  %v330_v32 = vsel %vm329_vm3, %v322_v29, %v324_v20 }
  0x9d   : > { %380 = vmatpush.bf16.msra.mxu1 %v330_v32  ;;  %v271_v33 = vsel %vm269_vm4, %v264_v30, %v266_v15  ;;  %v302_v38 = vsel %vm299_vm1, %v296_v21, %v298_v31  ;;  %v531_v21 = vor.u32 %v566_v18, %v530_v17 }
  0x9e   : > { %390 = vmatpush.bf16.msra.mxu2 %v271_v33 }
  0xa0   : > { %556 = vmatmul.msk.bf16.vlgmr.msra.gmra.mxu1 %vm355_vm5, %v668_v37 }
  0xa1   : > { %415 = vmatpush.bf16.msrb.mxu1 %v317_v34 }
  0xa3   : > { %v247_v51 = vpop.permute.xlu2 %246 }
  0xa4   : > { %v283_v39 = vpop.permute.xlu1 %282  ;;  %v277_v40 = vpop.permute.xlu0 %276 }
  0xa5   : > { %416 = vmatpush.bf16.msrb.mxu1 %v302_v38  ;;  %v285_v41 = vsel %vm284_vm2, %v277_v40, %v279_v27  ;;  %v287_v42 = vsel %vm284_vm2, %v281_v26, %v283_v39 }
  0xa6   : > { %361 = vmatpush.bf16.msra.mxu0 %v285_v41 }
  0xa9   : > { %417 = vmatpush.bf16.msrb.mxu1 %v287_v42 }
  0xab   : > { %v221_v59 = vpop.permute.xlu2 %220 }
  0xac   : > { %v249_v43 = vpop.permute.xlu1 %248  ;;  %v326_v44 = vpop.permute.xlu0 %325 }
  0xad   : > { %v256_v45 = vsel %vm254_vm6, %v249_v43, %v656_v25  ;;  %v331_v46 = vsel %vm329_vm3, %v324_v20, %v326_v44  ;;  %v255_v52 = vsel %vm254_vm6, %v247_v51, %v249_v43 }
  0xae   : > { %391 = vmatpush.bf16.msra.mxu2 %v256_v45  ;;  %408 = vmatpush.bf16.msra.mxu3 %v331_v46 }
  0xb1   : > { %557 = vmatmul.msk.bf16.vlgmr.msra.gmra.mxu3 %vm355_vm5, %v668_v37 }
  0xb3   : > { %v217_v10 = vpop.permute.xlu2 %216 }
  0xb4   : > { %v268_v47 = vpop.permute.xlu1 %267  ;;  %v262_v48 = vpop.permute.xlu0 %261 }
  0xb5   : > { %v270_v49 = vsel %vm269_vm4, %v262_v48, %v264_v30  ;;  %v272_v50 = vsel %vm269_vm4, %v266_v15, %v268_v47 }
  0xb6   : > { %362 = vmatpush.bf16.msra.mxu0 %v270_v49  ;;  %418 = vmatpush.bf16.msrb.mxu1 %v272_v50 }
  0xba   : > { %363 = vmatpush.bf16.msra.mxu0 %v255_v52 }
  0xbc   : > { %v236_v53 = vpop.permute.xlu1 %235  ;;  %v234_v54 = vpop.permute.xlu0 %233 }
  0xbd   : > { %v241_v55 = vsel %vm239_vm7, %v234_v54, %v236_v53 }
  0xbe   : > { %392 = vmatpush.bf16.msra.mxu2 %v241_v55 }
  0xc4   : > { %v219_v62 = vpop.permute.xlu1 %218  ;;  %v253_v63 = vpop.permute.xlu0 %252 }
  0xc5   : > { %v226_v0 = vsel %vm224_vm8, %v219_v62, %v221_v59  ;;  %v257_v1 = vsel %vm254_vm6, %v656_v25, %v253_v63  ;;  %v225_v13 = vsel %vm224_vm8, %v217_v10, %v219_v62  ;;  %v339_v25 = vpop.permute.xlu2 %338 }
  0xc6   : > { %393 = vmatpush.bf16.msra.mxu2 %v226_v0  ;;  %419 = vmatpush.bf16.msrb.mxu1 %v257_v1 }
  0xca   : > { %394 = vmatpush.bf16.msra.mxu2 %v527_v2 }
  0xcc   : > { %v238_v6 = vpop.permute.xlu1 %237  ;;  %v232_v7 = vpop.permute.xlu0 %231 }
  0xcd   : > { %395 = vmatmul.bf16.vlgmr.msra.gmra.mxu2 %v551_v5  ;;  %v240_v8 = vsel %vm239_vm7, %v232_v7, %v234_v54  ;;  %v242_v9 = vsel %vm239_vm7, %v236_v53, %v238_v6 }
  0xce   : > { %364 = vmatpush.bf16.msra.mxu0 %v240_v8  ;;  %420 = vmatpush.bf16.msrb.mxu1 %v242_v9 }
  0xd2   : > { %365 = vmatpush.bf16.msra.mxu0 %v225_v13 }
  0xd4   : > { %v328_v15 = vpop.permute.xlu1 %327  ;;  %v223_v16 = vpop.permute.xlu0 %222 }
  0xd5   : > { %v332_v19 = vsel %vm329_vm3, %v326_v44, %v328_v15  ;;  %v227_v20 = vsel %vm224_vm8, %v221_v59, %v223_v16 }
  0xd6   : > { %366 = vmatpush.bf16.msra.mxu0 %v523_v14  ;;  %436 = vmatpush.bf16.msrb.mxu3 %v332_v19 }
  0xd7   : > { %421 = vmatpush.bf16.msrb.mxu1 %v227_v20 }
  0xd9   : > { %367 = vmatmul.bf16.vlgmr.msra.gmra.mxu0 %v551_v5  ;;  %558 = vmatmul.msk.bf16.vlgmr.msrb.gmra.mxu3 %vm355_vm5, %v668_v37 }
  0xdb   : > { %422 = vmatpush.bf16.msrb.mxu1 %v531_v21 }
  0xdc   : > { %v344_v32 = vpop.permute.xlu0 %343 }
  0xde   : > { %423 = vmatmul.bf16.vlgmr.msrb.gmra.mxu1 %v551_v5 }
 0x11d   : > { %v382_v22 = vpop.f32.mrf.mxu1 }
 0x125   : > { %v384_v27 = vpop.f32.mrf.mxu1 }
 0x134   : > { %v410_v23 = vpop.f32.mrf.mxu3 }
 0x13c   : > { %v412_v28 = vpop.f32.mrf.mxu3 }
 0x150   : > { %v396_v24 = vpop.f32.mrf.mxu2 }
 0x151   : > { %v397_v26 = vadd.f32 %v396_v24, %v339_v25 }
 0x153   : > { %v411_v30 = vadd.f32 %v410_v23, %v397_v26 }
 0x155   : > { %v444_v35 = vmax.f32 %v411_v30, 0.0 }
 0x156   : > { %v368_v29 = vpop.f32.mrf.mxu0 }
 0x157   : > { %v369_v31 = vadd.f32 %v368_v29, %v339_v25 }
 0x158   : > { %v398_v33 = vpop.f32.mrf.mxu2 }
 0x159   : > { %v383_v34 = vadd.f32 %v382_v22, %v369_v31  ;;  %v399_v38 = vadd.f32 %v398_v33, %v344_v32 }
 0x15b   : > { %v443_v36 = vmax.f32 %v383_v34, 0.0  ;;  %v424_v37 = vpop.f32.mrf.mxu1  ;;  %v413_v44 = vadd.f32 %v412_v28, %v399_v38 }
 0x15c   : > { %v425_v39 = vadd.f32 %v424_v37, %v339_v25  ;;  %v438_v40 = vpop.f32.mrf.mxu3 }
 0x15d   : > { %v449_v41 = vpack.c.bf16 %v444_v35, %v443_v36  ;;  %v447_v49 = vmax.f32 %v413_v44, 0.0 }
 0x15e   : > { %v370_v42 = vpop.f32.mrf.mxu0  ;;  %v439_v43 = vadd.f32 %v438_v40, %v425_v39 }
 0x15f   : > { %453 = vst [vmem:[%s170_s16] sm:$0xff] %v449_v41  ;;  %v371_v45 = vadd.f32 %v370_v42, %v344_v32 }
 0x160   : > { %v445_v46 = vmax.f32 %v439_v43, 0.0 }
 0x161   : > { %v385_v47 = vadd.f32 %v384_v27, %v371_v45 }
 0x162   : > { %v450_v48 = vpack.c.bf16 %v445_v46, %v445_v46 }
 0x163   : > { %v446_v50 = vmax.f32 %v385_v47, 0.0  ;;  %v426_v51 = vpop.f32.mrf.mxu1 }
 0x164   : > { %454 = vst [vmem:[%s170_s16 + $0x8] sm:$0xf] %v450_v48  ;;  %v427_v52 = vadd.f32 %v426_v51, %v344_v32  ;;  %v440_v53 = vpop.f32.mrf.mxu3 }
 0x165   : > { %v451_v54 = vpack.c.bf16 %v447_v49, %v446_v50 }
 0x166   : > { %v441_v55 = vadd.f32 %v440_v53, %v427_v52 }
 0x167   : > { %455 = vst [vmem:[%s170_s16 + $0xc] sm:$0xff] %v451_v54 }
 0x168   : > { %v448_v56 = vmax.f32 %v441_v55, 0.0 }
 0x16a   : > { %v452_v57 = vpack.c.bf16 %v448_v56, %v448_v56 }
 0x16c   : > { %456 = vst [vmem:[%s170_s16 + $0x14] sm:$0xf] %v452_v57 }
 0x16d PF: > { %s13_s12 = sadd.s32 1, %s597_s12  }
 0x16e   : > { %p10_p4 = scmp.ge.s32.totalorder %s13_s12, 4  }
 0x170   :  { %12 = sbr.rel (!%p10_p4) target bundleno = 1 (0x1), region = 62 }

// kernel: unet_forward.22
= control target key start
LH: loop header
LB: loop body
LE: loop exit
PB: predicated region body
PF: predicated region fallthrough
CT: control target
= control target key end

     0   :  { %s530_s12 = smov 0   ;;  %s600_s0 = inlined_call_operand.vmem [shape: bf16[2,16,256], index: 0, kind: input, shape index: {}]   ;;  %s601_s1 = inlined_call_operand.vmem [shape: bf16[32,144], index: 1, kind: input, shape index: {}]   ;;  %s602_s2 = inlined_call_operand.vmem [shape: f32[32,1], index: 2, kind: input, shape index: {}]   ;;  %s603_s3 = inlined_call_operand.vmem [shape: bf16[2,32,128], index: 3, kind: output, shape index: {}]  }
   0x1 LB: > { %s404_s13 = sadd.s32 4294967295, %s499_s12   ;;  %p408_p0 = scmp.ge.s32.totalorder %s499_s12, 1  ;;  %s499_s12 = sphi %s530_s12, %s13_s12  }
   0x2   : > { %p137_p1 = scmp.lt.s32.totalorder %s499_s12, 3 }
   0x4   : > { %p138_p2 = pnand %p408_p0, %p137_p1 }
   0x5   : > { %p161_p3 = scmp.lt.s32.totalorder (!%p138_p2), %s404_s13, 1  ;;  %s501_s18 = smov (!%p138_p2), 108  }
   0x6   : > { %141 = sbr.rel (%p138_p2) target bundleno = 329 (0x149), region = 32  ;;  %s502_s19 = smov (!%p138_p2), 107  }
   0x7   : > { %s503_s20 = smov (!%p138_p2), 116   ;;  %s504_s21 = smov (!%p138_p2), 117  }
   0x8   : > { %s505_s22 = smov (!%p138_p2), 118   ;;  %s506_s23 = smov (!%p138_p2), 126  }
   0x9   : > { %s507_s24 = smov (!%p138_p2), 106   ;;  %s508_s25 = smov (!%p138_p2), 127  }
   0xb   : > { %s605_s13 = smov (!%p161_p3, %s404_s13), 1  ;;  %vm244_vm0 = vcmask 875520   ;;  %vm237_vm1 = vcmask 883712   ;;  %vm230_vm2 = vcmask 949248   ;;  %vm223_vm3 = vcmask 957440   ;;  %v176_v19 = vld [vmem:[%s602_s2] sm:$0xff] }
   0xc   : > { %s445_s14 = sshll.u32 %s605_s13, 4  ;;  %v178_v20 = vld [vmem:[%s602_s2 + $0x10] sm:$0xff]  ;;  %vm216_vm4 = vcmask 965632   ;;  %v509_v22 = vmov 0   ;;  %vm209_vm5 = vcmask 1031168   ;;  %v177_v25 = vld [vmem:[%s602_s2 + $0x8] sm:$0xff] }
   0xd   : > { %s546_s17 = scalar_lea.vmem %s600_s0, %s445_s14  ;;  %490 = vset.pattern.permute.xlu1 %v509_v22  ;;  %492 = vset.pattern.permute.xlu0 %v509_v22  ;;  %v179_v28 = vld [vmem:[%s602_s2 + $0x18] sm:$0xff]  ;;  %vm251_vm6 = vcmask 867328   ;;  %v447_v29 = vld [vmem:[%s601_s1 + $0x4] sm:$0xf]  ;;  %v429_v30 = vld [vmem:[%s601_s1 + $0x8] sm:$0xf0]  ;;  %s170_s28 = scalar_lea.vmem %s603_s3, %s445_s14 }
   0xe   : > { %v419_v0 = vld [vmem:[%s546_s17] sm:$0xf]  ;;  %v453_v1 = vld [vmem:[%s546_s17 + $0x4] sm:$0xf0]  ;;  %v452_v3 = vld [vmem:[%s546_s17 + $0x4] sm:$0xf]  ;;  %491 = vset.pattern.permute.xlu2 %v509_v22  ;;  %v432_v34 = vor.u32 %v447_v29, %v429_v30 }
   0xf   : > { %v420_v2 = vor.u32 %v453_v1, %v419_v0  ;;  %v421_v4 = vld [vmem:[%s546_s17 + $0x8] sm:$0xf0]  ;;  %vm292_vm7 = vcmask 130048   ;;  %vm202_vm8 = vcmask 1039360   ;;  %v415_v36 = vld [vmem:[%s546_s17] sm:$0xf] }
  0x10   : > { %v424_v5 = vor.u32 %v452_v3, %v421_v4  ;;  %v451_v37 = vld [vmem:[%s546_s17 + $0x4] sm:$0xf0]  ;;  %v427_v40 = vld [vmem:[%s601_s1] sm:$0xf]  ;;  %v435_v43 = vld [vmem:[%s601_s1 + $0x10] sm:$0xf] }
  0x11   : > { %233 = vrot.lane.b32.xlu1 %v420_v2, %s501_s18  ;;  %240 = vrot.lane.b32.xlu0 %v420_v2, %s502_s19  ;;  %v416_v41 = vor.u32 %v451_v37, %v415_v36  ;;  %v448_v42 = vld [vmem:[%s601_s1 + $0x4] sm:$0xf0]  ;;  %v450_v44 = vld [vmem:[%s601_s1 + $0x14] sm:$0xf0] }
  0x12   : > { %226 = vrot.lane.b32.xlu2 %v420_v2, %s503_s20  ;;  %v428_v45 = vor.u32 %v448_v42, %v427_v40  ;;  %v436_v46 = vor.u32 %v450_v44, %v435_v43  ;;  %v449_v47 = vld [vmem:[%s601_s1 + $0x14] sm:$0xf]  ;;  %v437_v48 = vld [vmem:[%s601_s1 + $0x18] sm:$0xf0] }
  0x13   : > { %v440_v49 = vor.u32 %v449_v47, %v437_v48 }
  0x19   : > { %235 = vrot.lane.b32.xlu1 %v424_v5, %s501_s18  ;;  %242 = vrot.lane.b32.xlu0 %v424_v5, %s502_s19 }
  0x1a   : > { %228 = vrot.lane.b32.xlu2 %v424_v5, %s503_s20 }
  0x21   : > { %221 = vrot.lane.b32.xlu1 %v424_v5, %s504_s21  ;;  %219 = vrot.lane.b32.xlu0 %v420_v2, %s504_s21 }
  0x22   : > { %212 = vrot.lane.b32.xlu2 %v420_v2, %s505_s22 }
  0x29   : > { %205 = vrot.lane.b32.xlu1 %v420_v2, %s506_s23  ;;  %214 = vrot.lane.b32.xlu0 %v424_v5, %s505_s22 }
  0x2a   : > { %207 = vrot.lane.b32.xlu2 %v424_v5, %s506_s23 }
  0x31   : > { %249 = vrot.lane.b32.xlu1 %v424_v5, %s507_s24  ;;  %247 = vrot.lane.b32.xlu0 %v420_v2, %s507_s24 }
  0x32   : > { %198 = vrot.lane.b32.xlu2 %v420_v2, %s508_s25 }
  0x39   : > { %200 = vrot.lane.b32.xlu0 %v424_v5, %s508_s25  ;;  %256 = vperm.xlu1 %490, %v176_v19  }
  0x3a   : > { %261 = vperm.xlu2 %491, %v177_v25  }
  0x41   : > { %266 = vperm.xlu0 %492, %v178_v20   ;;  %271 = vperm.xlu1 %490, %v179_v28  }
  0x6c   : > { %v227_v6 = vpop.permute.xlu2 %226 }
  0x74   : > { %v229_v9 = vpop.permute.xlu2 %228 }
  0x75   : > { %v231_v17 = vsel %vm230_vm2, %v227_v6, %v229_v9 }
  0x7c   : > { %v213_v14 = vpop.permute.xlu2 %212 }
  0x83   : > { %v234_v7 = vpop.permute.xlu1 %233  ;;  %v241_v8 = vpop.permute.xlu0 %240 }
  0x84   : > { %v208_v21 = vpop.permute.xlu2 %207 }
  0x8b   : > { %v236_v10 = vpop.permute.xlu1 %235  ;;  %v243_v11 = vpop.permute.xlu0 %242 }
  0x8c   : > { %v245_v12 = vsel %vm244_vm0, %v241_v8, %v243_v11  ;;  %v238_v13 = vsel %vm237_vm1, %v234_v7, %v236_v10  ;;  %v199_v35 = vpop.permute.xlu2 %198 }
  0x8d   : > { %299 = vmatpush.bf16.msra.mxu0 %v245_v12  ;;  %465 = vmatpush.bf16.msra.mxu2 %v245_v12 }
  0x91   : > { %300 = vmatpush.bf16.msra.mxu0 %v238_v13  ;;  %466 = vmatpush.bf16.msra.mxu2 %v238_v13 }
  0x93   : > { %v222_v15 = vpop.permute.xlu1 %221  ;;  %v220_v16 = vpop.permute.xlu0 %219 }
  0x94   : > { %v224_v18 = vsel %vm223_vm3, %v220_v16, %v222_v15  ;;  %v262_v55 = vpop.permute.xlu2 %261 }
  0x95   : > { %301 = vmatpush.bf16.msra.mxu0 %v231_v17  ;;  %467 = vmatpush.bf16.msra.mxu2 %v231_v17 }
  0x99   : > { %302 = vmatpush.bf16.msra.mxu0 %v224_v18  ;;  %468 = vmatpush.bf16.msra.mxu2 %v224_v18 }
  0x9b   : > { %v206_v23 = vpop.permute.xlu1 %205  ;;  %v215_v24 = vpop.permute.xlu0 %214 }
  0x9c   : > { %v217_v26 = vsel %vm216_vm4, %v213_v14, %v215_v24  ;;  %v210_v27 = vsel %vm209_vm5, %v206_v23, %v208_v21 }
  0x9d   : > { %303 = vmatpush.bf16.msra.mxu0 %v217_v26  ;;  %469 = vmatpush.bf16.msra.mxu2 %v217_v26 }
  0xa1   : > { %304 = vmatpush.bf16.msra.mxu0 %v210_v27  ;;  %470 = vmatpush.bf16.msra.mxu2 %v210_v27 }
  0xa3   : > { %v250_v31 = vpop.permute.xlu1 %249  ;;  %v248_v32 = vpop.permute.xlu0 %247 }
  0xa4   : > { %v252_v33 = vsel %vm251_vm6, %v248_v32, %v250_v31 }
  0xa5   : > { %325 = vmatpush.bf16.msra.mxu1 %v252_v33 }
  0xa8   : > { %441 = vmatmul.msk.bf16.vlgmr.msra.gmra.mxu1 %vm292_vm7, %v432_v34 }
  0xab   : > { %v201_v38 = vpop.permute.xlu0 %200  ;;  %v257_v53 = vpop.permute.xlu1 %256 }
  0xac   : > { %v203_v39 = vsel %vm202_vm8, %v199_v35, %v201_v38 }
  0xad   : > { %305 = vmatpush.bf16.msra.mxu0 %v203_v39  ;;  %471 = vmatpush.bf16.msra.mxu2 %v203_v39 }
  0xb1   : > { %306 = vmatpush.bf16.msra.mxu0 %v416_v41  ;;  %472 = vmatpush.bf16.msra.mxu2 %v416_v41 }
  0xb3   : > { %v267_v58 = vpop.permute.xlu0 %266  ;;  %v272_v2 = vpop.permute.xlu1 %271 }
  0xb4   : > { %307 = vmatmul.bf16.vlgmr.msra.gmra.mxu0 %v428_v45  ;;  %312 = vmatmul.bf16.vlgmr.msra.gmra.mxu2 %v436_v46 }
  0xb8   : > { %442 = vmatmul.msk.bf16.gmra.mxu1 %vm292_vm7, %v440_v49 }
 0x125   : > { %v327_v50 = vpop.f32.mrf.mxu1 }
 0x12d   : > { %v329_v51 = vpop.f32.mrf.mxu1 }
 0x131   : > { %v308_v52 = vpop.f32.mrf.mxu0 }
 0x132   : > { %v309_v54 = vadd.f32 %v308_v52, %v257_v53 }
 0x134   : > { %v328_v60 = vadd.f32 %v327_v50, %v309_v54 }
 0x135   : > { %v332_v56 = vpop.f32.mrf.mxu1 }
 0x136   : > { %v337_v0 = vmax.f32 %v328_v60, 0.0 }
 0x137   : > { %v313_v57 = vpop.f32.mrf.mxu2 }
 0x138   : > { %v314_v62 = vadd.f32 %v313_v57, %v267_v58 }
 0x139   : > { %v310_v59 = vpop.f32.mrf.mxu0 }
 0x13a   : > { %v311_v61 = vadd.f32 %v310_v59, %v262_v55  ;;  %v333_v4 = vadd.f32 %v332_v56, %v314_v62 }
 0x13c   : > { %v330_v63 = vadd.f32 %v329_v51, %v311_v61  ;;  %v339_v9 = vmax.f32 %v333_v4, 0.0 }
 0x13d   : > { %v334_v7 = vpop.f32.mrf.mxu1 }
 0x13e   : > { %v338_v1 = vmax.f32 %v330_v63, 0.0 }
 0x13f   : > { %v315_v3 = vpop.f32.mrf.mxu2 }
 0x140   : > { %v457_v5 = vpack.c.bf16 %v338_v1, %v337_v0  ;;  %v316_v6 = vadd.f32 %v315_v3, %v272_v2 }
 0x142   : > { %458 = vst [vmem:[%s170_s28] sm:$0xff] %v457_v5   ;;  %v335_v8 = vadd.f32 %v334_v7, %v316_v6 }
 0x144   : > { %v340_v10 = vmax.f32 %v335_v8, 0.0 }
 0x146   : > { %v462_v11 = vpack.c.bf16 %v340_v10, %v339_v9 }
 0x148   : > { %464 = vst [vmem:[%s170_s28 + $0x8] sm:$0xff] %v462_v11  }
 0x149 PF: > { %s13_s12 = sadd.s32 1, %s499_s12  }
 0x14a   : > { %p10_p4 = scmp.ge.s32.totalorder %s13_s12, 4  }
 0x14c   :  { %12 = sbr.rel (!%p10_p4) target bundleno = 1 (0x1), region = 62 }

// kernel: unet_forward.23
= control target key start
LH: loop header
LB: loop body
LE: loop exit
PB: predicated region body
PF: predicated region fallthrough
CT: control target
= control target key end

     0   :  { %s656_s12 = smov 0   ;;  %s749_s0 = inlined_call_operand.vmem [shape: bf16[2,32,256], index: 0, kind: input, shape index: {}]   ;;  %s750_s1 = inlined_call_operand.vmem [shape: bf16[32,288], index: 1, kind: input, shape index: {}]   ;;  %s751_s2 = inlined_call_operand.vmem [shape: f32[32,1], index: 2, kind: input, shape index: {}]   ;;  %s752_s3 = inlined_call_operand.vmem [shape: bf16[2,32,128], index: 3, kind: output, shape index: {}]  }
   0x1 LB: > { %s505_s13 = sadd.s32 4294967295, %s625_s12   ;;  %p509_p0 = scmp.ge.s32.totalorder %s625_s12, 1  ;;  %s625_s12 = sphi %s656_s12, %s13_s12  }
   0x2   : > { %p137_p1 = scmp.lt.s32.totalorder %s625_s12, 3 }
   0x4   : > { %p138_p2 = pnand %p509_p0, %p137_p1 }
   0x5   : > { %p161_p3 = scmp.lt.s32.totalorder (!%p138_p2), %s505_s13, 1  ;;  %s627_s18 = smov (!%p138_p2), 107  }
   0x6   : > { %141 = sbr.rel (%p138_p2) target bundleno = 377 (0x179), region = 32  ;;  %s628_s19 = smov (!%p138_p2), 118  }
   0x7   : > { %s629_s20 = smov (!%p138_p2), 108   ;;  %s630_s21 = smov (!%p138_p2), 126  }
   0x8   : > { %s631_s22 = smov (!%p138_p2), 116   ;;  %s632_s23 = smov (!%p138_p2), 106  }
   0x9   : > { %s633_s24 = smov (!%p138_p2), 127   ;;  %s634_s25 = smov (!%p138_p2), 117  }
   0xb   : > { %s754_s13 = smov (!%p161_p3, %s505_s13), 1  ;;  %vm254_vm0 = vcmask 965632   ;;  %vm306_vm1 = vcmask 875520   ;;  %vm293_vm2 = vcmask 883712   ;;  %vm241_vm3 = vcmask 1031168   ;;  %v181_v55 = vld [vmem:[%s751_s2 + $0x8] sm:$0xff] }
   0xc   : > { %s566_s14 = sshll.u32 %s754_s13, 5  ;;  %vm280_vm4 = vcmask 949248   ;;  %vm319_vm5 = vcmask 867328   ;;  %vm228_vm6 = vcmask 1039360   ;;  %vm267_vm7 = vcmask 957440   ;;  %v182_v56 = vld [vmem:[%s751_s2 + $0x10] sm:$0xff] }
   0xd   : > { %s670_s17 = scalar_lea.vmem %s749_s0, %s566_s14  ;;  %v548_v52 = vld [vmem:[%s750_s1 + $0x8] sm:$0xf]  ;;  %v570_v53 = vld [vmem:[%s750_s1 + $0x10] sm:$0xf0]  ;;  %v635_v60 = vmov 0   ;;  %vm374_vm8 = vcmask 261120  }
   0xe   : > { %v532_v0 = vld [vmem:[%s670_s17 + $0x10] sm:$0xf]  ;;  %v579_v1 = vld [vmem:[%s670_s17 + $0x14] sm:$0xf0]  ;;  %v524_v2 = vld [vmem:[%s670_s17] sm:$0xf]  ;;  %617 = vset.pattern.permute.xlu0 %v635_v60  ;;  %618 = vset.pattern.permute.xlu1 %v635_v60  ;;  %v549_v63 = vor.u32 %v570_v53, %v548_v52 }
   0xf   : > { %v533_v3 = vor.u32 %v579_v1, %v532_v0  ;;  %v577_v4 = vld [vmem:[%s670_s17 + $0x4] sm:$0xf0]  ;;  %v578_v6 = vld [vmem:[%s670_s17 + $0x14] sm:$0xf]  ;;  %v534_v7 = vld [vmem:[%s670_s17 + $0x18] sm:$0xf0]  ;;  %616 = vset.pattern.permute.xlu2 %v635_v60 }
  0x10   : > { %v525_v5 = vor.u32 %v577_v4, %v524_v2  ;;  %v576_v8 = vld [vmem:[%s670_s17 + $0x4] sm:$0xf]  ;;  %v526_v9 = vld [vmem:[%s670_s17 + $0x8] sm:$0xf0]  ;;  %v537_v10 = vor.u32 %v578_v6, %v534_v7  ;;  %v520_v58 = vld [vmem:[%s670_s17 + $0x10] sm:$0xf] }
  0x11   : > { %302 = vrot.lane.b32.xlu0 %v533_v3, %s627_s18  ;;  %250 = vrot.lane.b32.xlu2 %v533_v3, %s628_s19  ;;  %v529_v11 = vor.u32 %v576_v8, %v526_v9  ;;  %v575_v59 = vld [vmem:[%s670_s17 + $0x14] sm:$0xf0]  ;;  %v180_v0 = vld [vmem:[%s751_s2] sm:$0xff]  ;;  %s567_s6 = sshll.u32 %s754_s13, 4 }
  0x12   : > { %298 = vrot.lane.b32.xlu1 %v525_v5, %s627_s18  ;;  %v521_v2 = vor.u32 %v575_v59, %v520_v58  ;;  %v574_v4 = vld [vmem:[%s670_s17 + $0x4] sm:$0xf0]  ;;  %v569_v7 = vld [vmem:[%s750_s1 + $0x8] sm:$0xf0]  ;;  %v552_v8 = vld [vmem:[%s750_s1 + $0x18] sm:$0xf]  ;;  %s170_s9 = scalar_lea.vmem %s752_s3, %s567_s6 }
  0x13   : > { %v572_v9 = vld [vmem:[%s750_s1 + $0x20] sm:$0xf0] }
  0x19   : > { %304 = vrot.lane.b32.xlu0 %v537_v10, %s627_s18  ;;  %252 = vrot.lane.b32.xlu2 %v537_v10, %s628_s19 }
  0x1a   : > { %300 = vrot.lane.b32.xlu1 %v529_v11, %s627_s18 }
  0x21   : > { %289 = vrot.lane.b32.xlu0 %v533_v3, %s629_s20  ;;  %246 = vrot.lane.b32.xlu2 %v525_v5, %s628_s19 }
  0x22   : > { %291 = vrot.lane.b32.xlu1 %v537_v10, %s629_s20 }
  0x29   : > { %248 = vrot.lane.b32.xlu0 %v529_v11, %s628_s19  ;;  %287 = vrot.lane.b32.xlu2 %v529_v11, %s629_s20 }
  0x2a   : > { %285 = vrot.lane.b32.xlu1 %v525_v5, %s629_s20 }
  0x31   : > { %237 = vrot.lane.b32.xlu0 %v533_v3, %s630_s21  ;;  %276 = vrot.lane.b32.xlu2 %v533_v3, %s631_s22 }
  0x32   : > { %239 = vrot.lane.b32.xlu1 %v537_v10, %s630_s21 }
  0x39   : > { %278 = vrot.lane.b32.xlu0 %v537_v10, %s631_s22  ;;  %235 = vrot.lane.b32.xlu2 %v529_v11, %s630_s21 }
  0x3a   : > { %233 = vrot.lane.b32.xlu1 %v525_v5, %s630_s21 }
  0x41   : > { %272 = vrot.lane.b32.xlu0 %v525_v5, %s631_s22  ;;  %315 = vrot.lane.b32.xlu2 %v533_v3, %s632_s23 }
  0x42   : > { %274 = vrot.lane.b32.xlu1 %v529_v11, %s631_s22 }
  0x49   : > { %317 = vrot.lane.b32.xlu0 %v537_v10, %s632_s23  ;;  %226 = vrot.lane.b32.xlu2 %v537_v10, %s633_s24 }
  0x4a   : > { %224 = vrot.lane.b32.xlu1 %v533_v3, %s633_s24 }
  0x51   : > { %263 = vrot.lane.b32.xlu0 %v533_v3, %s634_s25  ;;  %311 = vrot.lane.b32.xlu2 %v525_v5, %s632_s23  ;;  %v516_v3 = vld [vmem:[%s670_s17] sm:$0xf] }
  0x52   : > { %265 = vrot.lane.b32.xlu1 %v537_v10, %s634_s25  ;;  %v517_v6 = vor.u32 %v574_v4, %v516_v3 }
  0x59   : > { %313 = vrot.lane.b32.xlu0 %v529_v11, %s632_s23  ;;  %222 = vrot.lane.b32.xlu2 %v529_v11, %s633_s24 }
  0x5a   : > { %220 = vrot.lane.b32.xlu1 %v525_v5, %s633_s24 }
  0x61   : > { %259 = vrot.lane.b32.xlu0 %v525_v5, %s634_s25  ;;  %326 = vperm.xlu2 %616, %v180_v0   ;;  %v540_v5 = vld [vmem:[%s750_s1] sm:$0xf] }
  0x62   : > { %261 = vrot.lane.b32.xlu1 %v529_v11, %s634_s25  ;;  %v568_v11 = vld [vmem:[%s750_s1 + $0x4] sm:$0xf] }
  0x69   : > { %331 = vperm.xlu0 %617, %v181_v55  }
  0x6a   : > { %336 = vperm.xlu1 %618, %v182_v56  }
  0x6b   : > { %v251_v12 = vpop.permute.xlu2 %250 }
  0x73   : > { %v253_v13 = vpop.permute.xlu2 %252 }
  0x74   : > { %v256_v14 = vsel %vm254_vm0, %v251_v12, %v253_v13  ;;  %v542_v12 = vld [vmem:[%s750_s1 + $0xc] sm:$0xf0] }
  0x75   : > { %381 = vmatpush.bf16.msra.mxu0 %v256_v14  ;;  %591 = vmatpush.bf16.msra.mxu3 %v256_v14  ;;  %v183_v14 = vld [vmem:[%s751_s2 + $0x18] sm:$0xff] }
  0x76   : > { %341 = vperm.xlu2 %616, %v183_v14  }
  0x7b   : > { %v247_v17 = vpop.permute.xlu2 %246 }
  0x83   : > { %v303_v15 = vpop.permute.xlu0 %302  ;;  %v288_v21 = vpop.permute.xlu2 %287 }
  0x84   : > { %v299_v16 = vpop.permute.xlu1 %298 }
  0x8b   : > { %v305_v18 = vpop.permute.xlu0 %304  ;;  %v277_v26 = vpop.permute.xlu2 %276 }
  0x8c   : > { %v301_v19 = vpop.permute.xlu1 %300  ;;  %v308_v20 = vsel %vm306_vm1, %v303_v15, %v305_v18  ;;  %v545_v18 = vor.u32 %v568_v11, %v542_v12 }
  0x8d   : > { %400 = vmatpush.bf16.msra.mxu1 %v308_v20  ;;  %v307_v22 = vsel %vm306_vm1, %v299_v16, %v301_v19  ;;  %v541_v16 = vor.u32 %v569_v7, %v540_v5  ;;  %v560_v19 = vld [vmem:[%s750_s1 + $0x20] sm:$0xf]  ;;  %v573_v20 = vld [vmem:[%s750_s1 + $0x28] sm:$0xf0] }
  0x91   : > { %401 = vmatpush.bf16.msra.mxu1 %v307_v22  ;;  %v571_v22 = vld [vmem:[%s750_s1 + $0x1c] sm:$0xf] }
  0x93   : > { %v290_v23 = vpop.permute.xlu0 %289  ;;  %v236_v31 = vpop.permute.xlu2 %235 }
  0x94   : > { %v292_v24 = vpop.permute.xlu1 %291 }
  0x95   : > { %v295_v25 = vsel %vm293_vm2, %v290_v23, %v292_v24  ;;  %v554_v23 = vld [vmem:[%s750_s1 + $0x24] sm:$0xf0] }
  0x96   : > { %402 = vmatpush.bf16.msra.mxu1 %v295_v25  ;;  %v557_v24 = vor.u32 %v571_v22, %v554_v23 }
  0x9b   : > { %v249_v27 = vpop.permute.xlu0 %248  ;;  %v316_v38 = vpop.permute.xlu2 %315 }
  0x9c   : > { %v286_v28 = vpop.permute.xlu1 %285  ;;  %v255_v29 = vsel %vm254_vm0, %v247_v17, %v249_v27  ;;  %v553_v17 = vor.u32 %v572_v9, %v552_v8 }
  0x9d   : > { %382 = vmatpush.bf16.msra.mxu0 %v255_v29  ;;  %592 = vmatpush.bf16.msra.mxu3 %v255_v29  ;;  %v294_v30 = vsel %vm293_vm2, %v286_v28, %v288_v21  ;;  %v561_v21 = vor.u32 %v573_v20, %v560_v19 }
  0x9e   : > { %403 = vmatpush.bf16.msra.mxu1 %v294_v30 }
  0xa3   : > { %v238_v32 = vpop.permute.xlu0 %237  ;;  %v227_v43 = vpop.permute.xlu2 %226 }
  0xa4   : > { %v240_v33 = vpop.permute.xlu1 %239 }
  0xa5   : > { %v243_v34 = vsel %vm241_vm3, %v238_v32, %v240_v33 }
  0xa6   : > { %383 = vmatpush.bf16.msra.mxu0 %v243_v34  ;;  %593 = vmatpush.bf16.msra.mxu3 %v243_v34 }
  0xab   : > { %v279_v35 = vpop.permute.xlu0 %278  ;;  %v312_v48 = vpop.permute.xlu2 %311 }
  0xac   : > { %v234_v36 = vpop.permute.xlu1 %233  ;;  %v282_v37 = vsel %vm280_vm4, %v277_v26, %v279_v35 }
  0xad   : > { %v242_v39 = vsel %vm241_vm3, %v234_v36, %v236_v31  ;;  %404 = vmatpush.bf16.msra.mxu1 %v282_v37 }
  0xae   : > { %384 = vmatpush.bf16.msra.mxu0 %v242_v39  ;;  %594 = vmatpush.bf16.msra.mxu3 %v242_v39 }
  0xb3   : > { %v273_v40 = vpop.permute.xlu0 %272  ;;  %v223_v54 = vpop.permute.xlu2 %222 }
  0xb4   : > { %v275_v41 = vpop.permute.xlu1 %274 }
  0xb5   : > { %v281_v42 = vsel %vm280_vm4, %v273_v40, %v275_v41 }
  0xb6   : > { %405 = vmatpush.bf16.msra.mxu1 %v281_v42 }
  0xbb   : > { %v318_v44 = vpop.permute.xlu0 %317  ;;  %v327_v26 = vpop.permute.xlu2 %326 }
  0xbc   : > { %v225_v45 = vpop.permute.xlu1 %224  ;;  %v321_v46 = vsel %vm319_vm5, %v316_v38, %v318_v44 }
  0xbd   : > { %v230_v47 = vsel %vm228_vm6, %v225_v45, %v227_v43  ;;  %425 = vmatpush.bf16.msra.mxu2 %v321_v46 }
  0xbe   : > { %385 = vmatpush.bf16.msra.mxu0 %v230_v47  ;;  %595 = vmatpush.bf16.msra.mxu3 %v230_v47 }
  0xc3   : > { %v264_v49 = vpop.permute.xlu0 %263 }
  0xc4   : > { %v266_v50 = vpop.permute.xlu1 %265 }
  0xc5   : > { %v269_v51 = vsel %vm267_vm7, %v264_v49, %v266_v50 }
  0xc6   : > { %406 = vmatpush.bf16.msra.mxu1 %v269_v51 }
  0xcb   : > { %v314_v57 = vpop.permute.xlu0 %313 }
  0xcc   : > { %v221_v61 = vpop.permute.xlu1 %220  ;;  %v320_v62 = vsel %vm319_vm5, %v312_v48, %v314_v57 }
  0xcd   : > { %v229_v1 = vsel %vm228_vm6, %v221_v61, %v223_v54  ;;  %426 = vmatpush.bf16.msra.mxu2 %v320_v62 }
  0xce   : > { %386 = vmatpush.bf16.msra.mxu0 %v229_v1  ;;  %596 = vmatpush.bf16.msra.mxu3 %v229_v1 }
  0xd0   : > { %562 = vmatmul.msk.bf16.vlgmr.msra.gmra.mxu2 %vm374_vm8, %v549_v63  ;;  %v342_v47 = vpop.permute.xlu2 %341 }
  0xd2   : > { %387 = vmatpush.bf16.msra.mxu0 %v521_v2  ;;  %597 = vmatpush.bf16.msra.mxu3 %v521_v2 }
  0xd3   : > { %v260_v10 = vpop.permute.xlu0 %259 }
  0xd4   : > { %v262_v13 = vpop.permute.xlu1 %261 }
  0xd5   : > { %v268_v15 = vsel %vm267_vm7, %v260_v10, %v262_v13 }
  0xd6   : > { %388 = vmatpush.bf16.msra.mxu0 %v517_v6  ;;  %598 = vmatpush.bf16.msra.mxu3 %v517_v6 }
  0xd7   : > { %407 = vmatpush.bf16.msra.mxu1 %v268_v15 }
  0xd9   : > { %389 = vmatmul.bf16.vlgmr.msra.gmra.mxu0 %v541_v16  ;;  %394 = vmatmul.bf16.vlgmr.msra.gmra.mxu3 %v553_v17 }
  0xda   : > { %408 = vmatmul.bf16.vlgmr.msra.gmra.mxu1 %v545_v18 }
  0xdb   : > { %v332_v30 = vpop.permute.xlu0 %331 }
  0xdc   : > { %v337_v42 = vpop.permute.xlu1 %336 }
  0xe0   : > { %563 = vmatmul.msk.bf16.gmra.mxu2 %vm374_vm8, %v561_v21 }
  0xea   : > { %413 = vmatmul.bf16.gmra.mxu1 %v557_v24 }
 0x153   : > { %v428_v25 = vpop.f32.mrf.mxu2 }
 0x156   : > { %v390_v27 = vpop.f32.mrf.mxu0 }
 0x157   : > { %v409_v28 = vpop.f32.mrf.mxu1  ;;  %v391_v29 = vadd.f32 %v390_v27, %v327_v26 }
 0x159   : > { %v410_v31 = vadd.f32 %v409_v28, %v391_v29 }
 0x15b   : > { %v430_v32 = vpop.f32.mrf.mxu2  ;;  %v429_v36 = vadd.f32 %v428_v25, %v410_v31 }
 0x15c   : > { %v395_v37 = vpop.f32.mrf.mxu3 }
 0x15d   : > { %v438_v40 = vmax.f32 %v429_v36, 0.0  ;;  %v396_v46 = vadd.f32 %v395_v37, %v337_v42 }
 0x15e   : > { %v392_v33 = vpop.f32.mrf.mxu0 }
 0x15f   : > { %v393_v34 = vadd.f32 %v392_v33, %v332_v30  ;;  %v411_v35 = vpop.f32.mrf.mxu1 }
 0x161   : > { %v412_v38 = vadd.f32 %v411_v35, %v393_v34 }
 0x163   : > { %v431_v39 = vadd.f32 %v430_v32, %v412_v38  ;;  %v433_v44 = vpop.f32.mrf.mxu2 }
 0x164   : > { %v397_v48 = vpop.f32.mrf.mxu3 }
 0x165   : > { %v439_v41 = vmax.f32 %v431_v39, 0.0  ;;  %v398_v50 = vadd.f32 %v397_v48, %v342_v47 }
 0x167   : > { %v583_v43 = vpack.c.bf16 %v439_v41, %v438_v40  ;;  %v414_v45 = vpop.f32.mrf.mxu1 }
 0x168   : > { %v415_v49 = vadd.f32 %v414_v45, %v396_v46 }
 0x169   : > { %584 = vst [vmem:[%s170_s9] sm:$0xff] %v583_v43  }
 0x16a   : > { %v434_v52 = vadd.f32 %v433_v44, %v415_v49 }
 0x16b   : > { %v435_v54 = vpop.f32.mrf.mxu2 }
 0x16c   : > { %v440_v56 = vmax.f32 %v434_v52, 0.0 }
 0x16f   : > { %v416_v51 = vpop.f32.mrf.mxu1 }
 0x170   : > { %v417_v53 = vadd.f32 %v416_v51, %v398_v50 }
 0x172   : > { %v436_v55 = vadd.f32 %v435_v54, %v417_v53 }
 0x174   : > { %v441_v57 = vmax.f32 %v436_v55, 0.0 }
 0x176   : > { %v588_v58 = vpack.c.bf16 %v441_v57, %v440_v56 }
 0x178   : > { %590 = vst [vmem:[%s170_s9 + $0x8] sm:$0xff] %v588_v58  }
 0x179 PF: > { %s13_s12 = sadd.s32 1, %s625_s12  }
 0x17a   : > { %p10_p4 = scmp.ge.s32.totalorder %s13_s12, 4  }
 0x17c   :  { %12 = sbr.rel (!%p10_p4) target bundleno = 1 (0x1), region = 62 }

// kernel: unet_forward.24
= control target key start
LH: loop header
LB: loop body
LE: loop exit
PB: predicated region body
PF: predicated region fallthrough
CT: control target
= control target key end

     0   :  { %s818_s12 = smov 0   ;;  %s982_s0 = inlined_call_operand.vmem [shape: bf16[2,32,256], index: 0, kind: input, shape index: {}]   ;;  %s983_s1 = inlined_call_operand.vmem [shape: bf16[64,288], index: 1, kind: input, shape index: {}]   ;;  %s984_s2 = inlined_call_operand.vmem [shape: f32[64,1], index: 2, kind: input, shape index: {}]   ;;  %s985_s3 = inlined_call_operand.vmem [shape: bf16[2,64,128], index: 3, kind: output, shape index: {}]  }
   0x1 LB: > { %s615_s13 = sadd.s32 4294967295, %s787_s12   ;;  %p619_p0 = scmp.ge.s32.totalorder %s787_s12, 1  ;;  %s787_s12 = sphi %s818_s12, %s13_s12  }
   0x2   : > { %p137_p1 = scmp.lt.s32.totalorder %s787_s12, 3 }
   0x4   : > { %p138_p2 = pnand %p619_p0, %p137_p1 }
   0x5   : > { %p161_p3 = scmp.lt.s32.totalorder (!%p138_p2), %s615_s13, 1  ;;  %s789_s18 = smov (!%p138_p2), 122  }
   0x6   : > { %141 = sbr.rel (%p138_p2) target bundleno = 392 (0x188), region = 32  ;;  %s790_s19 = smov (!%p138_p2), 126  }
   0x7   : > { %s791_s20 = smov (!%p138_p2), 115   ;;  %s792_s21 = smov (!%p138_p2), 114  }
   0x8   : > { %s793_s22 = smov (!%p138_p2), 127   ;;  %s794_s23 = smov (!%p138_p2), 116  }
   0x9   : > { %s795_s24 = smov (!%p138_p2), 120   ;;  %s796_s25 = smov (!%p138_p2), 121  }
   0xb   : > { %s987_s13 = smov (!%p161_p3, %s615_s13), 1  ;;  %vm266_vm0 = vcmask 998400   ;;  %vm253_vm1 = vcmask 1031168   ;;  %vm318_vm2 = vcmask 941056   ;;  %vm331_vm3 = vcmask 932864   ;;  %v190_v56 = vld [vmem:[%s984_s2 + $0x10] sm:$0xff] }
   0xc   : > { %s702_s14 = sshll.u32 %s987_s13, 5  ;;  %vm240_vm4 = vcmask 1039360   ;;  %vm305_vm5 = vcmask 949248   ;;  %v658_v40 = vld [vmem:[%s983_s1 + $0x8] sm:$0xf]  ;;  %vm436_vm6 = vcmask 261120  }
   0xd   : > { %s834_s17 = scalar_lea.vmem %s982_s0, %s702_s14  ;;  %v706_v41 = vld [vmem:[%s983_s1 + $0x10] sm:$0xf0]  ;;  %v797_v57 = vmov 0   ;;  %v662_v58 = vld [vmem:[%s983_s1 + $0x18] sm:$0xf]  ;;  %vm292_vm7 = vcmask 982016  }
   0xe   : > { %v642_v0 = vld [vmem:[%s834_s17 + $0x10] sm:$0xf]  ;;  %v721_v1 = vld [vmem:[%s834_s17 + $0x14] sm:$0xf0]  ;;  %v634_v2 = vld [vmem:[%s834_s17] sm:$0xf]  ;;  %v659_v45 = vor.u32 %v706_v41, %v658_v40  ;;  %780 = vset.pattern.permute.xlu1 %v797_v57  ;;  %778 = vset.pattern.permute.xlu2 %v797_v57 }
   0xf   : > { %v643_v3 = vor.u32 %v721_v1, %v642_v0  ;;  %v719_v4 = vld [vmem:[%s834_s17 + $0x4] sm:$0xf0]  ;;  %v720_v6 = vld [vmem:[%s834_s17 + $0x14] sm:$0xf]  ;;  %v644_v7 = vld [vmem:[%s834_s17 + $0x18] sm:$0xf0]  ;;  %779 = vset.pattern.permute.xlu0 %v797_v57 }
  0x10   : > { %v635_v5 = vor.u32 %v719_v4, %v634_v2  ;;  %v718_v8 = vld [vmem:[%s834_s17 + $0x4] sm:$0xf]  ;;  %v636_v9 = vld [vmem:[%s834_s17 + $0x8] sm:$0xf0]  ;;  %v647_v10 = vor.u32 %v720_v6, %v644_v7  ;;  %v630_v47 = vld [vmem:[%s834_s17 + $0x10] sm:$0xf] }
  0x11   : > { %262 = vrot.lane.b32.xlu0 %v643_v3, %s789_s18  ;;  %249 = vrot.lane.b32.xlu2 %v643_v3, %s790_s19  ;;  %v639_v11 = vor.u32 %v718_v8, %v636_v9  ;;  %v717_v48 = vld [vmem:[%s834_s17 + $0x14] sm:$0xf0]  ;;  %v626_v54 = vld [vmem:[%s834_s17] sm:$0xf]  ;;  %vm279_vm8 = vcmask 990208  }
  0x12   : > { %258 = vrot.lane.b32.xlu1 %v635_v5, %s789_s18  ;;  %v631_v53 = vor.u32 %v717_v48, %v630_v47  ;;  %v716_v55 = vld [vmem:[%s834_s17 + $0x4] sm:$0xf0]  ;;  %v708_v60 = vld [vmem:[%s983_s1 + $0x20] sm:$0xf0]  ;;  %v650_v61 = vld [vmem:[%s983_s1] sm:$0xf] }
  0x13   : > { %v627_v59 = vor.u32 %v716_v55, %v626_v54  ;;  %v705_v62 = vld [vmem:[%s983_s1 + $0x8] sm:$0xf0]  ;;  %v670_v63 = vld [vmem:[%s983_s1 + $0x20] sm:$0xf]  ;;  %v663_v4 = vor.u32 %v708_v60, %v662_v58  ;;  %v715_v40 = vld [vmem:[%s983_s1 + $0x58] sm:$0xf0] }
  0x14   : > { %v709_v0 = vld [vmem:[%s983_s1 + $0x28] sm:$0xf0]  ;;  %v188_v8 = vld [vmem:[%s984_s2] sm:$0xff] }
  0x15   : > { %v671_v7 = vor.u32 %v709_v0, %v670_v63  ;;  %v192_v9 = vld [vmem:[%s984_s2 + $0x20] sm:$0xff] }
  0x19   : > { %264 = vrot.lane.b32.xlu0 %v647_v10, %s789_s18  ;;  %251 = vrot.lane.b32.xlu2 %v647_v10, %s790_s19 }
  0x1a   : > { %260 = vrot.lane.b32.xlu1 %v639_v11, %s789_s18 }
  0x21   : > { %314 = vrot.lane.b32.xlu0 %v643_v3, %s791_s20  ;;  %245 = vrot.lane.b32.xlu2 %v635_v5, %s790_s19 }
  0x22   : > { %316 = vrot.lane.b32.xlu1 %v647_v10, %s791_s20 }
  0x29   : > { %247 = vrot.lane.b32.xlu0 %v639_v11, %s790_s19  ;;  %312 = vrot.lane.b32.xlu2 %v639_v11, %s791_s20 }
  0x2a   : > { %310 = vrot.lane.b32.xlu1 %v635_v5, %s791_s20  ;;  %s973_s20 = scalar_lea.vmem %s985_s3, %s702_s14 }
  0x31   : > { %327 = vrot.lane.b32.xlu0 %v643_v3, %s792_s21  ;;  %236 = vrot.lane.b32.xlu2 %v643_v3, %s793_s22 }
  0x32   : > { %329 = vrot.lane.b32.xlu1 %v647_v10, %s792_s21 }
  0x39   : > { %238 = vrot.lane.b32.xlu0 %v647_v10, %s793_s22  ;;  %303 = vrot.lane.b32.xlu2 %v647_v10, %s794_s23 }
  0x3a   : > { %301 = vrot.lane.b32.xlu1 %v643_v3, %s794_s23 }
  0x41   : > { %323 = vrot.lane.b32.xlu0 %v635_v5, %s792_s21  ;;  %232 = vrot.lane.b32.xlu2 %v635_v5, %s793_s22 }
  0x42   : > { %325 = vrot.lane.b32.xlu1 %v639_v11, %s792_s21 }
  0x49   : > { %234 = vrot.lane.b32.xlu0 %v639_v11, %s793_s22  ;;  %299 = vrot.lane.b32.xlu2 %v639_v11, %s794_s23 }
  0x4a   : > { %297 = vrot.lane.b32.xlu1 %v635_v5, %s794_s23 }
  0x51   : > { %288 = vrot.lane.b32.xlu0 %v643_v3, %s795_s24  ;;  %284 = vrot.lane.b32.xlu2 %v635_v5, %s795_s24 }
  0x52   : > { %290 = vrot.lane.b32.xlu1 %v647_v10, %s795_s24 }
  0x59   : > { %286 = vrot.lane.b32.xlu0 %v639_v11, %s795_s24  ;;  %277 = vrot.lane.b32.xlu2 %v647_v10, %s796_s25  ;;  %v189_v10 = vld [vmem:[%s984_s2 + $0x8] sm:$0xff] }
  0x5a   : > { %275 = vrot.lane.b32.xlu1 %v643_v3, %s796_s25 }
  0x61   : > { %271 = vrot.lane.b32.xlu0 %v635_v5, %s796_s25  ;;  %v651_v5 = vor.u32 %v705_v62, %v650_v61  ;;  %338 = vperm.xlu2 %778, %v188_v8  }
  0x62   : > { %273 = vrot.lane.b32.xlu1 %v639_v11, %s796_s25 }
  0x69   : > { %343 = vperm.xlu0 %779, %v189_v10  }
  0x6a   : > { %348 = vperm.xlu1 %780, %v190_v56  }
  0x6b   : > { %v250_v12 = vpop.permute.xlu2 %249 }
  0x72   : > { %358 = vperm.xlu1 %780, %v192_v9  }
  0x73   : > { %v252_v13 = vpop.permute.xlu2 %251 }
  0x74   : > { %v255_v24 = vsel %vm253_vm1, %v250_v12, %v252_v13 }
  0x7b   : > { %v246_v16 = vpop.permute.xlu2 %245 }
  0x83   : > { %v263_v14 = vpop.permute.xlu0 %262  ;;  %v313_v21 = vpop.permute.xlu2 %312 }
  0x84   : > { %v259_v15 = vpop.permute.xlu1 %258 }
  0x8b   : > { %v265_v17 = vpop.permute.xlu0 %264  ;;  %v237_v27 = vpop.permute.xlu2 %236 }
  0x8c   : > { %v261_v18 = vpop.permute.xlu1 %260  ;;  %v268_v19 = vsel %vm266_vm0, %v263_v14, %v265_v17  ;;  %v711_v17 = vld [vmem:[%s983_s1 + $0x38] sm:$0xf0] }
  0x8d   : > { %449 = vmatpush.bf16.msra.mxu0 %v268_v19  ;;  %745 = vmatpush.bf16.msra.mxu3 %v268_v19  ;;  %v267_v20 = vsel %vm266_vm0, %v259_v15, %v261_v18  ;;  %v707_v18 = vld [vmem:[%s983_s1 + $0x1c] sm:$0xf]  ;;  %v664_v19 = vld [vmem:[%s983_s1 + $0x24] sm:$0xf0] }
  0x91   : > { %450 = vmatpush.bf16.msra.mxu0 %v267_v20  ;;  %746 = vmatpush.bf16.msra.mxu3 %v267_v20  ;;  %v682_v20 = vld [vmem:[%s983_s1 + $0x38] sm:$0xf] }
  0x93   : > { %v315_v22 = vpop.permute.xlu0 %314  ;;  %v304_v34 = vpop.permute.xlu2 %303 }
  0x94   : > { %v317_v23 = vpop.permute.xlu1 %316 }
  0x95   : > { %451 = vmatpush.bf16.msra.mxu0 %v255_v24  ;;  %747 = vmatpush.bf16.msra.mxu3 %v255_v24  ;;  %v844_v25 = vsel %vm318_vm2, %v315_v22, %v317_v23 }
  0x96   : > { %753 = vmatpush.bf16.msra.mxu1 %v844_v25 }
  0x9b   : > { %v248_v26 = vpop.permute.xlu0 %247  ;;  %v233_v39 = vpop.permute.xlu2 %232 }
  0x9c   : > { %v311_v28 = vpop.permute.xlu1 %310  ;;  %v254_v29 = vsel %vm253_vm1, %v246_v16, %v248_v26  ;;  %v674_v16 = vld [vmem:[%s983_s1 + $0x30] sm:$0xf]  ;;  %v667_v26 = vor.u32 %v707_v18, %v664_v19 }
  0x9d   : > { %452 = vmatpush.bf16.msra.mxu0 %v254_v29  ;;  %748 = vmatpush.bf16.msra.mxu3 %v254_v29  ;;  %v847_v30 = vsel %vm318_vm2, %v311_v28, %v313_v21  ;;  %v712_v21 = vld [vmem:[%s983_s1 + $0x40] sm:$0xf0]  ;;  %v675_v24 = vor.u32 %v711_v17, %v674_v16  ;;  %v191_v28 = vld [vmem:[%s984_s2 + $0x18] sm:$0xff] }
  0x9e   : > { %754 = vmatpush.bf16.msra.mxu1 %v847_v30  ;;  %v195_v29 = vld [vmem:[%s984_s2 + $0x38] sm:$0xff]  ;;  %353 = vperm.xlu2 %778, %v191_v28  }
  0x9f   : > { %373 = vperm.xlu1 %780, %v195_v29  }
  0xa3   : > { %v328_v31 = vpop.permute.xlu0 %327  ;;  %v300_v46 = vpop.permute.xlu2 %299 }
  0xa4   : > { %v330_v32 = vpop.permute.xlu1 %329 }
  0xa5   : > { %v333_v33 = vsel %vm331_vm3, %v328_v31, %v330_v32  ;;  %v704_v31 = vld [vmem:[%s983_s1 + $0x4] sm:$0xf]  ;;  %v652_v32 = vld [vmem:[%s983_s1 + $0xc] sm:$0xf0] }
  0xa6   : > { %513 = vmatpush.bf16.msra.mxu2 %v333_v33  ;;  %v193_v33 = vld [vmem:[%s984_s2 + $0x28] sm:$0xff] }
  0xa7   : > { %363 = vperm.xlu2 %778, %v193_v33  }
  0xab   : > { %v239_v35 = vpop.permute.xlu0 %238  ;;  %v285_v1 = vpop.permute.xlu2 %284 }
  0xac   : > { %v302_v36 = vpop.permute.xlu1 %301  ;;  %v242_v37 = vsel %vm240_vm4, %v237_v27, %v239_v35  ;;  %v683_v27 = vor.u32 %v712_v21, %v682_v20  ;;  %v686_v35 = vld [vmem:[%s983_s1 + $0x48] sm:$0xf] }
  0xad   : > { %453 = vmatpush.bf16.msra.mxu0 %v242_v37  ;;  %749 = vmatpush.bf16.msra.mxu3 %v242_v37  ;;  %v853_v38 = vsel %vm305_vm5, %v302_v36, %v304_v34  ;;  %v655_v34 = vor.u32 %v704_v31, %v652_v32  ;;  %v714_v36 = vld [vmem:[%s983_s1 + $0x50] sm:$0xf0] }
  0xae   : > { %755 = vmatpush.bf16.msra.mxu1 %v853_v38  ;;  %v710_v37 = vld [vmem:[%s983_s1 + $0x34] sm:$0xf]  ;;  %v687_v41 = vor.u32 %v714_v36, %v686_v35 }
  0xb3   : > { %v324_v42 = vpop.permute.xlu0 %323  ;;  %v278_v14 = vpop.permute.xlu2 %277 }
  0xb4   : > { %v326_v43 = vpop.permute.xlu1 %325 }
  0xb5   : > { %v332_v44 = vsel %vm331_vm3, %v324_v42, %v326_v43 }
  0xb6   : > { %514 = vmatpush.bf16.msra.mxu2 %v332_v44  ;;  %v713_v44 = vld [vmem:[%s983_s1 + $0x4c] sm:$0xf] }
  0xb9   : > { %696 = vmatmul.msk.bf16.vlgmr.msra.gmra.mxu2 %vm436_vm6, %v659_v45  ;;  %v688_v45 = vld [vmem:[%s983_s1 + $0x54] sm:$0xf0] }
  0xbb   : > { %v235_v49 = vpop.permute.xlu0 %234 }
  0xbc   : > { %v298_v50 = vpop.permute.xlu1 %297  ;;  %v241_v51 = vsel %vm240_vm4, %v233_v39, %v235_v49  ;;  %v694_v39 = vld [vmem:[%s983_s1 + $0x50] sm:$0xf] }
  0xbd   : > { %454 = vmatpush.bf16.msra.mxu0 %v241_v51  ;;  %750 = vmatpush.bf16.msra.mxu3 %v241_v51  ;;  %v306_v52 = vsel %vm305_vm5, %v298_v50, %v300_v46  ;;  %v695_v43 = vor.u32 %v715_v40, %v694_v39  ;;  %v691_v46 = vor.u32 %v713_v44, %v688_v45 }
  0xbe   : > { %756 = vmatpush.bf16.msra.mxu1 %v306_v52 }
  0xc1   : > { %455 = vmatpush.bf16.msra.mxu0 %v631_v53  ;;  %751 = vmatpush.bf16.msra.mxu3 %v631_v53 }
  0xc3   : > { %v289_v2 = vpop.permute.xlu0 %288 }
  0xc4   : > { %v291_v3 = vpop.permute.xlu1 %290 }
  0xc5   : > { %456 = vmatpush.bf16.msra.mxu0 %v627_v59  ;;  %752 = vmatpush.bf16.msra.mxu3 %v627_v59  ;;  %v294_v6 = vsel %vm292_vm7, %v289_v2, %v291_v3 }
  0xc6   : > { %757 = vmatpush.bf16.msra.mxu1 %v294_v6 }
  0xc8   : > { %462 = vmatmul.bf16.vlgmr.msra.gmra.mxu3 %v663_v4  ;;  %457 = vmatmul.bf16.vlgmr.msra.gmra.mxu0 %v651_v5 }
  0xc9   : > { %478 = vmatpush.bf16.msrb.mxu0 %v844_v25  ;;  %697 = vmatmul.msk.bf16.gmra.mxu2 %vm436_vm6, %v671_v7 }
  0xcb   : > { %v287_v11 = vpop.permute.xlu0 %286 }
  0xcc   : > { %v276_v12 = vpop.permute.xlu1 %275  ;;  %v293_v13 = vsel %vm292_vm7, %v285_v1, %v287_v11 }
  0xcd   : > { %479 = vmatpush.bf16.msrb.mxu0 %v847_v30  ;;  %758 = vmatpush.bf16.msra.mxu1 %v293_v13  ;;  %v281_v15 = vsel %vm279_vm8, %v276_v12, %v278_v14  ;;  %v194_v30 = vld [vmem:[%s984_s2 + $0x30] sm:$0xff] }
  0xce   : > { %368 = vperm.xlu0 %779, %v194_v30  }
  0xd1   : > { %480 = vmatpush.bf16.msrb.mxu0 %v853_v38  ;;  %759 = vmatpush.bf16.msra.mxu1 %v281_v15  ;;  %v676_v38 = vld [vmem:[%s983_s1 + $0x3c] sm:$0xf0] }
  0xd2   : > { %v679_v42 = vor.u32 %v710_v37, %v676_v38 }
  0xd3   : > { %v272_v22 = vpop.permute.xlu0 %271 }
  0xd4   : > { %v274_v23 = vpop.permute.xlu1 %273 }
  0xd5   : > { %481 = vmatpush.bf16.msrb.mxu0 %v306_v52  ;;  %v280_v25 = vsel %vm279_vm8, %v272_v22, %v274_v23  ;;  %v339_v52 = vpop.permute.xlu2 %338 }
  0xd6   : > { %760 = vmatpush.bf16.msra.mxu1 %v280_v25 }
  0xd8   : > { %467 = vmatmul.bf16.gmra.mxu3 %v675_v24 }
  0xd9   : > { %482 = vmatpush.bf16.msrb.mxu0 %v294_v6  ;;  %491 = vmatmul.bf16.vlgmr.msra.gmra.mxu1 %v667_v26 }
  0xda   : > { %698 = vmatmul.msk.bf16.gmra.mxu2 %vm436_vm6, %v683_v27 }
  0xdb   : > { %v344_v10 = vpop.permute.xlu0 %343 }
  0xdc   : > { %v349_v54 = vpop.permute.xlu1 %348 }
  0xdd   : > { %483 = vmatpush.bf16.msrb.mxu0 %v293_v13 }
  0xe1   : > { %484 = vmatpush.bf16.msrb.mxu0 %v281_v15 }
  0xe4   : > { %v359_v8 = vpop.permute.xlu1 %358 }
  0xe5   : > { %485 = vmatpush.bf16.msrb.mxu0 %v280_v25 }
  0xe8   : > { %486 = vmatmul.bf16.vlgmr.msrb.gmra.mxu0 %v655_v34  ;;  %472 = vmatmul.bf16.gmra.mxu3 %v687_v41 }
  0xe9   : > { %496 = vmatmul.bf16.gmra.mxu1 %v679_v42 }
  0xea   : > { %699 = vmatmul.msk.bf16.gmra.mxu2 %vm436_vm6, %v695_v43 }
  0xf8   : > { %v354_v59 = vpop.permute.xlu2 %353 }
  0xf9   : > { %501 = vmatmul.bf16.gmra.mxu1 %v691_v46 }
 0x101   : > { %v364_v16 = vpop.permute.xlu2 %363 }
 0x111   : > { %v374_v41 = vpop.permute.xlu1 %373 }
 0x13c   : > { %v516_v47 = vpop.f32.mrf.mxu2 }
 0x140   : > { %v369_v34 = vpop.permute.xlu0 %368 }
 0x144   : > { %v518_v48 = vpop.f32.mrf.mxu2 }
 0x145   : > { %v458_v51 = vpop.f32.mrf.mxu0 }
 0x146   : > { %v459_v5 = vadd.f32 %v458_v51, %v339_v52 }
 0x14b   : > { %v463_v49 = vpop.f32.mrf.mxu3 }
 0x14c   : > { %v521_v50 = vpop.f32.mrf.mxu2  ;;  %v464_v56 = vadd.f32 %v463_v49, %v349_v54 }
 0x14d   : > { %v460_v58 = vpop.f32.mrf.mxu0 }
 0x14e   : > { %v461_v15 = vadd.f32 %v460_v58, %v344_v10 }
 0x153   : > { %v465_v53 = vpop.f32.mrf.mxu3 }
 0x154   : > { %v523_v57 = vpop.f32.mrf.mxu2  ;;  %v466_v62 = vadd.f32 %v465_v53, %v354_v59 }
 0x156   : > { %v492_v55 = vpop.f32.mrf.mxu1 }
 0x157   : > { %v493_v60 = vadd.f32 %v492_v55, %v464_v56 }
 0x159   : > { %v522_v0 = vadd.f32 %v521_v50, %v493_v60 }
 0x15b   : > { %v468_v61 = vpop.f32.mrf.mxu3  ;;  %v538_v6 = vmax.f32 %v522_v0, 0.0 }
 0x15c   : > { %v469_v14 = vadd.f32 %v468_v61, %v359_v8 }
 0x15d   : > { %v526_v3 = vpop.f32.mrf.mxu2 }
 0x15e   : > { %v494_v63 = vpop.f32.mrf.mxu1 }
 0x15f   : > { %v495_v1 = vadd.f32 %v494_v63, %v466_v62 }
 0x161   : > { %v524_v2 = vadd.f32 %v523_v57, %v495_v1 }
 0x163   : > { %v539_v7 = vmax.f32 %v524_v2, 0.0  ;;  %v470_v11 = vpop.f32.mrf.mxu3 }
 0x164   : > { %v471_v22 = vadd.f32 %v470_v11, %v364_v16 }
 0x165   : > { %v487_v4 = vpop.f32.mrf.mxu0  ;;  %v730_v9 = vpack.c.bf16 %v539_v7, %v538_v6  ;;  %v528_v21 = vpop.f32.mrf.mxu2 }
 0x166   : > { %v497_v12 = vpop.f32.mrf.mxu1  ;;  %v488_v13 = vadd.f32 %v487_v4, %v459_v5 }
 0x167   : > { %742 = vst [vmem:[%s973_s20 + $0x8] sm:$0xff] %v730_v9   ;;  %v498_v19 = vadd.f32 %v497_v12, %v469_v14 }
 0x168   : > { %v517_v18 = vadd.f32 %v516_v47, %v488_v13 }
 0x169   : > { %v527_v26 = vadd.f32 %v526_v3, %v498_v19 }
 0x16a   : > { %v536_v25 = vmax.f32 %v517_v18, 0.0 }
 0x16b   : > { %v473_v29 = vpop.f32.mrf.mxu3  ;;  %v540_v32 = vmax.f32 %v527_v26, 0.0 }
 0x16c   : > { %v474_v38 = vadd.f32 %v473_v29, %v369_v34 }
 0x16d   : > { %v489_v17 = vpop.f32.mrf.mxu0  ;;  %v531_v36 = vpop.f32.mrf.mxu2 }
 0x16e   : > { %v490_v20 = vadd.f32 %v489_v17, %v461_v15  ;;  %v499_v24 = vpop.f32.mrf.mxu1 }
 0x16f   : > { %v500_v28 = vadd.f32 %v499_v24, %v471_v22 }
 0x170   : > { %v519_v23 = vadd.f32 %v518_v48, %v490_v20 }
 0x171   : > { %v529_v31 = vadd.f32 %v528_v21, %v500_v28 }
 0x172   : > { %v537_v27 = vmax.f32 %v519_v23, 0.0 }
 0x173   : > { %v541_v33 = vmax.f32 %v529_v31, 0.0  ;;  %v475_v39 = vpop.f32.mrf.mxu3 }
 0x174   : > { %v725_v30 = vpack.c.bf16 %v537_v27, %v536_v25  ;;  %v476_v42 = vadd.f32 %v475_v39, %v374_v41 }
 0x175   : > { %v735_v35 = vpack.c.bf16 %v541_v33, %v540_v32  ;;  %v533_v46 = vpop.f32.mrf.mxu2 }
 0x176   : > { %726 = vst [vmem:[%s973_s20] sm:$0xff] %v725_v30   ;;  %v502_v37 = vpop.f32.mrf.mxu1 }
 0x177   : > { %743 = vst [vmem:[%s973_s20 + $0x10] sm:$0xff] %v735_v35   ;;  %v503_v40 = vadd.f32 %v502_v37, %v474_v38 }
 0x179   : > { %v532_v44 = vadd.f32 %v531_v36, %v503_v40 }
 0x17b   : > { %v542_v48 = vmax.f32 %v532_v44, 0.0 }
 0x17e   : > { %v504_v43 = vpop.f32.mrf.mxu1 }
 0x17f   : > { %v505_v45 = vadd.f32 %v504_v43, %v476_v42 }
 0x181   : > { %v534_v47 = vadd.f32 %v533_v46, %v505_v45 }
 0x183   : > { %v543_v49 = vmax.f32 %v534_v47, 0.0 }
 0x185   : > { %v740_v50 = vpack.c.bf16 %v543_v49, %v542_v48 }
 0x187   : > { %744 = vst [vmem:[%s973_s20 + $0x18] sm:$0xff] %v740_v50  }
 0x188 PF: > { %s13_s12 = sadd.s32 1, %s787_s12  }
 0x189   : > { %p10_p4 = scmp.ge.s32.totalorder %s13_s12, 4  }
 0x18b   :  { %12 = sbr.rel (!%p10_p4) target bundleno = 1 (0x1), region = 62 }

// kernel: unet_forward.25
= control target key start
LH: loop header
LB: loop body
LE: loop exit
PB: predicated region body
PF: predicated region fallthrough
CT: control target
= control target key end

     0   :  { %s1126_s12 = smov 0   ;;  %s1483_s0 = inlined_call_operand.vmem [shape: bf16[2,64,256], index: 0, kind: input, shape index: {}]   ;;  %s1484_s1 = inlined_call_operand.vmem [shape: bf16[64,576], index: 1, kind: input, shape index: {}]   ;;  %s1485_s2 = inlined_call_operand.vmem [shape: f32[64,1], index: 2, kind: input, shape index: {}]   ;;  %s1486_s3 = inlined_call_operand.vmem [shape: bf16[2,64,128], index: 3, kind: output, shape index: {}]  }
   0x1 LB: > { %s853_s13 = sadd.s32 4294967295, %s1095_s12   ;;  %p857_p0 = scmp.ge.s32.totalorder %s1095_s12, 1  ;;  %s1095_s12 = sphi %s1126_s12, %s13_s12  }
   0x2   : > { %p137_p1 = scmp.lt.s32.totalorder %s1095_s12, 3 }
   0x4   : > { %p138_p2 = pnand %p857_p0, %p137_p1 }
   0x5   : > { %p161_p3 = scmp.lt.s32.totalorder (!%p138_p2), %s853_s13, 1  ;;  %s1097_s18 = smov (!%p138_p2), 127  }
   0x6   : > { %141 = sbr.rel (%p138_p2) target bundleno = 494 (0x1ee), region = 32  ;;  %s1098_s19 = smov (!%p138_p2), 120  }
   0x7   : > { %s1099_s20 = smov (!%p138_p2), 115   ;;  %s1100_s21 = smov (!%p138_p2), 122  }
   0x8   : > { %s1101_s22 = smov (!%p138_p2), 121   ;;  %s1102_s23 = smov (!%p138_p2), 116  }
   0x9   : > { %s1103_s24 = smov (!%p138_p2), 126   ;;  %s1104_s25 = smov (!%p138_p2), 114  }
   0xb   : > { %s1488_s13 = smov (!%p161_p3, %s853_s13), 1  ;;  %vm292_vm0 = vcmask 1039360   ;;  %vm442_vm1 = vcmask 941056   ;;  %vm342_vm2 = vcmask 998400   ;;  %vm392_vm3 = vcmask 982016  }
   0xc   : > { %s996_s14 = sshll.u32 %s1488_s13, 6  ;;  %vm367_vm4 = vcmask 990208   ;;  %vm417_vm5 = vcmask 949248   ;;  %vm317_vm6 = vcmask 1031168   ;;  %vm467_vm7 = vcmask 932864  }
   0xd   : > { %s1140_s17 = scalar_lea.vmem %s1483_s0, %s996_s14  ;;  %vm616_vm8 = vcmask 523264  }
   0xe   : > { %v904_v0 = vld [vmem:[%s1140_s17 + $0x30] sm:$0xf]  ;;  %v1029_v1 = vld [vmem:[%s1140_s17 + $0x34] sm:$0xf0]  ;;  %v896_v2 = vld [vmem:[%s1140_s17 + $0x20] sm:$0xf] }
   0xf   : > { %v1145_v3 = vor.u32 %v1029_v1, %v904_v0  ;;  %v1027_v4 = vld [vmem:[%s1140_s17 + $0x24] sm:$0xf0]  ;;  %v1028_v6 = vld [vmem:[%s1140_s17 + $0x34] sm:$0xf]  ;;  %v906_v7 = vld [vmem:[%s1140_s17 + $0x38] sm:$0xf0] }
  0x10   : > { %v1148_v5 = vor.u32 %v1027_v4, %v896_v2  ;;  %v888_v8 = vld [vmem:[%s1140_s17 + $0x10] sm:$0xf]  ;;  %v1025_v9 = vld [vmem:[%s1140_s17 + $0x14] sm:$0xf0]  ;;  %v1026_v10 = vld [vmem:[%s1140_s17 + $0x24] sm:$0xf]  ;;  %v1160_v13 = vor.u32 %v1028_v6, %v906_v7 }
  0x11   : > { %288 = vrot.lane.b32.xlu0 %v1145_v3, %s1097_s18  ;;  %v898_v11 = vld [vmem:[%s1140_s17 + $0x28] sm:$0xf0]  ;;  %v1158_v12 = vor.u32 %v1025_v9, %v888_v8  ;;  %v1024_v15 = vld [vmem:[%s1140_s17 + $0x14] sm:$0xf]  ;;  %v890_v16 = vld [vmem:[%s1140_s17 + $0x18] sm:$0xf0] }
  0x12   : > { %284 = vrot.lane.b32.xlu1 %v1148_v5, %s1097_s18  ;;  %v1163_v14 = vor.u32 %v1026_v10, %v898_v11  ;;  %v1168_v17 = vor.u32 %v1024_v15, %v890_v16  ;;  %v880_v18 = vld [vmem:[%s1140_s17] sm:$0xf]  ;;  %v1023_v19 = vld [vmem:[%s1140_s17 + $0x4] sm:$0xf0]  ;;  %v1022_v20 = vld [vmem:[%s1140_s17 + $0x4] sm:$0xf] }
  0x13   : > { %280 = vrot.lane.b32.xlu2 %v1158_v12, %s1097_s18  ;;  %v882_v21 = vld [vmem:[%s1140_s17 + $0x8] sm:$0xf0]  ;;  %v1175_v22 = vor.u32 %v1023_v19, %v880_v18  ;;  %v876_v38 = vld [vmem:[%s1140_s17 + $0x30] sm:$0xf]  ;;  %v1021_v39 = vld [vmem:[%s1140_s17 + $0x34] sm:$0xf0] }
  0x14   : > { %v1178_v23 = vor.u32 %v1022_v20, %v882_v21  ;;  %v877_v42 = vor.u32 %v1021_v39, %v876_v38  ;;  %v872_v43 = vld [vmem:[%s1140_s17 + $0x20] sm:$0xf]  ;;  %v1020_v44 = vld [vmem:[%s1140_s17 + $0x24] sm:$0xf0]  ;;  %v868_v49 = vld [vmem:[%s1140_s17 + $0x10] sm:$0xf] }
  0x15   : > { %v873_v47 = vor.u32 %v1020_v44, %v872_v43  ;;  %v1019_v50 = vld [vmem:[%s1140_s17 + $0x14] sm:$0xf0]  ;;  %v864_v53 = vld [vmem:[%s1140_s17] sm:$0xf]  ;;  %v1018_v54 = vld [vmem:[%s1140_s17 + $0x4] sm:$0xf0] }
  0x16   : > { %v869_v52 = vor.u32 %v1019_v50, %v868_v49  ;;  %v865_v57 = vor.u32 %v1018_v54, %v864_v53  ;;  %v952_v43 = vld [vmem:[%s1484_s1 + $0x50] sm:$0xf]  ;;  %v1010_v44 = vld [vmem:[%s1484_s1 + $0x60] sm:$0xf0]  ;;  %v912_v53 = vld [vmem:[%s1484_s1] sm:$0xf] }
  0x17   : > { %v1000_v54 = vld [vmem:[%s1484_s1 + $0x10] sm:$0xf0] }
  0x19   : > { %290 = vrot.lane.b32.xlu0 %v1160_v13, %s1097_s18 }
  0x1a   : > { %286 = vrot.lane.b32.xlu1 %v1163_v14, %s1097_s18 }
  0x1b   : > { %282 = vrot.lane.b32.xlu2 %v1168_v17, %s1097_s18 }
  0x21   : > { %276 = vrot.lane.b32.xlu0 %v1175_v22, %s1097_s18 }
  0x22   : > { %278 = vrot.lane.b32.xlu1 %v1178_v23, %s1097_s18 }
  0x23   : > { %388 = vrot.lane.b32.xlu2 %v1145_v3, %s1098_s19 }
  0x29   : > { %390 = vrot.lane.b32.xlu0 %v1160_v13, %s1098_s19 }
  0x2a   : > { %438 = vrot.lane.b32.xlu1 %v1145_v3, %s1099_s20 }
  0x2b   : > { %440 = vrot.lane.b32.xlu2 %v1160_v13, %s1099_s20 }
  0x31   : > { %338 = vrot.lane.b32.xlu0 %v1145_v3, %s1100_s21 }
  0x32   : > { %340 = vrot.lane.b32.xlu1 %v1160_v13, %s1100_s21 }
  0x33   : > { %384 = vrot.lane.b32.xlu2 %v1148_v5, %s1098_s19 }
  0x39   : > { %386 = vrot.lane.b32.xlu0 %v1163_v14, %s1098_s19 }
  0x3a   : > { %434 = vrot.lane.b32.xlu1 %v1148_v5, %s1099_s20 }
  0x3b   : > { %436 = vrot.lane.b32.xlu2 %v1163_v14, %s1099_s20 }
  0x41   : > { %334 = vrot.lane.b32.xlu0 %v1148_v5, %s1100_s21 }
  0x42   : > { %336 = vrot.lane.b32.xlu1 %v1163_v14, %s1100_s21 }
  0x43   : > { %380 = vrot.lane.b32.xlu2 %v1158_v12, %s1098_s19 }
  0x49   : > { %382 = vrot.lane.b32.xlu0 %v1168_v17, %s1098_s19 }
  0x4a   : > { %430 = vrot.lane.b32.xlu1 %v1158_v12, %s1099_s20 }
  0x4b   : > { %432 = vrot.lane.b32.xlu2 %v1168_v17, %s1099_s20 }
  0x51   : > { %330 = vrot.lane.b32.xlu0 %v1158_v12, %s1100_s21 }
  0x52   : > { %332 = vrot.lane.b32.xlu1 %v1168_v17, %s1100_s21 }
  0x53   : > { %376 = vrot.lane.b32.xlu2 %v1175_v22, %s1098_s19 }
  0x59   : > { %378 = vrot.lane.b32.xlu0 %v1178_v23, %s1098_s19 }
  0x5a   : > { %426 = vrot.lane.b32.xlu1 %v1175_v22, %s1099_s20 }
  0x5b   : > { %428 = vrot.lane.b32.xlu2 %v1178_v23, %s1099_s20 }
  0x61   : > { %326 = vrot.lane.b32.xlu0 %v1175_v22, %s1100_s21 }
  0x62   : > { %328 = vrot.lane.b32.xlu1 %v1178_v23, %s1100_s21 }
  0x63   : > { %363 = vrot.lane.b32.xlu2 %v1145_v3, %s1101_s22 }
  0x69   : > { %365 = vrot.lane.b32.xlu0 %v1160_v13, %s1101_s22 }
  0x6a   : > { %413 = vrot.lane.b32.xlu1 %v1145_v3, %s1102_s23 }
  0x6b   : > { %415 = vrot.lane.b32.xlu2 %v1160_v13, %s1102_s23 }
  0x6d   : > { %v281_v24 = vpop.permute.xlu2 %280 }
  0x71   : > { %313 = vrot.lane.b32.xlu0 %v1145_v3, %s1103_s24 }
  0x72   : > { %315 = vrot.lane.b32.xlu1 %v1160_v13, %s1103_s24 }
  0x73   : > { %359 = vrot.lane.b32.xlu2 %v1148_v5, %s1101_s22 }
  0x75   : > { %v283_v25 = vpop.permute.xlu2 %282 }
  0x76   : > { %v294_v37 = vsel %vm292_vm0, %v281_v24, %v283_v25 }
  0x79   : > { %361 = vrot.lane.b32.xlu0 %v1163_v14, %s1101_s22 }
  0x7a   : > { %409 = vrot.lane.b32.xlu1 %v1148_v5, %s1102_s23 }
  0x7b   : > { %411 = vrot.lane.b32.xlu2 %v1163_v14, %s1102_s23 }
  0x7d   : > { %v1226_v26 = vpop.permute.xlu2 %388 }
  0x81   : > { %309 = vrot.lane.b32.xlu0 %v1148_v5, %s1103_s24 }
  0x82   : > { %311 = vrot.lane.b32.xlu1 %v1163_v14, %s1103_s24 }
  0x83   : > { %v289_v27 = vpop.permute.xlu0 %288  ;;  %355 = vrot.lane.b32.xlu2 %v1158_v12, %s1101_s22 }
  0x84   : > { %v285_v28 = vpop.permute.xlu1 %284 }
  0x85   : > { %v441_v29 = vpop.permute.xlu2 %440 }
  0x89   : > { %357 = vrot.lane.b32.xlu0 %v1168_v17, %s1101_s22 }
  0x8a   : > { %405 = vrot.lane.b32.xlu1 %v1158_v12, %s1102_s23 }
  0x8b   : > { %v291_v30 = vpop.permute.xlu0 %290  ;;  %407 = vrot.lane.b32.xlu2 %v1168_v17, %s1102_s23 }
  0x8c   : > { %v287_v31 = vpop.permute.xlu1 %286  ;;  %v296_v32 = vsel %vm292_vm0, %v289_v27, %v291_v30  ;;  %v932_v27 = vld [vmem:[%s1484_s1 + $0x28] sm:$0xf] }
  0x8d   : > { %629 = vmatpush.bf16.msra.mxu0 %v296_v32  ;;  %1053 = vmatpush.bf16.msra.mxu1 %v296_v32  ;;  %v1241_v33 = vpop.permute.xlu2 %384  ;;  %v295_v34 = vsel %vm292_vm0, %v285_v28, %v287_v31  ;;  %v1005_v28 = vld [vmem:[%s1484_s1 + $0x38] sm:$0xf0] }
  0x8e   : > { %1054 = vmatpush.bf16.msra.mxu2 %v296_v32 }
  0x91   : > { %630 = vmatpush.bf16.msra.mxu0 %v295_v34  ;;  %1055 = vmatpush.bf16.msra.mxu1 %v295_v34 }
  0x92   : > { %1056 = vmatpush.bf16.msra.mxu2 %v295_v34  ;;  %463 = vrot.lane.b32.xlu0 %v1145_v3, %s1104_s25 }
  0x93   : > { %465 = vrot.lane.b32.xlu1 %v1160_v13, %s1104_s25  ;;  %v277_v35 = vpop.permute.xlu0 %276  ;;  %305 = vrot.lane.b32.xlu2 %v1158_v12, %s1103_s24 }
  0x94   : > { %v279_v36 = vpop.permute.xlu1 %278 }
  0x95   : > { %631 = vmatpush.bf16.msra.mxu0 %v294_v37  ;;  %1057 = vmatpush.bf16.msra.mxu1 %v294_v37  ;;  %v437_v40 = vpop.permute.xlu2 %436  ;;  %v293_v41 = vsel %vm292_vm0, %v277_v35, %v279_v36  ;;  %v972_v36 = vld [vmem:[%s1484_s1 + $0x78] sm:$0xf] }
  0x96   : > { %1058 = vmatpush.bf16.msra.mxu2 %v294_v37  ;;  %v1015_v37 = vld [vmem:[%s1484_s1 + $0x88] sm:$0xf0] }
  0x99   : > { %632 = vmatpush.bf16.msra.mxu0 %v293_v41  ;;  %1059 = vmatpush.bf16.msra.mxu1 %v293_v41 }
  0x9a   : > { %307 = vrot.lane.b32.xlu0 %v1168_v17, %s1103_s24  ;;  %1060 = vmatpush.bf16.msra.mxu2 %v293_v41 }
  0x9b   : > { %351 = vrot.lane.b32.xlu1 %v1175_v22, %s1101_s22  ;;  %v391_v45 = vpop.permute.xlu0 %390  ;;  %353 = vrot.lane.b32.xlu2 %v1178_v23, %s1101_s22  ;;  %s997_s22 = sshll.u32 %s1488_s13, 5 }
  0x9c   : > { %v439_v46 = vpop.permute.xlu1 %438  ;;  %v396_v60 = vsel %vm392_vm3, %v1226_v26, %v391_v45  ;;  %v1105_v45 = vmov 0  }
  0x9d   : > { %1061 = vmatpush.bf16.msra.mxu1 %v877_v42  ;;  %v446_v48 = vsel %vm442_vm1, %v439_v46, %v441_v29  ;;  %633 = vmatpush.bf16.msra.mxu0 %v877_v42  ;;  %v381_v51 = vpop.permute.xlu2 %380  ;;  %v933_v29 = vor.u32 %v1005_v28, %v932_v27  ;;  %v953_v46 = vor.u32 %v1010_v44, %v952_v43  ;;  %v1011_v43 = vld [vmem:[%s1484_s1 + $0x68] sm:$0xf0] }
  0x9e   : > { %1062 = vmatpush.bf16.msra.mxu2 %v877_v42  ;;  %716 = vmatpush.bf16.msra.mxu3 %v446_v48  ;;  %v196_v42 = vld [vmem:[%s1485_s2] sm:$0xff] }
  0x9f   : > { %1086 = vset.pattern.permute.xlu1 %v1105_v45  ;;  %1088 = vset.pattern.permute.xlu0 %v1105_v45 }
  0xa0   : > { %1087 = vset.pattern.permute.xlu2 %v1105_v45 }
  0xa1   : > { %1063 = vmatpush.bf16.msra.mxu1 %v873_v47  ;;  %634 = vmatpush.bf16.msra.mxu0 %v873_v47 }
  0xa2   : > { %401 = vrot.lane.b32.xlu0 %v1175_v22, %s1102_s23  ;;  %1064 = vmatpush.bf16.msra.mxu2 %v873_v47 }
  0xa3   : > { %403 = vrot.lane.b32.xlu1 %v1178_v23, %s1102_s23  ;;  %v339_v55 = vpop.permute.xlu0 %338  ;;  %459 = vrot.lane.b32.xlu2 %v1148_v5, %s1104_s25 }
  0xa4   : > { %v341_v56 = vpop.permute.xlu1 %340 }
  0xa5   : > { %1065 = vmatpush.bf16.msra.mxu1 %v869_v52  ;;  %635 = vmatpush.bf16.msra.mxu0 %v869_v52  ;;  %v433_v58 = vpop.permute.xlu2 %432  ;;  %v346_v59 = vsel %vm342_vm2, %v339_v55, %v341_v56  ;;  %v913_v55 = vor.u32 %v1000_v54, %v912_v53  ;;  %v948_v53 = vld [vmem:[%s1484_s1 + $0x38] sm:$0xf]  ;;  %v1007_v54 = vld [vmem:[%s1484_s1 + $0x48] sm:$0xf0] }
  0xa6   : > { %1066 = vmatpush.bf16.msra.mxu2 %v869_v52  ;;  %v199_v52 = vld [vmem:[%s1485_s2 + $0x18] sm:$0xff] }
  0xa9   : > { %1067 = vmatpush.bf16.msra.mxu1 %v865_v57  ;;  %636 = vmatpush.bf16.msra.mxu0 %v865_v57 }
  0xaa   : > { %461 = vrot.lane.b32.xlu0 %v1163_v14, %s1104_s25  ;;  %1068 = vmatpush.bf16.msra.mxu2 %v865_v57 }
  0xab   : > { %301 = vrot.lane.b32.xlu1 %v1175_v22, %s1103_s24  ;;  %v387_v61 = vpop.permute.xlu0 %386  ;;  %303 = vrot.lane.b32.xlu2 %v1178_v23, %s1103_s24 }
  0xac   : > { %v435_v62 = vpop.permute.xlu1 %434  ;;  %v395_v63 = vsel %vm392_vm3, %v1241_v33, %v387_v61  ;;  %642 = vmatmul.bf16.vlgmr.msra.gmra.mxu1 %v933_v29  ;;  %637 = vmatmul.bf16.vlgmr.msra.gmra.mxu0 %v913_v55  ;;  %v954_v55 = vld [vmem:[%s1484_s1 + $0x64] sm:$0xf0] }
  0xad   : > { %658 = vmatpush.bf16.msrb.mxu1 %v346_v59  ;;  %v445_v0 = vsel %vm442_vm1, %v435_v62, %v437_v40  ;;  %v377_v1 = vpop.permute.xlu2 %376  ;;  %v973_v40 = vor.u32 %v1015_v37, %v972_v36 }
  0xae   : > { %687 = vmatpush.bf16.msrb.mxu2 %v396_v60  ;;  %717 = vmatpush.bf16.msra.mxu3 %v445_v0  ;;  %v201_v0 = vld [vmem:[%s1485_s2 + $0x28] sm:$0xff] }
  0xaf   : > { %652 = vmatmul.bf16.vlgmr.msra.gmra.mxu2 %v973_v40  ;;  %v1002_v40 = vld [vmem:[%s1484_s1 + $0x20] sm:$0xf0] }
  0xb2   : > { %688 = vmatpush.bf16.msrb.mxu2 %v395_v63  ;;  %455 = vrot.lane.b32.xlu0 %v1158_v12, %s1104_s25 }
  0xb3   : > { %457 = vrot.lane.b32.xlu1 %v1168_v17, %s1104_s25  ;;  %v335_v2 = vpop.permute.xlu0 %334  ;;  %451 = vrot.lane.b32.xlu2 %v1175_v22, %s1104_s25 }
  0xb4   : > { %v337_v3 = vpop.permute.xlu1 %336 }
  0xb5   : > { %v345_v4 = vsel %vm342_vm2, %v335_v2, %v337_v3  ;;  %v429_v5 = vpop.permute.xlu2 %428  ;;  %v203_v2 = vld [vmem:[%s1485_s2 + $0x38] sm:$0xff]  ;;  %v920_v3 = vld [vmem:[%s1484_s1 + $0x8] sm:$0xf] }
  0xb6   : > { %659 = vmatpush.bf16.msrb.mxu1 %v345_v4  ;;  %v1001_v4 = vld [vmem:[%s1484_s1 + $0x18] sm:$0xf0] }
  0xba   : > { %453 = vrot.lane.b32.xlu0 %v1178_v23, %s1104_s25  ;;  %s1472_s25 = scalar_lea.vmem %s1486_s3, %s997_s22 }
  0xbb   : > { %v383_v6 = vpop.permute.xlu0 %382  ;;  %478 = vperm.xlu1 %1086, %v196_v42   ;;  %v960_v42 = vld [vmem:[%s1484_s1 + $0x58] sm:$0xf] }
  0xbc   : > { %v431_v7 = vpop.permute.xlu1 %430  ;;  %v394_v8 = vsel %vm392_vm3, %v381_v51, %v383_v6  ;;  %647 = vmatmul.bf16.gmra.mxu1 %v953_v46  ;;  %v198_v51 = vld [vmem:[%s1485_s2 + $0x10] sm:$0xff] }
  0xbd   : > { %689 = vmatpush.bf16.msrb.mxu2 %v394_v8  ;;  %v444_v9 = vsel %vm442_vm1, %v431_v7, %v433_v58  ;;  %v364_v10 = vpop.permute.xlu2 %363 }
  0xbe   : > { %718 = vmatpush.bf16.msra.mxu3 %v444_v9  ;;  %v921_v9 = vor.u32 %v1001_v4, %v920_v3  ;;  %v974_v3 = vld [vmem:[%s1484_s1 + $0x8c] sm:$0xf0] }
  0xc2   : > { %488 = vperm.xlu0 %1088, %v198_v51  }
  0xc3   : > { %v331_v11 = vpop.permute.xlu0 %330  ;;  %493 = vperm.xlu1 %1086, %v199_v52   ;;  %v1008_v52 = vld [vmem:[%s1484_s1 + $0x54] sm:$0xf] }
  0xc4   : > { %v333_v12 = vpop.permute.xlu1 %332 }
  0xc5   : > { %v344_v13 = vsel %vm342_vm2, %v331_v11, %v333_v12  ;;  %v416_v15 = vpop.permute.xlu2 %415  ;;  %v999_v12 = vld [vmem:[%s1484_s1 + $0xc] sm:$0xf] }
  0xc6   : > { %660 = vmatpush.bf16.msrb.mxu1 %v344_v13  ;;  %v922_v13 = vld [vmem:[%s1484_s1 + $0x1c] sm:$0xf0] }
  0xca   : > { %513 = vperm.xlu0 %1088, %v203_v2   ;;  %v1013_v2 = vld [vmem:[%s1484_s1 + $0x7c] sm:$0xf] }
  0xcb   : > { %v379_v14 = vpop.permute.xlu0 %378  ;;  %503 = vperm.xlu1 %1086, %v201_v0   ;;  %v968_v0 = vld [vmem:[%s1484_s1 + $0x60] sm:$0xf] }
  0xcc   : > { %v427_v16 = vpop.permute.xlu1 %426  ;;  %v393_v17 = vsel %vm392_vm3, %v377_v1, %v379_v14 }
  0xcd   : > { %690 = vmatpush.bf16.msrb.mxu2 %v393_v17  ;;  %v443_v18 = vsel %vm442_vm1, %v427_v16, %v429_v5  ;;  %v360_v22 = vpop.permute.xlu2 %359 }
  0xce   : > { %719 = vmatpush.bf16.msra.mxu3 %v443_v18  ;;  %v925_v18 = vor.u32 %v999_v12, %v922_v13 }
  0xd3   : > { %v327_v19 = vpop.permute.xlu0 %326 }
  0xd4   : > { %v329_v20 = vpop.permute.xlu1 %328 }
  0xd5   : > { %v343_v21 = vsel %vm342_vm2, %v327_v19, %v329_v20  ;;  %v412_v30 = vpop.permute.xlu2 %411  ;;  %v998_v19 = vld [vmem:[%s1484_s1 + $0x4] sm:$0xf] }
  0xd6   : > { %661 = vmatpush.bf16.msrb.mxu1 %v343_v21  ;;  %v914_v21 = vld [vmem:[%s1484_s1 + $0x14] sm:$0xf0] }
  0xd7   : > { %v917_v29 = vor.u32 %v998_v19, %v914_v21 }
  0xdb   : > { %v366_v23 = vpop.permute.xlu0 %365 }
  0xdc   : > { %v414_v24 = vpop.permute.xlu1 %413  ;;  %v371_v25 = vsel %vm367_vm4, %v364_v10, %v366_v23  ;;  %v197_v10 = vld [vmem:[%s1485_s2 + $0x8] sm:$0xff]  ;;  %v1006_v23 = vld [vmem:[%s1484_s1 + $0x40] sm:$0xf0] }
  0xdd   : > { %691 = vmatpush.bf16.msrb.mxu2 %v371_v25  ;;  %v421_v26 = vsel %vm417_vm5, %v414_v24, %v416_v15  ;;  %v356_v34 = vpop.permute.xlu2 %355  ;;  %483 = vperm.xlu2 %1087, %v197_v10   ;;  %v200_v15 = vld [vmem:[%s1485_s2 + $0x20] sm:$0xff]  ;;  %v202_v25 = vld [vmem:[%s1485_s2 + $0x30] sm:$0xff] }
  0xde   : > { %720 = vmatpush.bf16.msra.mxu3 %v421_v26 }
  0xe3   : > { %v314_v31 = vpop.permute.xlu0 %313 }
  0xe4   : > { %v316_v32 = vpop.permute.xlu1 %315 }
  0xe5   : > { %v321_v33 = vsel %vm317_vm6, %v314_v31, %v316_v32  ;;  %v408_v48 = vpop.permute.xlu2 %407  ;;  %498 = vperm.xlu2 %1087, %v200_v15   ;;  %v1004_v31 = vld [vmem:[%s1484_s1 + $0x34] sm:$0xf]  ;;  %v942_v32 = vld [vmem:[%s1484_s1 + $0x44] sm:$0xf0] }
  0xe6   : > { %662 = vmatpush.bf16.msrb.mxu1 %v321_v33  ;;  %v945_v36 = vor.u32 %v1004_v31, %v942_v32 }
  0xeb   : > { %v362_v35 = vpop.permute.xlu0 %361 }
  0xec   : > { %v410_v38 = vpop.permute.xlu1 %409  ;;  %v370_v39 = vsel %vm367_vm4, %v360_v22, %v362_v35  ;;  %v940_v22 = vld [vmem:[%s1484_s1 + $0x30] sm:$0xf] }
  0xed   : > { %692 = vmatpush.bf16.msrb.mxu2 %v370_v39  ;;  %v420_v41 = vsel %vm417_vm5, %v410_v38, %v412_v30  ;;  %v306_v60 = vpop.permute.xlu2 %305  ;;  %v941_v30 = vor.u32 %v1006_v23, %v940_v22  ;;  %508 = vperm.xlu2 %1087, %v202_v25   ;;  %v1003_v38 = vld [vmem:[%s1484_s1 + $0x2c] sm:$0xf]  ;;  %v928_v39 = vld [vmem:[%s1484_s1 + $0x10] sm:$0xf] }
  0xee   : > { %721 = vmatpush.bf16.msra.mxu3 %v420_v41  ;;  %v934_v41 = vld [vmem:[%s1484_s1 + $0x3c] sm:$0xf0]  ;;  %v929_v46 = vor.u32 %v1002_v40, %v928_v39 }
  0xf3   : > { %v310_v47 = vpop.permute.xlu0 %309 }
  0xf4   : > { %v312_v49 = vpop.permute.xlu1 %311 }
  0xf5   : > { %v320_v50 = vsel %vm317_vm6, %v310_v47, %v312_v49  ;;  %v354_v1 = vpop.permute.xlu2 %353  ;;  %v937_v47 = vor.u32 %v1003_v38, %v934_v41  ;;  %v1009_v49 = vld [vmem:[%s1484_s1 + $0x5c] sm:$0xf] }
  0xf6   : > { %663 = vmatpush.bf16.msrb.mxu1 %v320_v50  ;;  %v962_v50 = vld [vmem:[%s1484_s1 + $0x6c] sm:$0xf0] }
  0xf7   : > { %v965_v51 = vor.u32 %v1009_v49, %v962_v50 }
  0xfb   : > { %v358_v56 = vpop.permute.xlu0 %357 }
  0xfc   : > { %v406_v57 = vpop.permute.xlu1 %405  ;;  %v369_v58 = vsel %vm367_vm4, %v356_v34, %v358_v56  ;;  %v980_v56 = vld [vmem:[%s1484_s1 + $0x80] sm:$0xf] }
  0xfd   : > { %693 = vmatpush.bf16.msrb.mxu2 %v369_v58  ;;  %v419_v59 = vsel %vm417_vm5, %v406_v57, %v408_v48  ;;  %v460_v11 = vpop.permute.xlu2 %459  ;;  %v961_v48 = vor.u32 %v1011_v43, %v960_v42  ;;  %v1016_v57 = vld [vmem:[%s1484_s1 + $0x90] sm:$0xf0]  ;;  %v949_v58 = vor.u32 %v1007_v54, %v948_v53 }
  0xfe   : > { %722 = vmatpush.bf16.msra.mxu3 %v419_v59  ;;  %v957_v59 = vor.u32 %v1008_v52, %v954_v55 }
 0x104   : > { %v464_v61 = vpop.permute.xlu0 %463 }
 0x105   : > { %v466_v62 = vpop.permute.xlu1 %465  ;;  %v304_v20 = vpop.permute.xlu2 %303 }
 0x106   : > { %v471_v63 = vsel %vm467_vm7, %v464_v61, %v466_v62  ;;  %v1014_v61 = vld [vmem:[%s1484_s1 + $0x84] sm:$0xf]  ;;  %v982_v62 = vld [vmem:[%s1484_s1 + $0x94] sm:$0xf0] }
 0x107   : > { %749 = vmatpush.bf16.msrb.mxu0 %v471_v63  ;;  %v985_v63 = vor.u32 %v1014_v61, %v982_v62 }
 0x10c   : > { %v308_v5 = vpop.permute.xlu0 %307 }
 0x10d   : > { %v352_v6 = vpop.permute.xlu1 %351  ;;  %v319_v7 = vsel %vm317_vm6, %v306_v60, %v308_v5  ;;  %v452_v37 = vpop.permute.xlu2 %451  ;;  %v981_v60 = vor.u32 %v1016_v57, %v980_v56  ;;  %v977_v5 = vor.u32 %v1013_v2, %v974_v3 }
 0x10e   : > { %664 = vmatpush.bf16.msrb.mxu1 %v319_v7  ;;  %v368_v8 = vsel %vm367_vm4, %v352_v6, %v354_v1  ;;  %v1012_v1 = vld [vmem:[%s1484_s1 + $0x70] sm:$0xf0]  ;;  %v988_v6 = vld [vmem:[%s1484_s1 + $0x88] sm:$0xf]  ;;  %v1017_v7 = vld [vmem:[%s1484_s1 + $0x98] sm:$0xf0] }
 0x10f   : > { %694 = vmatpush.bf16.msrb.mxu2 %v368_v8  ;;  %v969_v4 = vor.u32 %v1012_v1, %v968_v0  ;;  %v989_v8 = vor.u32 %v1017_v7, %v988_v6 }
 0x112   : > { %695 = vmatmul.bf16.vlgmr.msrb.gmra.mxu2 %v921_v9 }
 0x114   : > { %v402_v14 = vpop.permute.xlu0 %401 }
 0x115   : > { %v404_v16 = vpop.permute.xlu1 %403 }
 0x116   : > { %v418_v17 = vsel %vm417_vm5, %v402_v14, %v404_v16 }
 0x117   : > { %723 = vmatpush.bf16.msra.mxu3 %v418_v17 }
 0x11a   : > { %724 = vmatmul.bf16.vlgmr.msra.gmra.mxu3 %v925_v18 }
 0x11c   : > { %v462_v24 = vpop.permute.xlu0 %461 }
 0x11d   : > { %v302_v26 = vpop.permute.xlu1 %301  ;;  %v470_v27 = vsel %vm467_vm7, %v460_v11, %v462_v24 }
 0x11e   : > { %v318_v28 = vsel %vm317_vm6, %v302_v26, %v304_v20  ;;  %750 = vmatpush.bf16.msrb.mxu0 %v470_v27 }
 0x11f   : > { %665 = vmatpush.bf16.msrb.mxu1 %v318_v28 }
 0x122   : > { %666 = vmatmul.bf16.vlgmr.msrb.gmra.mxu1 %v917_v29  ;;  %700 = vmatmul.bf16.gmra.mxu2 %v941_v30 }
 0x124   : > { %v456_v33 = vpop.permute.xlu0 %455 }
 0x125   : > { %v458_v34 = vpop.permute.xlu1 %457 }
 0x126   : > { %v469_v35 = vsel %vm467_vm7, %v456_v33, %v458_v34 }
 0x127   : > { %751 = vmatpush.bf16.msrb.mxu0 %v469_v35 }
 0x129   : > { %v643_v9 = vpop.f32.mrf.mxu1  ;;  %v638_v16 = vpop.f32.mrf.mxu0 }
 0x12a   : > { %729 = vmatmul.bf16.gmra.mxu3 %v945_v36 }
 0x12c   : > { %v454_v44 = vpop.permute.xlu0 %453 }
 0x12d   : > { %v468_v45 = vsel %vm467_vm7, %v452_v37, %v454_v44  ;;  %v479_v20 = vpop.permute.xlu1 %478 }
 0x12e   : > { %752 = vmatpush.bf16.msrb.mxu0 %v468_v45  ;;  %v639_v23 = vadd.f32 %v638_v16, %v479_v20 }
 0x131   : > { %990 = vmatmul.msk.bf16.vlgmr.msrb.gmra.mxu0 %vm616_vm8, %v929_v46  ;;  %v645_v10 = vpop.f32.mrf.mxu1  ;;  %v640_v21 = vpop.f32.mrf.mxu0 }
 0x132   : > { %671 = vmatmul.bf16.gmra.mxu1 %v937_v47  ;;  %705 = vmatmul.bf16.gmra.mxu2 %v961_v48  ;;  %v1464_v11 = vpop.f32.mrf.mxu2 }
 0x134   : > { %v489_v36 = vpop.permute.xlu0 %488 }
 0x135   : > { %v494_v43 = vpop.permute.xlu1 %493  ;;  %v644_v44 = vadd.f32 %v643_v9, %v489_v36 }
 0x136   : > { %v646_v48 = vadd.f32 %v645_v10, %v494_v43 }
 0x137   : > { %v484_v25 = vpop.permute.xlu2 %483 }
 0x138   : > { %v641_v27 = vadd.f32 %v640_v21, %v484_v25 }
 0x139   : > { %v648_v12 = vpop.f32.mrf.mxu1 }
 0x13a   : > { %734 = vmatmul.bf16.gmra.mxu3 %v965_v51  ;;  %v1466_v13 = vpop.f32.mrf.mxu2 }
 0x13c   : > { %v514_v25 = vpop.permute.xlu0 %513 }
 0x13d   : > { %v504_v1 = vpop.permute.xlu1 %503 }
 0x13f   : > { %v499_v0 = vpop.permute.xlu2 %498 }
 0x140   : > { %v649_v2 = vadd.f32 %v648_v12, %v499_v0 }
 0x141   : > { %991 = vmatmul.msk.bf16.gmra.mxu0 %vm616_vm8, %v949_v58  ;;  %v650_v14 = vpop.f32.mrf.mxu1 }
 0x142   : > { %676 = vmatmul.bf16.gmra.mxu1 %v957_v59  ;;  %710 = vmatmul.bf16.gmra.mxu2 %v981_v60  ;;  %v651_v6 = vadd.f32 %v650_v14, %v504_v1 }
 0x14a   : > { %739 = vmatmul.bf16.gmra.mxu3 %v985_v63 }
 0x151   : > { %992 = vmatmul.msk.bf16.gmra.mxu0 %vm616_vm8, %v969_v4 }
 0x152   : > { %681 = vmatmul.bf16.gmra.mxu1 %v977_v5 }
 0x161   : > { %993 = vmatmul.msk.bf16.gmra.mxu0 %vm616_vm8, %v989_v8 }
 0x195   : > { %v696_v15 = vpop.f32.mrf.mxu2 }
 0x19d   : > { %v725_v17 = vpop.f32.mrf.mxu3  ;;  %v698_v19 = vpop.f32.mrf.mxu2 }
 0x19f   : > { %v667_v18 = vpop.f32.mrf.mxu1 }
 0x1a0   : > { %v668_v26 = vadd.f32 %v667_v18, %v639_v23  ;;  %v509_v23 = vpop.permute.xlu2 %508 }
 0x1a1   : > { %v654_v14 = vadd.f32 %v1464_v11, %v509_v23 }
 0x1a2   : > { %v697_v31 = vadd.f32 %v696_v15, %v668_v26 }
 0x1a4   : > { %v726_v35 = vadd.f32 %v725_v17, %v697_v31 }
 0x1a5   : > { %v727_v22 = vpop.f32.mrf.mxu3  ;;  %v701_v28 = vpop.f32.mrf.mxu2 }
 0x1a7   : > { %v669_v24 = vpop.f32.mrf.mxu1 }
 0x1a8   : > { %v670_v29 = vadd.f32 %v669_v24, %v641_v27 }
 0x1aa   : > { %v699_v34 = vadd.f32 %v698_v19, %v670_v29 }
 0x1ac   : > { %v728_v37 = vadd.f32 %v727_v22, %v699_v34 }
 0x1ad   : > { %v730_v33 = vpop.f32.mrf.mxu3  ;;  %v703_v40 = vpop.f32.mrf.mxu2 }
 0x1ae   : > { %v754_v30 = vpop.f32.mrf.mxu0 }
 0x1af   : > { %v672_v32 = vpop.f32.mrf.mxu1  ;;  %v755_v38 = vadd.f32 %v754_v30, %v726_v35  ;;  %v656_v30 = vadd.f32 %v1466_v13, %v514_v25 }
 0x1b0   : > { %v673_v49 = vadd.f32 %v672_v32, %v644_v44 }
 0x1b1   : > { %v774_v45 = vmax.f32 %v755_v38, 0.0 }
 0x1b2   : > { %v702_v53 = vadd.f32 %v701_v28, %v673_v49 }
 0x1b4   : > { %v731_v57 = vadd.f32 %v730_v33, %v702_v53 }
 0x1b5   : > { %v732_v47 = vpop.f32.mrf.mxu3  ;;  %v706_v55 = vpop.f32.mrf.mxu2 }
 0x1b6   : > { %v756_v39 = vpop.f32.mrf.mxu0 }
 0x1b7   : > { %v674_v41 = vpop.f32.mrf.mxu1  ;;  %v757_v42 = vadd.f32 %v756_v39, %v728_v37 }
 0x1b8   : > { %v675_v51 = vadd.f32 %v674_v41, %v646_v48 }
 0x1b9   : > { %v775_v46 = vmax.f32 %v757_v42, 0.0 }
 0x1ba   : > { %v704_v56 = vadd.f32 %v703_v40, %v675_v51 }
 0x1bb   : > { %v1033_v50 = vpack.c.bf16 %v775_v46, %v774_v45 }
 0x1bc   : > { %v733_v59 = vadd.f32 %v732_v47, %v704_v56 }
 0x1bd   : > { %1034 = vst [vmem:[%s1472_s25] sm:$0xff] %v1033_v50   ;;  %v735_v58 = vpop.f32.mrf.mxu3  ;;  %v708_v5 = vpop.f32.mrf.mxu2 }
 0x1be   : > { %v759_v52 = vpop.f32.mrf.mxu0 }
 0x1bf   : > { %v677_v54 = vpop.f32.mrf.mxu1  ;;  %v760_v60 = vadd.f32 %v759_v52, %v731_v57 }
 0x1c0   : > { %v678_v7 = vadd.f32 %v677_v54, %v649_v2 }
 0x1c1   : > { %v776_v3 = vmax.f32 %v760_v60, 0.0 }
 0x1c2   : > { %v707_v16 = vadd.f32 %v706_v55, %v678_v7 }
 0x1c4   : > { %v736_v19 = vadd.f32 %v735_v58, %v707_v16 }
 0x1c5   : > { %v737_v10 = vpop.f32.mrf.mxu3  ;;  %v711_v20 = vpop.f32.mrf.mxu2 }
 0x1c6   : > { %v761_v61 = vpop.f32.mrf.mxu0 }
 0x1c7   : > { %v679_v62 = vpop.f32.mrf.mxu1  ;;  %v762_v63 = vadd.f32 %v761_v61, %v733_v59 }
 0x1c8   : > { %v680_v9 = vadd.f32 %v679_v62, %v651_v6 }
 0x1c9   : > { %v777_v4 = vmax.f32 %v762_v63, 0.0 }
 0x1ca   : > { %v709_v18 = vadd.f32 %v708_v5, %v680_v9 }
 0x1cb   : > { %v1038_v8 = vpack.c.bf16 %v777_v4, %v776_v3 }
 0x1cc   : > { %v738_v21 = vadd.f32 %v737_v10, %v709_v18 }
 0x1cd   : > { %1050 = vst [vmem:[%s1472_s25 + $0x8] sm:$0xff] %v1038_v8   ;;  %v740_v26 = vpop.f32.mrf.mxu3  ;;  %v713_v34 = vpop.f32.mrf.mxu2 }
 0x1ce   : > { %v764_v15 = vpop.f32.mrf.mxu0 }
 0x1cf   : > { %v682_v17 = vpop.f32.mrf.mxu1  ;;  %v765_v22 = vadd.f32 %v764_v15, %v736_v19 }
 0x1d0   : > { %v683_v31 = vadd.f32 %v682_v17, %v654_v14 }
 0x1d1   : > { %v778_v27 = vmax.f32 %v765_v22, 0.0 }
 0x1d2   : > { %v712_v36 = vadd.f32 %v711_v20, %v683_v31 }
 0x1d4   : > { %v741_v39 = vadd.f32 %v740_v26, %v712_v36 }
 0x1d5   : > { %v742_v38 = vpop.f32.mrf.mxu3 }
 0x1d6   : > { %v766_v12 = vpop.f32.mrf.mxu0 }
 0x1d7   : > { %v767_v24 = vadd.f32 %v766_v12, %v738_v21  ;;  %v684_v29 = vpop.f32.mrf.mxu1 }
 0x1d8   : > { %v685_v33 = vadd.f32 %v684_v29, %v656_v30 }
 0x1d9   : > { %v779_v28 = vmax.f32 %v767_v24, 0.0 }
 0x1da   : > { %v714_v37 = vadd.f32 %v713_v34, %v685_v33 }
 0x1db   : > { %v1043_v32 = vpack.c.bf16 %v779_v28, %v778_v27 }
 0x1dc   : > { %v743_v40 = vadd.f32 %v742_v38, %v714_v37 }
 0x1dd   : > { %1051 = vst [vmem:[%s1472_s25 + $0x10] sm:$0xff] %v1043_v32  }
 0x1de   : > { %v769_v35 = vpop.f32.mrf.mxu0 }
 0x1df   : > { %v770_v41 = vadd.f32 %v769_v35, %v741_v39 }
 0x1e1   : > { %v780_v43 = vmax.f32 %v770_v41, 0.0 }
 0x1e6   : > { %v771_v42 = vpop.f32.mrf.mxu0 }
 0x1e7   : > { %v772_v11 = vadd.f32 %v771_v42, %v743_v40 }
 0x1e9   : > { %v781_v44 = vmax.f32 %v772_v11, 0.0 }
 0x1eb   : > { %v1048_v45 = vpack.c.bf16 %v781_v44, %v780_v43 }
 0x1ed   : > { %1052 = vst [vmem:[%s1472_s25 + $0x18] sm:$0xff] %v1048_v45  }
 0x1ee PF: > { %s13_s12 = sadd.s32 1, %s1095_s12  }
 0x1ef   : > { %p10_p4 = scmp.ge.s32.totalorder %s13_s12, 4  }
 0x1f1   :  { %12 = sbr.rel (!%p10_p4) target bundleno = 1 (0x1), region = 62 }

// kernel: unet_forward.26
= control target key start
LH: loop header
LB: loop body
LE: loop exit
PB: predicated region body
PF: predicated region fallthrough
CT: control target
= control target key end

     0   :  { %s1570_s12 = smov 0   ;;  %s2115_s0 = inlined_call_operand.vmem [shape: bf16[2,64,256], index: 0, kind: input, shape index: {}]   ;;  %s2116_s1 = inlined_call_operand.vmem [shape: bf16[128,576], index: 1, kind: input, shape index: {}]   ;;  %s2117_s2 = inlined_call_operand.vmem [shape: f32[128,1], index: 2, kind: input, shape index: {}]   ;;  %s2118_s3 = inlined_call_operand.vmem [shape: bf16[2,128,128], index: 3, kind: output, shape index: {}]  }
   0x1 LB: > { %s1161_s13 = sadd.s32 4294967295, %s1539_s12   ;;  %p1165_p0 = scmp.ge.s32.totalorder %s1539_s12, 1  ;;  %s1539_s12 = sphi %s1570_s12, %s13_s12  }
   0x2   : > { %p137_p1 = scmp.lt.s32.totalorder %s1539_s12, 3 }
   0x4   : > { %p138_p2 = pnand %p1165_p0, %p137_p1 }
   0x5   : > { %p161_p3 = scmp.lt.s32.totalorder (!%p138_p2), %s1161_s13, 1  ;;  %s1541_s18 = smov (!%p138_p2), 127  }
   0x6   : > { %141 = sbr.rel (%p138_p2) target bundleno = 559 (0x22f), region = 32  ;;  %s1542_s19 = smov (!%p138_p2), 122  }
   0x7   : > { %s1543_s20 = smov (!%p138_p2), 119   ;;  %s1544_s21 = smov (!%p138_p2), 124  }
   0x8   : > { %s1545_s22 = smov (!%p138_p2), 123   ;;  %s1546_s23 = smov (!%p138_p2), 120  }
   0x9   : > { %s1547_s24 = smov (!%p138_p2), 126   ;;  %s1548_s25 = smov (!%p138_p2), 118  }
   0xb   : > { %s2120_s13 = smov (!%p161_p3, %s1161_s13), 1  ;;  %vm324_vm0 = vcmask 1039360   ;;  %vm374_vm1 = vcmask 1014784   ;;  %vm424_vm2 = vcmask 998400   ;;  %vm474_vm3 = vcmask 973824  }
   0xc   : > { %s1388_s14 = sshll.u32 %s2120_s13, 6  ;;  %vm399_vm4 = vcmask 1006592   ;;  %vm449_vm5 = vcmask 982016   ;;  %vm349_vm6 = vcmask 1031168   ;;  %vm499_vm7 = vcmask 965632  }
   0xd   : > { %s1586_s17 = scalar_lea.vmem %s2115_s0, %s1388_s14  ;;  %vm788_vm8 = vcmask 523264   ;;  %s2090_s28 = scalar_lea.vmem %s2118_s3, %s1388_s14 }
   0xe   : > { %v1212_v0 = vld [vmem:[%s1586_s17 + $0x30] sm:$0xf]  ;;  %v1441_v1 = vld [vmem:[%s1586_s17 + $0x34] sm:$0xf0]  ;;  %v1204_v2 = vld [vmem:[%s1586_s17 + $0x20] sm:$0xf] }
   0xf   : > { %v1591_v3 = vor.u32 %v1441_v1, %v1212_v0  ;;  %v1439_v4 = vld [vmem:[%s1586_s17 + $0x24] sm:$0xf0]  ;;  %v1440_v6 = vld [vmem:[%s1586_s17 + $0x34] sm:$0xf]  ;;  %v1214_v7 = vld [vmem:[%s1586_s17 + $0x38] sm:$0xf0] }
  0x10   : > { %v1594_v5 = vor.u32 %v1439_v4, %v1204_v2  ;;  %v1196_v8 = vld [vmem:[%s1586_s17 + $0x10] sm:$0xf]  ;;  %v1437_v9 = vld [vmem:[%s1586_s17 + $0x14] sm:$0xf0]  ;;  %v1438_v10 = vld [vmem:[%s1586_s17 + $0x24] sm:$0xf]  ;;  %v1606_v13 = vor.u32 %v1440_v6, %v1214_v7 }
  0x11   : > { %320 = vrot.lane.b32.xlu0 %v1591_v3, %s1541_s18  ;;  %v1206_v11 = vld [vmem:[%s1586_s17 + $0x28] sm:$0xf0]  ;;  %v1604_v12 = vor.u32 %v1437_v9, %v1196_v8  ;;  %v1436_v15 = vld [vmem:[%s1586_s17 + $0x14] sm:$0xf]  ;;  %v1198_v16 = vld [vmem:[%s1586_s17 + $0x18] sm:$0xf0] }
  0x12   : > { %316 = vrot.lane.b32.xlu1 %v1594_v5, %s1541_s18  ;;  %v1609_v14 = vor.u32 %v1438_v10, %v1206_v11  ;;  %v1614_v17 = vor.u32 %v1436_v15, %v1198_v16  ;;  %v1188_v18 = vld [vmem:[%s1586_s17] sm:$0xf]  ;;  %v1435_v19 = vld [vmem:[%s1586_s17 + $0x4] sm:$0xf0]  ;;  %v1434_v20 = vld [vmem:[%s1586_s17 + $0x4] sm:$0xf] }
  0x13   : > { %312 = vrot.lane.b32.xlu2 %v1604_v12, %s1541_s18  ;;  %v1190_v21 = vld [vmem:[%s1586_s17 + $0x8] sm:$0xf0]  ;;  %v1621_v22 = vor.u32 %v1435_v19, %v1188_v18  ;;  %v1184_v38 = vld [vmem:[%s1586_s17 + $0x30] sm:$0xf]  ;;  %v1433_v39 = vld [vmem:[%s1586_s17 + $0x34] sm:$0xf0] }
  0x14   : > { %v1624_v23 = vor.u32 %v1434_v20, %v1190_v21  ;;  %v1185_v42 = vor.u32 %v1433_v39, %v1184_v38  ;;  %v1180_v43 = vld [vmem:[%s1586_s17 + $0x20] sm:$0xf]  ;;  %v1432_v44 = vld [vmem:[%s1586_s17 + $0x24] sm:$0xf0]  ;;  %v1176_v48 = vld [vmem:[%s1586_s17 + $0x10] sm:$0xf] }
  0x15   : > { %v1181_v47 = vor.u32 %v1432_v44, %v1180_v43  ;;  %v1431_v49 = vld [vmem:[%s1586_s17 + $0x14] sm:$0xf0]  ;;  %v1172_v52 = vld [vmem:[%s1586_s17] sm:$0xf]  ;;  %v1430_v53 = vld [vmem:[%s1586_s17 + $0x4] sm:$0xf0] }
  0x16   : > { %v1177_v51 = vor.u32 %v1431_v49, %v1176_v48  ;;  %v1173_v56 = vor.u32 %v1430_v53, %v1172_v52  ;;  %v220_v38 = vld [vmem:[%s2117_s2] sm:$0xff]  ;;  %v1392_v44 = vld [vmem:[%s2116_s1 + $0x10] sm:$0xf0]  ;;  %v227_v49 = vld [vmem:[%s2117_s2 + $0x38] sm:$0xff] }
  0x17   : > { %v1220_v43 = vld [vmem:[%s2116_s1] sm:$0xf]  ;;  %v1320_v52 = vld [vmem:[%s2116_s1 + $0xc8] sm:$0xf]  ;;  %v1417_v53 = vld [vmem:[%s2116_s1 + $0xd8] sm:$0xf0] }
  0x19   : > { %322 = vrot.lane.b32.xlu0 %v1606_v13, %s1541_s18 }
  0x1a   : > { %318 = vrot.lane.b32.xlu1 %v1609_v14, %s1541_s18 }
  0x1b   : > { %314 = vrot.lane.b32.xlu2 %v1614_v17, %s1541_s18 }
  0x21   : > { %308 = vrot.lane.b32.xlu0 %v1621_v22, %s1541_s18 }
  0x22   : > { %310 = vrot.lane.b32.xlu1 %v1624_v23, %s1541_s18 }
  0x23   : > { %420 = vrot.lane.b32.xlu2 %v1591_v3, %s1542_s19 }
  0x29   : > { %422 = vrot.lane.b32.xlu0 %v1606_v13, %s1542_s19 }
  0x2a   : > { %470 = vrot.lane.b32.xlu1 %v1591_v3, %s1543_s20 }
  0x2b   : > { %472 = vrot.lane.b32.xlu2 %v1606_v13, %s1543_s20 }
  0x31   : > { %370 = vrot.lane.b32.xlu0 %v1591_v3, %s1544_s21 }
  0x32   : > { %372 = vrot.lane.b32.xlu1 %v1606_v13, %s1544_s21 }
  0x33   : > { %416 = vrot.lane.b32.xlu2 %v1594_v5, %s1542_s19 }
  0x39   : > { %418 = vrot.lane.b32.xlu0 %v1609_v14, %s1542_s19 }
  0x3a   : > { %466 = vrot.lane.b32.xlu1 %v1594_v5, %s1543_s20 }
  0x3b   : > { %468 = vrot.lane.b32.xlu2 %v1609_v14, %s1543_s20 }
  0x41   : > { %366 = vrot.lane.b32.xlu0 %v1594_v5, %s1544_s21 }
  0x42   : > { %368 = vrot.lane.b32.xlu1 %v1609_v14, %s1544_s21 }
  0x43   : > { %412 = vrot.lane.b32.xlu2 %v1604_v12, %s1542_s19 }
  0x49   : > { %414 = vrot.lane.b32.xlu0 %v1614_v17, %s1542_s19 }
  0x4a   : > { %462 = vrot.lane.b32.xlu1 %v1604_v12, %s1543_s20 }
  0x4b   : > { %464 = vrot.lane.b32.xlu2 %v1614_v17, %s1543_s20 }
  0x51   : > { %362 = vrot.lane.b32.xlu0 %v1604_v12, %s1544_s21 }
  0x52   : > { %364 = vrot.lane.b32.xlu1 %v1614_v17, %s1544_s21 }
  0x53   : > { %408 = vrot.lane.b32.xlu2 %v1621_v22, %s1542_s19 }
  0x59   : > { %410 = vrot.lane.b32.xlu0 %v1624_v23, %s1542_s19 }
  0x5a   : > { %458 = vrot.lane.b32.xlu1 %v1621_v22, %s1543_s20 }
  0x5b   : > { %460 = vrot.lane.b32.xlu2 %v1624_v23, %s1543_s20 }
  0x61   : > { %358 = vrot.lane.b32.xlu0 %v1621_v22, %s1544_s21 }
  0x62   : > { %360 = vrot.lane.b32.xlu1 %v1624_v23, %s1544_s21 }
  0x63   : > { %395 = vrot.lane.b32.xlu2 %v1591_v3, %s1545_s22 }
  0x69   : > { %397 = vrot.lane.b32.xlu0 %v1606_v13, %s1545_s22 }
  0x6a   : > { %445 = vrot.lane.b32.xlu1 %v1591_v3, %s1546_s23 }
  0x6b   : > { %447 = vrot.lane.b32.xlu2 %v1606_v13, %s1546_s23 }
  0x6d   : > { %v313_v24 = vpop.permute.xlu2 %312 }
  0x71   : > { %345 = vrot.lane.b32.xlu0 %v1591_v3, %s1547_s24 }
  0x72   : > { %347 = vrot.lane.b32.xlu1 %v1606_v13, %s1547_s24 }
  0x73   : > { %391 = vrot.lane.b32.xlu2 %v1594_v5, %s1545_s22 }
  0x75   : > { %v315_v25 = vpop.permute.xlu2 %314 }
  0x76   : > { %v326_v36 = vsel %vm324_vm0, %v313_v24, %v315_v25 }
  0x79   : > { %393 = vrot.lane.b32.xlu0 %v1609_v14, %s1545_s22 }
  0x7a   : > { %441 = vrot.lane.b32.xlu1 %v1594_v5, %s1546_s23 }
  0x7b   : > { %443 = vrot.lane.b32.xlu2 %v1609_v14, %s1546_s23 }
  0x7d   : > { %v1672_v26 = vpop.permute.xlu2 %420 }
  0x81   : > { %341 = vrot.lane.b32.xlu0 %v1594_v5, %s1547_s24 }
  0x82   : > { %343 = vrot.lane.b32.xlu1 %v1609_v14, %s1547_s24 }
  0x83   : > { %v321_v27 = vpop.permute.xlu0 %320  ;;  %387 = vrot.lane.b32.xlu2 %v1604_v12, %s1545_s22 }
  0x84   : > { %v317_v28 = vpop.permute.xlu1 %316 }
  0x85   : > { %v1680_v29 = vpop.permute.xlu2 %472 }
  0x89   : > { %389 = vrot.lane.b32.xlu0 %v1614_v17, %s1545_s22 }
  0x8a   : > { %437 = vrot.lane.b32.xlu1 %v1604_v12, %s1546_s23 }
  0x8b   : > { %v323_v30 = vpop.permute.xlu0 %322  ;;  %439 = vrot.lane.b32.xlu2 %v1614_v17, %s1546_s23 }
  0x8c   : > { %v328_v31 = vsel %vm324_vm0, %v321_v27, %v323_v30  ;;  %v319_v32 = vpop.permute.xlu1 %318  ;;  %v1412_v27 = vld [vmem:[%s2116_s1 + $0xb0] sm:$0xf0]  ;;  %v1340_v30 = vld [vmem:[%s2116_s1 + $0xf0] sm:$0xf] }
  0x8d   : > { %813 = vmatpush.bf16.msra.mxu0 %v328_v31  ;;  %1489 = vmatpush.bf16.msra.mxu1 %v328_v31  ;;  %v1689_v33 = vpop.permute.xlu2 %416  ;;  %v327_v34 = vsel %vm324_vm0, %v317_v28, %v319_v32  ;;  %v1260_v32 = vld [vmem:[%s2116_s1 + $0x50] sm:$0xf] }
  0x8e   : > { %1490 = vmatpush.bf16.msra.mxu2 %v328_v31  ;;  %1491 = vmatpush.bf16.msra.mxu3 %v328_v31  ;;  %v1422_v31 = vld [vmem:[%s2116_s1 + $0x100] sm:$0xf0] }
  0x91   : > { %814 = vmatpush.bf16.msra.mxu0 %v327_v34  ;;  %1492 = vmatpush.bf16.msra.mxu1 %v327_v34 }
  0x92   : > { %1493 = vmatpush.bf16.msra.mxu2 %v327_v34  ;;  %1494 = vmatpush.bf16.msra.mxu3 %v327_v34  ;;  %v1341_v34 = vor.u32 %v1422_v31, %v1340_v30 }
  0x93   : > { %495 = vrot.lane.b32.xlu0 %v1591_v3, %s1548_s25  ;;  %497 = vrot.lane.b32.xlu1 %v1606_v13, %s1548_s25  ;;  %v309_v35 = vpop.permute.xlu0 %308 }
  0x94   : > { %v311_v37 = vpop.permute.xlu1 %310  ;;  %337 = vrot.lane.b32.xlu2 %v1604_v12, %s1547_s24 }
  0x95   : > { %815 = vmatpush.bf16.msra.mxu0 %v326_v36  ;;  %1495 = vmatpush.bf16.msra.mxu1 %v326_v36  ;;  %v469_v40 = vpop.permute.xlu2 %468  ;;  %v325_v41 = vsel %vm324_vm0, %v309_v35, %v311_v37  ;;  %v1402_v35 = vld [vmem:[%s2116_s1 + $0x60] sm:$0xf0]  ;;  %v1549_v37 = vmov 0  }
  0x96   : > { %1496 = vmatpush.bf16.msra.mxu2 %v326_v36  ;;  %1497 = vmatpush.bf16.msra.mxu3 %v326_v36  ;;  %v1261_v36 = vor.u32 %v1402_v35, %v1260_v32  ;;  %v232_v32 = vld [vmem:[%s2117_s2 + $0x60] sm:$0xff] }
  0x97   : > { %1530 = vset.pattern.permute.xlu1 %v1549_v37  ;;  %1532 = vset.pattern.permute.xlu0 %v1549_v37 }
  0x98   : > { %1531 = vset.pattern.permute.xlu2 %v1549_v37 }
  0x99   : > { %816 = vmatpush.bf16.msra.mxu0 %v325_v41  ;;  %1498 = vmatpush.bf16.msra.mxu1 %v325_v41 }
  0x9a   : > { %1499 = vmatpush.bf16.msra.mxu2 %v325_v41  ;;  %1500 = vmatpush.bf16.msra.mxu3 %v325_v41 }
  0x9b   : > { %339 = vrot.lane.b32.xlu0 %v1614_v17, %s1547_s24  ;;  %383 = vrot.lane.b32.xlu1 %v1621_v22, %s1545_s22  ;;  %v423_v45 = vpop.permute.xlu0 %422 }
  0x9c   : > { %v471_v46 = vpop.permute.xlu1 %470  ;;  %385 = vrot.lane.b32.xlu2 %v1624_v23, %s1545_s22  ;;  %v428_v59 = vsel %vm424_vm2, %v1672_v26, %v423_v45  ;;  %v1300_v26 = vld [vmem:[%s2116_s1 + $0xa0] sm:$0xf] }
  0x9d   : > { %1501 = vmatpush.bf16.msra.mxu1 %v1185_v42  ;;  %817 = vmatpush.bf16.msra.mxu0 %v1185_v42  ;;  %v413_v50 = vpop.permute.xlu2 %412  ;;  %v478_v61 = vsel %vm474_vm3, %v471_v46, %v1680_v29  ;;  %v1301_v29 = vor.u32 %v1412_v27, %v1300_v26  ;;  %v223_v46 = vld [vmem:[%s2117_s2 + $0x18] sm:$0xff] }
  0x9e   : > { %1502 = vmatpush.bf16.msra.mxu2 %v1185_v42  ;;  %1503 = vmatpush.bf16.msra.mxu3 %v1185_v42 }
  0xa1   : > { %1504 = vmatpush.bf16.msra.mxu1 %v1181_v47  ;;  %818 = vmatpush.bf16.msra.mxu0 %v1181_v47 }
  0xa2   : > { %1505 = vmatpush.bf16.msra.mxu2 %v1181_v47  ;;  %1506 = vmatpush.bf16.msra.mxu3 %v1181_v47  ;;  %v1221_v47 = vor.u32 %v1392_v44, %v1220_v43  ;;  %v1398_v43 = vld [vmem:[%s2116_s1 + $0x40] sm:$0xf0] }
  0xa3   : > { %433 = vrot.lane.b32.xlu0 %v1621_v22, %s1546_s23  ;;  %435 = vrot.lane.b32.xlu1 %v1624_v23, %s1546_s23  ;;  %v371_v54 = vpop.permute.xlu0 %370 }
  0xa4   : > { %v373_v55 = vpop.permute.xlu1 %372  ;;  %491 = vrot.lane.b32.xlu2 %v1594_v5, %s1548_s25 }
  0xa5   : > { %1507 = vmatpush.bf16.msra.mxu1 %v1177_v51  ;;  %819 = vmatpush.bf16.msra.mxu0 %v1177_v51  ;;  %v465_v57 = vpop.permute.xlu2 %464  ;;  %v378_v58 = vsel %vm374_vm1, %v371_v54, %v373_v55  ;;  %v1321_v55 = vor.u32 %v1417_v53, %v1320_v52  ;;  %v1250_v52 = vld [vmem:[%s2116_s1 + $0x44] sm:$0xf0] }
  0xa6   : > { %1508 = vmatpush.bf16.msra.mxu2 %v1177_v51  ;;  %1509 = vmatpush.bf16.msra.mxu3 %v1177_v51 }
  0xa9   : > { %1510 = vmatpush.bf16.msra.mxu1 %v1173_v56  ;;  %820 = vmatpush.bf16.msra.mxu0 %v1173_v56 }
  0xaa   : > { %1511 = vmatpush.bf16.msra.mxu2 %v1173_v56  ;;  %1512 = vmatpush.bf16.msra.mxu3 %v1173_v56  ;;  %v1360_v56 = vld [vmem:[%s2116_s1 + $0x118] sm:$0xf] }
  0xab   : > { %493 = vrot.lane.b32.xlu0 %v1609_v14, %s1548_s25  ;;  %333 = vrot.lane.b32.xlu1 %v1621_v22, %s1547_s24  ;;  %v419_v60 = vpop.permute.xlu0 %418 }
  0xac   : > { %v467_v62 = vpop.permute.xlu1 %466  ;;  %v427_v63 = vsel %vm424_vm2, %v1689_v33, %v419_v60  ;;  %335 = vrot.lane.b32.xlu2 %v1624_v23, %s1547_s24  ;;  %831 = vmatmul.bf16.vlgmr.msra.gmra.mxu1 %v1261_v36  ;;  %v1407_v60 = vld [vmem:[%s2116_s1 + $0x88] sm:$0xf0] }
  0xad   : > { %862 = vmatpush.bf16.msrb.mxu1 %v378_v58  ;;  %v477_v0 = vsel %vm474_vm3, %v467_v62, %v469_v40  ;;  %v409_v1 = vpop.permute.xlu2 %408  ;;  %841 = vmatmul.bf16.vlgmr.msra.gmra.mxu2 %v1301_v29  ;;  %v222_v40 = vld [vmem:[%s2117_s2 + $0x10] sm:$0xff]  ;;  %v225_v62 = vld [vmem:[%s2117_s2 + $0x28] sm:$0xff] }
  0xae   : > { %911 = vmatpush.bf16.msrb.mxu2 %v428_v59  ;;  %960 = vmatpush.bf16.msrb.mxu3 %v478_v61  ;;  %v1280_v59 = vld [vmem:[%s2116_s1 + $0x78] sm:$0xf] }
  0xaf   : > { %851 = vmatmul.bf16.vlgmr.msra.gmra.mxu3 %v1341_v34  ;;  %821 = vmatmul.bf16.vlgmr.msra.gmra.mxu0 %v1221_v47  ;;  %v1281_v61 = vor.u32 %v1407_v60, %v1280_v59  ;;  %v1230_v34 = vld [vmem:[%s2116_s1 + $0x1c] sm:$0xf0]  ;;  %v1236_v60 = vld [vmem:[%s2116_s1 + $0x10] sm:$0xf] }
  0xb0   : > { %v1242_v59 = vld [vmem:[%s2116_s1 + $0x3c] sm:$0xf0] }
  0xb2   : > { %912 = vmatpush.bf16.msrb.mxu2 %v427_v63  ;;  %961 = vmatpush.bf16.msrb.mxu3 %v477_v0 }
  0xb3   : > { %487 = vrot.lane.b32.xlu0 %v1604_v12, %s1548_s25  ;;  %489 = vrot.lane.b32.xlu1 %v1614_v17, %s1548_s25  ;;  %v367_v2 = vpop.permute.xlu0 %366 }
  0xb4   : > { %v369_v3 = vpop.permute.xlu1 %368  ;;  %483 = vrot.lane.b32.xlu2 %v1621_v22, %s1548_s25 }
  0xb5   : > { %v377_v4 = vsel %vm374_vm1, %v367_v2, %v369_v3  ;;  %v461_v5 = vpop.permute.xlu2 %460  ;;  %v230_v2 = vld [vmem:[%s2117_s2 + $0x50] sm:$0xff] }
  0xb6   : > { %863 = vmatpush.bf16.msrb.mxu1 %v377_v4 }
  0xbb   : > { %485 = vrot.lane.b32.xlu0 %v1624_v23, %s1548_s25  ;;  %v415_v6 = vpop.permute.xlu0 %414  ;;  %510 = vperm.xlu1 %1530, %v220_v38  }
  0xbc   : > { %v463_v7 = vpop.permute.xlu1 %462  ;;  %v426_v8 = vsel %vm424_vm2, %v413_v50, %v415_v6  ;;  %836 = vmatmul.bf16.gmra.mxu1 %v1281_v61  ;;  %v1397_v6 = vld [vmem:[%s2116_s1 + $0x38] sm:$0xf0]  ;;  %v1394_v61 = vld [vmem:[%s2116_s1 + $0x20] sm:$0xf0] }
  0xbd   : > { %913 = vmatpush.bf16.msrb.mxu2 %v426_v8  ;;  %v476_v9 = vsel %vm474_vm3, %v463_v7, %v465_v57  ;;  %v396_v10 = vpop.permute.xlu2 %395  ;;  %v1427_v57 = vld [vmem:[%s2116_s1 + $0x128] sm:$0xf0]  ;;  %v228_v7 = vld [vmem:[%s2117_s2 + $0x40] sm:$0xff] }
  0xbe   : > { %962 = vmatpush.bf16.msrb.mxu3 %v476_v9  ;;  %846 = vmatmul.bf16.gmra.mxu2 %v1321_v55  ;;  %v1361_v58 = vor.u32 %v1427_v57, %v1360_v56  ;;  %v1395_v57 = vld [vmem:[%s2116_s1 + $0x2c] sm:$0xf] }
  0xc0   : > { %856 = vmatmul.bf16.gmra.mxu3 %v1361_v58 }
  0xc3   : > { %v363_v11 = vpop.permute.xlu0 %362  ;;  %520 = vperm.xlu0 %1532, %v222_v40   ;;  %525 = vperm.xlu1 %1530, %v223_v46  }
  0xc4   : > { %v365_v12 = vpop.permute.xlu1 %364 }
  0xc5   : > { %v376_v13 = vsel %vm374_vm1, %v363_v11, %v365_v12  ;;  %v448_v15 = vpop.permute.xlu2 %447  ;;  %v233_v11 = vld [vmem:[%s2117_s2 + $0x68] sm:$0xff] }
  0xc6   : > { %864 = vmatpush.bf16.msrb.mxu1 %v376_v13 }
  0xcb   : > { %v411_v14 = vpop.permute.xlu0 %410  ;;  %545 = vperm.xlu0 %1532, %v227_v49   ;;  %535 = vperm.xlu1 %1530, %v225_v62   ;;  %v1268_v62 = vld [vmem:[%s2116_s1 + $0x58] sm:$0xf] }
  0xcc   : > { %v459_v16 = vpop.permute.xlu1 %458  ;;  %v425_v17 = vsel %vm424_vm2, %v409_v1, %v411_v14  ;;  %v221_v1 = vld [vmem:[%s2117_s2 + $0x8] sm:$0xff] }
  0xcd   : > { %914 = vmatpush.bf16.msrb.mxu2 %v425_v17  ;;  %v475_v18 = vsel %vm474_vm3, %v459_v16, %v461_v5  ;;  %v392_v22 = vpop.permute.xlu2 %391  ;;  %515 = vperm.xlu2 %1531, %v221_v1   ;;  %v1240_v5 = vld [vmem:[%s2116_s1 + $0x28] sm:$0xf]  ;;  %v226_v16 = vld [vmem:[%s2117_s2 + $0x30] sm:$0xff]  ;;  %v231_v17 = vld [vmem:[%s2117_s2 + $0x58] sm:$0xff] }
  0xce   : > { %963 = vmatpush.bf16.msrb.mxu3 %v475_v18  ;;  %v1241_v8 = vor.u32 %v1397_v6, %v1240_v5  ;;  %v1401_v5 = vld [vmem:[%s2116_s1 + $0x5c] sm:$0xf]  ;;  %v1270_v6 = vld [vmem:[%s2116_s1 + $0x6c] sm:$0xf0] }
  0xd0   : > { %826 = vmatmul.bf16.gmra.mxu0 %v1241_v8  ;;  %v1400_v8 = vld [vmem:[%s2116_s1 + $0x54] sm:$0xf] }
  0xd3   : > { %v359_v19 = vpop.permute.xlu0 %358  ;;  %560 = vperm.xlu0 %1532, %v230_v2   ;;  %550 = vperm.xlu1 %1530, %v228_v7   ;;  %v1245_v2 = vor.u32 %v1395_v57, %v1242_v59  ;;  %v1273_v7 = vor.u32 %v1401_v5, %v1270_v6 }
  0xd4   : > { %v361_v20 = vpop.permute.xlu1 %360 }
  0xd5   : > { %v375_v21 = vsel %vm374_vm1, %v359_v19, %v361_v20  ;;  %v444_v33 = vpop.permute.xlu2 %443 }
  0xd6   : > { %865 = vmatpush.bf16.msrb.mxu1 %v375_v21 }
  0xdb   : > { %v398_v23 = vpop.permute.xlu0 %397  ;;  %575 = vperm.xlu0 %1532, %v233_v11   ;;  %565 = vperm.xlu1 %1530, %v231_v17   ;;  %v1399_v11 = vld [vmem:[%s2116_s1 + $0x48] sm:$0xf0]  ;;  %v1406_v17 = vld [vmem:[%s2116_s1 + $0x84] sm:$0xf] }
  0xdc   : > { %v446_v24 = vpop.permute.xlu1 %445  ;;  %v403_v25 = vsel %vm399_vm4, %v396_v10, %v398_v23  ;;  %v224_v10 = vld [vmem:[%s2117_s2 + $0x20] sm:$0xff]  ;;  %v1393_v23 = vld [vmem:[%s2116_s1 + $0x18] sm:$0xf0] }
  0xdd   : > { %915 = vmatpush.bf16.msrb.mxu2 %v403_v25  ;;  %v453_v28 = vsel %vm449_vm5, %v446_v24, %v448_v15  ;;  %v388_v45 = vpop.permute.xlu2 %387  ;;  %530 = vperm.xlu2 %1531, %v224_v10   ;;  %v229_v24 = vld [vmem:[%s2117_s2 + $0x48] sm:$0xff]  ;;  %v234_v25 = vld [vmem:[%s2117_s2 + $0x70] sm:$0xff]  ;;  %v1256_v10 = vld [vmem:[%s2116_s1 + $0x38] sm:$0xf] }
  0xde   : > { %964 = vmatpush.bf16.msrb.mxu3 %v453_v28 }
  0xe3   : > { %v346_v39 = vpop.permute.xlu0 %345  ;;  %580 = vperm.xlu1 %1530, %v234_v25   ;;  %v1413_v25 = vld [vmem:[%s2116_s1 + $0xb8] sm:$0xf0] }
  0xe4   : > { %v348_v41 = vpop.permute.xlu1 %347 }
  0xe5   : > { %v353_v42 = vsel %vm349_vm6, %v346_v39, %v348_v41  ;;  %v440_v0 = vpop.permute.xlu2 %439  ;;  %540 = vperm.xlu2 %1531, %v226_v16   ;;  %v1390_v39 = vld [vmem:[%s2116_s1 + $0x4] sm:$0xf]  ;;  %v1222_v41 = vld [vmem:[%s2116_s1 + $0x14] sm:$0xf0] }
  0xe6   : > { %866 = vmatpush.bf16.msrb.mxu1 %v353_v42  ;;  %v1248_v42 = vld [vmem:[%s2116_s1 + $0x30] sm:$0xf] }
  0xe7   : > { %v1249_v49 = vor.u32 %v1398_v43, %v1248_v42  ;;  %v1330_v42 = vld [vmem:[%s2116_s1 + $0xe4] sm:$0xf0] }
  0xeb   : > { %v394_v48 = vpop.permute.xlu0 %393 }
  0xec   : > { %v442_v50 = vpop.permute.xlu1 %441  ;;  %v402_v51 = vsel %vm399_vm4, %v392_v22, %v394_v48  ;;  %v1228_v22 = vld [vmem:[%s2116_s1 + $0x8] sm:$0xf]  ;;  %v1225_v48 = vor.u32 %v1390_v39, %v1222_v41  ;;  %v1416_v41 = vld [vmem:[%s2116_s1 + $0xd4] sm:$0xf] }
  0xed   : > { %916 = vmatpush.bf16.msrb.mxu2 %v402_v51  ;;  %v452_v54 = vsel %vm449_vm5, %v442_v50, %v444_v33  ;;  %555 = vperm.xlu2 %1531, %v229_v24   ;;  %v1229_v30 = vor.u32 %v1393_v23, %v1228_v22  ;;  %v1391_v33 = vld [vmem:[%s2116_s1 + $0xc] sm:$0xf]  ;;  %v235_v50 = vld [vmem:[%s2117_s2 + $0x78] sm:$0xff]  ;;  %v1396_v51 = vld [vmem:[%s2116_s1 + $0x34] sm:$0xf]  ;;  %v1333_v43 = vor.u32 %v1416_v41, %v1330_v42 }
  0xee   : > { %965 = vmatpush.bf16.msrb.mxu3 %v452_v54  ;;  %v338_v15 = vpop.permute.xlu2 %337  ;;  %v1233_v38 = vor.u32 %v1391_v33, %v1230_v34  ;;  %v1253_v56 = vor.u32 %v1396_v51, %v1250_v52  ;;  %v1276_v22 = vld [vmem:[%s2116_s1 + $0x60] sm:$0xf]  ;;  %v1404_v23 = vld [vmem:[%s2116_s1 + $0x70] sm:$0xf0]  ;;  %v1308_v24 = vld [vmem:[%s2116_s1 + $0xa8] sm:$0xf] }
  0xef   : > { %v1302_v33 = vld [vmem:[%s2116_s1 + $0xb4] sm:$0xf0]  ;;  %v1296_v34 = vld [vmem:[%s2116_s1 + $0x88] sm:$0xf] }
  0xf3   : > { %v342_v63 = vpop.permute.xlu0 %341 }
  0xf4   : > { %v344_v3 = vpop.permute.xlu1 %343 }
  0xf5   : > { %v352_v4 = vsel %vm349_vm6, %v342_v63, %v344_v3  ;;  %570 = vperm.xlu2 %1531, %v232_v32   ;;  %v1403_v63 = vld [vmem:[%s2116_s1 + $0x68] sm:$0xf0]  ;;  %v1237_v3 = vor.u32 %v1394_v61, %v1236_v60  ;;  %v1410_v32 = vld [vmem:[%s2116_s1 + $0xa4] sm:$0xf]  ;;  %v1420_v60 = vld [vmem:[%s2116_s1 + $0xf4] sm:$0xf] }
  0xf6   : > { %867 = vmatpush.bf16.msrb.mxu1 %v352_v4  ;;  %v386_v21 = vpop.permute.xlu2 %385  ;;  %v1269_v4 = vor.u32 %v1403_v63, %v1268_v62  ;;  %v1342_v61 = vld [vmem:[%s2116_s1 + $0x104] sm:$0xf0]  ;;  %v1336_v62 = vld [vmem:[%s2116_s1 + $0xd8] sm:$0xf]  ;;  %v1419_v63 = vld [vmem:[%s2116_s1 + $0xe8] sm:$0xf0] }
  0xfb   : > { %v390_v9 = vpop.permute.xlu0 %389 }
  0xfc   : > { %v438_v12 = vpop.permute.xlu1 %437  ;;  %v401_v13 = vsel %vm399_vm4, %v388_v45, %v390_v9  ;;  %v1262_v9 = vld [vmem:[%s2116_s1 + $0x64] sm:$0xf0] }
  0xfd   : > { %917 = vmatpush.bf16.msrb.mxu2 %v401_v13  ;;  %v451_v14 = vsel %vm449_vm5, %v438_v12, %v440_v0  ;;  %585 = vperm.xlu2 %1531, %v235_v50   ;;  %v1288_v12 = vld [vmem:[%s2116_s1 + $0x80] sm:$0xf]  ;;  %v1408_v13 = vld [vmem:[%s2116_s1 + $0x90] sm:$0xf0] }
  0xfe   : > { %966 = vmatpush.bf16.msrb.mxu3 %v451_v14  ;;  %v492_v31 = vpop.permute.xlu2 %491  ;;  %v1265_v14 = vor.u32 %v1400_v8, %v1262_v9  ;;  %v1289_v16 = vor.u32 %v1408_v13, %v1288_v12  ;;  %v1426_v8 = vld [vmem:[%s2116_s1 + $0x124] sm:$0xf]  ;;  %v1370_v9 = vld [vmem:[%s2116_s1 + $0x134] sm:$0xf0]  ;;  %v1425_v13 = vld [vmem:[%s2116_s1 + $0x11c] sm:$0xf] }
 0x105   : > { %v496_v18 = vpop.permute.xlu0 %495  ;;  %v498_v19 = vpop.permute.xlu1 %497 }
 0x106   : > { %v503_v20 = vsel %vm499_vm7, %v496_v18, %v498_v19  ;;  %v336_v40 = vpop.permute.xlu2 %335  ;;  %v1290_v18 = vld [vmem:[%s2116_s1 + $0x94] sm:$0xf0] }
 0x107   : > { %1013 = vmatpush.bf16.msrb.mxu0 %v503_v20  ;;  %v1293_v19 = vor.u32 %v1406_v17, %v1290_v18  ;;  %v1405_v20 = vld [vmem:[%s2116_s1 + $0x7c] sm:$0xf]  ;;  %v1424_v17 = vld [vmem:[%s2116_s1 + $0x110] sm:$0xf0] }
 0x10d   : > { %v340_v26 = vpop.permute.xlu0 %339  ;;  %v384_v27 = vpop.permute.xlu1 %383 }
 0x10e   : > { %v351_v28 = vsel %vm349_vm6, %v338_v15, %v340_v26  ;;  %v400_v29 = vsel %vm399_vm4, %v384_v27, %v386_v21  ;;  %v484_v58 = vpop.permute.xlu2 %483  ;;  %v1257_v15 = vor.u32 %v1399_v11, %v1256_v10  ;;  %v1282_v21 = vld [vmem:[%s2116_s1 + $0x8c] sm:$0xf0]  ;;  %v1277_v27 = vor.u32 %v1404_v23, %v1276_v22 }
 0x10f   : > { %868 = vmatpush.bf16.msrb.mxu1 %v351_v28  ;;  %918 = vmatpush.bf16.msrb.mxu2 %v400_v29  ;;  %v1285_v26 = vor.u32 %v1405_v20, %v1282_v21  ;;  %v1309_v28 = vor.u32 %v1413_v25, %v1308_v24  ;;  %v1411_v29 = vld [vmem:[%s2116_s1 + $0xac] sm:$0xf]  ;;  %v1373_v10 = vor.u32 %v1426_v8, %v1370_v9  ;;  %v1376_v25 = vld [vmem:[%s2116_s1 + $0x128] sm:$0xf] }
 0x112   : > { %919 = vmatmul.bf16.vlgmr.msrb.gmra.mxu2 %v1229_v30  ;;  %v1310_v30 = vld [vmem:[%s2116_s1 + $0xbc] sm:$0xf0] }
 0x115   : > { %v434_v35 = vpop.permute.xlu0 %433  ;;  %v436_v36 = vpop.permute.xlu1 %435 }
 0x116   : > { %v450_v37 = vsel %vm449_vm5, %v434_v35, %v436_v36  ;;  %v1409_v35 = vld [vmem:[%s2116_s1 + $0x98] sm:$0xf0]  ;;  %v1328_v36 = vld [vmem:[%s2116_s1 + $0xd0] sm:$0xf] }
 0x117   : > { %967 = vmatpush.bf16.msrb.mxu3 %v450_v37  ;;  %v1418_v37 = vld [vmem:[%s2116_s1 + $0xe0] sm:$0xf0]  ;;  %v1297_v39 = vor.u32 %v1409_v35, %v1296_v34 }
 0x11a   : > { %968 = vmatmul.bf16.vlgmr.msrb.gmra.mxu3 %v1233_v38  ;;  %v1305_v38 = vor.u32 %v1410_v32, %v1302_v33 }
 0x11d   : > { %v494_v44 = vpop.permute.xlu0 %493  ;;  %v334_v45 = vpop.permute.xlu1 %333 }
 0x11e   : > { %v350_v46 = vsel %vm349_vm6, %v334_v45, %v336_v40  ;;  %v502_v47 = vsel %vm499_vm7, %v492_v31, %v494_v44  ;;  %v1313_v31 = vor.u32 %v1411_v29, %v1310_v30  ;;  %v1329_v40 = vor.u32 %v1418_v37, %v1328_v36  ;;  %v1415_v44 = vld [vmem:[%s2116_s1 + $0xcc] sm:$0xf]  ;;  %v1322_v45 = vld [vmem:[%s2116_s1 + $0xdc] sm:$0xf0] }
 0x11f   : > { %869 = vmatpush.bf16.msrb.mxu1 %v350_v46  ;;  %1014 = vmatpush.bf16.msrb.mxu0 %v502_v47  ;;  %v1316_v46 = vld [vmem:[%s2116_s1 + $0xb0] sm:$0xf]  ;;  %v1414_v47 = vld [vmem:[%s2116_s1 + $0xc0] sm:$0xf0]  ;;  %v1325_v51 = vor.u32 %v1415_v44, %v1322_v45 }
 0x120   : > { %v1317_v52 = vor.u32 %v1414_v47, %v1316_v46 }
 0x122   : > { %870 = vmatmul.bf16.vlgmr.msrb.gmra.mxu1 %v1225_v48  ;;  %924 = vmatmul.bf16.gmra.mxu2 %v1249_v49  ;;  %v1348_v48 = vld [vmem:[%s2116_s1 + $0xf8] sm:$0xf]  ;;  %v1423_v49 = vld [vmem:[%s2116_s1 + $0x108] sm:$0xf0] }
 0x125   : > { %v488_v53 = vpop.permute.xlu0 %487  ;;  %v490_v54 = vpop.permute.xlu1 %489 }
 0x126   : > { %v501_v55 = vsel %vm499_vm7, %v488_v53, %v490_v54  ;;  %v1349_v53 = vor.u32 %v1423_v49, %v1348_v48  ;;  %v1421_v54 = vld [vmem:[%s2116_s1 + $0xfc] sm:$0xf] }
 0x127   : > { %1015 = vmatpush.bf16.msrb.mxu0 %v501_v55  ;;  %v1350_v55 = vld [vmem:[%s2116_s1 + $0x10c] sm:$0xf0] }
 0x128   : > { %v1353_v57 = vor.u32 %v1421_v54, %v1350_v55 }
 0x12a   : > { %973 = vmatmul.bf16.gmra.mxu3 %v1253_v56 }
 0x12c   : > { %v822_v11 = vpop.f32.mrf.mxu0 }
 0x12d   : > { %v486_v0 = vpop.permute.xlu0 %485  ;;  %v511_v36 = vpop.permute.xlu1 %510 }
 0x12e   : > { %v500_v1 = vsel %vm499_vm7, %v484_v58, %v486_v0  ;;  %v2020_v58 = vpop.f32.mrf.mxu1  ;;  %v1368_v0 = vld [vmem:[%s2116_s1 + $0x120] sm:$0xf]  ;;  %v823_v37 = vadd.f32 %v822_v11, %v511_v36 }
 0x12f   : > { %1016 = vmatpush.bf16.msrb.mxu0 %v500_v1  ;;  %v1428_v1 = vld [vmem:[%s2116_s1 + $0x130] sm:$0xf0] }
 0x130   : > { %v2009_v50 = vpop.f32.mrf.mxu2  ;;  %v1369_v5 = vor.u32 %v1428_v1, %v1368_v0 }
 0x132   : > { %875 = vmatmul.bf16.gmra.mxu1 %v1245_v2  ;;  %1378 = vmatmul.msk.bf16.vlgmr.msrb.gmra.mxu0 %vm788_vm8, %v1237_v3  ;;  %v2018_v56 = vpop.f32.mrf.mxu3  ;;  %v1345_v2 = vor.u32 %v1420_v60, %v1342_v61  ;;  %v1337_v3 = vor.u32 %v1419_v63, %v1336_v62 }
 0x133   : > { %929 = vmatmul.bf16.gmra.mxu2 %v1269_v4 }
 0x134   : > { %v824_v21 = vpop.f32.mrf.mxu0 }
 0x135   : > { %v521_v60 = vpop.permute.xlu0 %520  ;;  %v526_v0 = vpop.permute.xlu1 %525 }
 0x136   : > { %v2044_v6 = vpop.f32.mrf.mxu1 }
 0x138   : > { %v2022_v59 = vpop.f32.mrf.mxu2 }
 0x13a   : > { %978 = vmatmul.bf16.gmra.mxu3 %v1273_v7  ;;  %v2042_v4 = vpop.f32.mrf.mxu3 }
 0x141   : > { %v2046_v7 = vpop.f32.mrf.mxu2 }
 0x142   : > { %880 = vmatmul.bf16.gmra.mxu1 %v1265_v14  ;;  %1379 = vmatmul.msk.bf16.gmra.mxu0 %vm788_vm8, %v1257_v15  ;;  %v2060_v14 = vpop.f32.mrf.mxu1  ;;  %v1362_v15 = vld [vmem:[%s2116_s1 + $0x12c] sm:$0xf0] }
 0x143   : > { %934 = vmatmul.bf16.gmra.mxu2 %v1289_v16  ;;  %v2055_v12 = vpop.f32.mrf.mxu3  ;;  %v1356_v16 = vld [vmem:[%s2116_s1 + $0x100] sm:$0xf] }
 0x144   : > { %v1357_v20 = vor.u32 %v1424_v17, %v1356_v16 }
 0x149   : > { %v2071_v18 = vpop.f32.mrf.mxu2 }
 0x14a   : > { %983 = vmatmul.bf16.gmra.mxu3 %v1293_v19  ;;  %v1365_v19 = vor.u32 %v1425_v13, %v1362_v15  ;;  %v2076_v23 = vpop.f32.mrf.mxu1 }
 0x14b   : > { %v2074_v22 = vpop.f32.mrf.mxu3 }
 0x152   : > { %885 = vmatmul.bf16.gmra.mxu1 %v1285_v26  ;;  %1380 = vmatmul.msk.bf16.gmra.mxu0 %vm788_vm8, %v1277_v27  ;;  %v1429_v26 = vld [vmem:[%s2116_s1 + $0x138] sm:$0xf0]  ;;  %v827_v27 = vpop.f32.mrf.mxu0 }
 0x153   : > { %939 = vmatmul.bf16.gmra.mxu2 %v1309_v28  ;;  %v1377_v30 = vor.u32 %v1429_v26, %v1376_v25  ;;  %v828_v61 = vadd.f32 %v827_v27, %v521_v60 }
 0x15a   : > { %988 = vmatmul.bf16.gmra.mxu3 %v1313_v31  ;;  %v829_v34 = vpop.f32.mrf.mxu0 }
 0x15b   : > { %v830_v1 = vadd.f32 %v829_v34, %v526_v0 }
 0x162   : > { %890 = vmatmul.bf16.gmra.mxu1 %v1305_v38  ;;  %1381 = vmatmul.msk.bf16.gmra.mxu0 %vm788_vm8, %v1297_v39  ;;  %v516_v38 = vpop.permute.xlu2 %515 }
 0x163   : > { %944 = vmatmul.bf16.gmra.mxu2 %v1329_v40  ;;  %v825_v39 = vadd.f32 %v824_v21, %v516_v38 }
 0x16a   : > { %993 = vmatmul.bf16.gmra.mxu3 %v1333_v43  ;;  %v531_v27 = vpop.permute.xlu2 %530 }
 0x172   : > { %895 = vmatmul.bf16.gmra.mxu1 %v1325_v51  ;;  %1382 = vmatmul.msk.bf16.gmra.mxu0 %vm788_vm8, %v1317_v52 }
 0x173   : > { %949 = vmatmul.bf16.gmra.mxu2 %v1349_v53 }
 0x17a   : > { %998 = vmatmul.bf16.gmra.mxu3 %v1353_v57 }
 0x182   : > { %900 = vmatmul.bf16.gmra.mxu1 %v1345_v2  ;;  %1383 = vmatmul.msk.bf16.gmra.mxu0 %vm788_vm8, %v1337_v3 }
 0x183   : > { %954 = vmatmul.bf16.gmra.mxu2 %v1369_v5 }
 0x18a   : > { %1003 = vmatmul.bf16.gmra.mxu3 %v1373_v10 }
 0x192   : > { %905 = vmatmul.bf16.gmra.mxu1 %v1365_v19  ;;  %1384 = vmatmul.msk.bf16.gmra.mxu0 %vm788_vm8, %v1357_v20 }
 0x195   : > { %v920_v24 = vpop.f32.mrf.mxu2 }
 0x19d   : > { %v969_v28 = vpop.f32.mrf.mxu3  ;;  %v922_v29 = vpop.f32.mrf.mxu2 }
 0x19f   : > { %v871_v31 = vpop.f32.mrf.mxu1 }
 0x1a0   : > { %v872_v40 = vadd.f32 %v871_v31, %v823_v37  ;;  %v536_v31 = vpop.permute.xlu1 %535 }
 0x1a2   : > { %1385 = vmatmul.msk.bf16.gmra.mxu0 %vm788_vm8, %v1377_v30  ;;  %v921_v46 = vadd.f32 %v920_v24, %v872_v40 }
 0x1a4   : > { %v970_v48 = vadd.f32 %v969_v28, %v921_v46  ;;  %v833_v28 = vadd.f32 %v2020_v58, %v531_v27 }
 0x1a5   : > { %v971_v32 = vpop.f32.mrf.mxu3  ;;  %v925_v33 = vpop.f32.mrf.mxu2 }
 0x1a7   : > { %v873_v35 = vpop.f32.mrf.mxu1 }
 0x1a8   : > { %v874_v43 = vadd.f32 %v873_v35, %v825_v39 }
 0x1aa   : > { %v923_v47 = vadd.f32 %v922_v29, %v874_v43 }
 0x1ac   : > { %v972_v51 = vadd.f32 %v971_v32, %v923_v47  ;;  %v835_v32 = vadd.f32 %v2044_v6, %v536_v31  ;;  %v541_v6 = vpop.permute.xlu2 %540 }
 0x1ad   : > { %v974_v41 = vpop.f32.mrf.mxu3  ;;  %v927_v42 = vpop.f32.mrf.mxu2 }
 0x1af   : > { %v876_v44 = vpop.f32.mrf.mxu1  ;;  %v1018_v45 = vpop.f32.mrf.mxu0 }
 0x1b0   : > { %v1019_v52 = vadd.f32 %v1018_v45, %v970_v48  ;;  %v877_v2 = vadd.f32 %v876_v44, %v828_v61 }
 0x1b2   : > { %v1058_v62 = vmax.f32 %v1019_v52, 0.0  ;;  %v926_v13 = vadd.f32 %v925_v33, %v877_v2 }
 0x1b4   : > { %v975_v16 = vadd.f32 %v974_v41, %v926_v13 }
 0x1b5   : > { %v976_v49 = vpop.f32.mrf.mxu3 }
 0x1b6   : > { %v930_v53 = vpop.f32.mrf.mxu2 }
 0x1b7   : > { %v878_v54 = vpop.f32.mrf.mxu1  ;;  %v1020_v55 = vpop.f32.mrf.mxu0 }
 0x1b8   : > { %v1021_v57 = vadd.f32 %v1020_v55, %v972_v51  ;;  %v879_v8 = vadd.f32 %v878_v54, %v830_v1  ;;  %v546_v54 = vpop.permute.xlu0 %545 }
 0x1b9   : > { %v840_v55 = vadd.f32 %v2076_v23, %v546_v54 }
 0x1ba   : > { %v1059_v63 = vmax.f32 %v1021_v57, 0.0  ;;  %v928_v15 = vadd.f32 %v927_v42, %v879_v8 }
 0x1bc   : > { %v1445_v3 = vpack.c.bf16 %v1059_v63, %v1058_v62  ;;  %v977_v19 = vadd.f32 %v976_v49, %v928_v15  ;;  %v838_v49 = vadd.f32 %v2060_v14, %v541_v6 }
 0x1bd   : > { %v979_v5 = vpop.f32.mrf.mxu3 }
 0x1be   : > { %1446 = vst [vmem:[%s2090_s28] sm:$0xff] %v1445_v3   ;;  %v932_v9 = vpop.f32.mrf.mxu2 }
 0x1bf   : > { %v881_v10 = vpop.f32.mrf.mxu1  ;;  %v1023_v11 = vpop.f32.mrf.mxu0 }
 0x1c0   : > { %v1024_v20 = vadd.f32 %v1023_v11, %v975_v16  ;;  %v882_v34 = vadd.f32 %v881_v10, %v833_v28 }
 0x1c2   : > { %v1060_v29 = vmax.f32 %v1024_v20, 0.0  ;;  %v931_v40 = vadd.f32 %v930_v53, %v882_v34 }
 0x1c4   : > { %v980_v42 = vadd.f32 %v979_v5, %v931_v40  ;;  %v551_v5 = vpop.permute.xlu1 %550 }
 0x1c5   : > { %v981_v17 = vpop.f32.mrf.mxu3  ;;  %v843_v23 = vadd.f32 %v2009_v50, %v551_v5 }
 0x1c6   : > { %v935_v21 = vpop.f32.mrf.mxu2 }
 0x1c7   : > { %v883_v24 = vpop.f32.mrf.mxu1  ;;  %v1025_v25 = vpop.f32.mrf.mxu0 }
 0x1c8   : > { %v1026_v26 = vadd.f32 %v1025_v25, %v977_v19  ;;  %v884_v36 = vadd.f32 %v883_v24, %v835_v32 }
 0x1ca   : > { %v1061_v30 = vmax.f32 %v1026_v26, 0.0  ;;  %v933_v41 = vadd.f32 %v932_v9, %v884_v36 }
 0x1cc   : > { %v1450_v33 = vpack.c.bf16 %v1061_v30, %v1060_v29  ;;  %v982_v44 = vadd.f32 %v981_v17, %v933_v41  ;;  %v556_v17 = vpop.permute.xlu2 %555  ;;  %v566_v40 = vpop.permute.xlu1 %565 }
 0x1cd   : > { %v984_v35 = vpop.f32.mrf.mxu3  ;;  %v845_v19 = vadd.f32 %v2022_v59, %v556_v17 }
 0x1ce   : > { %1482 = vst [vmem:[%s2090_s28 + $0x8] sm:$0xff] %v1450_v33   ;;  %v937_v37 = vpop.f32.mrf.mxu2 }
 0x1cf   : > { %v886_v38 = vpop.f32.mrf.mxu1  ;;  %v1028_v39 = vpop.f32.mrf.mxu0 }
 0x1d0   : > { %v1029_v58 = vadd.f32 %v1028_v39, %v980_v42  ;;  %v887_v57 = vadd.f32 %v886_v38, %v838_v49  ;;  %v850_v42 = vadd.f32 %v2071_v18, %v566_v40 }
 0x1d2   : > { %v1062_v51 = vmax.f32 %v1029_v58, 0.0  ;;  %v936_v0 = vadd.f32 %v935_v21, %v887_v57 }
 0x1d4   : > { %v985_v3 = vadd.f32 %v984_v35, %v936_v0 }
 0x1d5   : > { %v986_v43 = vpop.f32.mrf.mxu3 }
 0x1d6   : > { %v940_v48 = vpop.f32.mrf.mxu2 }
 0x1d7   : > { %v888_v45 = vpop.f32.mrf.mxu1  ;;  %v1030_v46 = vpop.f32.mrf.mxu0 }
 0x1d8   : > { %v1031_v47 = vadd.f32 %v1030_v46, %v982_v44  ;;  %v889_v61 = vadd.f32 %v888_v45, %v840_v55 }
 0x1da   : > { %v1063_v52 = vmax.f32 %v1031_v47, 0.0  ;;  %v938_v1 = vadd.f32 %v937_v37, %v889_v61  ;;  %v561_v37 = vpop.permute.xlu0 %560 }
 0x1db   : > { %v848_v59 = vadd.f32 %v2046_v7, %v561_v37 }
 0x1dc   : > { %v1455_v53 = vpack.c.bf16 %v1063_v52, %v1062_v51  ;;  %v987_v8 = vadd.f32 %v986_v43, %v938_v1  ;;  %v571_v52 = vpop.permute.xlu2 %570 }
 0x1dd   : > { %v989_v60 = vpop.f32.mrf.mxu3  ;;  %v853_v18 = vadd.f32 %v2018_v56, %v571_v52  ;;  %v581_v56 = vpop.permute.xlu1 %580 }
 0x1de   : > { %1483 = vst [vmem:[%s2090_s28 + $0x10] sm:$0xff] %v1455_v53   ;;  %v942_v2 = vpop.f32.mrf.mxu2 }
 0x1df   : > { %v891_v62 = vpop.f32.mrf.mxu1  ;;  %v1033_v63 = vpop.f32.mrf.mxu0 }
 0x1e0   : > { %v1034_v14 = vadd.f32 %v1033_v63, %v985_v3  ;;  %v892_v20 = vadd.f32 %v891_v62, %v843_v23 }
 0x1e2   : > { %v1064_v15 = vmax.f32 %v1034_v14, 0.0  ;;  %v941_v28 = vadd.f32 %v940_v48, %v892_v20 }
 0x1e4   : > { %v990_v31 = vadd.f32 %v989_v60, %v941_v28  ;;  %v576_v60 = vpop.permute.xlu0 %575 }
 0x1e5   : > { %v991_v9 = vpop.f32.mrf.mxu3  ;;  %v855_v0 = vadd.f32 %v2042_v4, %v576_v60  ;;  %v858_v4 = vadd.f32 %v2055_v12, %v581_v56 }
 0x1e6   : > { %v945_v24 = vpop.f32.mrf.mxu2 }
 0x1e7   : > { %v893_v10 = vpop.f32.mrf.mxu1  ;;  %v1035_v11 = vpop.f32.mrf.mxu0 }
 0x1e8   : > { %v1036_v13 = vadd.f32 %v1035_v11, %v987_v8  ;;  %v894_v25 = vadd.f32 %v893_v10, %v845_v19  ;;  %v586_v19 = vpop.permute.xlu2 %585 }
 0x1ea   : > { %v1065_v16 = vmax.f32 %v1036_v13, 0.0  ;;  %v943_v30 = vadd.f32 %v942_v2, %v894_v25 }
 0x1ec   : > { %v1460_v21 = vpack.c.bf16 %v1065_v16, %v1064_v15  ;;  %v992_v32 = vadd.f32 %v991_v9, %v943_v30 }
 0x1ed   : > { %v994_v29 = vpop.f32.mrf.mxu3 }
 0x1ee   : > { %1484 = vst [vmem:[%s2090_s28 + $0x18] sm:$0xff] %v1460_v21   ;;  %v947_v50 = vpop.f32.mrf.mxu2 }
 0x1ef   : > { %v896_v26 = vpop.f32.mrf.mxu1  ;;  %v1038_v27 = vpop.f32.mrf.mxu0 }
 0x1f0   : > { %v1039_v34 = vadd.f32 %v1038_v27, %v990_v31  ;;  %v897_v43 = vadd.f32 %v896_v26, %v848_v59  ;;  %v860_v26 = vadd.f32 %v2074_v22, %v586_v19 }
 0x1f2   : > { %v1066_v38 = vmax.f32 %v1039_v34, 0.0  ;;  %v946_v47 = vadd.f32 %v945_v24, %v897_v43 }
 0x1f4   : > { %v995_v49 = vadd.f32 %v994_v29, %v946_v47 }
 0x1f5   : > { %v996_v41 = vpop.f32.mrf.mxu3 }
 0x1f6   : > { %v950_v48 = vpop.f32.mrf.mxu2 }
 0x1f7   : > { %v898_v33 = vpop.f32.mrf.mxu1  ;;  %v1040_v35 = vpop.f32.mrf.mxu0 }
 0x1f8   : > { %v1041_v36 = vadd.f32 %v1040_v35, %v992_v32  ;;  %v899_v58 = vadd.f32 %v898_v33, %v850_v42 }
 0x1fa   : > { %v1067_v39 = vmax.f32 %v1041_v36, 0.0  ;;  %v948_v6 = vadd.f32 %v947_v50, %v899_v58 }
 0x1fc   : > { %v1465_v44 = vpack.c.bf16 %v1067_v39, %v1066_v38  ;;  %v997_v7 = vadd.f32 %v996_v41, %v948_v6 }
 0x1fd   : > { %v999_v51 = vpop.f32.mrf.mxu3 }
 0x1fe   : > { %1485 = vst [vmem:[%s2090_s28 + $0x20] sm:$0xff] %v1465_v44   ;;  %v952_v63 = vpop.f32.mrf.mxu2 }
 0x1ff   : > { %v901_v45 = vpop.f32.mrf.mxu1  ;;  %v1043_v46 = vpop.f32.mrf.mxu0 }
 0x200   : > { %v1044_v54 = vadd.f32 %v1043_v46, %v995_v49  ;;  %v902_v1 = vadd.f32 %v901_v45, %v853_v18 }
 0x202   : > { %v1068_v61 = vmax.f32 %v1044_v54, 0.0  ;;  %v951_v14 = vadd.f32 %v950_v48, %v902_v1 }
 0x204   : > { %v1000_v11 = vadd.f32 %v999_v51, %v951_v14 }
 0x205   : > { %v1001_v5 = vpop.f32.mrf.mxu3 }
 0x206   : > { %v955_v13 = vpop.f32.mrf.mxu2 }
 0x207   : > { %v903_v55 = vpop.f32.mrf.mxu1  ;;  %v1045_v57 = vpop.f32.mrf.mxu0 }
 0x208   : > { %v1046_v53 = vadd.f32 %v1045_v57, %v997_v7  ;;  %v904_v3 = vadd.f32 %v903_v55, %v855_v0 }
 0x20a   : > { %v1069_v62 = vmax.f32 %v1046_v53, 0.0  ;;  %v953_v10 = vadd.f32 %v952_v63, %v904_v3 }
 0x20c   : > { %v1470_v2 = vpack.c.bf16 %v1069_v62, %v1068_v61  ;;  %v1002_v23 = vadd.f32 %v1001_v5, %v953_v10 }
 0x20d   : > { %v1004_v20 = vpop.f32.mrf.mxu3 }
 0x20e   : > { %1486 = vst [vmem:[%s2090_s28 + $0x28] sm:$0xff] %v1470_v2   ;;  %v957_v30 = vpop.f32.mrf.mxu2 }
 0x20f   : > { %v1048_v8 = vpop.f32.mrf.mxu0  ;;  %v906_v9 = vpop.f32.mrf.mxu1 }
 0x210   : > { %v1049_v15 = vadd.f32 %v1048_v8, %v1000_v11  ;;  %v907_v27 = vadd.f32 %v906_v9, %v858_v4 }
 0x212   : > { %v1070_v21 = vmax.f32 %v1049_v15, 0.0  ;;  %v956_v32 = vadd.f32 %v955_v13, %v907_v27 }
 0x214   : > { %v1005_v33 = vadd.f32 %v1004_v20, %v956_v32 }
 0x215   : > { %v1006_v50 = vpop.f32.mrf.mxu3 }
 0x217   : > { %v1050_v16 = vpop.f32.mrf.mxu0  ;;  %v908_v25 = vpop.f32.mrf.mxu1 }
 0x218   : > { %v1051_v17 = vadd.f32 %v1050_v16, %v1002_v23  ;;  %v909_v29 = vadd.f32 %v908_v25, %v860_v26 }
 0x21a   : > { %v1071_v24 = vmax.f32 %v1051_v17, 0.0  ;;  %v958_v34 = vadd.f32 %v957_v30, %v909_v29 }
 0x21c   : > { %v1475_v28 = vpack.c.bf16 %v1071_v24, %v1070_v21  ;;  %v1007_v35 = vadd.f32 %v1006_v50, %v958_v34 }
 0x21e   : > { %1487 = vst [vmem:[%s2090_s28 + $0x30] sm:$0xff] %v1475_v28  }
 0x21f   : > { %v1053_v31 = vpop.f32.mrf.mxu0 }
 0x220   : > { %v1054_v36 = vadd.f32 %v1053_v31, %v1005_v33 }
 0x222   : > { %v1072_v59 = vmax.f32 %v1054_v36, 0.0 }
 0x227   : > { %v1055_v37 = vpop.f32.mrf.mxu0 }
 0x228   : > { %v1056_v12 = vadd.f32 %v1055_v37, %v1007_v35 }
 0x22a   : > { %v1073_v38 = vmax.f32 %v1056_v12, 0.0 }
 0x22c   : > { %v1480_v39 = vpack.c.bf16 %v1073_v38, %v1072_v59 }
 0x22e   : > { %1488 = vst [vmem:[%s2090_s28 + $0x38] sm:$0xff] %v1480_v39  }
 0x22f PF: > { %s13_s12 = sadd.s32 1, %s1539_s12  }
 0x230   : > { %p10_p4 = scmp.ge.s32.totalorder %s13_s12, 4  }
 0x232   :  { %12 = sbr.rel (!%p10_p4) target bundleno = 1 (0x1), region = 62 }

// kernel: unet_forward.27
= control target key start
LH: loop header
LB: loop body
LE: loop exit
PB: predicated region body
PF: predicated region fallthrough
CT: control target
= control target key end

     0   :  { %s1728_s12 = smov 0   ;;  %s2519_s0 = inlined_call_operand.vmem [shape: bf16[2,128,256], index: 0, kind: input, shape index: {}]   ;;  %s2520_s1 = inlined_call_operand.vmem [shape: bf16[64,1152], index: 1, kind: input, shape index: {}]   ;;  %s2521_s2 = inlined_call_operand.vmem [shape: f32[64,1], index: 2, kind: input, shape index: {}]   ;;  %s2522_s3 = inlined_call_operand.vmem [shape: bf16[2,64,128], index: 3, kind: output, shape index: {}]  }
   0x1 LB: > { %s1319_s13 = sadd.s32 4294967295, %s1697_s12   ;;  %p1323_p0 = scmp.ge.s32.totalorder %s1697_s12, 1  ;;  %s1697_s12 = sphi %s1728_s12, %s13_s12  }
   0x2   : > { %p137_p1 = scmp.lt.s32.totalorder %s1697_s12, 3 }
   0x4   : > { %p138_p2 = pnand %p1323_p0, %p137_p1 }
   0x5   : > { %p161_p3 = scmp.lt.s32.totalorder (!%p138_p2), %s1319_s13, 1  ;;  %s1699_s18 = smov (!%p138_p2), 127  }
   0x6   : > { %141 = sbr.rel (%p138_p2) target bundleno = 646 (0x286), region = 32  ;;  %s1700_s19 = smov (!%p138_p2), 126  }
   0x7   : > { %s1701_s20 = smov (!%p138_p2), 124   ;;  %s1702_s21 = smov (!%p138_p2), 123  }
   0x8   : > { %s1703_s22 = smov (!%p138_p2), 120   ;;  %s1704_s23 = smov (!%p138_p2), 119  }
   0x9   : > { %s1705_s24 = smov (!%p138_p2), 122   ;;  %s1706_s9 = smov (!%p138_p2), 118  }
   0xb   : > { %s2524_s13 = smov (!%p161_p3, %s1319_s13), 1  ;;  %vm444_vm0 = vcmask 1031168   ;;  %vm395_vm1 = vcmask 1039360   ;;  %vm493_vm2 = vcmask 1014784   ;;  %vm542_vm3 = vcmask 1006592  }
   0xc   : > { %s1570_s14 = sshll.u32 %s2524_s13, 7  ;;  %vm640_vm4 = vcmask 982016   ;;  %vm689_vm5 = vcmask 973824   ;;  %vm591_vm6 = vcmask 998400   ;;  %vm738_vm7 = vcmask 965632   ;;  %s1571_s16 = sshll.u32 %s2524_s13, 5 }
   0xd   : > { %s1742_s17 = scalar_lea.vmem %s2519_s0, %s1570_s14 }
   0xe   : > { %v1370_v0 = vld [vmem:[%s1742_s17 + $0x10] sm:$0xf]  ;;  %v1619_v1 = vld [vmem:[%s1742_s17 + $0x14] sm:$0xf0]  ;;  %v1362_v2 = vld [vmem:[%s1742_s17] sm:$0xf] }
   0xf   : > { %v1747_v3 = vor.u32 %v1619_v1, %v1370_v0  ;;  %v1617_v4 = vld [vmem:[%s1742_s17 + $0x4] sm:$0xf0]  ;;  %v1618_v6 = vld [vmem:[%s1742_s17 + $0x14] sm:$0xf]  ;;  %v1372_v7 = vld [vmem:[%s1742_s17 + $0x18] sm:$0xf0] }
  0x10   : > { %v1750_v5 = vor.u32 %v1617_v4, %v1362_v2  ;;  %v1378_v8 = vld [vmem:[%s1742_s17 + $0x20] sm:$0xf]  ;;  %v1621_v9 = vld [vmem:[%s1742_s17 + $0x24] sm:$0xf0]  ;;  %v1616_v10 = vld [vmem:[%s1742_s17 + $0x4] sm:$0xf]  ;;  %v1764_v13 = vor.u32 %v1618_v6, %v1372_v7 }
  0x11   : > { %367 = vrot.lane.b32.xlu1 %v1747_v3, %s1699_s18  ;;  %v1364_v11 = vld [vmem:[%s1742_s17 + $0x8] sm:$0xf0]  ;;  %v1762_v12 = vor.u32 %v1621_v9, %v1378_v8  ;;  %v1620_v15 = vld [vmem:[%s1742_s17 + $0x24] sm:$0xf]  ;;  %v1622_v18 = vld [vmem:[%s1742_s17 + $0x34] sm:$0xf] }
  0x12   : > { %363 = vrot.lane.b32.xlu0 %v1750_v5, %s1699_s18  ;;  %v1768_v14 = vor.u32 %v1616_v10, %v1364_v11  ;;  %v1380_v16 = vld [vmem:[%s1742_s17 + $0x28] sm:$0xf0]  ;;  %v1388_v19 = vld [vmem:[%s1742_s17 + $0x38] sm:$0xf0]  ;;  %v1386_v20 = vld [vmem:[%s1742_s17 + $0x30] sm:$0xf] }
  0x13   : > { %371 = vrot.lane.b32.xlu2 %v1762_v12, %s1699_s18  ;;  %v1774_v17 = vor.u32 %v1620_v15, %v1380_v16  ;;  %v1623_v21 = vld [vmem:[%s1742_s17 + $0x34] sm:$0xf0]  ;;  %v1782_v22 = vor.u32 %v1622_v18, %v1388_v19  ;;  %v1394_v24 = vld [vmem:[%s1742_s17 + $0x40] sm:$0xf]  ;;  %v1625_v25 = vld [vmem:[%s1742_s17 + $0x44] sm:$0xf0] }
  0x14   : > { %v1786_v23 = vor.u32 %v1623_v21, %v1386_v20  ;;  %v1792_v26 = vor.u32 %v1625_v25, %v1394_v24  ;;  %v1402_v27 = vld [vmem:[%s1742_s17 + $0x50] sm:$0xf]  ;;  %v1627_v28 = vld [vmem:[%s1742_s17 + $0x54] sm:$0xf0]  ;;  %v1624_v29 = vld [vmem:[%s1742_s17 + $0x44] sm:$0xf] }
  0x15   : > { %v1396_v30 = vld [vmem:[%s1742_s17 + $0x48] sm:$0xf0]  ;;  %v1800_v31 = vor.u32 %v1627_v28, %v1402_v27  ;;  %v1626_v33 = vld [vmem:[%s1742_s17 + $0x54] sm:$0xf]  ;;  %v1404_v34 = vld [vmem:[%s1742_s17 + $0x58] sm:$0xf0] }
  0x16   : > { %v1804_v32 = vor.u32 %v1624_v29, %v1396_v30  ;;  %v1810_v35 = vor.u32 %v1626_v33, %v1404_v34  ;;  %v1628_v36 = vld [vmem:[%s1742_s17 + $0x64] sm:$0xf]  ;;  %v1412_v37 = vld [vmem:[%s1742_s17 + $0x68] sm:$0xf0]  ;;  %v1410_v38 = vld [vmem:[%s1742_s17 + $0x60] sm:$0xf] }
  0x17   : > { %v1629_v39 = vld [vmem:[%s1742_s17 + $0x64] sm:$0xf0]  ;;  %v1818_v40 = vor.u32 %v1628_v36, %v1412_v37  ;;  %v1418_v42 = vld [vmem:[%s1742_s17 + $0x70] sm:$0xf]  ;;  %v1631_v43 = vld [vmem:[%s1742_s17 + $0x74] sm:$0xf0] }
  0x18   : > { %v1822_v41 = vor.u32 %v1629_v39, %v1410_v38  ;;  %v1828_v44 = vor.u32 %v1631_v43, %v1418_v42  ;;  %v1630_v45 = vld [vmem:[%s1742_s17 + $0x74] sm:$0xf]  ;;  %v1420_v46 = vld [vmem:[%s1742_s17 + $0x78] sm:$0xf0]  ;;  %v1358_v48 = vld [vmem:[%s1742_s17 + $0x70] sm:$0xf] }
  0x19   : > { %369 = vrot.lane.b32.xlu1 %v1764_v13, %s1699_s18  ;;  %v1836_v47 = vor.u32 %v1630_v45, %v1420_v46  ;;  %v1615_v49 = vld [vmem:[%s1742_s17 + $0x74] sm:$0xf0]  ;;  %v1354_v52 = vld [vmem:[%s1742_s17 + $0x60] sm:$0xf]  ;;  %v1614_v53 = vld [vmem:[%s1742_s17 + $0x64] sm:$0xf0] }
  0x1a   : > { %365 = vrot.lane.b32.xlu0 %v1768_v14, %s1699_s18  ;;  %v1359_v50 = vor.u32 %v1615_v49, %v1358_v48  ;;  %v1355_v54 = vor.u32 %v1614_v53, %v1354_v52  ;;  %v1350_v55 = vld [vmem:[%s1742_s17 + $0x50] sm:$0xf]  ;;  %v1613_v56 = vld [vmem:[%s1742_s17 + $0x54] sm:$0xf0]  ;;  %v1346_v59 = vld [vmem:[%s1742_s17 + $0x40] sm:$0xf] }
  0x1b   : > { %373 = vrot.lane.b32.xlu2 %v1774_v17, %s1699_s18  ;;  %v1351_v57 = vor.u32 %v1613_v56, %v1350_v55  ;;  %v1612_v60 = vld [vmem:[%s1742_s17 + $0x44] sm:$0xf0]  ;;  %v1342_v62 = vld [vmem:[%s1742_s17 + $0x30] sm:$0xf]  ;;  %v1611_v63 = vld [vmem:[%s1742_s17 + $0x34] sm:$0xf0] }
  0x1c   : > { %1655 = vmatpush.bf16.msra.mxu1 %v1359_v50  ;;  %979 = vmatpush.bf16.msra.mxu0 %v1359_v50  ;;  %v1347_v61 = vor.u32 %v1612_v60, %v1346_v59  ;;  %v1343_v0 = vor.u32 %v1611_v63, %v1342_v62  ;;  %v1338_v2 = vld [vmem:[%s1742_s17 + $0x20] sm:$0xf]  ;;  %v1610_v4 = vld [vmem:[%s1742_s17 + $0x24] sm:$0xf0]  ;;  %v1334_v9 = vld [vmem:[%s1742_s17 + $0x10] sm:$0xf] }
  0x1d   : > { %v1339_v7 = vor.u32 %v1610_v4, %v1338_v2  ;;  %v1609_v10 = vld [vmem:[%s1742_s17 + $0x14] sm:$0xf0]  ;;  %v1330_v16 = vld [vmem:[%s1742_s17] sm:$0xf]  ;;  %v1608_v18 = vld [vmem:[%s1742_s17 + $0x4] sm:$0xf0] }
  0x1e   : > { %v1335_v11 = vor.u32 %v1609_v10, %v1334_v9  ;;  %v1331_v20 = vor.u32 %v1608_v18, %v1330_v16 }
  0x20   : > { %1656 = vmatpush.bf16.msra.mxu1 %v1355_v54  ;;  %980 = vmatpush.bf16.msra.mxu0 %v1355_v54 }
  0x21   : > { %377 = vrot.lane.b32.xlu1 %v1782_v22, %s1699_s18 }
  0x22   : > { %375 = vrot.lane.b32.xlu0 %v1786_v23, %s1699_s18 }
  0x23   : > { %379 = vrot.lane.b32.xlu2 %v1792_v26, %s1699_s18 }
  0x24   : > { %1657 = vmatpush.bf16.msra.mxu1 %v1351_v57  ;;  %981 = vmatpush.bf16.msra.mxu0 %v1351_v57 }
  0x28   : > { %1658 = vmatpush.bf16.msra.mxu1 %v1347_v61  ;;  %982 = vmatpush.bf16.msra.mxu0 %v1347_v61 }
  0x29   : > { %383 = vrot.lane.b32.xlu1 %v1800_v31, %s1699_s18 }
  0x2a   : > { %381 = vrot.lane.b32.xlu0 %v1804_v32, %s1699_s18 }
  0x2b   : > { %385 = vrot.lane.b32.xlu2 %v1810_v35, %s1699_s18 }
  0x2c   : > { %1659 = vmatpush.bf16.msra.mxu1 %v1343_v0  ;;  %983 = vmatpush.bf16.msra.mxu0 %v1343_v0 }
  0x30   : > { %1660 = vmatpush.bf16.msra.mxu1 %v1339_v7  ;;  %984 = vmatpush.bf16.msra.mxu0 %v1339_v7 }
  0x31   : > { %389 = vrot.lane.b32.xlu1 %v1818_v40, %s1699_s18 }
  0x32   : > { %387 = vrot.lane.b32.xlu0 %v1822_v41, %s1699_s18 }
  0x33   : > { %391 = vrot.lane.b32.xlu2 %v1828_v44, %s1699_s18 }
  0x34   : > { %1661 = vmatpush.bf16.msra.mxu1 %v1335_v11  ;;  %985 = vmatpush.bf16.msra.mxu0 %v1335_v11 }
  0x38   : > { %1662 = vmatpush.bf16.msra.mxu1 %v1331_v20  ;;  %986 = vmatpush.bf16.msra.mxu0 %v1331_v20 }
  0x39   : > { %412 = vrot.lane.b32.xlu1 %v1750_v5, %s1700_s19 }
  0x3a   : > { %393 = vrot.lane.b32.xlu0 %v1836_v47, %s1699_s18  ;;  %s2502_s18 = scalar_lea.vmem %s2522_s3, %s1571_s16 }
  0x3b   : > { %414 = vrot.lane.b32.xlu2 %v1768_v14, %s1700_s19 }
  0x41   : > { %418 = vrot.lane.b32.xlu1 %v1764_v13, %s1700_s19 }
  0x42   : > { %416 = vrot.lane.b32.xlu0 %v1747_v3, %s1700_s19 }
  0x43   : > { %420 = vrot.lane.b32.xlu2 %v1762_v12, %s1700_s19 }
  0x49   : > { %424 = vrot.lane.b32.xlu1 %v1786_v23, %s1700_s19 }
  0x4a   : > { %422 = vrot.lane.b32.xlu0 %v1774_v17, %s1700_s19 }
  0x4b   : > { %426 = vrot.lane.b32.xlu2 %v1782_v22, %s1700_s19 }
  0x51   : > { %430 = vrot.lane.b32.xlu1 %v1804_v32, %s1700_s19 }
  0x52   : > { %428 = vrot.lane.b32.xlu0 %v1792_v26, %s1700_s19 }
  0x53   : > { %432 = vrot.lane.b32.xlu2 %v1800_v31, %s1700_s19 }
  0x59   : > { %436 = vrot.lane.b32.xlu1 %v1822_v41, %s1700_s19 }
  0x5a   : > { %434 = vrot.lane.b32.xlu0 %v1810_v35, %s1700_s19 }
  0x5b   : > { %440 = vrot.lane.b32.xlu2 %v1828_v44, %s1700_s19 }
  0x61   : > { %438 = vrot.lane.b32.xlu1 %v1818_v40, %s1700_s19 }
  0x62   : > { %442 = vrot.lane.b32.xlu0 %v1836_v47, %s1700_s19 }
  0x63   : > { %461 = vrot.lane.b32.xlu2 %v1750_v5, %s1701_s20 }
  0x69   : > { %489 = vrot.lane.b32.xlu1 %v1828_v44, %s1701_s20 }
  0x6a   : > { %463 = vrot.lane.b32.xlu0 %v1768_v14, %s1701_s20 }
  0x6b   : > { %491 = vrot.lane.b32.xlu2 %v1836_v47, %s1701_s20 }
  0x6d   : > { %v1866_v51 = vpop.permute.xlu2 %371 }
  0x71   : > { %487 = vrot.lane.b32.xlu1 %v1818_v40, %s1701_s20 }
  0x72   : > { %485 = vrot.lane.b32.xlu0 %v1822_v41, %s1701_s20 }
  0x73   : > { %481 = vrot.lane.b32.xlu2 %v1800_v31, %s1701_s20 }
  0x75   : > { %v1878_v58 = vpop.permute.xlu2 %373 }
  0x76   : > { %v398_v59 = vsel %vm395_vm1, %v1866_v51, %v1878_v58 }
  0x79   : > { %477 = vrot.lane.b32.xlu1 %v1792_v26, %s1701_s20 }
  0x7a   : > { %483 = vrot.lane.b32.xlu0 %v1810_v35, %s1701_s20 }
  0x7b   : > { %479 = vrot.lane.b32.xlu2 %v1804_v32, %s1701_s20 }
  0x7d   : > { %v1890_v1 = vpop.permute.xlu2 %379 }
  0x81   : > { %475 = vrot.lane.b32.xlu1 %v1782_v22, %s1701_s20 }
  0x82   : > { %473 = vrot.lane.b32.xlu0 %v1786_v23, %s1701_s20 }
  0x83   : > { %v1898_v6 = vpop.permute.xlu1 %367  ;;  %469 = vrot.lane.b32.xlu2 %v1762_v12, %s1701_s20 }
  0x84   : > { %v1900_v8 = vpop.permute.xlu0 %363 }
  0x85   : > { %v386_v15 = vpop.permute.xlu2 %385 }
  0x89   : > { %465 = vrot.lane.b32.xlu1 %v1747_v3, %s1701_s20 }
  0x8a   : > { %471 = vrot.lane.b32.xlu0 %v1774_v17, %s1701_s20 }
  0x8b   : > { %v1912_v19 = vpop.permute.xlu1 %369  ;;  %467 = vrot.lane.b32.xlu2 %v1764_v13, %s1701_s20 }
  0x8c   : > { %v1914_v21 = vpop.permute.xlu0 %365  ;;  %v397_v62 = vsel %vm395_vm1, %v1898_v6, %v1912_v19 }
  0x8d   : > { %v392_v24 = vpop.permute.xlu2 %391  ;;  %v396_v51 = vsel %vm395_vm1, %v1900_v8, %v1914_v21 }
  0x91   : > { %540 = vrot.lane.b32.xlu1 %v1836_v47, %s1702_s21 }
  0x92   : > { %538 = vrot.lane.b32.xlu0 %v1828_v44, %s1702_s21 }
  0x93   : > { %v378_v25 = vpop.permute.xlu1 %377  ;;  %534 = vrot.lane.b32.xlu2 %v1822_v41, %s1702_s21 }
  0x94   : > { %v376_v27 = vpop.permute.xlu0 %375 }
  0x95   : > { %v415_v28 = vpop.permute.xlu2 %414  ;;  %v399_v56 = vsel %vm395_vm1, %v376_v27, %v378_v25 }
  0x99   : > { %530 = vrot.lane.b32.xlu1 %v1800_v31, %s1702_s21 }
  0x9a   : > { %536 = vrot.lane.b32.xlu0 %v1818_v40, %s1702_s21 }
  0x9b   : > { %v384_v29 = vpop.permute.xlu1 %383  ;;  %532 = vrot.lane.b32.xlu2 %v1810_v35, %s1702_s21 }
  0x9c   : > { %v382_v30 = vpop.permute.xlu0 %381  ;;  %v401_v50 = vsel %vm395_vm1, %v384_v29, %v386_v15 }
  0x9d   : > { %v1930_v33 = vpop.permute.xlu2 %420  ;;  %v400_v53 = vsel %vm395_vm1, %v1890_v1, %v382_v30 }
  0xa1   : > { %528 = vrot.lane.b32.xlu1 %v1804_v32, %s1702_s21 }
  0xa2   : > { %526 = vrot.lane.b32.xlu0 %v1792_v26, %s1702_s21 }
  0xa3   : > { %v390_v34 = vpop.permute.xlu1 %389  ;;  %522 = vrot.lane.b32.xlu2 %v1786_v23, %s1702_s21 }
  0xa4   : > { %v388_v36 = vpop.permute.xlu0 %387 }
  0xa5   : > { %v1938_v37 = vpop.permute.xlu2 %426  ;;  %v402_v46 = vsel %vm395_vm1, %v388_v36, %v390_v34 }
  0xa9   : > { %518 = vrot.lane.b32.xlu1 %v1762_v12, %s1702_s21 }
  0xaa   : > { %524 = vrot.lane.b32.xlu0 %v1782_v22, %s1702_s21 }
  0xab   : > { %v413_v38 = vpop.permute.xlu1 %412  ;;  %520 = vrot.lane.b32.xlu2 %v1774_v17, %s1702_s21 }
  0xac   : > { %v394_v39 = vpop.permute.xlu0 %393  ;;  %v1945_v42 = vsel %vm444_vm0, %v413_v38, %v415_v28 }
  0xad   : > { %v403_v43 = vsel %vm395_vm1, %v392_v24, %v394_v39  ;;  %v433_v45 = vpop.permute.xlu2 %432 }
  0xae   : > { %1008 = vmatpush.bf16.msrb.mxu1 %v403_v43 }
  0xb1   : > { %516 = vrot.lane.b32.xlu1 %v1764_v13, %s1702_s21 }
  0xb2   : > { %514 = vrot.lane.b32.xlu0 %v1747_v3, %s1702_s21  ;;  %1009 = vmatpush.bf16.msrb.mxu1 %v402_v46  ;;  %v1594_v46 = vld [vmem:[%s2520_s1 + $0xb0] sm:$0xf0] }
  0xb3   : > { %v1955_v48 = vpop.permute.xlu1 %418  ;;  %636 = vrot.lane.b32.xlu2 %v1828_v44, %s1703_s22 }
  0xb4   : > { %v1957_v49 = vpop.permute.xlu0 %416 }
  0xb5   : > { %v441_v52 = vpop.permute.xlu2 %440  ;;  %v446_v30 = vsel %vm444_vm0, %v1957_v49, %v1955_v48 }
  0xb6   : > { %1010 = vmatpush.bf16.msrb.mxu1 %v401_v50 }
  0xb9   : > { %510 = vrot.lane.b32.xlu1 %v1750_v5, %s1702_s21 }
  0xba   : > { %638 = vrot.lane.b32.xlu0 %v1836_v47, %s1703_s22  ;;  %1011 = vmatpush.bf16.msrb.mxu1 %v400_v53 }
  0xbb   : > { %v425_v54 = vpop.permute.xlu1 %424  ;;  %512 = vrot.lane.b32.xlu2 %v1768_v14, %s1702_s21 }
  0xbc   : > { %v423_v55 = vpop.permute.xlu0 %422  ;;  %v448_v21 = vsel %vm444_vm0, %v425_v54, %v1938_v37  ;;  %v1426_v54 = vld [vmem:[%s2520_s1] sm:$0xf] }
  0xbd   : > { %v1971_v57 = vpop.permute.xlu2 %461  ;;  %v447_v27 = vsel %vm444_vm0, %v1930_v33, %v423_v55  ;;  %v1576_v55 = vld [vmem:[%s2520_s1 + $0x20] sm:$0xf0] }
  0xbe   : > { %1012 = vmatpush.bf16.msrb.mxu1 %v399_v56  ;;  %v1427_v56 = vor.u32 %v1576_v55, %v1426_v54 }
  0xc0   : > { %987 = vmatmul.bf16.vlgmr.msra.gmra.mxu0 %v1427_v56  ;;  %v1464_v56 = vld [vmem:[%s2520_s1 + $0x6c] sm:$0xf0] }
  0xc1   : > { %634 = vrot.lane.b32.xlu1 %v1818_v40, %s1703_s22 }
  0xc2   : > { %632 = vrot.lane.b32.xlu0 %v1822_v41, %s1703_s22  ;;  %1013 = vmatpush.bf16.msrb.mxu1 %v398_v59 }
  0xc3   : > { %v431_v60 = vpop.permute.xlu1 %430  ;;  %628 = vrot.lane.b32.xlu2 %v1800_v31, %s1703_s22 }
  0xc4   : > { %v429_v61 = vpop.permute.xlu0 %428 }
  0xc5   : > { %v492_v63 = vpop.permute.xlu2 %491  ;;  %v449_v18 = vsel %vm444_vm0, %v429_v61, %v431_v60 }
  0xc6   : > { %1014 = vmatpush.bf16.msrb.mxu1 %v397_v62 }
  0xc9   : > { %624 = vrot.lane.b32.xlu1 %v1792_v26, %s1703_s22 }
  0xca   : > { %630 = vrot.lane.b32.xlu0 %v1810_v35, %s1703_s22  ;;  %1015 = vmatpush.bf16.msrb.mxu1 %v396_v51 }
  0xcb   : > { %v437_v58 = vpop.permute.xlu1 %436  ;;  %626 = vrot.lane.b32.xlu2 %v1804_v32, %s1703_s22 }
  0xcc   : > { %v435_v0 = vpop.permute.xlu0 %434 }
  0xcd   : > { %v482_v1 = vpop.permute.xlu2 %481  ;;  %v450_v15 = vsel %vm444_vm0, %v433_v45, %v435_v0 }
  0xd1   : > { %687 = vrot.lane.b32.xlu1 %v1836_v47, %s1704_s23 }
  0xd2   : > { %685 = vrot.lane.b32.xlu0 %v1828_v44, %s1704_s23 }
  0xd3   : > { %v439_v2 = vpop.permute.xlu1 %438  ;;  %587 = vrot.lane.b32.xlu2 %v1828_v44, %s1705_s24 }
  0xd4   : > { %v443_v4 = vpop.permute.xlu0 %442  ;;  %v451_v8 = vsel %vm444_vm0, %v437_v58, %v439_v2  ;;  %v1534_v58 = vld [vmem:[%s2520_s1 + $0xd8] sm:$0xf] }
  0xd5   : > { %v452_v6 = vsel %vm444_vm0, %v441_v52, %v443_v4  ;;  %v480_v7 = vpop.permute.xlu2 %479 }
  0xd6   : > { %1037 = vmatpush.bf16.msra.mxu2 %v452_v6 }
  0xd9   : > { %620 = vrot.lane.b32.xlu1 %v1786_v23, %s1703_s22 }
  0xda   : > { %589 = vrot.lane.b32.xlu0 %v1836_v47, %s1705_s24  ;;  %1038 = vmatpush.bf16.msra.mxu2 %v451_v8  ;;  %v1585_v8 = vld [vmem:[%s2520_s1 + $0x68] sm:$0xf0] }
  0xdb   : > { %v490_v9 = vpop.permute.xlu1 %489  ;;  %622 = vrot.lane.b32.xlu2 %v1782_v22, %s1703_s22 }
  0xdc   : > { %v2006_v10 = vpop.permute.xlu0 %463  ;;  %v501_v11 = vsel %vm493_vm2, %v490_v9, %v492_v63 }
  0xdd   : > { %1066 = vmatpush.bf16.msra.mxu3 %v501_v11  ;;  %v470_v16 = vpop.permute.xlu2 %469  ;;  %v494_v61 = vsel %vm493_vm2, %v1971_v57, %v2006_v10  ;;  %v1603_v57 = vld [vmem:[%s2520_s1 + $0xf8] sm:$0xf0] }
  0xde   : > { %1039 = vmatpush.bf16.msra.mxu2 %v450_v15 }
  0xe1   : > { %683 = vrot.lane.b32.xlu1 %v1818_v40, %s1704_s23 }
  0xe2   : > { %681 = vrot.lane.b32.xlu0 %v1822_v41, %s1704_s23  ;;  %1040 = vmatpush.bf16.msra.mxu2 %v449_v18  ;;  %v1434_v18 = vld [vmem:[%s2520_s1 + $0x8] sm:$0xf] }
  0xe3   : > { %v488_v19 = vpop.permute.xlu1 %487  ;;  %583 = vrot.lane.b32.xlu2 %v1822_v41, %s1705_s24 }
  0xe4   : > { %v486_v20 = vpop.permute.xlu0 %485 }
  0xe5   : > { %v500_v24 = vsel %vm493_vm2, %v486_v20, %v488_v19  ;;  %v468_v25 = vpop.permute.xlu2 %467  ;;  %v1577_v19 = vld [vmem:[%s2520_s1 + $0x28] sm:$0xf0] }
  0xe6   : > { %1041 = vmatpush.bf16.msra.mxu2 %v448_v21  ;;  %1067 = vmatpush.bf16.msra.mxu3 %v500_v24  ;;  %v1435_v20 = vor.u32 %v1577_v19, %v1434_v18  ;;  %v1573_v21 = vld [vmem:[%s2520_s1 + $0xc] sm:$0xf]  ;;  %v1436_v24 = vld [vmem:[%s2520_s1 + $0x2c] sm:$0xf0] }
  0xe9   : > { %616 = vrot.lane.b32.xlu1 %v1762_v12, %s1703_s22 }
  0xea   : > { %585 = vrot.lane.b32.xlu0 %v1818_v40, %s1705_s24  ;;  %1042 = vmatpush.bf16.msra.mxu2 %v447_v27 }
  0xeb   : > { %v478_v28 = vpop.permute.xlu1 %477  ;;  %618 = vrot.lane.b32.xlu2 %v1774_v17, %s1703_s22 }
  0xec   : > { %v484_v29 = vpop.permute.xlu0 %483  ;;  %v498_v33 = vsel %vm493_vm2, %v478_v28, %v480_v7  ;;  %v1462_v7 = vld [vmem:[%s2520_s1 + $0x48] sm:$0xf]  ;;  %v1572_v28 = vld [vmem:[%s2520_s1 + $0x4] sm:$0xf] }
  0xed   : > { %v499_v34 = vsel %vm493_vm2, %v482_v1, %v484_v29  ;;  %v535_v36 = vpop.permute.xlu2 %534  ;;  %v1535_v1 = vor.u32 %v1603_v57, %v1534_v58  ;;  %v1463_v9 = vor.u32 %v1585_v8, %v1462_v7  ;;  %v1428_v29 = vld [vmem:[%s2520_s1 + $0x24] sm:$0xf0]  ;;  %v1587_v7 = vld [vmem:[%s2520_s1 + $0x78] sm:$0xf0] }
  0xee   : > { %1043 = vmatpush.bf16.msra.mxu2 %v446_v30  ;;  %1068 = vmatpush.bf16.msra.mxu3 %v499_v34  ;;  %v1431_v34 = vor.u32 %v1572_v28, %v1428_v29  ;;  %v1591_v8 = vld [vmem:[%s2520_s1 + $0x9c] sm:$0xf]  ;;  %v1542_v29 = vld [vmem:[%s2520_s1 + $0xe0] sm:$0xf] }
  0xef   : > { %992 = vmatmul.bf16.gmra.mxu0 %v1463_v9  ;;  %v1508_v9 = vld [vmem:[%s2520_s1 + $0xbc] sm:$0xf0] }
  0xf1   : > { %679 = vrot.lane.b32.xlu1 %v1810_v35, %s1704_s23 }
  0xf2   : > { %677 = vrot.lane.b32.xlu0 %v1800_v31, %s1704_s23  ;;  %1044 = vmatpush.bf16.msra.mxu2 %v1945_v42  ;;  %v1498_v42 = vld [vmem:[%s2520_s1 + $0x90] sm:$0xf] }
  0xf3   : > { %1069 = vmatpush.bf16.msra.mxu3 %v498_v33  ;;  %v476_v37 = vpop.permute.xlu1 %475  ;;  %579 = vrot.lane.b32.xlu2 %v1800_v31, %s1705_s24  ;;  %v1499_v49 = vor.u32 %v1594_v46, %v1498_v42  ;;  %v1470_v42 = vld [vmem:[%s2520_s1 + $0x50] sm:$0xf]  ;;  %v1586_v46 = vld [vmem:[%s2520_s1 + $0x70] sm:$0xf0] }
  0xf4   : > { %v474_v38 = vpop.permute.xlu0 %473 }
  0xf5   : > { %v497_v39 = vsel %vm493_vm2, %v474_v38, %v476_v37  ;;  %v533_v43 = vpop.permute.xlu2 %532  ;;  %997 = vmatmul.bf16.vlgmr.msra.gmra.mxu1 %v1499_v49  ;;  %1045 = vmatmul.bf16.vlgmr.msra.gmra.mxu2 %v1435_v20  ;;  %v1471_v49 = vor.u32 %v1586_v46, %v1470_v42 }
  0xf7   : > { %1070 = vmatpush.bf16.msra.mxu3 %v497_v39 }
  0xf9   : > { %612 = vrot.lane.b32.xlu1 %v1747_v3, %s1703_s22 }
  0xfa   : > { %581 = vrot.lane.b32.xlu0 %v1810_v35, %s1705_s24 }
  0xfb   : > { %v466_v45 = vpop.permute.xlu1 %465  ;;  %614 = vrot.lane.b32.xlu2 %v1764_v13, %s1703_s22 }
  0xfc   : > { %v472_v48 = vpop.permute.xlu0 %471  ;;  %v495_v53 = vsel %vm493_vm2, %v466_v45, %v468_v25  ;;  %v1439_v25 = vor.u32 %v1573_v21, %v1436_v24 }
  0xfd   : > { %v496_v50 = vsel %vm493_vm2, %v470_v16, %v472_v48  ;;  %v523_v52 = vpop.permute.xlu2 %522  ;;  %v1442_v48 = vld [vmem:[%s2520_s1 + $0x10] sm:$0xf] }
  0xfe   : > { %1071 = vmatpush.bf16.msra.mxu3 %v496_v50  ;;  %v1578_v50 = vld [vmem:[%s2520_s1 + $0x30] sm:$0xf0] }
 0x101   : > { %675 = vrot.lane.b32.xlu1 %v1804_v32, %s1704_s23 }
 0x102   : > { %673 = vrot.lane.b32.xlu0 %v1792_v26, %s1704_s23  ;;  %1072 = vmatpush.bf16.msra.mxu3 %v495_v53  ;;  %v1472_v53 = vld [vmem:[%s2520_s1 + $0x74] sm:$0xf0] }
 0x103   : > { %v541_v59 = vpop.permute.xlu1 %540  ;;  %575 = vrot.lane.b32.xlu2 %v1792_v26, %s1705_s24 }
 0x104   : > { %v539_v60 = vpop.permute.xlu0 %538 }
 0x105   : > { %v550_v62 = vsel %vm542_vm3, %v539_v60, %v541_v59  ;;  %v521_v63 = vpop.permute.xlu2 %520  ;;  %1002 = vmatmul.bf16.gmra.mxu1 %v1535_v1  ;;  %1050 = vmatmul.bf16.gmra.mxu2 %v1471_v49  ;;  %v1506_v1 = vld [vmem:[%s2520_s1 + $0x98] sm:$0xf] }
 0x106   : > { %1073 = vmatpush.bf16.msra.mxu3 %v494_v61  ;;  %1095 = vmatpush.bf16.msrb.mxu0 %v550_v62  ;;  %v1443_v61 = vor.u32 %v1578_v50, %v1442_v48 }
 0x109   : > { %608 = vrot.lane.b32.xlu1 %v1750_v5, %s1703_s22  ;;  %1074 = vmatmul.bf16.vlgmr.msra.gmra.mxu3 %v1439_v25 }
 0x10a   : > { %577 = vrot.lane.b32.xlu0 %v1804_v32, %s1705_s24 }
 0x10b   : > { %v531_v51 = vpop.permute.xlu1 %530  ;;  %610 = vrot.lane.b32.xlu2 %v1768_v14, %s1703_s22 }
 0x10c   : > { %v537_v0 = vpop.permute.xlu0 %536  ;;  %v548_v6 = vsel %vm542_vm3, %v531_v51, %v533_v43 }
 0x10d   : > { %v549_v2 = vsel %vm542_vm3, %v535_v36, %v537_v0  ;;  %v2086_v4 = vpop.permute.xlu2 %636 }
 0x10e   : > { %1096 = vmatpush.bf16.msrb.mxu0 %v549_v2  ;;  %v1595_v2 = vld [vmem:[%s2520_s1 + $0xb8] sm:$0xf0] }
 0x111   : > { %671 = vrot.lane.b32.xlu1 %v1782_v22, %s1704_s23 }
 0x112   : > { %669 = vrot.lane.b32.xlu0 %v1786_v23, %s1704_s23  ;;  %1097 = vmatpush.bf16.msrb.mxu0 %v548_v6  ;;  %v1507_v6 = vor.u32 %v1595_v2, %v1506_v1  ;;  %v217_v2 = vld [vmem:[%s2521_s2 + $0x30] sm:$0xff] }
 0x113   : > { %v529_v10 = vpop.permute.xlu1 %528  ;;  %571 = vrot.lane.b32.xlu2 %v1786_v23, %s1705_s24 }
 0x114   : > { %v527_v11 = vpop.permute.xlu0 %526 }
 0x115   : > { %v547_v15 = vsel %vm542_vm3, %v527_v11, %v529_v10  ;;  %v513_v16 = vpop.permute.xlu2 %512  ;;  %1016 = vmatmul.bf16.vlgmr.msrb.gmra.mxu1 %v1431_v34  ;;  %1055 = vmatmul.bf16.gmra.mxu2 %v1507_v6  ;;  %v1511_v10 = vor.u32 %v1591_v8, %v1508_v9  ;;  %v1514_v34 = vld [vmem:[%s2520_s1 + $0xa0] sm:$0xf]  ;;  %v218_v9 = vld [vmem:[%s2521_s2 + $0x38] sm:$0xff] }
 0x116   : > { %1098 = vmatpush.bf16.msrb.mxu0 %v547_v15  ;;  %v1500_v15 = vld [vmem:[%s2520_s1 + $0xb4] sm:$0xf0] }
 0x119   : > { %665 = vrot.lane.b32.xlu1 %v1762_v12, %s1704_s23 }
 0x11a   : > { %573 = vrot.lane.b32.xlu0 %v1782_v22, %s1705_s24 }
 0x11b   : > { %v519_v27 = vpop.permute.xlu1 %518  ;;  %667 = vrot.lane.b32.xlu2 %v1774_v17, %s1704_s23 }
 0x11c   : > { %v525_v30 = vpop.permute.xlu0 %524  ;;  %v545_v37 = vsel %vm542_vm3, %v519_v27, %v521_v63 }
 0x11d   : > { %v546_v36 = vsel %vm542_vm3, %v523_v52, %v525_v30  ;;  %v2127_v33 = vpop.permute.xlu2 %628  ;;  %v1582_v52 = vld [vmem:[%s2520_s1 + $0x54] sm:$0xf]  ;;  %v1604_v30 = vld [vmem:[%s2520_s1 + $0x100] sm:$0xf0] }
 0x11e   : > { %1099 = vmatpush.bf16.msrb.mxu0 %v546_v36  ;;  %v1475_v54 = vor.u32 %v1582_v52, %v1472_v53  ;;  %v1596_v36 = vld [vmem:[%s2520_s1 + $0xc0] sm:$0xf0] }
 0x11f   : > { %v1515_v48 = vor.u32 %v1596_v36, %v1514_v34 }
 0x120   : > { %1079 = vmatmul.bf16.gmra.mxu3 %v1475_v54 }
 0x121   : > { %569 = vrot.lane.b32.xlu1 %v1774_v17, %s1705_s24 }
 0x122   : > { %567 = vrot.lane.b32.xlu0 %v1762_v12, %s1705_s24  ;;  %1100 = vmatpush.bf16.msrb.mxu0 %v545_v37  ;;  %v1544_v37 = vld [vmem:[%s2520_s1 + $0x104] sm:$0xf0] }
 0x123   : > { %v517_v38 = vpop.permute.xlu1 %516  ;;  %661 = vrot.lane.b32.xlu2 %v1747_v3, %s1704_s23 }
 0x124   : > { %v515_v39 = vpop.permute.xlu0 %514 }
 0x125   : > { %v544_v43 = vsel %vm542_vm3, %v515_v39, %v517_v38  ;;  %v2137_v45 = vpop.permute.xlu2 %626  ;;  %v1707_v38 = vmov 0  }
 0x126   : > { %1101 = vmatpush.bf16.msrb.mxu0 %v544_v43  ;;  %1690 = vset.pattern.permute.xlu1 %v1707_v38 }
 0x127   : > { %1689 = vset.pattern.permute.xlu0 %v1707_v38  ;;  %1688 = vset.pattern.permute.xlu2 %v1707_v38 }
 0x129   : > { %734 = vrot.lane.b32.xlu1 %v1828_v44, %s1706_s9  ;;  %v1581_v44 = vld [vmem:[%s2520_s1 + $0x4c] sm:$0xf] }
 0x12a   : > { %663 = vrot.lane.b32.xlu0 %v1764_v13, %s1704_s23  ;;  %v1467_v62 = vor.u32 %v1581_v44, %v1464_v56 }
 0x12b   : > { %v511_v55 = vpop.permute.xlu1 %510  ;;  %736 = vrot.lane.b32.xlu2 %v1836_v47, %s1706_s9 }
 0x12c   : > { %v639_v59 = vpop.permute.xlu0 %638  ;;  %v543_v60 = vsel %vm542_vm3, %v511_v55, %v513_v16  ;;  %1021 = vmatmul.bf16.gmra.mxu1 %v1467_v62 }
 0x12d   : > { %v648_v63 = vsel %vm640_vm4, %v2086_v4, %v639_v59  ;;  %1102 = vmatpush.bf16.msrb.mxu0 %v543_v60  ;;  %v2172_v51 = vpop.permute.xlu2 %587  ;;  %v1478_v4 = vld [vmem:[%s2520_s1 + $0x58] sm:$0xf] }
 0x12e   : > { %1153 = vmatpush.bf16.msrb.mxu2 %v648_v63  ;;  %v1479_v18 = vor.u32 %v1587_v7, %v1478_v4  ;;  %v216_v4 = vld [vmem:[%s2521_s2 + $0x28] sm:$0xff] }
 0x130   : > { %1103 = vmatmul.bf16.vlgmr.msrb.gmra.mxu0 %v1443_v61  ;;  %1084 = vmatmul.bf16.gmra.mxu3 %v1511_v10 }
 0x131   : > { %565 = vrot.lane.b32.xlu1 %v1764_v13, %s1705_s24 }
 0x132   : > { %563 = vrot.lane.b32.xlu0 %v1747_v3, %s1705_s24 }
 0x133   : > { %v635_v58 = vpop.permute.xlu1 %634  ;;  %657 = vrot.lane.b32.xlu2 %v1750_v5, %s1704_s23 }
 0x134   : > { %v633_v57 = vpop.permute.xlu0 %632 }
 0x135   : > { %v647_v0 = vsel %vm640_vm4, %v633_v57, %v635_v58  ;;  %v623_v47 = vpop.permute.xlu2 %622 }
 0x136   : > { %1154 = vmatpush.bf16.msrb.mxu2 %v647_v0 }
 0x139   : > { %730 = vrot.lane.b32.xlu1 %v1822_v41, %s1706_s9  ;;  %v1590_v41 = vld [vmem:[%s2520_s1 + $0x94] sm:$0xf] }
 0x13a   : > { %659 = vrot.lane.b32.xlu0 %v1768_v14, %s1704_s23  ;;  %v1503_v19 = vor.u32 %v1590_v41, %v1500_v15 }
 0x13b   : > { %v625_v11 = vpop.permute.xlu1 %624  ;;  %732 = vrot.lane.b32.xlu2 %v1818_v40, %s1706_s9 }
 0x13c   : > { %v631_v16 = vpop.permute.xlu0 %630  ;;  %1026 = vmatmul.bf16.gmra.mxu1 %v1503_v19  ;;  %v645_v24 = vsel %vm640_vm4, %v625_v11, %v2137_v45  ;;  %v1536_v45 = vld [vmem:[%s2520_s1 + $0xfc] sm:$0xf0] }
 0x13d   : > { %v646_v20 = vsel %vm640_vm4, %v2127_v33, %v631_v16  ;;  %v584_v21 = vpop.permute.xlu2 %583  ;;  %v1543_v33 = vor.u32 %v1604_v30, %v1542_v29 }
 0x13e   : > { %1155 = vmatpush.bf16.msrb.mxu2 %v646_v20 }
 0x13f   : > { %1060 = vmatmul.bf16.gmra.mxu2 %v1543_v33 }
 0x140   : > { %1108 = vmatmul.bf16.gmra.mxu0 %v1479_v18 }
 0x141   : > { %561 = vrot.lane.b32.xlu1 %v1768_v14, %s1705_s24 }
 0x142   : > { %559 = vrot.lane.b32.xlu0 %v1750_v5, %s1705_s24  ;;  %1156 = vmatpush.bf16.msrb.mxu2 %v645_v24 }
 0x143   : > { %v688_v25 = vpop.permute.xlu1 %687  ;;  %726 = vrot.lane.b32.xlu2 %v1800_v31, %s1706_s9  ;;  %v1600_v31 = vld [vmem:[%s2520_s1 + $0xe4] sm:$0xf] }
 0x144   : > { %v686_v27 = vpop.permute.xlu0 %685  ;;  %v1547_v39 = vor.u32 %v1600_v31, %v1544_v37 }
 0x145   : > { %v697_v28 = vsel %vm689_vm5, %v686_v27, %v688_v25  ;;  %v619_v40 = vpop.permute.xlu2 %618  ;;  %v1450_v27 = vld [vmem:[%s2520_s1 + $0x18] sm:$0xf] }
 0x146   : > { %1182 = vmatpush.bf16.msrb.mxu3 %v697_v28  ;;  %v1579_v28 = vld [vmem:[%s2520_s1 + $0x38] sm:$0xf0] }
 0x147   : > { %1089 = vmatmul.bf16.gmra.mxu3 %v1547_v39  ;;  %v1451_v29 = vor.u32 %v1579_v28, %v1450_v27  ;;  %v1488_v27 = vld [vmem:[%s2520_s1 + $0x84] sm:$0xf0] }
 0x149   : > { %722 = vrot.lane.b32.xlu1 %v1792_v26, %s1706_s9  ;;  %v1599_v26 = vld [vmem:[%s2520_s1 + $0xdc] sm:$0xf] }
 0x14a   : > { %728 = vrot.lane.b32.xlu0 %v1810_v35, %s1706_s9  ;;  %v1539_v35 = vor.u32 %v1599_v26, %v1536_v45 }
 0x14b   : > { %v621_v43 = vpop.permute.xlu1 %620  ;;  %724 = vrot.lane.b32.xlu2 %v1804_v32, %s1706_s9  ;;  %v1550_v32 = vld [vmem:[%s2520_s1 + $0xe8] sm:$0xf] }
 0x14c   : > { %v590_v42 = vpop.permute.xlu0 %589  ;;  %v644_v46 = vsel %vm640_vm4, %v621_v43, %v623_v47  ;;  %1031 = vmatmul.bf16.gmra.mxu1 %v1539_v35  ;;  %v215_v47 = vld [vmem:[%s2521_s2 + $0x20] sm:$0xff] }
 0x14d   : > { %v599_v49 = vsel %vm591_vm6, %v2172_v51, %v590_v42  ;;  %1157 = vmatpush.bf16.msrb.mxu2 %v644_v46  ;;  %v580_v50 = vpop.permute.xlu2 %579  ;;  %v1486_v42 = vld [vmem:[%s2520_s1 + $0x60] sm:$0xf]  ;;  %v1588_v46 = vld [vmem:[%s2520_s1 + $0x80] sm:$0xf0] }
 0x14e   : > { %1124 = vmatpush.bf16.msra.mxu1 %v599_v49  ;;  %v2334_v49 = vpop.f32.mrf.mxu0 }
 0x150   : > { %1113 = vmatmul.bf16.gmra.mxu0 %v1515_v48  ;;  %v1487_v48 = vor.u32 %v1588_v46, %v1486_v42 }
 0x151   : > { %720 = vrot.lane.b32.xlu1 %v1782_v22, %s1706_s9  ;;  %v1605_v22 = vld [vmem:[%s2520_s1 + $0x108] sm:$0xf0] }
 0x152   : > { %718 = vrot.lane.b32.xlu0 %v1786_v23, %s1706_s9  ;;  %v1551_v56 = vor.u32 %v1605_v22, %v1550_v32 }
 0x153   : > { %v684_v52 = vpop.permute.xlu1 %683  ;;  %714 = vrot.lane.b32.xlu2 %v1762_v12, %s1706_s9 }
 0x154   : > { %v682_v53 = vpop.permute.xlu0 %681 }
 0x155   : > { %v696_v54 = vsel %vm689_vm5, %v682_v53, %v684_v52  ;;  %v615_v55 = vpop.permute.xlu2 %614 }
 0x156   : > { %1183 = vmatpush.bf16.msrb.mxu3 %v696_v54 }
 0x159   : > { %710 = vrot.lane.b32.xlu1 %v1747_v3, %s1706_s9 }
 0x15a   : > { %716 = vrot.lane.b32.xlu0 %v1774_v17, %s1706_s9  ;;  %v211_v17 = vld [vmem:[%s2521_s2] sm:$0xff] }
 0x15b   : > { %v617_v23 = vpop.permute.xlu1 %616  ;;  %712 = vrot.lane.b32.xlu2 %v1764_v13, %s1706_s9  ;;  %v213_v13 = vld [vmem:[%s2521_s2 + $0x10] sm:$0xff] }
 0x15c   : > { %v586_v44 = vpop.permute.xlu0 %585  ;;  %v643_v12 = vsel %vm640_vm4, %v617_v23, %v619_v40 }
 0x15d   : > { %v598_v59 = vsel %vm591_vm6, %v584_v21, %v586_v44  ;;  %1158 = vmatpush.bf16.msrb.mxu2 %v643_v12  ;;  %v576_v3 = vpop.permute.xlu2 %575 }
 0x15e   : > { %1125 = vmatpush.bf16.msra.mxu1 %v598_v59 }
 0x160   : > { %1118 = vmatmul.bf16.gmra.mxu0 %v1551_v56  ;;  %v2345_v56 = vpop.f32.mrf.mxu0 }
 0x161   : > { %708 = vrot.lane.b32.xlu1 %v1768_v14, %s1706_s9  ;;  %v212_v14 = vld [vmem:[%s2521_s2 + $0x8] sm:$0xff] }
 0x162   : > { %706 = vrot.lane.b32.xlu0 %v1750_v5, %s1706_s9  ;;  %v214_v5 = vld [vmem:[%s2521_s2 + $0x18] sm:$0xff] }
 0x163   : > { %v680_v60 = vpop.permute.xlu1 %679  ;;  %757 = vperm.xlu2 %1688, %v211_v17   ;;  %v1597_v17 = vld [vmem:[%s2520_s1 + $0xc8] sm:$0xf0] }
 0x164   : > { %v678_v61 = vpop.permute.xlu0 %677 }
 0x165   : > { %v695_v62 = vsel %vm689_vm5, %v678_v61, %v680_v60  ;;  %v611_v63 = vpop.permute.xlu2 %610 }
 0x166   : > { %1184 = vmatpush.bf16.msrb.mxu3 %v695_v62 }
 0x169   : > { %767 = vperm.xlu1 %1690, %v213_v13   ;;  %v1575_v13 = vld [vmem:[%s2520_s1 + $0x1c] sm:$0xf] }
 0x16a   : > { %762 = vperm.xlu0 %1689, %v212_v14  }
 0x16b   : > { %v613_v51 = vpop.permute.xlu1 %612  ;;  %772 = vperm.xlu2 %1688, %v214_v5  }
 0x16c   : > { %v582_v58 = vpop.permute.xlu0 %581  ;;  %v642_v57 = vsel %vm640_vm4, %v613_v51, %v615_v55 }
 0x16d   : > { %v597_v0 = vsel %vm591_vm6, %v580_v50, %v582_v58  ;;  %1159 = vmatpush.bf16.msrb.mxu2 %v642_v57  ;;  %v572_v1 = vpop.permute.xlu2 %571 }
 0x16e   : > { %1126 = vmatpush.bf16.msra.mxu1 %v597_v0 }
 0x171   : > { %777 = vperm.xlu1 %1690, %v215_v47   ;;  %v2367_v47 = vpop.f32.mrf.mxu0 }
 0x172   : > { %787 = vperm.xlu0 %1689, %v217_v2   ;;  %v2308_v41 = vpop.f32.mrf.mxu1 }
 0x173   : > { %v676_v6 = vpop.permute.xlu1 %675  ;;  %782 = vperm.xlu2 %1688, %v216_v4   ;;  %v1574_v4 = vld [vmem:[%s2520_s1 + $0x14] sm:$0xf] }
 0x174   : > { %v674_v7 = vpop.permute.xlu0 %673 }
 0x175   : > { %v694_v8 = vsel %vm689_vm5, %v674_v7, %v676_v6  ;;  %v668_v10 = vpop.permute.xlu2 %667  ;;  %v1444_v6 = vld [vmem:[%s2520_s1 + $0x34] sm:$0xf0] }
 0x176   : > { %1185 = vmatpush.bf16.msrb.mxu3 %v694_v8 }
 0x178   : > { %v2340_v32 = vpop.f32.mrf.mxu2 }
 0x179   : > { %792 = vperm.xlu1 %1690, %v218_v9  }
 0x17a   : > { %v2312_v21 = vpop.f32.mrf.mxu1 }
 0x17b   : > { %v609_v11 = vpop.permute.xlu1 %608 }
 0x17c   : > { %v578_v15 = vpop.permute.xlu0 %577  ;;  %v641_v16 = vsel %vm640_vm4, %v609_v11, %v611_v63  ;;  %v1452_v63 = vld [vmem:[%s2520_s1 + $0x3c] sm:$0xf0]  ;;  %v1447_v11 = vor.u32 %v1574_v4, %v1444_v6  ;;  %v1592_v6 = vld [vmem:[%s2520_s1 + $0xa4] sm:$0xf] }
 0x17d   : > { %v596_v18 = vsel %vm591_vm6, %v576_v3, %v578_v15  ;;  %1160 = vmatpush.bf16.msrb.mxu2 %v641_v16  ;;  %v662_v19 = vpop.permute.xlu2 %661  ;;  %v1522_v3 = vld [vmem:[%s2520_s1 + $0xa8] sm:$0xf]  ;;  %v1455_v0 = vor.u32 %v1575_v13, %v1452_v63 }
 0x17e   : > { %1127 = vmatpush.bf16.msra.mxu1 %v596_v18  ;;  %v1523_v61 = vor.u32 %v1597_v17, %v1522_v3  ;;  %v1558_v18 = vld [vmem:[%s2520_s1 + $0xf0] sm:$0xf] }
 0x180   : > { %1161 = vmatmul.bf16.vlgmr.msrb.gmra.mxu2 %v1451_v29  ;;  %v2355_v62 = vpop.f32.mrf.mxu2 }
 0x182   : > { %v2321_v34 = vpop.f32.mrf.mxu1 }
 0x183   : > { %v672_v20 = vpop.permute.xlu1 %671 }
 0x184   : > { %v670_v24 = vpop.permute.xlu0 %669 }
 0x185   : > { %v693_v25 = vsel %vm689_vm5, %v670_v24, %v672_v20  ;;  %v737_v40 = vpop.permute.xlu2 %736  ;;  %v995_v24 = vpop.f32.mrf.mxu0 }
 0x186   : > { %1186 = vmatpush.bf16.msrb.mxu3 %v693_v25  ;;  %v1584_v25 = vld [vmem:[%s2520_s1 + $0x64] sm:$0xf] }
 0x188   : > { %v2377_v8 = vpop.f32.mrf.mxu2 }
 0x18a   : > { %v2325_v39 = vpop.f32.mrf.mxu1 }
 0x18b   : > { %v666_v30 = vpop.permute.xlu1 %665 }
 0x18c   : > { %v574_v36 = vpop.permute.xlu0 %573  ;;  %v692_v33 = vsel %vm689_vm5, %v666_v30, %v668_v10  ;;  %v2342_v22 = vpop.f32.mrf.mxu3 }
 0x18d   : > { %v595_v31 = vsel %vm591_vm6, %v572_v1, %v574_v36  ;;  %1187 = vmatpush.bf16.msrb.mxu3 %v692_v33  ;;  %v658_v37 = vpop.permute.xlu2 %657  ;;  %v1491_v36 = vor.u32 %v1584_v25, %v1488_v27 }
 0x18e   : > { %1128 = vmatpush.bf16.msra.mxu1 %v595_v31 }
 0x190   : > { %1166 = vmatmul.bf16.gmra.mxu2 %v1487_v48  ;;  %v1053_v33 = vpop.f32.mrf.mxu2 }
 0x192   : > { %v2338_v54 = vpop.f32.mrf.mxu1 }
 0x193   : > { %v570_v38 = vpop.permute.xlu1 %569 }
 0x194   : > { %v568_v43 = vpop.permute.xlu0 %567  ;;  %v2363_v5 = vpop.f32.mrf.mxu3 }
 0x195   : > { %v594_v26 = vsel %vm591_vm6, %v568_v43, %v570_v38  ;;  %v733_v45 = vpop.permute.xlu2 %732 }
 0x196   : > { %1129 = vmatpush.bf16.msra.mxu1 %v594_v26  ;;  %v1583_v26 = vld [vmem:[%s2520_s1 + $0x5c] sm:$0xf] }
 0x19a   : > { %v2353_v60 = vpop.f32.mrf.mxu1 }
 0x19b   : > { %v735_v35 = vpop.permute.xlu1 %734 }
 0x19c   : > { %v664_v50 = vpop.permute.xlu0 %663  ;;  %v746_v52 = vsel %vm738_vm7, %v735_v35, %v737_v40 }
 0x19d   : > { %v691_v53 = vsel %vm689_vm5, %v662_v19, %v664_v50  ;;  %1211 = vmatpush.bf16.msra.mxu0 %v746_v52  ;;  %1663 = vmatpush.bf16.msra.mxu2 %v746_v52  ;;  %v727_v55 = vpop.permute.xlu2 %726  ;;  %v1606_v19 = vld [vmem:[%s2520_s1 + $0x110] sm:$0xf0] }
 0x19e   : > { %1188 = vmatpush.bf16.msrb.mxu3 %v691_v53  ;;  %v1559_v20 = vor.u32 %v1606_v19, %v1558_v18  ;;  %v1607_v18 = vld [vmem:[%s2520_s1 + $0x118] sm:$0xf0] }
 0x1a0   : > { %1171 = vmatmul.bf16.gmra.mxu2 %v1523_v61 }
 0x1a3   : > { %v566_v23 = vpop.permute.xlu1 %565  ;;  %v2380_v15 = vpop.f32.mrf.mxu3 }
 0x1a4   : > { %v564_v44 = vpop.permute.xlu0 %563 }
 0x1a5   : > { %v593_v12 = vsel %vm591_vm6, %v564_v44, %v566_v23  ;;  %v725_v59 = vpop.permute.xlu2 %724  ;;  %v2408_v23 = vpop.f32.mrf.mxu2 }
 0x1a6   : > { %1130 = vmatpush.bf16.msra.mxu1 %v593_v12 }
 0x1a9   : > { %v2369_v2 = vpop.f32.mrf.mxu1 }
 0x1ab   : > { %v731_v14 = vpop.permute.xlu1 %730 }
 0x1ac   : > { %v660_v51 = vpop.permute.xlu0 %659  ;;  %v745_v58 = vsel %vm738_vm7, %v731_v14, %v733_v45  ;;  %v1480_v45 = vld [vmem:[%s2520_s1 + $0x7c] sm:$0xf0] }
 0x1ad   : > { %v690_v57 = vsel %vm689_vm5, %v658_v37, %v660_v51  ;;  %1212 = vmatpush.bf16.msra.mxu0 %v745_v58  ;;  %1664 = vmatpush.bf16.msra.mxu2 %v745_v58  ;;  %v715_v1 = vpop.permute.xlu2 %714  ;;  %v1082_v37 = vpop.f32.mrf.mxu3  ;;  %v1483_v50 = vor.u32 %v1583_v26, %v1480_v45 }
 0x1ae   : > { %1189 = vmatpush.bf16.msrb.mxu3 %v690_v57  ;;  %v1104_v48 = vpop.f32.mrf.mxu0 }
 0x1b0   : > { %1176 = vmatmul.bf16.gmra.mxu2 %v1559_v20 }
 0x1b1   : > { %1190 = vmatmul.bf16.vlgmr.msrb.gmra.mxu3 %v1455_v0  ;;  %v1024_v40 = vpop.f32.mrf.mxu1 }
 0x1b3   : > { %v562_v7 = vpop.permute.xlu1 %561 }
 0x1b4   : > { %v560_v9 = vpop.permute.xlu0 %559 }
 0x1b5   : > { %v592_v10 = vsel %vm591_vm6, %v560_v9, %v562_v7  ;;  %v713_v16 = vpop.permute.xlu2 %712  ;;  %v2410_v12 = vpop.f32.mrf.mxu3  ;;  %v1516_v7 = vld [vmem:[%s2520_s1 + $0xc4] sm:$0xf0]  ;;  %v1458_v9 = vld [vmem:[%s2520_s1 + $0x20] sm:$0xf] }
 0x1b6   : > { %1131 = vmatpush.bf16.msra.mxu1 %v592_v10  ;;  %v2419_v63 = vpop.f32.mrf.mxu0  ;;  %v1519_v27 = vor.u32 %v1592_v6, %v1516_v7 }
 0x1b9   : > { %1132 = vmatmul.bf16.vlgmr.msra.gmra.mxu1 %v1447_v11  ;;  %v2406_v53 = vpop.f32.mrf.mxu1 }
 0x1bb   : > { %v723_v28 = vpop.permute.xlu1 %722 }
 0x1bc   : > { %v729_v29 = vpop.permute.xlu0 %728  ;;  %v743_v43 = vsel %vm738_vm7, %v723_v28, %v725_v59 }
 0x1bd   : > { %v744_v30 = vsel %vm738_vm7, %v727_v55, %v729_v29  ;;  %v758_v31 = vpop.permute.xlu2 %757  ;;  %v1087_v19 = vpop.f32.mrf.mxu3 }
 0x1be   : > { %1213 = vmatpush.bf16.msra.mxu0 %v744_v30  ;;  %1665 = vmatpush.bf16.msra.mxu2 %v744_v30  ;;  %v989_v38 = vadd.f32 %v2334_v49, %v758_v31  ;;  %v1109_v30 = vpop.f32.mrf.mxu0 }
 0x1c0   : > { %v1018_v42 = vadd.f32 %v2338_v54, %v989_v38  ;;  %v1593_v54 = vld [vmem:[%s2520_s1 + $0xac] sm:$0xf] }
 0x1c1   : > { %1195 = vmatmul.bf16.gmra.mxu3 %v1491_v36  ;;  %v1029_v57 = vpop.f32.mrf.mxu1  ;;  %v1602_v36 = vld [vmem:[%s2520_s1 + $0xf4] sm:$0xf] }
 0x1c2   : > { %1214 = vmatpush.bf16.msra.mxu0 %v743_v43  ;;  %1666 = vmatpush.bf16.msra.mxu2 %v743_v43  ;;  %v1047_v49 = vadd.f32 %v2340_v32, %v1018_v42  ;;  %v1524_v32 = vld [vmem:[%s2520_s1 + $0xcc] sm:$0xf0] }
 0x1c3   : > { %v721_v46 = vpop.permute.xlu1 %720  ;;  %v1527_v13 = vor.u32 %v1593_v54, %v1524_v32 }
 0x1c4   : > { %v719_v35 = vpop.permute.xlu0 %718  ;;  %v1076_v31 = vadd.f32 %v2342_v22, %v1047_v49 }
 0x1c5   : > { %v742_v52 = vsel %vm738_vm7, %v719_v35, %v721_v46  ;;  %v773_v55 = vpop.permute.xlu2 %772 }
 0x1c6   : > { %1215 = vmatpush.bf16.msra.mxu0 %v742_v52  ;;  %1667 = vmatpush.bf16.msra.mxu2 %v742_v52  ;;  %v996_v44 = vadd.f32 %v995_v24, %v773_v55  ;;  %v1105_v26 = vadd.f32 %v1104_v48, %v1076_v31  ;;  %v1601_v52 = vld [vmem:[%s2520_s1 + $0xec] sm:$0xf]  ;;  %v2461_v22 = vpop.f32.mrf.mxu0  ;;  %v1552_v48 = vld [vmem:[%s2520_s1 + $0x10c] sm:$0xf0] }
 0x1c8   : > { %v1025_v3 = vadd.f32 %v1024_v40, %v996_v44  ;;  %v1555_v44 = vor.u32 %v1601_v52, %v1552_v48 }
 0x1c9   : > { %1137 = vmatmul.bf16.gmra.mxu1 %v1483_v50 }
 0x1ca   : > { %v1054_v14 = vadd.f32 %v1053_v33, %v1025_v3  ;;  %v1560_v33 = vld [vmem:[%s2520_s1 + $0x114] sm:$0xf0] }
 0x1cb   : > { %v711_v59 = vpop.permute.xlu1 %710  ;;  %v1563_v45 = vor.u32 %v1602_v36, %v1560_v33 }
 0x1cc   : > { %v717_v17 = vpop.permute.xlu0 %716  ;;  %v2421_v51 = vadd.f32 %v1082_v37, %v1054_v14  ;;  %v740_v4 = vsel %vm738_vm7, %v711_v59, %v713_v16  ;;  %v1566_v16 = vld [vmem:[%s2520_s1 + $0xf8] sm:$0xf]  ;;  %v1032_v59 = vpop.f32.mrf.mxu1 }
 0x1cd   : > { %v741_v61 = vsel %vm738_vm7, %v715_v1, %v717_v17  ;;  %v783_v58 = vpop.permute.xlu2 %782  ;;  %v1058_v1 = vpop.f32.mrf.mxu2  ;;  %v1567_v40 = vor.u32 %v1607_v18, %v1566_v16 }
 0x1ce   : > { %1216 = vmatpush.bf16.msra.mxu0 %v741_v61  ;;  %1668 = vmatpush.bf16.msra.mxu2 %v741_v61  ;;  %v1001_v0 = vadd.f32 %v2312_v21, %v783_v58  ;;  %v1580_v21 = vld [vmem:[%s2520_s1 + $0x40] sm:$0xf0]  ;;  %v1114_v58 = vpop.f32.mrf.mxu0 }
 0x1cf   : > { %v1459_v28 = vor.u32 %v1580_v21, %v1458_v9 }
 0x1d0   : > { %v1030_v10 = vadd.f32 %v1029_v57, %v1001_v0 }
 0x1d1   : > { %1200 = vmatmul.bf16.gmra.mxu3 %v1527_v13 }
 0x1d2   : > { %1217 = vmatpush.bf16.msra.mxu0 %v740_v4  ;;  %1669 = vmatpush.bf16.msra.mxu2 %v740_v4  ;;  %v1059_v24 = vadd.f32 %v1058_v1, %v1030_v10 }
 0x1d3   : > { %v709_v11 = vpop.permute.xlu1 %708 }
 0x1d4   : > { %v707_v20 = vpop.permute.xlu0 %706  ;;  %v2444_v29 = vadd.f32 %v1087_v19, %v1059_v24  ;;  %v1034_v9 = vpop.f32.mrf.mxu1 }
 0x1d5   : > { %v739_v25 = vsel %vm738_vm7, %v707_v20, %v709_v11  ;;  %v1061_v61 = vpop.f32.mrf.mxu2 }
 0x1d6   : > { %1218 = vmatpush.bf16.msra.mxu0 %v739_v25  ;;  %1670 = vmatpush.bf16.msra.mxu2 %v739_v25  ;;  %v2488_v16 = vpop.f32.mrf.mxu0 }
 0x1d9   : > { %1142 = vmatmul.bf16.gmra.mxu1 %v1519_v27  ;;  %1219 = vmatmul.bf16.vlgmr.msra.gmra.mxu0 %v1459_v28 }
 0x1da   : > { %1234 = vmatmul.bf16.vlgmr.msra.gmra.mxu2 %v1567_v40 }
 0x1db   : > { %v768_v37 = vpop.permute.xlu1 %767 }
 0x1dc   : > { %v994_v38 = vadd.f32 %v2367_v47, %v768_v37  ;;  %v763_v43 = vpop.permute.xlu0 %762 }
 0x1dd   : > { %v991_v42 = vadd.f32 %v2345_v56, %v763_v43  ;;  %v1494_v56 = vld [vmem:[%s2520_s1 + $0x68] sm:$0xf]  ;;  %v1063_v6 = vpop.f32.mrf.mxu2 }
 0x1de   : > { %v1023_v46 = vadd.f32 %v2369_v2, %v994_v38  ;;  %v1119_v24 = vpop.f32.mrf.mxu0 }
 0x1df   : > { %v1020_v35 = vadd.f32 %v2353_v60, %v991_v42  ;;  %v1589_v60 = vld [vmem:[%s2520_s1 + $0x88] sm:$0xf0] }
 0x1e0   : > { %v1052_v50 = vadd.f32 %v2377_v8, %v1023_v46 }
 0x1e1   : > { %1205 = vmatmul.bf16.gmra.mxu3 %v1563_v45  ;;  %v1049_v47 = vadd.f32 %v2355_v62, %v1020_v35  ;;  %v1495_v62 = vor.u32 %v1589_v60, %v1494_v56 }
 0x1e3   : > { %v778_v2 = vpop.permute.xlu1 %777  ;;  %v1078_v8 = vadd.f32 %v2363_v5, %v1049_v47  ;;  %v1090_v5 = vpop.f32.mrf.mxu3 }
 0x1e4   : > { %v999_v49 = vadd.f32 %v2308_v41, %v778_v2  ;;  %v788_v55 = vpop.permute.xlu0 %787  ;;  %v1081_v41 = vadd.f32 %v2380_v15, %v1052_v50 }
 0x1e5   : > { %v1004_v54 = vadd.f32 %v2321_v34, %v788_v55  ;;  %v1107_v31 = vadd.f32 %v2419_v63, %v1078_v8 }
 0x1e6   : > { %v1028_v32 = vadd.f32 %v2406_v53, %v999_v49  ;;  %v1110_v34 = vadd.f32 %v1109_v30, %v1081_v41  ;;  %v1530_v53 = vld [vmem:[%s2520_s1 + $0xb0] sm:$0xf]  ;;  %v1121_v30 = vpop.f32.mrf.mxu0 }
 0x1e7   : > { %v1033_v3 = vadd.f32 %v1032_v59, %v1004_v54 }
 0x1e8   : > { %v1057_v17 = vadd.f32 %v2408_v23, %v1028_v32  ;;  %v1598_v23 = vld [vmem:[%s2520_s1 + $0xd0] sm:$0xf0] }
 0x1e9   : > { %1147 = vmatmul.bf16.gmra.mxu1 %v1555_v44  ;;  %1224 = vmatmul.bf16.gmra.mxu0 %v1495_v62  ;;  %v1062_v13 = vadd.f32 %v1061_v61, %v1033_v3  ;;  %v1531_v4 = vor.u32 %v1598_v23, %v1530_v53  ;;  %v1112_v62 = vadd.f32 %v2461_v22, %v2421_v51 }
 0x1ea   : > { %v1086_v14 = vadd.f32 %v2410_v12, %v1057_v17 }
 0x1eb   : > { %v1091_v57 = vadd.f32 %v1090_v5, %v1062_v13  ;;  %v1092_v15 = vpop.f32.mrf.mxu3  ;;  %v793_v50 = vpop.permute.xlu1 %792 }
 0x1ec   : > { %v2480_v0 = vadd.f32 %v1114_v58, %v1086_v14  ;;  %v1006_v48 = vadd.f32 %v2325_v39, %v793_v50 }
 0x1ed   : > { %v1120_v32 = vadd.f32 %v1119_v24, %v1091_v57 }
 0x1ee   : > { %v1035_v8 = vadd.f32 %v1034_v9, %v1006_v48 }
 0x1f0   : > { %v1064_v59 = vadd.f32 %v1063_v6, %v1035_v8 }
 0x1f2   : > { %v1093_v58 = vadd.f32 %v1092_v15, %v1064_v59 }
 0x1f9   : > { %1229 = vmatmul.bf16.gmra.mxu0 %v1531_v4 }
 0x203   : > { %v1162_v12 = vpop.f32.mrf.mxu2 }
 0x20b   : > { %v1164_v1 = vpop.f32.mrf.mxu2 }
 0x213   : > { %v1167_v7 = vpop.f32.mrf.mxu2 }
 0x21b   : > { %v1169_v10 = vpop.f32.mrf.mxu2 }
 0x223   : > { %v2490_v20 = vpop.f32.mrf.mxu2 }
 0x22b   : > { %v2492_v28 = vpop.f32.mrf.mxu2 }
 0x233   : > { %v1177_v37 = vpop.f32.mrf.mxu2 }
 0x234   : > { %v1191_v21 = vpop.f32.mrf.mxu3 }
 0x236   : > { %v1133_v11 = vpop.f32.mrf.mxu1 }
 0x237   : > { %v1134_v33 = vadd.f32 %v1133_v11, %v1105_v26 }
 0x239   : > { %v1163_v46 = vadd.f32 %v1162_v12, %v1134_v33  ;;  %v1122_v12 = vadd.f32 %v1121_v30, %v1093_v58 }
 0x23b   : > { %v1192_v52 = vadd.f32 %v1191_v21, %v1163_v46  ;;  %v1179_v2 = vpop.f32.mrf.mxu2 }
 0x23c   : > { %v1193_v18 = vpop.f32.mrf.mxu3 }
 0x23e   : > { %v1135_v19 = vpop.f32.mrf.mxu1 }
 0x23f   : > { %v1136_v43 = vadd.f32 %v1135_v19, %v1107_v31 }
 0x241   : > { %v1165_v35 = vadd.f32 %v1164_v1, %v1136_v43 }
 0x243   : > { %v1194_v56 = vadd.f32 %v1193_v18, %v1165_v35 }
 0x244   : > { %v1196_v25 = vpop.f32.mrf.mxu3 }
 0x246   : > { %v1138_v27 = vpop.f32.mrf.mxu1 }
 0x247   : > { %v1139_v39 = vadd.f32 %v1138_v27, %v1110_v34 }
 0x249   : > { %v1168_v14 = vadd.f32 %v1167_v7, %v1139_v39  ;;  %v1117_v7 = vadd.f32 %v2488_v16, %v2444_v29 }
 0x24b   : > { %v1197_v23 = vadd.f32 %v1196_v25, %v1168_v14 }
 0x24c   : > { %v1198_v40 = vpop.f32.mrf.mxu3 }
 0x24e   : > { %v1140_v36 = vpop.f32.mrf.mxu1 }
 0x24f   : > { %v1141_v3 = vadd.f32 %v1140_v36, %v1112_v62 }
 0x251   : > { %v1170_v53 = vadd.f32 %v1169_v10, %v1141_v3 }
 0x253   : > { %v1199_v1 = vadd.f32 %v1198_v40, %v1170_v53 }
 0x254   : > { %v2495_v38 = vpop.f32.mrf.mxu3 }
 0x256   : > { %v1143_v45 = vpop.f32.mrf.mxu1  ;;  %v1220_v42 = vpop.f32.mrf.mxu0 }
 0x257   : > { %v1221_v60 = vadd.f32 %v1220_v42, %v1192_v52  ;;  %v1144_v10 = vadd.f32 %v1143_v45, %v2480_v0 }
 0x259   : > { %v1240_v55 = vmax.f32 %v1221_v60, 0.0  ;;  %v1173_v33 = vadd.f32 %v2490_v20, %v1144_v10 }
 0x25b   : > { %v1202_v29 = vadd.f32 %v2495_v38, %v1173_v33 }
 0x25c   : > { %v1203_v47 = vpop.f32.mrf.mxu3 }
 0x25d   : > { %v1235_v41 = vpop.f32.mrf.mxu2 }
 0x25e   : > { %v1145_v26 = vpop.f32.mrf.mxu1  ;;  %v1222_v49 = vpop.f32.mrf.mxu0 }
 0x25f   : > { %v1223_v63 = vadd.f32 %v1222_v49, %v1194_v56  ;;  %v1146_v40 = vadd.f32 %v1145_v26, %v1117_v7 }
 0x261   : > { %v1241_v44 = vmax.f32 %v1223_v63, 0.0  ;;  %v1175_v43 = vadd.f32 %v2492_v28, %v1146_v40 }
 0x263   : > { %v1635_v54 = vpack.c.bf16 %v1241_v44, %v1240_v55  ;;  %v1204_v16 = vadd.f32 %v1203_v47, %v1175_v43 }
 0x264   : > { %v1206_v17 = vpop.f32.mrf.mxu3 }
 0x265   : > { %1636 = vst [vmem:[%s2502_s18] sm:$0xff] %v1635_v54   ;;  %v1237_v15 = vpop.f32.mrf.mxu2 }
 0x266   : > { %v1148_v61 = vpop.f32.mrf.mxu1  ;;  %v1225_v13 = vpop.f32.mrf.mxu0 }
 0x267   : > { %v1149_v5 = vadd.f32 %v1148_v61, %v1120_v32  ;;  %v1226_v9 = vadd.f32 %v1225_v13, %v1197_v23 }
 0x269   : > { %v1178_v4 = vadd.f32 %v1177_v37, %v1149_v5  ;;  %v1242_v11 = vmax.f32 %v1226_v9, 0.0 }
 0x26b   : > { %v1207_v57 = vadd.f32 %v1206_v17, %v1178_v4 }
 0x26c   : > { %v1208_v21 = vpop.f32.mrf.mxu3 }
 0x26d   : > { %v1236_v24 = vadd.f32 %v1235_v41, %v1207_v57 }
 0x26e   : > { %v1150_v51 = vpop.f32.mrf.mxu1  ;;  %v1227_v22 = vpop.f32.mrf.mxu0 }
 0x26f   : > { %v1151_v34 = vadd.f32 %v1150_v51, %v1122_v12  ;;  %v1228_v6 = vadd.f32 %v1227_v22, %v1199_v1  ;;  %v1246_v31 = vmax.f32 %v1236_v24, 0.0 }
 0x271   : > { %v1243_v18 = vmax.f32 %v1228_v6, 0.0  ;;  %v1180_v19 = vadd.f32 %v1179_v2, %v1151_v34 }
 0x273   : > { %v1640_v25 = vpack.c.bf16 %v1243_v18, %v1242_v11  ;;  %v1209_v27 = vadd.f32 %v1208_v21, %v1180_v19 }
 0x275   : > { %1652 = vst [vmem:[%s2502_s18 + $0x8] sm:$0xff] %v1640_v25   ;;  %v1238_v30 = vadd.f32 %v1237_v15, %v1209_v27 }
 0x276   : > { %v1230_v36 = vpop.f32.mrf.mxu0 }
 0x277   : > { %v1247_v37 = vmax.f32 %v1238_v30, 0.0  ;;  %v1231_v0 = vadd.f32 %v1230_v36, %v1202_v29 }
 0x279   : > { %v1650_v42 = vpack.c.bf16 %v1247_v37, %v1246_v31  ;;  %v1244_v35 = vmax.f32 %v1231_v0, 0.0 }
 0x27b   : > { %1654 = vst [vmem:[%s2502_s18 + $0x18] sm:$0xff] %v1650_v42  }
 0x27e   : > { %v1232_v45 = vpop.f32.mrf.mxu0 }
 0x27f   : > { %v1233_v46 = vadd.f32 %v1232_v45, %v1204_v16 }
 0x281   : > { %v1245_v50 = vmax.f32 %v1233_v46, 0.0 }
 0x283   : > { %v1645_v52 = vpack.c.bf16 %v1245_v50, %v1244_v35 }
 0x285   : > { %1653 = vst [vmem:[%s2502_s18 + $0x10] sm:$0xff] %v1645_v52  }
 0x286 PF: > { %s13_s12 = sadd.s32 1, %s1697_s12  }
 0x287   : > { %p10_p4 = scmp.ge.s32.totalorder %s13_s12, 4  }
 0x289   :  { %12 = sbr.rel (!%p10_p4) target bundleno = 1 (0x1), region = 62 }

// kernel: unet_forward.28
= control target key start
LH: loop header
LB: loop body
LE: loop exit
PB: predicated region body
PF: predicated region fallthrough
CT: control target
= control target key end

     0   :  { %s1126_s12 = smov 0   ;;  %s1483_s0 = inlined_call_operand.vmem [shape: bf16[2,64,256], index: 0, kind: input, shape index: {}]   ;;  %s1484_s1 = inlined_call_operand.vmem [shape: bf16[64,576], index: 1, kind: input, shape index: {}]   ;;  %s1485_s2 = inlined_call_operand.vmem [shape: f32[64,1], index: 2, kind: input, shape index: {}]   ;;  %s1486_s3 = inlined_call_operand.vmem [shape: bf16[2,64,128], index: 3, kind: output, shape index: {}]  }
   0x1 LB: > { %s853_s13 = sadd.s32 4294967295, %s1095_s12   ;;  %p857_p0 = scmp.ge.s32.totalorder %s1095_s12, 1  ;;  %s1095_s12 = sphi %s1126_s12, %s13_s12  }
   0x2   : > { %p137_p1 = scmp.lt.s32.totalorder %s1095_s12, 3 }
   0x4   : > { %p138_p2 = pnand %p857_p0, %p137_p1 }
   0x5   : > { %p161_p3 = scmp.lt.s32.totalorder (!%p138_p2), %s853_s13, 1  ;;  %s1097_s18 = smov (!%p138_p2), 127  }
   0x6   : > { %141 = sbr.rel (%p138_p2) target bundleno = 494 (0x1ee), region = 32  ;;  %s1098_s19 = smov (!%p138_p2), 122  }
   0x7   : > { %s1099_s20 = smov (!%p138_p2), 119   ;;  %s1100_s21 = smov (!%p138_p2), 124  }
   0x8   : > { %s1101_s22 = smov (!%p138_p2), 123   ;;  %s1102_s23 = smov (!%p138_p2), 120  }
   0x9   : > { %s1103_s24 = smov (!%p138_p2), 126   ;;  %s1104_s25 = smov (!%p138_p2), 118  }
   0xb   : > { %s1488_s13 = smov (!%p161_p3, %s853_s13), 1  ;;  %vm292_vm0 = vcmask 1039360   ;;  %vm442_vm1 = vcmask 973824   ;;  %vm342_vm2 = vcmask 1014784   ;;  %vm392_vm3 = vcmask 998400  }
   0xc   : > { %s996_s14 = sshll.u32 %s1488_s13, 6  ;;  %vm367_vm4 = vcmask 1006592   ;;  %vm417_vm5 = vcmask 982016   ;;  %vm317_vm6 = vcmask 1031168   ;;  %vm467_vm7 = vcmask 965632  }
   0xd   : > { %s1140_s17 = scalar_lea.vmem %s1483_s0, %s996_s14  ;;  %vm616_vm8 = vcmask 523264  }
   0xe   : > { %v904_v0 = vld [vmem:[%s1140_s17 + $0x30] sm:$0xf]  ;;  %v1029_v1 = vld [vmem:[%s1140_s17 + $0x34] sm:$0xf0]  ;;  %v896_v2 = vld [vmem:[%s1140_s17 + $0x20] sm:$0xf] }
   0xf   : > { %v1145_v3 = vor.u32 %v1029_v1, %v904_v0  ;;  %v1027_v4 = vld [vmem:[%s1140_s17 + $0x24] sm:$0xf0]  ;;  %v1028_v6 = vld [vmem:[%s1140_s17 + $0x34] sm:$0xf]  ;;  %v906_v7 = vld [vmem:[%s1140_s17 + $0x38] sm:$0xf0] }
  0x10   : > { %v1148_v5 = vor.u32 %v1027_v4, %v896_v2  ;;  %v888_v8 = vld [vmem:[%s1140_s17 + $0x10] sm:$0xf]  ;;  %v1025_v9 = vld [vmem:[%s1140_s17 + $0x14] sm:$0xf0]  ;;  %v1026_v10 = vld [vmem:[%s1140_s17 + $0x24] sm:$0xf]  ;;  %v1160_v13 = vor.u32 %v1028_v6, %v906_v7 }
  0x11   : > { %288 = vrot.lane.b32.xlu0 %v1145_v3, %s1097_s18  ;;  %v898_v11 = vld [vmem:[%s1140_s17 + $0x28] sm:$0xf0]  ;;  %v1158_v12 = vor.u32 %v1025_v9, %v888_v8  ;;  %v1024_v15 = vld [vmem:[%s1140_s17 + $0x14] sm:$0xf]  ;;  %v890_v16 = vld [vmem:[%s1140_s17 + $0x18] sm:$0xf0] }
  0x12   : > { %284 = vrot.lane.b32.xlu1 %v1148_v5, %s1097_s18  ;;  %v1163_v14 = vor.u32 %v1026_v10, %v898_v11  ;;  %v1168_v17 = vor.u32 %v1024_v15, %v890_v16  ;;  %v880_v18 = vld [vmem:[%s1140_s17] sm:$0xf]  ;;  %v1023_v19 = vld [vmem:[%s1140_s17 + $0x4] sm:$0xf0]  ;;  %v1022_v20 = vld [vmem:[%s1140_s17 + $0x4] sm:$0xf] }
  0x13   : > { %280 = vrot.lane.b32.xlu2 %v1158_v12, %s1097_s18  ;;  %v882_v21 = vld [vmem:[%s1140_s17 + $0x8] sm:$0xf0]  ;;  %v1175_v22 = vor.u32 %v1023_v19, %v880_v18  ;;  %v876_v38 = vld [vmem:[%s1140_s17 + $0x30] sm:$0xf]  ;;  %v1021_v39 = vld [vmem:[%s1140_s17 + $0x34] sm:$0xf0] }
  0x14   : > { %v1178_v23 = vor.u32 %v1022_v20, %v882_v21  ;;  %v877_v42 = vor.u32 %v1021_v39, %v876_v38  ;;  %v872_v43 = vld [vmem:[%s1140_s17 + $0x20] sm:$0xf]  ;;  %v1020_v44 = vld [vmem:[%s1140_s17 + $0x24] sm:$0xf0]  ;;  %v868_v49 = vld [vmem:[%s1140_s17 + $0x10] sm:$0xf] }
  0x15   : > { %v873_v47 = vor.u32 %v1020_v44, %v872_v43  ;;  %v1019_v50 = vld [vmem:[%s1140_s17 + $0x14] sm:$0xf0]  ;;  %v864_v53 = vld [vmem:[%s1140_s17] sm:$0xf]  ;;  %v1018_v54 = vld [vmem:[%s1140_s17 + $0x4] sm:$0xf0] }
  0x16   : > { %v869_v52 = vor.u32 %v1019_v50, %v868_v49  ;;  %v865_v57 = vor.u32 %v1018_v54, %v864_v53  ;;  %v952_v43 = vld [vmem:[%s1484_s1 + $0x50] sm:$0xf]  ;;  %v1010_v44 = vld [vmem:[%s1484_s1 + $0x60] sm:$0xf0]  ;;  %v912_v53 = vld [vmem:[%s1484_s1] sm:$0xf] }
  0x17   : > { %v1000_v54 = vld [vmem:[%s1484_s1 + $0x10] sm:$0xf0] }
  0x19   : > { %290 = vrot.lane.b32.xlu0 %v1160_v13, %s1097_s18 }
  0x1a   : > { %286 = vrot.lane.b32.xlu1 %v1163_v14, %s1097_s18 }
  0x1b   : > { %282 = vrot.lane.b32.xlu2 %v1168_v17, %s1097_s18 }
  0x21   : > { %276 = vrot.lane.b32.xlu0 %v1175_v22, %s1097_s18 }
  0x22   : > { %278 = vrot.lane.b32.xlu1 %v1178_v23, %s1097_s18 }
  0x23   : > { %388 = vrot.lane.b32.xlu2 %v1145_v3, %s1098_s19 }
  0x29   : > { %390 = vrot.lane.b32.xlu0 %v1160_v13, %s1098_s19 }
  0x2a   : > { %438 = vrot.lane.b32.xlu1 %v1145_v3, %s1099_s20 }
  0x2b   : > { %440 = vrot.lane.b32.xlu2 %v1160_v13, %s1099_s20 }
  0x31   : > { %338 = vrot.lane.b32.xlu0 %v1145_v3, %s1100_s21 }
  0x32   : > { %340 = vrot.lane.b32.xlu1 %v1160_v13, %s1100_s21 }
  0x33   : > { %384 = vrot.lane.b32.xlu2 %v1148_v5, %s1098_s19 }
  0x39   : > { %386 = vrot.lane.b32.xlu0 %v1163_v14, %s1098_s19 }
  0x3a   : > { %434 = vrot.lane.b32.xlu1 %v1148_v5, %s1099_s20 }
  0x3b   : > { %436 = vrot.lane.b32.xlu2 %v1163_v14, %s1099_s20 }
  0x41   : > { %334 = vrot.lane.b32.xlu0 %v1148_v5, %s1100_s21 }
  0x42   : > { %336 = vrot.lane.b32.xlu1 %v1163_v14, %s1100_s21 }
  0x43   : > { %380 = vrot.lane.b32.xlu2 %v1158_v12, %s1098_s19 }
  0x49   : > { %382 = vrot.lane.b32.xlu0 %v1168_v17, %s1098_s19 }
  0x4a   : > { %430 = vrot.lane.b32.xlu1 %v1158_v12, %s1099_s20 }
  0x4b   : > { %432 = vrot.lane.b32.xlu2 %v1168_v17, %s1099_s20 }
  0x51   : > { %330 = vrot.lane.b32.xlu0 %v1158_v12, %s1100_s21 }
  0x52   : > { %332 = vrot.lane.b32.xlu1 %v1168_v17, %s1100_s21 }
  0x53   : > { %376 = vrot.lane.b32.xlu2 %v1175_v22, %s1098_s19 }
  0x59   : > { %378 = vrot.lane.b32.xlu0 %v1178_v23, %s1098_s19 }
  0x5a   : > { %426 = vrot.lane.b32.xlu1 %v1175_v22, %s1099_s20 }
  0x5b   : > { %428 = vrot.lane.b32.xlu2 %v1178_v23, %s1099_s20 }
  0x61   : > { %326 = vrot.lane.b32.xlu0 %v1175_v22, %s1100_s21 }
  0x62   : > { %328 = vrot.lane.b32.xlu1 %v1178_v23, %s1100_s21 }
  0x63   : > { %363 = vrot.lane.b32.xlu2 %v1145_v3, %s1101_s22 }
  0x69   : > { %365 = vrot.lane.b32.xlu0 %v1160_v13, %s1101_s22 }
  0x6a   : > { %413 = vrot.lane.b32.xlu1 %v1145_v3, %s1102_s23 }
  0x6b   : > { %415 = vrot.lane.b32.xlu2 %v1160_v13, %s1102_s23 }
  0x6d   : > { %v281_v24 = vpop.permute.xlu2 %280 }
  0x71   : > { %313 = vrot.lane.b32.xlu0 %v1145_v3, %s1103_s24 }
  0x72   : > { %315 = vrot.lane.b32.xlu1 %v1160_v13, %s1103_s24 }
  0x73   : > { %359 = vrot.lane.b32.xlu2 %v1148_v5, %s1101_s22 }
  0x75   : > { %v283_v25 = vpop.permute.xlu2 %282 }
  0x76   : > { %v294_v37 = vsel %vm292_vm0, %v281_v24, %v283_v25 }
  0x79   : > { %361 = vrot.lane.b32.xlu0 %v1163_v14, %s1101_s22 }
  0x7a   : > { %409 = vrot.lane.b32.xlu1 %v1148_v5, %s1102_s23 }
  0x7b   : > { %411 = vrot.lane.b32.xlu2 %v1163_v14, %s1102_s23 }
  0x7d   : > { %v1226_v26 = vpop.permute.xlu2 %388 }
  0x81   : > { %309 = vrot.lane.b32.xlu0 %v1148_v5, %s1103_s24 }
  0x82   : > { %311 = vrot.lane.b32.xlu1 %v1163_v14, %s1103_s24 }
  0x83   : > { %v289_v27 = vpop.permute.xlu0 %288  ;;  %355 = vrot.lane.b32.xlu2 %v1158_v12, %s1101_s22 }
  0x84   : > { %v285_v28 = vpop.permute.xlu1 %284 }
  0x85   : > { %v441_v29 = vpop.permute.xlu2 %440 }
  0x89   : > { %357 = vrot.lane.b32.xlu0 %v1168_v17, %s1101_s22 }
  0x8a   : > { %405 = vrot.lane.b32.xlu1 %v1158_v12, %s1102_s23 }
  0x8b   : > { %v291_v30 = vpop.permute.xlu0 %290  ;;  %407 = vrot.lane.b32.xlu2 %v1168_v17, %s1102_s23 }
  0x8c   : > { %v287_v31 = vpop.permute.xlu1 %286  ;;  %v296_v32 = vsel %vm292_vm0, %v289_v27, %v291_v30  ;;  %v932_v27 = vld [vmem:[%s1484_s1 + $0x28] sm:$0xf] }
  0x8d   : > { %629 = vmatpush.bf16.msra.mxu0 %v296_v32  ;;  %1053 = vmatpush.bf16.msra.mxu1 %v296_v32  ;;  %v1241_v33 = vpop.permute.xlu2 %384  ;;  %v295_v34 = vsel %vm292_vm0, %v285_v28, %v287_v31  ;;  %v1005_v28 = vld [vmem:[%s1484_s1 + $0x38] sm:$0xf0] }
  0x8e   : > { %1054 = vmatpush.bf16.msra.mxu2 %v296_v32 }
  0x91   : > { %630 = vmatpush.bf16.msra.mxu0 %v295_v34  ;;  %1055 = vmatpush.bf16.msra.mxu1 %v295_v34 }
  0x92   : > { %1056 = vmatpush.bf16.msra.mxu2 %v295_v34  ;;  %463 = vrot.lane.b32.xlu0 %v1145_v3, %s1104_s25 }
  0x93   : > { %465 = vrot.lane.b32.xlu1 %v1160_v13, %s1104_s25  ;;  %v277_v35 = vpop.permute.xlu0 %276  ;;  %305 = vrot.lane.b32.xlu2 %v1158_v12, %s1103_s24 }
  0x94   : > { %v279_v36 = vpop.permute.xlu1 %278 }
  0x95   : > { %631 = vmatpush.bf16.msra.mxu0 %v294_v37  ;;  %1057 = vmatpush.bf16.msra.mxu1 %v294_v37  ;;  %v437_v40 = vpop.permute.xlu2 %436  ;;  %v293_v41 = vsel %vm292_vm0, %v277_v35, %v279_v36  ;;  %v972_v36 = vld [vmem:[%s1484_s1 + $0x78] sm:$0xf] }
  0x96   : > { %1058 = vmatpush.bf16.msra.mxu2 %v294_v37  ;;  %v1015_v37 = vld [vmem:[%s1484_s1 + $0x88] sm:$0xf0] }
  0x99   : > { %632 = vmatpush.bf16.msra.mxu0 %v293_v41  ;;  %1059 = vmatpush.bf16.msra.mxu1 %v293_v41 }
  0x9a   : > { %307 = vrot.lane.b32.xlu0 %v1168_v17, %s1103_s24  ;;  %1060 = vmatpush.bf16.msra.mxu2 %v293_v41 }
  0x9b   : > { %351 = vrot.lane.b32.xlu1 %v1175_v22, %s1101_s22  ;;  %v391_v45 = vpop.permute.xlu0 %390  ;;  %353 = vrot.lane.b32.xlu2 %v1178_v23, %s1101_s22  ;;  %s997_s22 = sshll.u32 %s1488_s13, 5 }
  0x9c   : > { %v439_v46 = vpop.permute.xlu1 %438  ;;  %v396_v60 = vsel %vm392_vm3, %v1226_v26, %v391_v45  ;;  %v1105_v45 = vmov 0  }
  0x9d   : > { %1061 = vmatpush.bf16.msra.mxu1 %v877_v42  ;;  %v446_v48 = vsel %vm442_vm1, %v439_v46, %v441_v29  ;;  %633 = vmatpush.bf16.msra.mxu0 %v877_v42  ;;  %v381_v51 = vpop.permute.xlu2 %380  ;;  %v933_v29 = vor.u32 %v1005_v28, %v932_v27  ;;  %v953_v46 = vor.u32 %v1010_v44, %v952_v43  ;;  %v1011_v43 = vld [vmem:[%s1484_s1 + $0x68] sm:$0xf0] }
  0x9e   : > { %1062 = vmatpush.bf16.msra.mxu2 %v877_v42  ;;  %716 = vmatpush.bf16.msra.mxu3 %v446_v48  ;;  %v196_v42 = vld [vmem:[%s1485_s2] sm:$0xff] }
  0x9f   : > { %1086 = vset.pattern.permute.xlu1 %v1105_v45  ;;  %1088 = vset.pattern.permute.xlu0 %v1105_v45 }
  0xa0   : > { %1087 = vset.pattern.permute.xlu2 %v1105_v45 }
  0xa1   : > { %1063 = vmatpush.bf16.msra.mxu1 %v873_v47  ;;  %634 = vmatpush.bf16.msra.mxu0 %v873_v47 }
  0xa2   : > { %401 = vrot.lane.b32.xlu0 %v1175_v22, %s1102_s23  ;;  %1064 = vmatpush.bf16.msra.mxu2 %v873_v47 }
  0xa3   : > { %403 = vrot.lane.b32.xlu1 %v1178_v23, %s1102_s23  ;;  %v339_v55 = vpop.permute.xlu0 %338  ;;  %459 = vrot.lane.b32.xlu2 %v1148_v5, %s1104_s25 }
  0xa4   : > { %v341_v56 = vpop.permute.xlu1 %340 }
  0xa5   : > { %1065 = vmatpush.bf16.msra.mxu1 %v869_v52  ;;  %635 = vmatpush.bf16.msra.mxu0 %v869_v52  ;;  %v433_v58 = vpop.permute.xlu2 %432  ;;  %v346_v59 = vsel %vm342_vm2, %v339_v55, %v341_v56  ;;  %v913_v55 = vor.u32 %v1000_v54, %v912_v53  ;;  %v948_v53 = vld [vmem:[%s1484_s1 + $0x38] sm:$0xf]  ;;  %v1007_v54 = vld [vmem:[%s1484_s1 + $0x48] sm:$0xf0] }
  0xa6   : > { %1066 = vmatpush.bf16.msra.mxu2 %v869_v52  ;;  %v199_v52 = vld [vmem:[%s1485_s2 + $0x18] sm:$0xff] }
  0xa9   : > { %1067 = vmatpush.bf16.msra.mxu1 %v865_v57  ;;  %636 = vmatpush.bf16.msra.mxu0 %v865_v57 }
  0xaa   : > { %461 = vrot.lane.b32.xlu0 %v1163_v14, %s1104_s25  ;;  %1068 = vmatpush.bf16.msra.mxu2 %v865_v57 }
  0xab   : > { %301 = vrot.lane.b32.xlu1 %v1175_v22, %s1103_s24  ;;  %v387_v61 = vpop.permute.xlu0 %386  ;;  %303 = vrot.lane.b32.xlu2 %v1178_v23, %s1103_s24 }
  0xac   : > { %v435_v62 = vpop.permute.xlu1 %434  ;;  %v395_v63 = vsel %vm392_vm3, %v1241_v33, %v387_v61  ;;  %642 = vmatmul.bf16.vlgmr.msra.gmra.mxu1 %v933_v29  ;;  %637 = vmatmul.bf16.vlgmr.msra.gmra.mxu0 %v913_v55  ;;  %v954_v55 = vld [vmem:[%s1484_s1 + $0x64] sm:$0xf0] }
  0xad   : > { %658 = vmatpush.bf16.msrb.mxu1 %v346_v59  ;;  %v445_v0 = vsel %vm442_vm1, %v435_v62, %v437_v40  ;;  %v377_v1 = vpop.permute.xlu2 %376  ;;  %v973_v40 = vor.u32 %v1015_v37, %v972_v36 }
  0xae   : > { %687 = vmatpush.bf16.msrb.mxu2 %v396_v60  ;;  %717 = vmatpush.bf16.msra.mxu3 %v445_v0  ;;  %v201_v0 = vld [vmem:[%s1485_s2 + $0x28] sm:$0xff] }
  0xaf   : > { %652 = vmatmul.bf16.vlgmr.msra.gmra.mxu2 %v973_v40  ;;  %v1002_v40 = vld [vmem:[%s1484_s1 + $0x20] sm:$0xf0] }
  0xb2   : > { %688 = vmatpush.bf16.msrb.mxu2 %v395_v63  ;;  %455 = vrot.lane.b32.xlu0 %v1158_v12, %s1104_s25 }
  0xb3   : > { %457 = vrot.lane.b32.xlu1 %v1168_v17, %s1104_s25  ;;  %v335_v2 = vpop.permute.xlu0 %334  ;;  %451 = vrot.lane.b32.xlu2 %v1175_v22, %s1104_s25 }
  0xb4   : > { %v337_v3 = vpop.permute.xlu1 %336 }
  0xb5   : > { %v345_v4 = vsel %vm342_vm2, %v335_v2, %v337_v3  ;;  %v429_v5 = vpop.permute.xlu2 %428  ;;  %v203_v2 = vld [vmem:[%s1485_s2 + $0x38] sm:$0xff]  ;;  %v920_v3 = vld [vmem:[%s1484_s1 + $0x8] sm:$0xf] }
  0xb6   : > { %659 = vmatpush.bf16.msrb.mxu1 %v345_v4  ;;  %v1001_v4 = vld [vmem:[%s1484_s1 + $0x18] sm:$0xf0] }
  0xba   : > { %453 = vrot.lane.b32.xlu0 %v1178_v23, %s1104_s25  ;;  %s1472_s25 = scalar_lea.vmem %s1486_s3, %s997_s22 }
  0xbb   : > { %v383_v6 = vpop.permute.xlu0 %382  ;;  %478 = vperm.xlu1 %1086, %v196_v42   ;;  %v960_v42 = vld [vmem:[%s1484_s1 + $0x58] sm:$0xf] }
  0xbc   : > { %v431_v7 = vpop.permute.xlu1 %430  ;;  %v394_v8 = vsel %vm392_vm3, %v381_v51, %v383_v6  ;;  %647 = vmatmul.bf16.gmra.mxu1 %v953_v46  ;;  %v198_v51 = vld [vmem:[%s1485_s2 + $0x10] sm:$0xff] }
  0xbd   : > { %689 = vmatpush.bf16.msrb.mxu2 %v394_v8  ;;  %v444_v9 = vsel %vm442_vm1, %v431_v7, %v433_v58  ;;  %v364_v10 = vpop.permute.xlu2 %363 }
  0xbe   : > { %718 = vmatpush.bf16.msra.mxu3 %v444_v9  ;;  %v921_v9 = vor.u32 %v1001_v4, %v920_v3  ;;  %v974_v3 = vld [vmem:[%s1484_s1 + $0x8c] sm:$0xf0] }
  0xc2   : > { %488 = vperm.xlu0 %1088, %v198_v51  }
  0xc3   : > { %v331_v11 = vpop.permute.xlu0 %330  ;;  %493 = vperm.xlu1 %1086, %v199_v52   ;;  %v1008_v52 = vld [vmem:[%s1484_s1 + $0x54] sm:$0xf] }
  0xc4   : > { %v333_v12 = vpop.permute.xlu1 %332 }
  0xc5   : > { %v344_v13 = vsel %vm342_vm2, %v331_v11, %v333_v12  ;;  %v416_v15 = vpop.permute.xlu2 %415  ;;  %v999_v12 = vld [vmem:[%s1484_s1 + $0xc] sm:$0xf] }
  0xc6   : > { %660 = vmatpush.bf16.msrb.mxu1 %v344_v13  ;;  %v922_v13 = vld [vmem:[%s1484_s1 + $0x1c] sm:$0xf0] }
  0xca   : > { %513 = vperm.xlu0 %1088, %v203_v2   ;;  %v1013_v2 = vld [vmem:[%s1484_s1 + $0x7c] sm:$0xf] }
  0xcb   : > { %v379_v14 = vpop.permute.xlu0 %378  ;;  %503 = vperm.xlu1 %1086, %v201_v0   ;;  %v968_v0 = vld [vmem:[%s1484_s1 + $0x60] sm:$0xf] }
  0xcc   : > { %v427_v16 = vpop.permute.xlu1 %426  ;;  %v393_v17 = vsel %vm392_vm3, %v377_v1, %v379_v14 }
  0xcd   : > { %690 = vmatpush.bf16.msrb.mxu2 %v393_v17  ;;  %v443_v18 = vsel %vm442_vm1, %v427_v16, %v429_v5  ;;  %v360_v22 = vpop.permute.xlu2 %359 }
  0xce   : > { %719 = vmatpush.bf16.msra.mxu3 %v443_v18  ;;  %v925_v18 = vor.u32 %v999_v12, %v922_v13 }
  0xd3   : > { %v327_v19 = vpop.permute.xlu0 %326 }
  0xd4   : > { %v329_v20 = vpop.permute.xlu1 %328 }
  0xd5   : > { %v343_v21 = vsel %vm342_vm2, %v327_v19, %v329_v20  ;;  %v412_v30 = vpop.permute.xlu2 %411  ;;  %v998_v19 = vld [vmem:[%s1484_s1 + $0x4] sm:$0xf] }
  0xd6   : > { %661 = vmatpush.bf16.msrb.mxu1 %v343_v21  ;;  %v914_v21 = vld [vmem:[%s1484_s1 + $0x14] sm:$0xf0] }
  0xd7   : > { %v917_v29 = vor.u32 %v998_v19, %v914_v21 }
  0xdb   : > { %v366_v23 = vpop.permute.xlu0 %365 }
  0xdc   : > { %v414_v24 = vpop.permute.xlu1 %413  ;;  %v371_v25 = vsel %vm367_vm4, %v364_v10, %v366_v23  ;;  %v197_v10 = vld [vmem:[%s1485_s2 + $0x8] sm:$0xff]  ;;  %v1006_v23 = vld [vmem:[%s1484_s1 + $0x40] sm:$0xf0] }
  0xdd   : > { %691 = vmatpush.bf16.msrb.mxu2 %v371_v25  ;;  %v421_v26 = vsel %vm417_vm5, %v414_v24, %v416_v15  ;;  %v356_v34 = vpop.permute.xlu2 %355  ;;  %483 = vperm.xlu2 %1087, %v197_v10   ;;  %v200_v15 = vld [vmem:[%s1485_s2 + $0x20] sm:$0xff]  ;;  %v202_v25 = vld [vmem:[%s1485_s2 + $0x30] sm:$0xff] }
  0xde   : > { %720 = vmatpush.bf16.msra.mxu3 %v421_v26 }
  0xe3   : > { %v314_v31 = vpop.permute.xlu0 %313 }
  0xe4   : > { %v316_v32 = vpop.permute.xlu1 %315 }
  0xe5   : > { %v321_v33 = vsel %vm317_vm6, %v314_v31, %v316_v32  ;;  %v408_v48 = vpop.permute.xlu2 %407  ;;  %498 = vperm.xlu2 %1087, %v200_v15   ;;  %v1004_v31 = vld [vmem:[%s1484_s1 + $0x34] sm:$0xf]  ;;  %v942_v32 = vld [vmem:[%s1484_s1 + $0x44] sm:$0xf0] }
  0xe6   : > { %662 = vmatpush.bf16.msrb.mxu1 %v321_v33  ;;  %v945_v36 = vor.u32 %v1004_v31, %v942_v32 }
  0xeb   : > { %v362_v35 = vpop.permute.xlu0 %361 }
  0xec   : > { %v410_v38 = vpop.permute.xlu1 %409  ;;  %v370_v39 = vsel %vm367_vm4, %v360_v22, %v362_v35  ;;  %v940_v22 = vld [vmem:[%s1484_s1 + $0x30] sm:$0xf] }
  0xed   : > { %692 = vmatpush.bf16.msrb.mxu2 %v370_v39  ;;  %v420_v41 = vsel %vm417_vm5, %v410_v38, %v412_v30  ;;  %v306_v60 = vpop.permute.xlu2 %305  ;;  %v941_v30 = vor.u32 %v1006_v23, %v940_v22  ;;  %508 = vperm.xlu2 %1087, %v202_v25   ;;  %v1003_v38 = vld [vmem:[%s1484_s1 + $0x2c] sm:$0xf]  ;;  %v928_v39 = vld [vmem:[%s1484_s1 + $0x10] sm:$0xf] }
  0xee   : > { %721 = vmatpush.bf16.msra.mxu3 %v420_v41  ;;  %v934_v41 = vld [vmem:[%s1484_s1 + $0x3c] sm:$0xf0]  ;;  %v929_v46 = vor.u32 %v1002_v40, %v928_v39 }
  0xf3   : > { %v310_v47 = vpop.permute.xlu0 %309 }
  0xf4   : > { %v312_v49 = vpop.permute.xlu1 %311 }
  0xf5   : > { %v320_v50 = vsel %vm317_vm6, %v310_v47, %v312_v49  ;;  %v354_v1 = vpop.permute.xlu2 %353  ;;  %v937_v47 = vor.u32 %v1003_v38, %v934_v41  ;;  %v1009_v49 = vld [vmem:[%s1484_s1 + $0x5c] sm:$0xf] }
  0xf6   : > { %663 = vmatpush.bf16.msrb.mxu1 %v320_v50  ;;  %v962_v50 = vld [vmem:[%s1484_s1 + $0x6c] sm:$0xf0] }
  0xf7   : > { %v965_v51 = vor.u32 %v1009_v49, %v962_v50 }
  0xfb   : > { %v358_v56 = vpop.permute.xlu0 %357 }
  0xfc   : > { %v406_v57 = vpop.permute.xlu1 %405  ;;  %v369_v58 = vsel %vm367_vm4, %v356_v34, %v358_v56  ;;  %v980_v56 = vld [vmem:[%s1484_s1 + $0x80] sm:$0xf] }
  0xfd   : > { %693 = vmatpush.bf16.msrb.mxu2 %v369_v58  ;;  %v419_v59 = vsel %vm417_vm5, %v406_v57, %v408_v48  ;;  %v460_v11 = vpop.permute.xlu2 %459  ;;  %v961_v48 = vor.u32 %v1011_v43, %v960_v42  ;;  %v1016_v57 = vld [vmem:[%s1484_s1 + $0x90] sm:$0xf0]  ;;  %v949_v58 = vor.u32 %v1007_v54, %v948_v53 }
  0xfe   : > { %722 = vmatpush.bf16.msra.mxu3 %v419_v59  ;;  %v957_v59 = vor.u32 %v1008_v52, %v954_v55 }
 0x104   : > { %v464_v61 = vpop.permute.xlu0 %463 }
 0x105   : > { %v466_v62 = vpop.permute.xlu1 %465  ;;  %v304_v20 = vpop.permute.xlu2 %303 }
 0x106   : > { %v471_v63 = vsel %vm467_vm7, %v464_v61, %v466_v62  ;;  %v1014_v61 = vld [vmem:[%s1484_s1 + $0x84] sm:$0xf]  ;;  %v982_v62 = vld [vmem:[%s1484_s1 + $0x94] sm:$0xf0] }
 0x107   : > { %749 = vmatpush.bf16.msrb.mxu0 %v471_v63  ;;  %v985_v63 = vor.u32 %v1014_v61, %v982_v62 }
 0x10c   : > { %v308_v5 = vpop.permute.xlu0 %307 }
 0x10d   : > { %v352_v6 = vpop.permute.xlu1 %351  ;;  %v319_v7 = vsel %vm317_vm6, %v306_v60, %v308_v5  ;;  %v452_v37 = vpop.permute.xlu2 %451  ;;  %v981_v60 = vor.u32 %v1016_v57, %v980_v56  ;;  %v977_v5 = vor.u32 %v1013_v2, %v974_v3 }
 0x10e   : > { %664 = vmatpush.bf16.msrb.mxu1 %v319_v7  ;;  %v368_v8 = vsel %vm367_vm4, %v352_v6, %v354_v1  ;;  %v1012_v1 = vld [vmem:[%s1484_s1 + $0x70] sm:$0xf0]  ;;  %v988_v6 = vld [vmem:[%s1484_s1 + $0x88] sm:$0xf]  ;;  %v1017_v7 = vld [vmem:[%s1484_s1 + $0x98] sm:$0xf0] }
 0x10f   : > { %694 = vmatpush.bf16.msrb.mxu2 %v368_v8  ;;  %v969_v4 = vor.u32 %v1012_v1, %v968_v0  ;;  %v989_v8 = vor.u32 %v1017_v7, %v988_v6 }
 0x112   : > { %695 = vmatmul.bf16.vlgmr.msrb.gmra.mxu2 %v921_v9 }
 0x114   : > { %v402_v14 = vpop.permute.xlu0 %401 }
 0x115   : > { %v404_v16 = vpop.permute.xlu1 %403 }
 0x116   : > { %v418_v17 = vsel %vm417_vm5, %v402_v14, %v404_v16 }
 0x117   : > { %723 = vmatpush.bf16.msra.mxu3 %v418_v17 }
 0x11a   : > { %724 = vmatmul.bf16.vlgmr.msra.gmra.mxu3 %v925_v18 }
 0x11c   : > { %v462_v24 = vpop.permute.xlu0 %461 }
 0x11d   : > { %v302_v26 = vpop.permute.xlu1 %301  ;;  %v470_v27 = vsel %vm467_vm7, %v460_v11, %v462_v24 }
 0x11e   : > { %v318_v28 = vsel %vm317_vm6, %v302_v26, %v304_v20  ;;  %750 = vmatpush.bf16.msrb.mxu0 %v470_v27 }
 0x11f   : > { %665 = vmatpush.bf16.msrb.mxu1 %v318_v28 }
 0x122   : > { %666 = vmatmul.bf16.vlgmr.msrb.gmra.mxu1 %v917_v29  ;;  %700 = vmatmul.bf16.gmra.mxu2 %v941_v30 }
 0x124   : > { %v456_v33 = vpop.permute.xlu0 %455 }
 0x125   : > { %v458_v34 = vpop.permute.xlu1 %457 }
 0x126   : > { %v469_v35 = vsel %vm467_vm7, %v456_v33, %v458_v34 }
 0x127   : > { %751 = vmatpush.bf16.msrb.mxu0 %v469_v35 }
 0x129   : > { %v643_v9 = vpop.f32.mrf.mxu1  ;;  %v638_v16 = vpop.f32.mrf.mxu0 }
 0x12a   : > { %729 = vmatmul.bf16.gmra.mxu3 %v945_v36 }
 0x12c   : > { %v454_v44 = vpop.permute.xlu0 %453 }
 0x12d   : > { %v468_v45 = vsel %vm467_vm7, %v452_v37, %v454_v44  ;;  %v479_v20 = vpop.permute.xlu1 %478 }
 0x12e   : > { %752 = vmatpush.bf16.msrb.mxu0 %v468_v45  ;;  %v639_v23 = vadd.f32 %v638_v16, %v479_v20 }
 0x131   : > { %990 = vmatmul.msk.bf16.vlgmr.msrb.gmra.mxu0 %vm616_vm8, %v929_v46  ;;  %v645_v10 = vpop.f32.mrf.mxu1  ;;  %v640_v21 = vpop.f32.mrf.mxu0 }
 0x132   : > { %671 = vmatmul.bf16.gmra.mxu1 %v937_v47  ;;  %705 = vmatmul.bf16.gmra.mxu2 %v961_v48  ;;  %v1464_v11 = vpop.f32.mrf.mxu2 }
 0x134   : > { %v489_v36 = vpop.permute.xlu0 %488 }
 0x135   : > { %v494_v43 = vpop.permute.xlu1 %493  ;;  %v644_v44 = vadd.f32 %v643_v9, %v489_v36 }
 0x136   : > { %v646_v48 = vadd.f32 %v645_v10, %v494_v43 }
 0x137   : > { %v484_v25 = vpop.permute.xlu2 %483 }
 0x138   : > { %v641_v27 = vadd.f32 %v640_v21, %v484_v25 }
 0x139   : > { %v648_v12 = vpop.f32.mrf.mxu1 }
 0x13a   : > { %734 = vmatmul.bf16.gmra.mxu3 %v965_v51  ;;  %v1466_v13 = vpop.f32.mrf.mxu2 }
 0x13c   : > { %v514_v25 = vpop.permute.xlu0 %513 }
 0x13d   : > { %v504_v1 = vpop.permute.xlu1 %503 }
 0x13f   : > { %v499_v0 = vpop.permute.xlu2 %498 }
 0x140   : > { %v649_v2 = vadd.f32 %v648_v12, %v499_v0 }
 0x141   : > { %991 = vmatmul.msk.bf16.gmra.mxu0 %vm616_vm8, %v949_v58  ;;  %v650_v14 = vpop.f32.mrf.mxu1 }
 0x142   : > { %676 = vmatmul.bf16.gmra.mxu1 %v957_v59  ;;  %710 = vmatmul.bf16.gmra.mxu2 %v981_v60  ;;  %v651_v6 = vadd.f32 %v650_v14, %v504_v1 }
 0x14a   : > { %739 = vmatmul.bf16.gmra.mxu3 %v985_v63 }
 0x151   : > { %992 = vmatmul.msk.bf16.gmra.mxu0 %vm616_vm8, %v969_v4 }
 0x152   : > { %681 = vmatmul.bf16.gmra.mxu1 %v977_v5 }
 0x161   : > { %993 = vmatmul.msk.bf16.gmra.mxu0 %vm616_vm8, %v989_v8 }
 0x195   : > { %v696_v15 = vpop.f32.mrf.mxu2 }
 0x19d   : > { %v725_v17 = vpop.f32.mrf.mxu3  ;;  %v698_v19 = vpop.f32.mrf.mxu2 }
 0x19f   : > { %v667_v18 = vpop.f32.mrf.mxu1 }
 0x1a0   : > { %v668_v26 = vadd.f32 %v667_v18, %v639_v23  ;;  %v509_v23 = vpop.permute.xlu2 %508 }
 0x1a1   : > { %v654_v14 = vadd.f32 %v1464_v11, %v509_v23 }
 0x1a2   : > { %v697_v31 = vadd.f32 %v696_v15, %v668_v26 }
 0x1a4   : > { %v726_v35 = vadd.f32 %v725_v17, %v697_v31 }
 0x1a5   : > { %v727_v22 = vpop.f32.mrf.mxu3  ;;  %v701_v28 = vpop.f32.mrf.mxu2 }
 0x1a7   : > { %v669_v24 = vpop.f32.mrf.mxu1 }
 0x1a8   : > { %v670_v29 = vadd.f32 %v669_v24, %v641_v27 }
 0x1aa   : > { %v699_v34 = vadd.f32 %v698_v19, %v670_v29 }
 0x1ac   : > { %v728_v37 = vadd.f32 %v727_v22, %v699_v34 }
 0x1ad   : > { %v730_v33 = vpop.f32.mrf.mxu3  ;;  %v703_v40 = vpop.f32.mrf.mxu2 }
 0x1ae   : > { %v754_v30 = vpop.f32.mrf.mxu0 }
 0x1af   : > { %v672_v32 = vpop.f32.mrf.mxu1  ;;  %v755_v38 = vadd.f32 %v754_v30, %v726_v35  ;;  %v656_v30 = vadd.f32 %v1466_v13, %v514_v25 }
 0x1b0   : > { %v673_v49 = vadd.f32 %v672_v32, %v644_v44 }
 0x1b1   : > { %v774_v45 = vmax.f32 %v755_v38, 0.0 }
 0x1b2   : > { %v702_v53 = vadd.f32 %v701_v28, %v673_v49 }
 0x1b4   : > { %v731_v57 = vadd.f32 %v730_v33, %v702_v53 }
 0x1b5   : > { %v732_v47 = vpop.f32.mrf.mxu3  ;;  %v706_v55 = vpop.f32.mrf.mxu2 }
 0x1b6   : > { %v756_v39 = vpop.f32.mrf.mxu0 }
 0x1b7   : > { %v674_v41 = vpop.f32.mrf.mxu1  ;;  %v757_v42 = vadd.f32 %v756_v39, %v728_v37 }
 0x1b8   : > { %v675_v51 = vadd.f32 %v674_v41, %v646_v48 }
 0x1b9   : > { %v775_v46 = vmax.f32 %v757_v42, 0.0 }
 0x1ba   : > { %v704_v56 = vadd.f32 %v703_v40, %v675_v51 }
 0x1bb   : > { %v1033_v50 = vpack.c.bf16 %v775_v46, %v774_v45 }
 0x1bc   : > { %v733_v59 = vadd.f32 %v732_v47, %v704_v56 }
 0x1bd   : > { %1034 = vst [vmem:[%s1472_s25] sm:$0xff] %v1033_v50   ;;  %v735_v58 = vpop.f32.mrf.mxu3  ;;  %v708_v5 = vpop.f32.mrf.mxu2 }
 0x1be   : > { %v759_v52 = vpop.f32.mrf.mxu0 }
 0x1bf   : > { %v677_v54 = vpop.f32.mrf.mxu1  ;;  %v760_v60 = vadd.f32 %v759_v52, %v731_v57 }
 0x1c0   : > { %v678_v7 = vadd.f32 %v677_v54, %v649_v2 }
 0x1c1   : > { %v776_v3 = vmax.f32 %v760_v60, 0.0 }
 0x1c2   : > { %v707_v16 = vadd.f32 %v706_v55, %v678_v7 }
 0x1c4   : > { %v736_v19 = vadd.f32 %v735_v58, %v707_v16 }
 0x1c5   : > { %v737_v10 = vpop.f32.mrf.mxu3  ;;  %v711_v20 = vpop.f32.mrf.mxu2 }
 0x1c6   : > { %v761_v61 = vpop.f32.mrf.mxu0 }
 0x1c7   : > { %v679_v62 = vpop.f32.mrf.mxu1  ;;  %v762_v63 = vadd.f32 %v761_v61, %v733_v59 }
 0x1c8   : > { %v680_v9 = vadd.f32 %v679_v62, %v651_v6 }
 0x1c9   : > { %v777_v4 = vmax.f32 %v762_v63, 0.0 }
 0x1ca   : > { %v709_v18 = vadd.f32 %v708_v5, %v680_v9 }
 0x1cb   : > { %v1038_v8 = vpack.c.bf16 %v777_v4, %v776_v3 }
 0x1cc   : > { %v738_v21 = vadd.f32 %v737_v10, %v709_v18 }
 0x1cd   : > { %1050 = vst [vmem:[%s1472_s25 + $0x8] sm:$0xff] %v1038_v8   ;;  %v740_v26 = vpop.f32.mrf.mxu3  ;;  %v713_v34 = vpop.f32.mrf.mxu2 }
 0x1ce   : > { %v764_v15 = vpop.f32.mrf.mxu0 }
 0x1cf   : > { %v682_v17 = vpop.f32.mrf.mxu1  ;;  %v765_v22 = vadd.f32 %v764_v15, %v736_v19 }
 0x1d0   : > { %v683_v31 = vadd.f32 %v682_v17, %v654_v14 }
 0x1d1   : > { %v778_v27 = vmax.f32 %v765_v22, 0.0 }
 0x1d2   : > { %v712_v36 = vadd.f32 %v711_v20, %v683_v31 }
 0x1d4   : > { %v741_v39 = vadd.f32 %v740_v26, %v712_v36 }
 0x1d5   : > { %v742_v38 = vpop.f32.mrf.mxu3 }
 0x1d6   : > { %v766_v12 = vpop.f32.mrf.mxu0 }
 0x1d7   : > { %v767_v24 = vadd.f32 %v766_v12, %v738_v21  ;;  %v684_v29 = vpop.f32.mrf.mxu1 }
 0x1d8   : > { %v685_v33 = vadd.f32 %v684_v29, %v656_v30 }
 0x1d9   : > { %v779_v28 = vmax.f32 %v767_v24, 0.0 }
 0x1da   : > { %v714_v37 = vadd.f32 %v713_v34, %v685_v33 }
 0x1db   : > { %v1043_v32 = vpack.c.bf16 %v779_v28, %v778_v27 }
 0x1dc   : > { %v743_v40 = vadd.f32 %v742_v38, %v714_v37 }
 0x1dd   : > { %1051 = vst [vmem:[%s1472_s25 + $0x10] sm:$0xff] %v1043_v32  }
 0x1de   : > { %v769_v35 = vpop.f32.mrf.mxu0 }
 0x1df   : > { %v770_v41 = vadd.f32 %v769_v35, %v741_v39 }
 0x1e1   : > { %v780_v43 = vmax.f32 %v770_v41, 0.0 }
 0x1e6   : > { %v771_v42 = vpop.f32.mrf.mxu0 }
 0x1e7   : > { %v772_v11 = vadd.f32 %v771_v42, %v743_v40 }
 0x1e9   : > { %v781_v44 = vmax.f32 %v772_v11, 0.0 }
 0x1eb   : > { %v1048_v45 = vpack.c.bf16 %v781_v44, %v780_v43 }
 0x1ed   : > { %1052 = vst [vmem:[%s1472_s25 + $0x18] sm:$0xff] %v1048_v45  }
 0x1ee PF: > { %s13_s12 = sadd.s32 1, %s1095_s12  }
 0x1ef   : > { %p10_p4 = scmp.ge.s32.totalorder %s13_s12, 4  }
 0x1f1   :  { %12 = sbr.rel (!%p10_p4) target bundleno = 1 (0x1), region = 62 }

// kernel: unet_forward.30
= control target key start
LH: loop header
LB: loop body
LE: loop exit
PB: predicated region body
PF: predicated region fallthrough
CT: control target
= control target key end

     0   :  { %s1390_s12 = smov 0   ;;  %s1810_s0 = inlined_call_operand.vmem [shape: bf16[2,64,256], index: 0, kind: input, shape index: {}]   ;;  %s1811_s1 = inlined_call_operand.vmem [shape: bf16[256,256], index: 1, kind: input, shape index: {}]   ;;  %s1812_s2 = inlined_call_operand.vmem [shape: f32[256,1], index: 2, kind: input, shape index: {}]   ;;  %s1813_s3 = inlined_call_operand.vmem [shape: bf16[2,256,128], index: 3, kind: output, shape index: {}]  }
   0x1 LB: > { %s999_s13 = sadd.s32 4294967295, %s1364_s12   ;;  %p1003_p0 = scmp.ge.s32.totalorder %s1364_s12, 1  ;;  %s1364_s12 = sphi %s1390_s12, %s13_s12  }
   0x2   : > { %p137_p1 = scmp.lt.s32.totalorder %s1364_s12, 3 }
   0x4   : > { %p138_p2 = pnand %p1003_p0, %p137_p1 }
   0x5   : > { %p161_p3 = scmp.lt.s32.totalorder (!%p138_p2), %s999_s13, 1  ;;  %s1366_s18 = smov (!%p138_p2), 124  }
   0x6   : > { %141 = sbr.rel (%p138_p2) target bundleno = 453 (0x1c5), region = 32  ;;  %s1367_s19 = smov (!%p138_p2), 127  }
   0x7   : > { %s1368_s20 = smov (!%p138_p2), 125  }
   0xb   : > { %s1815_s13 = smov (!%p161_p3, %s999_s13), 1  ;;  %vm373_vm0 = vcmask 1014784   ;;  %v203_v29 = vld [vmem:[%s1812_s2] sm:$0xff]  ;;  %v1369_v30 = vmov 0   ;;  %vm323_vm1 = vcmask 1039360   ;;  %v204_v33 = vld [vmem:[%s1812_s2 + $0x8] sm:$0xff] }
   0xc   : > { %s1186_s14 = sshll.u32 %s1815_s13, 6  ;;  %1356 = vset.pattern.permute.xlu1 %v1369_v30  ;;  %1355 = vset.pattern.permute.xlu0 %v1369_v30  ;;  %v208_v38 = vld [vmem:[%s1812_s2 + $0x28] sm:$0xff]  ;;  %v206_v41 = vld [vmem:[%s1812_s2 + $0x18] sm:$0xff]  ;;  %v211_v43 = vld [vmem:[%s1812_s2 + $0x40] sm:$0xff]  ;;  %vm348_vm2 = vcmask 1022976   ;;  %s1187_s11 = sshll.u32 %s1815_s13, 7 }
   0xd   : > { %s1404_s17 = scalar_lea.vmem %s1810_s0, %s1186_s14  ;;  %1357 = vset.pattern.permute.xlu2 %v1369_v30  ;;  %v209_v46 = vld [vmem:[%s1812_s2 + $0x30] sm:$0xff]  ;;  %v214_v51 = vld [vmem:[%s1812_s2 + $0x58] sm:$0xff]  ;;  %v212_v52 = vld [vmem:[%s1812_s2 + $0x48] sm:$0xff]  ;;  %s1774_s16 = scalar_lea.vmem %s1813_s3, %s1187_s11 }
   0xe   : > { %v1050_v0 = vld [vmem:[%s1404_s17 + $0x30] sm:$0xf]  ;;  %v1231_v1 = vld [vmem:[%s1404_s17 + $0x34] sm:$0xf0]  ;;  %v1042_v3 = vld [vmem:[%s1404_s17 + $0x20] sm:$0xf] }
   0xf   : > { %v1051_v2 = vor.u32 %v1231_v1, %v1050_v0  ;;  %v1229_v4 = vld [vmem:[%s1404_s17 + $0x24] sm:$0xf0]  ;;  %v1230_v6 = vld [vmem:[%s1404_s17 + $0x34] sm:$0xf]  ;;  %v1052_v7 = vld [vmem:[%s1404_s17 + $0x38] sm:$0xf0] }
  0x10   : > { %v1043_v5 = vor.u32 %v1229_v4, %v1042_v3  ;;  %v1055_v8 = vor.u32 %v1230_v6, %v1052_v7  ;;  %v1228_v9 = vld [vmem:[%s1404_s17 + $0x24] sm:$0xf]  ;;  %v1044_v10 = vld [vmem:[%s1404_s17 + $0x28] sm:$0xf0]  ;;  %v1034_v12 = vld [vmem:[%s1404_s17 + $0x10] sm:$0xf] }
  0x11   : > { %369 = vrot.lane.b32.xlu1 %v1051_v2, %s1366_s18  ;;  %319 = vrot.lane.b32.xlu0 %v1051_v2, %s1367_s19  ;;  %v1047_v11 = vor.u32 %v1228_v9, %v1044_v10  ;;  %v1227_v13 = vld [vmem:[%s1404_s17 + $0x14] sm:$0xf0]  ;;  %v1226_v15 = vld [vmem:[%s1404_s17 + $0x14] sm:$0xf] }
  0x12   : > { %315 = vrot.lane.b32.xlu2 %v1043_v5, %s1367_s19  ;;  %v1035_v14 = vor.u32 %v1227_v13, %v1034_v12  ;;  %v1036_v16 = vld [vmem:[%s1404_s17 + $0x18] sm:$0xf0]  ;;  %v1026_v18 = vld [vmem:[%s1404_s17] sm:$0xf]  ;;  %v1225_v19 = vld [vmem:[%s1404_s17 + $0x4] sm:$0xf0] }
  0x13   : > { %v1039_v17 = vor.u32 %v1226_v15, %v1036_v16  ;;  %v1224_v20 = vld [vmem:[%s1404_s17 + $0x4] sm:$0xf]  ;;  %v1028_v21 = vld [vmem:[%s1404_s17 + $0x8] sm:$0xf0]  ;;  %v1027_v22 = vor.u32 %v1225_v19, %v1026_v18  ;;  %v205_v50 = vld [vmem:[%s1812_s2 + $0x10] sm:$0xff] }
  0x14   : > { %v1031_v23 = vor.u32 %v1224_v20, %v1028_v21  ;;  %v1022_v53 = vld [vmem:[%s1404_s17 + $0x30] sm:$0xf]  ;;  %v1223_v54 = vld [vmem:[%s1404_s17 + $0x34] sm:$0xf0]  ;;  %v1018_v59 = vld [vmem:[%s1404_s17 + $0x20] sm:$0xf] }
  0x15   : > { %v1023_v58 = vor.u32 %v1223_v54, %v1022_v53  ;;  %v1222_v60 = vld [vmem:[%s1404_s17 + $0x24] sm:$0xf0]  ;;  %v207_v62 = vld [vmem:[%s1812_s2 + $0x20] sm:$0xff]  ;;  %v217_v63 = vld [vmem:[%s1812_s2 + $0x70] sm:$0xff] }
  0x16   : > { %v1019_v0 = vor.u32 %v1222_v60, %v1018_v59  ;;  %v215_v1 = vld [vmem:[%s1812_s2 + $0x60] sm:$0xff]  ;;  %v1221_v3 = vld [vmem:[%s1404_s17 + $0x14] sm:$0xf0]  ;;  %v1220_v9 = vld [vmem:[%s1404_s17 + $0x4] sm:$0xf0] }
  0x17   : > { %v1189_v13 = vld [vmem:[%s1811_s1 + $0x4] sm:$0xf0]  ;;  %v218_v19 = vld [vmem:[%s1812_s2 + $0x78] sm:$0xff]  ;;  %v1138_v59 = vld [vmem:[%s1811_s1 + $0xa0] sm:$0xf] }
  0x18   : > { %v220_v15 = vld [vmem:[%s1812_s2 + $0x88] sm:$0xff]  ;;  %v226_v53 = vld [vmem:[%s1812_s2 + $0xb8] sm:$0xff] }
  0x19   : > { %371 = vrot.lane.b32.xlu1 %v1055_v8, %s1366_s18  ;;  %321 = vrot.lane.b32.xlu0 %v1055_v8, %s1367_s19  ;;  %v1205_v18 = vld [vmem:[%s1811_s1 + $0x84] sm:$0xf0] }
  0x1a   : > { %317 = vrot.lane.b32.xlu2 %v1047_v11, %s1367_s19  ;;  %v1209_v60 = vld [vmem:[%s1811_s1 + $0xa4] sm:$0xf0] }
  0x21   : > { %365 = vrot.lane.b32.xlu0 %v1043_v5, %s1366_s18  ;;  %367 = vrot.lane.b32.xlu1 %v1047_v11, %s1366_s18 }
  0x22   : > { %311 = vrot.lane.b32.xlu2 %v1035_v14, %s1367_s19 }
  0x29   : > { %361 = vrot.lane.b32.xlu1 %v1035_v14, %s1366_s18  ;;  %313 = vrot.lane.b32.xlu0 %v1039_v17, %s1367_s19 }
  0x2a   : > { %363 = vrot.lane.b32.xlu2 %v1039_v17, %s1366_s18 }
  0x31   : > { %307 = vrot.lane.b32.xlu0 %v1027_v22, %s1367_s19  ;;  %309 = vrot.lane.b32.xlu1 %v1031_v23, %s1367_s19 }
  0x32   : > { %357 = vrot.lane.b32.xlu2 %v1027_v22, %s1366_s18 }
  0x39   : > { %359 = vrot.lane.b32.xlu0 %v1031_v23, %s1366_s18  ;;  %344 = vrot.lane.b32.xlu1 %v1051_v2, %s1368_s20  ;;  %v1014_v2 = vld [vmem:[%s1404_s17 + $0x10] sm:$0xf] }
  0x3a   : > { %346 = vrot.lane.b32.xlu2 %v1055_v8, %s1368_s20  ;;  %v1015_v7 = vor.u32 %v1221_v3, %v1014_v2  ;;  %v1010_v8 = vld [vmem:[%s1404_s17] sm:$0xf]  ;;  %v233_v2 = vld [vmem:[%s1812_s2 + $0xf0] sm:$0xff]  ;;  %v1192_v3 = vld [vmem:[%s1811_s1 + $0x24] sm:$0xf] }
  0x3b   : > { %v1011_v16 = vor.u32 %v1220_v9, %v1010_v8 }
  0x41   : > { %340 = vrot.lane.b32.xlu0 %v1043_v5, %s1368_s20  ;;  %342 = vrot.lane.b32.xlu1 %v1047_v11, %s1368_s20  ;;  %v1058_v11 = vld [vmem:[%s1811_s1] sm:$0xf] }
  0x42   : > { %336 = vrot.lane.b32.xlu2 %v1035_v14, %s1368_s20  ;;  %v210_v14 = vld [vmem:[%s1812_s2 + $0x38] sm:$0xff] }
  0x49   : > { %338 = vrot.lane.b32.xlu0 %v1039_v17, %s1368_s20  ;;  %332 = vrot.lane.b32.xlu1 %v1027_v22, %s1368_s20  ;;  %v1122_v17 = vld [vmem:[%s1811_s1 + $0x80] sm:$0xf] }
  0x4a   : > { %334 = vrot.lane.b32.xlu2 %v1031_v23, %s1368_s20  ;;  %v1059_v23 = vor.u32 %v1189_v13, %v1058_v11  ;;  %v228_v11 = vld [vmem:[%s1812_s2 + $0xc8] sm:$0xff]  ;;  %v1146_v13 = vld [vmem:[%s1811_s1 + $0xb0] sm:$0xf] }
  0x51   : > { %384 = vperm.xlu0 %1355, %v203_v29   ;;  %389 = vperm.xlu1 %1356, %v204_v33   ;;  %v1204_v33 = vld [vmem:[%s1811_s1 + $0x84] sm:$0xf] }
  0x52   : > { %394 = vperm.xlu2 %1357, %v205_v50   ;;  %v1068_v50 = vld [vmem:[%s1811_s1 + $0x18] sm:$0xf0] }
  0x59   : > { %409 = vperm.xlu0 %1355, %v208_v38   ;;  %399 = vperm.xlu1 %1356, %v206_v41   ;;  %v1066_v38 = vld [vmem:[%s1811_s1 + $0x10] sm:$0xf] }
  0x5a   : > { %404 = vperm.xlu2 %1357, %v207_v62   ;;  %v1130_v41 = vld [vmem:[%s1811_s1 + $0x90] sm:$0xf] }
  0x61   : > { %424 = vperm.xlu0 %1355, %v211_v43   ;;  %414 = vperm.xlu1 %1356, %v209_v46   ;;  %v224_v43 = vld [vmem:[%s1812_s2 + $0xa8] sm:$0xff]  ;;  %v219_v46 = vld [vmem:[%s1812_s2 + $0x80] sm:$0xff] }
  0x62   : > { %419 = vperm.xlu2 %1357, %v210_v14   ;;  %v1211_v14 = vld [vmem:[%s1811_s1 + $0xb4] sm:$0xf0] }
  0x69   : > { %439 = vperm.xlu0 %1355, %v214_v51   ;;  %429 = vperm.xlu1 %1356, %v212_v52   ;;  %v1206_v51 = vld [vmem:[%s1811_s1 + $0x94] sm:$0xf]  ;;  %v1132_v52 = vld [vmem:[%s1811_s1 + $0x98] sm:$0xf0] }
  0x6c   : > { %v316_v24 = vpop.permute.xlu2 %315 }
  0x71   : > { %454 = vperm.xlu0 %1355, %v217_v63   ;;  %444 = vperm.xlu1 %1356, %v215_v1   ;;  %v1139_v63 = vor.u32 %v1209_v60, %v1138_v59  ;;  %v229_v1 = vld [vmem:[%s1812_s2 + $0xd0] sm:$0xff]  ;;  %v1216_v59 = vld [vmem:[%s1811_s1 + $0xe4] sm:$0xf]  ;;  %v1172_v60 = vld [vmem:[%s1811_s1 + $0xe8] sm:$0xf0] }
  0x74   : > { %v318_v25 = vpop.permute.xlu2 %317 }
  0x75   : > { %v326_v36 = vsel %vm323_vm1, %v316_v24, %v318_v25  ;;  %v1123_v24 = vor.u32 %v1205_v18, %v1122_v17  ;;  %v213_v25 = vld [vmem:[%s1812_s2 + $0x50] sm:$0xff]  ;;  %v231_v17 = vld [vmem:[%s1812_s2 + $0xe0] sm:$0xff] }
  0x76   : > { %434 = vperm.xlu2 %1357, %v213_v25   ;;  %v1194_v18 = vld [vmem:[%s1811_s1 + $0x34] sm:$0xf]  ;;  %v234_v25 = vld [vmem:[%s1812_s2 + $0xf8] sm:$0xff] }
  0x79   : > { %469 = vperm.xlu0 %1355, %v220_v15   ;;  %459 = vperm.xlu1 %1356, %v218_v19   ;;  %v1084_v19 = vld [vmem:[%s1811_s1 + $0x38] sm:$0xf0] }
  0x7c   : > { %v312_v28 = vpop.permute.xlu2 %311 }
  0x83   : > { %v370_v26 = vpop.permute.xlu1 %369  ;;  %v320_v27 = vpop.permute.xlu0 %319 }
  0x84   : > { %v364_v37 = vpop.permute.xlu2 %363 }
  0x8b   : > { %v372_v31 = vpop.permute.xlu1 %371  ;;  %v322_v32 = vpop.permute.xlu0 %321 }
  0x8c   : > { %v327_v34 = vsel %vm323_vm1, %v320_v27, %v322_v32  ;;  %v377_v35 = vsel %vm373_vm0, %v370_v26, %v372_v31  ;;  %v358_v49 = vpop.permute.xlu2 %357  ;;  %v221_v26 = vld [vmem:[%s1812_s2 + $0x90] sm:$0xff]  ;;  %v1188_v31 = vld [vmem:[%s1811_s1 + $0x4] sm:$0xf]  ;;  %v1060_v32 = vld [vmem:[%s1811_s1 + $0x8] sm:$0xf0] }
  0x8d   : > { %702 = vmatpush.bf16.msra.mxu0 %v327_v34  ;;  %1327 = vmatpush.bf16.msra.mxu2 %v327_v34  ;;  %v1124_v34 = vld [vmem:[%s1811_s1 + $0x88] sm:$0xf0] }
  0x8e   : > { %791 = vmatpush.bf16.msra.mxu1 %v377_v35  ;;  %1335 = vmatpush.bf16.msra.mxu3 %v377_v35 }
  0x8f   : > { %474 = vperm.xlu1 %1356, %v221_v26   ;;  %v1197_v26 = vld [vmem:[%s1811_s1 + $0x44] sm:$0xf0] }
  0x91   : > { %703 = vmatpush.bf16.msra.mxu0 %v326_v36  ;;  %1328 = vmatpush.bf16.msra.mxu2 %v326_v36  ;;  %v1063_v36 = vor.u32 %v1188_v31, %v1060_v32  ;;  %v1196_v31 = vld [vmem:[%s1811_s1 + $0x44] sm:$0xf]  ;;  %v1092_v32 = vld [vmem:[%s1811_s1 + $0x48] sm:$0xf0] }
  0x93   : > { %v366_v39 = vpop.permute.xlu0 %365  ;;  %v368_v40 = vpop.permute.xlu1 %367 }
  0x94   : > { %v376_v42 = vsel %vm373_vm0, %v366_v39, %v368_v40  ;;  %v347_v61 = vpop.permute.xlu2 %346  ;;  %v216_v39 = vld [vmem:[%s1812_s2 + $0x68] sm:$0xff]  ;;  %v1191_v40 = vld [vmem:[%s1811_s1 + $0x14] sm:$0xf0] }
  0x95   : > { %792 = vmatpush.bf16.msra.mxu1 %v376_v42  ;;  %1336 = vmatpush.bf16.msra.mxu3 %v376_v42  ;;  %v1207_v42 = vld [vmem:[%s1811_s1 + $0x94] sm:$0xf0] }
  0x96   : > { %449 = vperm.xlu2 %1357, %v216_v39   ;;  %v1162_v39 = vld [vmem:[%s1811_s1 + $0xd0] sm:$0xf] }
  0x97   : > { %489 = vperm.xlu1 %1356, %v224_v43   ;;  %v1198_v43 = vld [vmem:[%s1811_s1 + $0x54] sm:$0xf] }
  0x9b   : > { %v362_v44 = vpop.permute.xlu1 %361  ;;  %v314_v45 = vpop.permute.xlu0 %313 }
  0x9c   : > { %v325_v47 = vsel %vm323_vm1, %v312_v28, %v314_v45  ;;  %v375_v48 = vsel %vm373_vm0, %v362_v44, %v364_v37  ;;  %v337_v12 = vpop.permute.xlu2 %336  ;;  %v1127_v37 = vor.u32 %v1204_v33, %v1124_v34  ;;  %v1067_v44 = vor.u32 %v1191_v40, %v1066_v38  ;;  %v1212_v33 = vld [vmem:[%s1811_s1 + $0xc4] sm:$0xf]  ;;  %v1156_v34 = vld [vmem:[%s1811_s1 + $0xc8] sm:$0xf0]  ;;  %v1199_v38 = vld [vmem:[%s1811_s1 + $0x54] sm:$0xf0] }
  0x9d   : > { %704 = vmatpush.bf16.msra.mxu0 %v325_v47  ;;  %1329 = vmatpush.bf16.msra.mxu2 %v325_v47  ;;  %v1131_v45 = vor.u32 %v1207_v42, %v1130_v41  ;;  %v223_v47 = vld [vmem:[%s1812_s2 + $0xa0] sm:$0xff]  ;;  %v1215_v40 = vld [vmem:[%s1811_s1 + $0xd4] sm:$0xf0] }
  0x9e   : > { %793 = vmatpush.bf16.msra.mxu1 %v375_v48  ;;  %1337 = vmatpush.bf16.msra.mxu3 %v375_v48  ;;  %v227_v48 = vld [vmem:[%s1812_s2 + $0xc0] sm:$0xff]  ;;  %v1163_v42 = vor.u32 %v1215_v40, %v1162_v39 }
  0x9f   : > { %484 = vperm.xlu0 %1355, %v223_v47   ;;  %464 = vperm.xlu2 %1357, %v219_v46   ;;  %v1164_v46 = vld [vmem:[%s1811_s1 + $0xd8] sm:$0xf0] }
  0xa0   : > { %504 = vperm.xlu1 %1356, %v227_v48  }
  0xa3   : > { %v308_v55 = vpop.permute.xlu0 %307  ;;  %v310_v56 = vpop.permute.xlu1 %309 }
  0xa4   : > { %v324_v57 = vsel %vm323_vm1, %v308_v55, %v310_v56  ;;  %v335_v27 = vpop.permute.xlu2 %334  ;;  %v1135_v55 = vor.u32 %v1206_v51, %v1132_v52  ;;  %v1074_v56 = vld [vmem:[%s1811_s1 + $0x20] sm:$0xf]  ;;  %v1217_v52 = vld [vmem:[%s1811_s1 + $0xe4] sm:$0xf0] }
  0xa5   : > { %705 = vmatpush.bf16.msra.mxu0 %v324_v57  ;;  %1330 = vmatpush.bf16.msra.mxu2 %v324_v57  ;;  %v222_v57 = vld [vmem:[%s1812_s2 + $0x98] sm:$0xff]  ;;  %v1170_v51 = vld [vmem:[%s1811_s1 + $0xe0] sm:$0xf] }
  0xa7   : > { %499 = vperm.xlu0 %1355, %v226_v53   ;;  %479 = vperm.xlu2 %1357, %v222_v57   ;;  %v1200_v57 = vld [vmem:[%s1811_s1 + $0x64] sm:$0xf] }
  0xa9   : > { %706 = vmatpush.bf16.msra.mxu0 %v1023_v58  ;;  %1331 = vmatpush.bf16.msra.mxu2 %v1023_v58  ;;  %v1193_v58 = vld [vmem:[%s1811_s1 + $0x24] sm:$0xf0] }
  0xaa   : > { %v1075_v62 = vor.u32 %v1193_v58, %v1074_v56  ;;  %v1108_v58 = vld [vmem:[%s1811_s1 + $0x68] sm:$0xf0] }
  0xab   : > { %v360_v4 = vpop.permute.xlu0 %359  ;;  %v345_v5 = vpop.permute.xlu1 %344 }
  0xac   : > { %v374_v6 = vsel %vm373_vm0, %v358_v49, %v360_v4  ;;  %v352_v10 = vsel %vm348_vm2, %v345_v5, %v347_v61  ;;  %v1190_v49 = vld [vmem:[%s1811_s1 + $0x14] sm:$0xf]  ;;  %v230_v61 = vld [vmem:[%s1812_s2 + $0xd8] sm:$0xff]  ;;  %v1076_v4 = vld [vmem:[%s1811_s1 + $0x28] sm:$0xf0] }
  0xad   : > { %707 = vmatpush.bf16.msra.mxu0 %v1019_v0  ;;  %1332 = vmatpush.bf16.msra.mxu2 %v1019_v0  ;;  %v1071_v54 = vor.u32 %v1190_v49, %v1068_v50  ;;  %v225_v0 = vld [vmem:[%s1812_s2 + $0xb0] sm:$0xff]  ;;  %v1208_v5 = vld [vmem:[%s1811_s1 + $0xa4] sm:$0xf]  ;;  %v1079_v8 = vor.u32 %v1192_v3, %v1076_v4  ;;  %v1106_v49 = vld [vmem:[%s1811_s1 + $0x60] sm:$0xf] }
  0xae   : > { %794 = vmatpush.bf16.msra.mxu1 %v374_v6  ;;  %1338 = vmatpush.bf16.msra.mxu3 %v374_v6  ;;  %v1140_v6 = vld [vmem:[%s1811_s1 + $0xa8] sm:$0xf0]  ;;  %v1201_v50 = vld [vmem:[%s1811_s1 + $0x64] sm:$0xf0]  ;;  %v1178_v3 = vld [vmem:[%s1811_s1 + $0xf0] sm:$0xf] }
  0xaf   : > { %519 = vperm.xlu1 %1356, %v230_v61   ;;  %514 = vperm.xlu0 %1355, %v229_v1   ;;  %v1143_v9 = vor.u32 %v1208_v5, %v1140_v6  ;;  %v1107_v53 = vor.u32 %v1201_v50, %v1106_v49  ;;  %v1219_v4 = vld [vmem:[%s1811_s1 + $0xf4] sm:$0xf0] }
  0xb0   : > { %494 = vperm.xlu2 %1357, %v225_v0   ;;  %v1114_v0 = vld [vmem:[%s1811_s1 + $0x70] sm:$0xf] }
  0xb1   : > { %708 = vmatpush.bf16.msra.mxu0 %v1015_v7  ;;  %1333 = vmatpush.bf16.msra.mxu2 %v1015_v7  ;;  %v232_v7 = vld [vmem:[%s1812_s2 + $0xe8] sm:$0xff] }
  0xb2   : > { %795 = vmatpush.bf16.msra.mxu1 %v352_v10  ;;  %1339 = vmatpush.bf16.msra.mxu3 %v352_v10  ;;  %v1082_v10 = vld [vmem:[%s1811_s1 + $0x30] sm:$0xf] }
  0xb3   : > { %v341_v20 = vpop.permute.xlu0 %340  ;;  %v343_v21 = vpop.permute.xlu1 %342 }
  0xb4   : > { %v351_v22 = vsel %vm348_vm2, %v341_v20, %v343_v21  ;;  %v1210_v20 = vld [vmem:[%s1811_s1 + $0xb4] sm:$0xf]  ;;  %v1148_v21 = vld [vmem:[%s1811_s1 + $0xb8] sm:$0xf0] }
  0xb5   : > { %709 = vmatpush.bf16.msra.mxu0 %v1011_v16  ;;  %1334 = vmatpush.bf16.msra.mxu2 %v1011_v16  ;;  %v1147_v16 = vor.u32 %v1211_v14, %v1146_v13  ;;  %v1218_v13 = vld [vmem:[%s1811_s1 + $0xf4] sm:$0xf]  ;;  %v1180_v14 = vld [vmem:[%s1811_s1 + $0xf8] sm:$0xf0] }
  0xb6   : > { %796 = vmatpush.bf16.msra.mxu1 %v351_v22  ;;  %1340 = vmatpush.bf16.msra.mxu3 %v351_v22  ;;  %v1087_v22 = vor.u32 %v1194_v18, %v1084_v19 }
  0xb7   : > { %534 = vperm.xlu1 %1356, %v233_v2   ;;  %529 = vperm.xlu0 %1355, %v232_v7   ;;  %v1203_v2 = vld [vmem:[%s1811_s1 + $0x74] sm:$0xf0]  ;;  %v1179_v7 = vor.u32 %v1219_v4, %v1178_v3 }
  0xb8   : > { %710 = vmatmul.bf16.vlgmr.msra.gmra.mxu0 %v1059_v23  ;;  %750 = vmatmul.bf16.vlgmr.msra.gmra.mxu2 %v1123_v24  ;;  %v1151_v23 = vor.u32 %v1210_v20, %v1148_v21  ;;  %v1090_v24 = vld [vmem:[%s1811_s1 + $0x40] sm:$0xf]  ;;  %v1115_v6 = vor.u32 %v1203_v2, %v1114_v0 }
  0xb9   : > { %509 = vperm.xlu2 %1357, %v228_v11  }
  0xbb   : > { %v339_v28 = vpop.permute.xlu0 %338  ;;  %v333_v29 = vpop.permute.xlu1 %332 }
  0xbc   : > { %v350_v30 = vsel %vm348_vm2, %v337_v12, %v339_v28  ;;  %v349_v35 = vsel %vm348_vm2, %v333_v29, %v335_v27  ;;  %v1195_v12 = vld [vmem:[%s1811_s1 + $0x34] sm:$0xf0]  ;;  %v1154_v27 = vld [vmem:[%s1811_s1 + $0xc0] sm:$0xf]  ;;  %v1213_v28 = vld [vmem:[%s1811_s1 + $0xc4] sm:$0xf0]  ;;  %v1091_v29 = vor.u32 %v1197_v26, %v1090_v24 }
  0xbd   : > { %797 = vmatpush.bf16.msra.mxu1 %v350_v30  ;;  %1341 = vmatpush.bf16.msra.mxu3 %v350_v30  ;;  %v1083_v15 = vor.u32 %v1195_v12, %v1082_v10  ;;  %v1155_v30 = vor.u32 %v1213_v28, %v1154_v27  ;;  %v1202_v10 = vld [vmem:[%s1811_s1 + $0x74] sm:$0xf]  ;;  %v1116_v12 = vld [vmem:[%s1811_s1 + $0x78] sm:$0xf0] }
  0xc1   : > { %798 = vmatpush.bf16.msra.mxu1 %v349_v35  ;;  %1342 = vmatpush.bf16.msra.mxu3 %v349_v35  ;;  %v1095_v35 = vor.u32 %v1196_v31, %v1092_v32 }
  0xc2   : > { %524 = vperm.xlu2 %1357, %v231_v17  }
  0xc3   : > { %v385_v56 = vpop.permute.xlu0 %384  ;;  %v390_v61 = vpop.permute.xlu1 %389 }
  0xc4   : > { %799 = vmatmul.bf16.vlgmr.msra.gmra.mxu1 %v1063_v36  ;;  %839 = vmatmul.bf16.vlgmr.msra.gmra.mxu3 %v1127_v37  ;;  %v1159_v36 = vor.u32 %v1212_v33, %v1156_v34  ;;  %v1098_v37 = vld [vmem:[%s1811_s1 + $0x50] sm:$0xf] }
  0xc5   : > { %v1099_v41 = vor.u32 %v1199_v38, %v1098_v37 }
  0xc8   : > { %715 = vmatmul.bf16.gmra.mxu0 %v1067_v44  ;;  %755 = vmatmul.bf16.gmra.mxu2 %v1131_v45  ;;  %v1100_v44 = vld [vmem:[%s1811_s1 + $0x58] sm:$0xf0]  ;;  %v1214_v45 = vld [vmem:[%s1811_s1 + $0xd4] sm:$0xf] }
  0xc9   : > { %v1103_v47 = vor.u32 %v1198_v43, %v1100_v44  ;;  %v1167_v48 = vor.u32 %v1214_v45, %v1164_v46 }
  0xca   : > { %539 = vperm.xlu2 %1357, %v234_v25  }
  0xcb   : > { %v1738_v5 = vpop.permute.xlu0 %409 }
  0xd3   : > { %v1745_v11 = vpop.permute.xlu0 %424 }
  0xd4   : > { %804 = vmatmul.bf16.gmra.mxu1 %v1071_v54  ;;  %844 = vmatmul.bf16.gmra.mxu3 %v1135_v55  ;;  %v1171_v54 = vor.u32 %v1217_v52, %v1170_v51  ;;  %v1710_v55 = vpop.permute.xlu2 %394 }
  0xd8   : > { %720 = vmatmul.bf16.gmra.mxu0 %v1075_v62  ;;  %760 = vmatmul.bf16.gmra.mxu2 %v1139_v63  ;;  %v1111_v62 = vor.u32 %v1200_v57, %v1108_v58  ;;  %v1175_v63 = vor.u32 %v1216_v59, %v1172_v60 }
  0xdb   : > { %v1760_v20 = vpop.permute.xlu0 %439 }
  0xdc   : > { %v1727_v1 = vpop.permute.xlu2 %404 }
  0xe3   : > { %v1766_v25 = vpop.permute.xlu0 %454 }
  0xe4   : > { %809 = vmatmul.bf16.gmra.mxu1 %v1079_v8  ;;  %849 = vmatmul.bf16.gmra.mxu3 %v1143_v9  ;;  %v400_v8 = vpop.permute.xlu1 %399  ;;  %v1740_v9 = vpop.permute.xlu2 %419 }
  0xe8   : > { %725 = vmatmul.bf16.gmra.mxu0 %v1083_v15  ;;  %765 = vmatmul.bf16.gmra.mxu2 %v1147_v16  ;;  %v1119_v15 = vor.u32 %v1202_v10, %v1116_v12  ;;  %v1183_v16 = vor.u32 %v1218_v13, %v1180_v14 }
  0xeb   : > { %v470_v37 = vpop.permute.xlu0 %469 }
  0xec   : > { %v1756_v17 = vpop.permute.xlu1 %414  ;;  %v1758_v18 = vpop.permute.xlu2 %434 }
  0xf4   : > { %814 = vmatmul.bf16.gmra.mxu1 %v1087_v22  ;;  %854 = vmatmul.bf16.gmra.mxu3 %v1151_v23  ;;  %v1762_v22 = vpop.permute.xlu1 %429  ;;  %v1764_v24 = vpop.permute.xlu2 %449 }
  0xf8   : > { %730 = vmatmul.bf16.gmra.mxu0 %v1091_v29  ;;  %770 = vmatmul.bf16.gmra.mxu2 %v1155_v30 }
  0xfc   : > { %v1768_v30 = vpop.permute.xlu1 %444  ;;  %v465_v33 = vpop.permute.xlu2 %464 }
 0x104   : > { %819 = vmatmul.bf16.gmra.mxu1 %v1095_v35  ;;  %859 = vmatmul.bf16.gmra.mxu3 %v1159_v36  ;;  %v1777_v46 = vpop.permute.xlu1 %459 }
 0x108   : > { %735 = vmatmul.bf16.gmra.mxu0 %v1099_v41  ;;  %775 = vmatmul.bf16.gmra.mxu2 %v1163_v42 }
 0x10c   : > { %v475_v58 = vpop.permute.xlu1 %474 }
 0x114   : > { %824 = vmatmul.bf16.gmra.mxu1 %v1103_v47  ;;  %864 = vmatmul.bf16.gmra.mxu3 %v1167_v48 }
 0x118   : > { %740 = vmatmul.bf16.gmra.mxu0 %v1107_v53  ;;  %780 = vmatmul.bf16.gmra.mxu2 %v1171_v54 }
 0x124   : > { %829 = vmatmul.bf16.gmra.mxu1 %v1111_v62  ;;  %869 = vmatmul.bf16.gmra.mxu3 %v1175_v63  ;;  %v480_v62 = vpop.permute.xlu2 %479 }
 0x128   : > { %745 = vmatmul.bf16.gmra.mxu0 %v1115_v6  ;;  %785 = vmatmul.bf16.gmra.mxu2 %v1179_v7 }
 0x134   : > { %834 = vmatmul.bf16.gmra.mxu1 %v1119_v15  ;;  %874 = vmatmul.bf16.gmra.mxu3 %v1183_v16 }
 0x135   : > { %v711_v19 = vpop.f32.mrf.mxu0 }
 0x136   : > { %v712_v29 = vadd.f32 %v711_v19, %v385_v56  ;;  %v485_v19 = vpop.permute.xlu0 %484 }
 0x13b   : > { %v751_v21 = vpop.f32.mrf.mxu2 }
 0x13c   : > { %v752_v39 = vadd.f32 %v751_v21, %v465_v33 }
 0x13d   : > { %v713_v23 = vpop.f32.mrf.mxu0 }
 0x13e   : > { %v714_v32 = vadd.f32 %v713_v23, %v390_v61 }
 0x141   : > { %v800_v26 = vpop.f32.mrf.mxu1 }
 0x142   : > { %v801_v35 = vadd.f32 %v800_v26, %v712_v29 }
 0x143   : > { %v753_v27 = vpop.f32.mrf.mxu2 }
 0x144   : > { %v754_v42 = vadd.f32 %v753_v27, %v470_v37  ;;  %v490_v27 = vpop.permute.xlu1 %489 }
 0x145   : > { %v716_v28 = vpop.f32.mrf.mxu0 }
 0x146   : > { %v717_v51 = vadd.f32 %v716_v28, %v1710_v55 }
 0x147   : > { %v840_v31 = vpop.f32.mrf.mxu3 }
 0x148   : > { %v841_v44 = vadd.f32 %v840_v31, %v752_v39 }
 0x149   : > { %v802_v34 = vpop.f32.mrf.mxu1 }
 0x14a   : > { %v803_v36 = vadd.f32 %v802_v34, %v714_v32 }
 0x14b   : > { %v756_v38 = vpop.f32.mrf.mxu2 }
 0x14c   : > { %v1235_v40 = vpack.c.bf16 %v803_v36, %v801_v35  ;;  %v757_v60 = vadd.f32 %v756_v38, %v475_v58 }
 0x14d   : > { %v718_v41 = vpop.f32.mrf.mxu0 }
 0x14e   : > { %1236 = vst [vmem:[%s1774_s16] sm:$0xff] %v1235_v40   ;;  %v719_v53 = vadd.f32 %v718_v41, %v400_v8 }
 0x14f   : > { %v842_v43 = vpop.f32.mrf.mxu3 }
 0x150   : > { %v843_v45 = vadd.f32 %v842_v43, %v754_v42  ;;  %v495_v43 = vpop.permute.xlu2 %494 }
 0x151   : > { %v805_v47 = vpop.f32.mrf.mxu1 }
 0x152   : > { %v1275_v48 = vpack.c.bf16 %v843_v45, %v841_v44  ;;  %v806_v56 = vadd.f32 %v805_v47, %v717_v51  ;;  %v500_v45 = vpop.permute.xlu0 %499 }
 0x153   : > { %v758_v49 = vpop.f32.mrf.mxu2 }
 0x154   : > { %1319 = vst [vmem:[%s1774_s16 + $0x40] sm:$0xff] %v1275_v48   ;;  %v759_v0 = vadd.f32 %v758_v49, %v480_v62 }
 0x155   : > { %v721_v50 = vpop.f32.mrf.mxu0 }
 0x156   : > { %v722_v10 = vadd.f32 %v721_v50, %v1727_v1 }
 0x157   : > { %v845_v52 = vpop.f32.mrf.mxu3 }
 0x158   : > { %v846_v3 = vadd.f32 %v845_v52, %v757_v60 }
 0x159   : > { %v807_v54 = vpop.f32.mrf.mxu1 }
 0x15a   : > { %v808_v57 = vadd.f32 %v807_v54, %v719_v53 }
 0x15b   : > { %v761_v59 = vpop.f32.mrf.mxu2 }
 0x15c   : > { %v1240_v61 = vpack.c.bf16 %v808_v57, %v806_v56  ;;  %v762_v23 = vadd.f32 %v761_v59, %v485_v19 }
 0x15d   : > { %v723_v63 = vpop.f32.mrf.mxu0 }
 0x15e   : > { %1312 = vst [vmem:[%s1774_s16 + $0x8] sm:$0xff] %v1240_v61   ;;  %v724_v13 = vadd.f32 %v723_v63, %v1738_v5  ;;  %v510_v63 = vpop.permute.xlu2 %509 }
 0x15f   : > { %v847_v2 = vpop.f32.mrf.mxu3 }
 0x160   : > { %v848_v4 = vadd.f32 %v847_v2, %v759_v0  ;;  %v505_v2 = vpop.permute.xlu1 %504 }
 0x161   : > { %v810_v6 = vpop.f32.mrf.mxu1 }
 0x162   : > { %v1280_v7 = vpack.c.bf16 %v848_v4, %v846_v3  ;;  %v811_v15 = vadd.f32 %v810_v6, %v722_v10 }
 0x163   : > { %v763_v55 = vpop.f32.mrf.mxu2 }
 0x164   : > { %1320 = vst [vmem:[%s1774_s16 + $0x48] sm:$0xff] %v1280_v7   ;;  %v764_v29 = vadd.f32 %v763_v55, %v490_v27  ;;  %v515_v27 = vpop.permute.xlu0 %514 }
 0x165   : > { %v726_v8 = vpop.f32.mrf.mxu0 }
 0x166   : > { %v727_v37 = vadd.f32 %v726_v8, %v1756_v17 }
 0x167   : > { %v850_v12 = vpop.f32.mrf.mxu3 }
 0x168   : > { %v851_v32 = vadd.f32 %v850_v12, %v762_v23  ;;  %v520_v23 = vpop.permute.xlu1 %519 }
 0x169   : > { %v812_v14 = vpop.f32.mrf.mxu1 }
 0x16a   : > { %v813_v16 = vadd.f32 %v812_v14, %v724_v13 }
 0x16b   : > { %v766_v21 = vpop.f32.mrf.mxu2 }
 0x16c   : > { %v1245_v26 = vpack.c.bf16 %v813_v16, %v811_v15  ;;  %v767_v48 = vadd.f32 %v766_v21, %v495_v43  ;;  %v525_v43 = vpop.permute.xlu2 %524 }
 0x16d   : > { %v728_v28 = vpop.f32.mrf.mxu0 }
 0x16e   : > { %1313 = vst [vmem:[%s1774_s16 + $0x10] sm:$0xff] %v1245_v26   ;;  %v729_v38 = vadd.f32 %v728_v28, %v1740_v9 }
 0x16f   : > { %v852_v31 = vpop.f32.mrf.mxu3 }
 0x170   : > { %v853_v33 = vadd.f32 %v852_v31, %v764_v29 }
 0x171   : > { %v815_v34 = vpop.f32.mrf.mxu1 }
 0x172   : > { %v1285_v1 = vpack.c.bf16 %v853_v33, %v851_v32  ;;  %v816_v40 = vadd.f32 %v815_v34, %v727_v37 }
 0x173   : > { %v768_v35 = vpop.f32.mrf.mxu2 }
 0x174   : > { %1321 = vst [vmem:[%s1774_s16 + $0x50] sm:$0xff] %v1285_v1   ;;  %v769_v49 = vadd.f32 %v768_v35, %v500_v45 }
 0x175   : > { %v731_v5 = vpop.f32.mrf.mxu0 }
 0x176   : > { %v732_v57 = vadd.f32 %v731_v5, %v1745_v11 }
 0x177   : > { %v855_v36 = vpop.f32.mrf.mxu3 }
 0x178   : > { %v856_v51 = vadd.f32 %v855_v36, %v767_v48 }
 0x179   : > { %v817_v39 = vpop.f32.mrf.mxu1 }
 0x17a   : > { %v818_v41 = vadd.f32 %v817_v39, %v729_v38 }
 0x17b   : > { %v771_v42 = vpop.f32.mrf.mxu2 }
 0x17c   : > { %v1250_v44 = vpack.c.bf16 %v818_v41, %v816_v40  ;;  %v772_v4 = vadd.f32 %v771_v42, %v505_v2 }
 0x17d   : > { %v733_v47 = vpop.f32.mrf.mxu0 }
 0x17e   : > { %1314 = vst [vmem:[%s1774_s16 + $0x18] sm:$0xff] %v1250_v44   ;;  %v734_v58 = vadd.f32 %v733_v47, %v1762_v22  ;;  %v530_v44 = vpop.permute.xlu0 %529 }
 0x17f   : > { %v857_v50 = vpop.f32.mrf.mxu3 }
 0x180   : > { %v858_v52 = vadd.f32 %v857_v50, %v769_v49 }
 0x181   : > { %v820_v53 = vpop.f32.mrf.mxu1 }
 0x182   : > { %v1290_v54 = vpack.c.bf16 %v858_v52, %v856_v51  ;;  %v821_v60 = vadd.f32 %v820_v53, %v732_v57 }
 0x183   : > { %v773_v17 = vpop.f32.mrf.mxu2 }
 0x184   : > { %1322 = vst [vmem:[%s1774_s16 + $0x58] sm:$0xff] %v1290_v54   ;;  %v774_v6 = vadd.f32 %v773_v17, %v510_v63 }
 0x185   : > { %v736_v9 = vpop.f32.mrf.mxu0 }
 0x186   : > { %v737_v14 = vadd.f32 %v736_v9, %v1758_v18 }
 0x187   : > { %v860_v56 = vpop.f32.mrf.mxu3 }
 0x188   : > { %v861_v55 = vadd.f32 %v860_v56, %v772_v4 }
 0x189   : > { %v822_v59 = vpop.f32.mrf.mxu1 }
 0x18a   : > { %v823_v61 = vadd.f32 %v822_v59, %v734_v58 }
 0x18b   : > { %v776_v62 = vpop.f32.mrf.mxu2 }
 0x18c   : > { %v1255_v0 = vpack.c.bf16 %v823_v61, %v821_v60  ;;  %v777_v29 = vadd.f32 %v776_v62, %v515_v27  ;;  %v540_v60 = vpop.permute.xlu2 %539  ;;  %v535_v61 = vpop.permute.xlu1 %534 }
 0x18d   : > { %v738_v3 = vpop.f32.mrf.mxu0 }
 0x18e   : > { %1315 = vst [vmem:[%s1774_s16 + $0x20] sm:$0xff] %v1255_v0   ;;  %v739_v15 = vadd.f32 %v738_v3, %v1760_v20 }
 0x18f   : > { %v862_v7 = vpop.f32.mrf.mxu3 }
 0x190   : > { %v863_v8 = vadd.f32 %v862_v7, %v774_v6 }
 0x191   : > { %v825_v10 = vpop.f32.mrf.mxu1 }
 0x192   : > { %v1295_v12 = vpack.c.bf16 %v863_v8, %v861_v55  ;;  %v826_v19 = vadd.f32 %v825_v10, %v737_v14 }
 0x193   : > { %v778_v11 = vpop.f32.mrf.mxu2 }
 0x194   : > { %1323 = vst [vmem:[%s1774_s16 + $0x60] sm:$0xff] %v1295_v12   ;;  %v779_v31 = vadd.f32 %v778_v11, %v520_v23 }
 0x195   : > { %v741_v22 = vpop.f32.mrf.mxu0 }
 0x196   : > { %v742_v36 = vadd.f32 %v741_v22, %v1768_v30 }
 0x197   : > { %v865_v13 = vpop.f32.mrf.mxu3 }
 0x198   : > { %v866_v33 = vadd.f32 %v865_v13, %v777_v29 }
 0x199   : > { %v827_v16 = vpop.f32.mrf.mxu1 }
 0x19a   : > { %v828_v21 = vadd.f32 %v827_v16, %v739_v15 }
 0x19b   : > { %v781_v28 = vpop.f32.mrf.mxu2 }
 0x19c   : > { %v1260_v26 = vpack.c.bf16 %v828_v21, %v826_v19  ;;  %v782_v45 = vadd.f32 %v781_v28, %v525_v43 }
 0x19d   : > { %v743_v1 = vpop.f32.mrf.mxu0 }
 0x19e   : > { %1316 = vst [vmem:[%s1774_s16 + $0x28] sm:$0xff] %v1260_v26   ;;  %v744_v37 = vadd.f32 %v743_v1, %v1764_v24 }
 0x19f   : > { %v867_v32 = vpop.f32.mrf.mxu3 }
 0x1a0   : > { %v868_v34 = vadd.f32 %v867_v32, %v779_v31 }
 0x1a1   : > { %v830_v35 = vpop.f32.mrf.mxu1 }
 0x1a2   : > { %v1300_v18 = vpack.c.bf16 %v868_v34, %v866_v33  ;;  %v831_v39 = vadd.f32 %v830_v35, %v742_v36 }
 0x1a3   : > { %v783_v20 = vpop.f32.mrf.mxu2 }
 0x1a4   : > { %1324 = vst [vmem:[%s1774_s16 + $0x68] sm:$0xff] %v1300_v18   ;;  %v784_v47 = vadd.f32 %v783_v20, %v530_v44 }
 0x1a5   : > { %v746_v41 = vpop.f32.mrf.mxu0 }
 0x1a6   : > { %v747_v54 = vadd.f32 %v746_v41, %v1766_v25 }
 0x1a7   : > { %v870_v5 = vpop.f32.mrf.mxu3 }
 0x1a8   : > { %v871_v49 = vadd.f32 %v870_v5, %v782_v45 }
 0x1a9   : > { %v832_v38 = vpop.f32.mrf.mxu1 }
 0x1aa   : > { %v833_v40 = vadd.f32 %v832_v38, %v744_v37 }
 0x1ab   : > { %v786_v51 = vpop.f32.mrf.mxu2 }
 0x1ac   : > { %v1265_v42 = vpack.c.bf16 %v833_v40, %v831_v39  ;;  %v787_v62 = vadd.f32 %v786_v51, %v535_v61 }
 0x1ad   : > { %v748_v24 = vpop.f32.mrf.mxu0 }
 0x1ae   : > { %1317 = vst [vmem:[%s1774_s16 + $0x30] sm:$0xff] %v1265_v42   ;;  %v749_v17 = vadd.f32 %v748_v24, %v1777_v46 }
 0x1af   : > { %v872_v48 = vpop.f32.mrf.mxu3 }
 0x1b0   : > { %v873_v50 = vadd.f32 %v872_v48, %v784_v47 }
 0x1b1   : > { %v835_v52 = vpop.f32.mrf.mxu1 }
 0x1b2   : > { %v1305_v30 = vpack.c.bf16 %v873_v50, %v871_v49  ;;  %v836_v56 = vadd.f32 %v835_v52, %v747_v54 }
 0x1b3   : > { %v788_v58 = vpop.f32.mrf.mxu2 }
 0x1b4   : > { %1325 = vst [vmem:[%s1774_s16 + $0x70] sm:$0xff] %v1305_v30   ;;  %v789_v63 = vadd.f32 %v788_v58, %v540_v60 }
 0x1b7   : > { %v875_v53 = vpop.f32.mrf.mxu3 }
 0x1b8   : > { %v876_v2 = vadd.f32 %v875_v53, %v787_v62 }
 0x1b9   : > { %v837_v9 = vpop.f32.mrf.mxu1 }
 0x1ba   : > { %v838_v57 = vadd.f32 %v837_v9, %v749_v17 }
 0x1bc   : > { %v1270_v59 = vpack.c.bf16 %v838_v57, %v836_v56 }
 0x1be   : > { %1318 = vst [vmem:[%s1774_s16 + $0x38] sm:$0xff] %v1270_v59  }
 0x1bf   : > { %v877_v0 = vpop.f32.mrf.mxu3 }
 0x1c0   : > { %v878_v3 = vadd.f32 %v877_v0, %v789_v63 }
 0x1c2   : > { %v1310_v4 = vpack.c.bf16 %v878_v3, %v876_v2 }
 0x1c4   : > { %1326 = vst [vmem:[%s1774_s16 + $0x78] sm:$0xff] %v1310_v4  }
 0x1c5 PF: > { %s13_s12 = sadd.s32 1, %s1364_s12  }
 0x1c6   : > { %p10_p4 = scmp.ge.s32.totalorder %s13_s12, 4  }
 0x1c8   :  { %12 = sbr.rel (!%p10_p4) target bundleno = 1 (0x1), region = 62 }

// kernel: unet_forward.31
= control target key start
LH: loop header
LB: loop body
LE: loop exit
PB: predicated region body
PF: predicated region fallthrough
CT: control target
= control target key end

     0   :  { %s1728_s12 = smov 0   ;;  %s2519_s0 = inlined_call_operand.vmem [shape: bf16[2,128,256], index: 0, kind: input, shape index: {}]   ;;  %s2520_s1 = inlined_call_operand.vmem [shape: bf16[64,1152], index: 1, kind: input, shape index: {}]   ;;  %s2521_s2 = inlined_call_operand.vmem [shape: f32[64,1], index: 2, kind: input, shape index: {}]   ;;  %s2522_s3 = inlined_call_operand.vmem [shape: bf16[2,64,128], index: 3, kind: output, shape index: {}]  }
   0x1 LB: > { %s1319_s13 = sadd.s32 4294967295, %s1697_s12   ;;  %p1323_p0 = scmp.ge.s32.totalorder %s1697_s12, 1  ;;  %s1697_s12 = sphi %s1728_s12, %s13_s12  }
   0x2   : > { %p137_p1 = scmp.lt.s32.totalorder %s1697_s12, 3 }
   0x4   : > { %p138_p2 = pnand %p1323_p0, %p137_p1 }
   0x5   : > { %p161_p3 = scmp.lt.s32.totalorder (!%p138_p2), %s1319_s13, 1  ;;  %s1699_s18 = smov (!%p138_p2), 127  }
   0x6   : > { %141 = sbr.rel (%p138_p2) target bundleno = 646 (0x286), region = 32  ;;  %s1700_s19 = smov (!%p138_p2), 126  }
   0x7   : > { %s1701_s20 = smov (!%p138_p2), 122   ;;  %s1702_s21 = smov (!%p138_p2), 121  }
   0x8   : > { %s1703_s22 = smov (!%p138_p2), 116   ;;  %s1704_s23 = smov (!%p138_p2), 115  }
   0x9   : > { %s1705_s24 = smov (!%p138_p2), 120   ;;  %s1706_s9 = smov (!%p138_p2), 114  }
   0xb   : > { %s2524_s13 = smov (!%p161_p3, %s1319_s13), 1  ;;  %vm444_vm0 = vcmask 1031168   ;;  %vm395_vm1 = vcmask 1039360   ;;  %vm493_vm2 = vcmask 998400   ;;  %vm542_vm3 = vcmask 990208  }
   0xc   : > { %s1570_s14 = sshll.u32 %s2524_s13, 7  ;;  %vm640_vm4 = vcmask 949248   ;;  %vm689_vm5 = vcmask 941056   ;;  %vm591_vm6 = vcmask 982016   ;;  %vm738_vm7 = vcmask 932864   ;;  %s1571_s16 = sshll.u32 %s2524_s13, 5 }
   0xd   : > { %s1742_s17 = scalar_lea.vmem %s2519_s0, %s1570_s14 }
   0xe   : > { %v1370_v0 = vld [vmem:[%s1742_s17 + $0x10] sm:$0xf]  ;;  %v1619_v1 = vld [vmem:[%s1742_s17 + $0x14] sm:$0xf0]  ;;  %v1362_v2 = vld [vmem:[%s1742_s17] sm:$0xf] }
   0xf   : > { %v1747_v3 = vor.u32 %v1619_v1, %v1370_v0  ;;  %v1617_v4 = vld [vmem:[%s1742_s17 + $0x4] sm:$0xf0]  ;;  %v1618_v6 = vld [vmem:[%s1742_s17 + $0x14] sm:$0xf]  ;;  %v1372_v7 = vld [vmem:[%s1742_s17 + $0x18] sm:$0xf0] }
  0x10   : > { %v1750_v5 = vor.u32 %v1617_v4, %v1362_v2  ;;  %v1378_v8 = vld [vmem:[%s1742_s17 + $0x20] sm:$0xf]  ;;  %v1621_v9 = vld [vmem:[%s1742_s17 + $0x24] sm:$0xf0]  ;;  %v1616_v10 = vld [vmem:[%s1742_s17 + $0x4] sm:$0xf]  ;;  %v1764_v13 = vor.u32 %v1618_v6, %v1372_v7 }
  0x11   : > { %367 = vrot.lane.b32.xlu1 %v1747_v3, %s1699_s18  ;;  %v1364_v11 = vld [vmem:[%s1742_s17 + $0x8] sm:$0xf0]  ;;  %v1762_v12 = vor.u32 %v1621_v9, %v1378_v8  ;;  %v1620_v15 = vld [vmem:[%s1742_s17 + $0x24] sm:$0xf]  ;;  %v1622_v18 = vld [vmem:[%s1742_s17 + $0x34] sm:$0xf] }
  0x12   : > { %363 = vrot.lane.b32.xlu0 %v1750_v5, %s1699_s18  ;;  %v1768_v14 = vor.u32 %v1616_v10, %v1364_v11  ;;  %v1380_v16 = vld [vmem:[%s1742_s17 + $0x28] sm:$0xf0]  ;;  %v1388_v19 = vld [vmem:[%s1742_s17 + $0x38] sm:$0xf0]  ;;  %v1386_v20 = vld [vmem:[%s1742_s17 + $0x30] sm:$0xf] }
  0x13   : > { %371 = vrot.lane.b32.xlu2 %v1762_v12, %s1699_s18  ;;  %v1774_v17 = vor.u32 %v1620_v15, %v1380_v16  ;;  %v1623_v21 = vld [vmem:[%s1742_s17 + $0x34] sm:$0xf0]  ;;  %v1782_v22 = vor.u32 %v1622_v18, %v1388_v19  ;;  %v1394_v24 = vld [vmem:[%s1742_s17 + $0x40] sm:$0xf]  ;;  %v1625_v25 = vld [vmem:[%s1742_s17 + $0x44] sm:$0xf0] }
  0x14   : > { %v1786_v23 = vor.u32 %v1623_v21, %v1386_v20  ;;  %v1792_v26 = vor.u32 %v1625_v25, %v1394_v24  ;;  %v1402_v27 = vld [vmem:[%s1742_s17 + $0x50] sm:$0xf]  ;;  %v1627_v28 = vld [vmem:[%s1742_s17 + $0x54] sm:$0xf0]  ;;  %v1624_v29 = vld [vmem:[%s1742_s17 + $0x44] sm:$0xf] }
  0x15   : > { %v1396_v30 = vld [vmem:[%s1742_s17 + $0x48] sm:$0xf0]  ;;  %v1800_v31 = vor.u32 %v1627_v28, %v1402_v27  ;;  %v1626_v33 = vld [vmem:[%s1742_s17 + $0x54] sm:$0xf]  ;;  %v1404_v34 = vld [vmem:[%s1742_s17 + $0x58] sm:$0xf0] }
  0x16   : > { %v1804_v32 = vor.u32 %v1624_v29, %v1396_v30  ;;  %v1810_v35 = vor.u32 %v1626_v33, %v1404_v34  ;;  %v1628_v36 = vld [vmem:[%s1742_s17 + $0x64] sm:$0xf]  ;;  %v1412_v37 = vld [vmem:[%s1742_s17 + $0x68] sm:$0xf0]  ;;  %v1410_v38 = vld [vmem:[%s1742_s17 + $0x60] sm:$0xf] }
  0x17   : > { %v1629_v39 = vld [vmem:[%s1742_s17 + $0x64] sm:$0xf0]  ;;  %v1818_v40 = vor.u32 %v1628_v36, %v1412_v37  ;;  %v1418_v42 = vld [vmem:[%s1742_s17 + $0x70] sm:$0xf]  ;;  %v1631_v43 = vld [vmem:[%s1742_s17 + $0x74] sm:$0xf0] }
  0x18   : > { %v1822_v41 = vor.u32 %v1629_v39, %v1410_v38  ;;  %v1828_v44 = vor.u32 %v1631_v43, %v1418_v42  ;;  %v1630_v45 = vld [vmem:[%s1742_s17 + $0x74] sm:$0xf]  ;;  %v1420_v46 = vld [vmem:[%s1742_s17 + $0x78] sm:$0xf0]  ;;  %v1358_v48 = vld [vmem:[%s1742_s17 + $0x70] sm:$0xf] }
  0x19   : > { %369 = vrot.lane.b32.xlu1 %v1764_v13, %s1699_s18  ;;  %v1836_v47 = vor.u32 %v1630_v45, %v1420_v46  ;;  %v1615_v49 = vld [vmem:[%s1742_s17 + $0x74] sm:$0xf0]  ;;  %v1354_v52 = vld [vmem:[%s1742_s17 + $0x60] sm:$0xf]  ;;  %v1614_v53 = vld [vmem:[%s1742_s17 + $0x64] sm:$0xf0] }
  0x1a   : > { %365 = vrot.lane.b32.xlu0 %v1768_v14, %s1699_s18  ;;  %v1359_v50 = vor.u32 %v1615_v49, %v1358_v48  ;;  %v1355_v54 = vor.u32 %v1614_v53, %v1354_v52  ;;  %v1350_v55 = vld [vmem:[%s1742_s17 + $0x50] sm:$0xf]  ;;  %v1613_v56 = vld [vmem:[%s1742_s17 + $0x54] sm:$0xf0]  ;;  %v1346_v59 = vld [vmem:[%s1742_s17 + $0x40] sm:$0xf] }
  0x1b   : > { %373 = vrot.lane.b32.xlu2 %v1774_v17, %s1699_s18  ;;  %v1351_v57 = vor.u32 %v1613_v56, %v1350_v55  ;;  %v1612_v60 = vld [vmem:[%s1742_s17 + $0x44] sm:$0xf0]  ;;  %v1342_v62 = vld [vmem:[%s1742_s17 + $0x30] sm:$0xf]  ;;  %v1611_v63 = vld [vmem:[%s1742_s17 + $0x34] sm:$0xf0] }
  0x1c   : > { %1655 = vmatpush.bf16.msra.mxu1 %v1359_v50  ;;  %979 = vmatpush.bf16.msra.mxu0 %v1359_v50  ;;  %v1347_v61 = vor.u32 %v1612_v60, %v1346_v59  ;;  %v1343_v0 = vor.u32 %v1611_v63, %v1342_v62  ;;  %v1338_v2 = vld [vmem:[%s1742_s17 + $0x20] sm:$0xf]  ;;  %v1610_v4 = vld [vmem:[%s1742_s17 + $0x24] sm:$0xf0]  ;;  %v1334_v9 = vld [vmem:[%s1742_s17 + $0x10] sm:$0xf] }
  0x1d   : > { %v1339_v7 = vor.u32 %v1610_v4, %v1338_v2  ;;  %v1609_v10 = vld [vmem:[%s1742_s17 + $0x14] sm:$0xf0]  ;;  %v1330_v16 = vld [vmem:[%s1742_s17] sm:$0xf]  ;;  %v1608_v18 = vld [vmem:[%s1742_s17 + $0x4] sm:$0xf0] }
  0x1e   : > { %v1335_v11 = vor.u32 %v1609_v10, %v1334_v9  ;;  %v1331_v20 = vor.u32 %v1608_v18, %v1330_v16 }
  0x20   : > { %1656 = vmatpush.bf16.msra.mxu1 %v1355_v54  ;;  %980 = vmatpush.bf16.msra.mxu0 %v1355_v54 }
  0x21   : > { %377 = vrot.lane.b32.xlu1 %v1782_v22, %s1699_s18 }
  0x22   : > { %375 = vrot.lane.b32.xlu0 %v1786_v23, %s1699_s18 }
  0x23   : > { %379 = vrot.lane.b32.xlu2 %v1792_v26, %s1699_s18 }
  0x24   : > { %1657 = vmatpush.bf16.msra.mxu1 %v1351_v57  ;;  %981 = vmatpush.bf16.msra.mxu0 %v1351_v57 }
  0x28   : > { %1658 = vmatpush.bf16.msra.mxu1 %v1347_v61  ;;  %982 = vmatpush.bf16.msra.mxu0 %v1347_v61 }
  0x29   : > { %383 = vrot.lane.b32.xlu1 %v1800_v31, %s1699_s18 }
  0x2a   : > { %381 = vrot.lane.b32.xlu0 %v1804_v32, %s1699_s18 }
  0x2b   : > { %385 = vrot.lane.b32.xlu2 %v1810_v35, %s1699_s18 }
  0x2c   : > { %1659 = vmatpush.bf16.msra.mxu1 %v1343_v0  ;;  %983 = vmatpush.bf16.msra.mxu0 %v1343_v0 }
  0x30   : > { %1660 = vmatpush.bf16.msra.mxu1 %v1339_v7  ;;  %984 = vmatpush.bf16.msra.mxu0 %v1339_v7 }
  0x31   : > { %389 = vrot.lane.b32.xlu1 %v1818_v40, %s1699_s18 }
  0x32   : > { %387 = vrot.lane.b32.xlu0 %v1822_v41, %s1699_s18 }
  0x33   : > { %391 = vrot.lane.b32.xlu2 %v1828_v44, %s1699_s18 }
  0x34   : > { %1661 = vmatpush.bf16.msra.mxu1 %v1335_v11  ;;  %985 = vmatpush.bf16.msra.mxu0 %v1335_v11 }
  0x38   : > { %1662 = vmatpush.bf16.msra.mxu1 %v1331_v20  ;;  %986 = vmatpush.bf16.msra.mxu0 %v1331_v20 }
  0x39   : > { %412 = vrot.lane.b32.xlu1 %v1750_v5, %s1700_s19 }
  0x3a   : > { %393 = vrot.lane.b32.xlu0 %v1836_v47, %s1699_s18  ;;  %s2502_s18 = scalar_lea.vmem %s2522_s3, %s1571_s16 }
  0x3b   : > { %414 = vrot.lane.b32.xlu2 %v1768_v14, %s1700_s19 }
  0x41   : > { %418 = vrot.lane.b32.xlu1 %v1764_v13, %s1700_s19 }
  0x42   : > { %416 = vrot.lane.b32.xlu0 %v1747_v3, %s1700_s19 }
  0x43   : > { %420 = vrot.lane.b32.xlu2 %v1762_v12, %s1700_s19 }
  0x49   : > { %424 = vrot.lane.b32.xlu1 %v1786_v23, %s1700_s19 }
  0x4a   : > { %422 = vrot.lane.b32.xlu0 %v1774_v17, %s1700_s19 }
  0x4b   : > { %426 = vrot.lane.b32.xlu2 %v1782_v22, %s1700_s19 }
  0x51   : > { %430 = vrot.lane.b32.xlu1 %v1804_v32, %s1700_s19 }
  0x52   : > { %428 = vrot.lane.b32.xlu0 %v1792_v26, %s1700_s19 }
  0x53   : > { %432 = vrot.lane.b32.xlu2 %v1800_v31, %s1700_s19 }
  0x59   : > { %436 = vrot.lane.b32.xlu1 %v1822_v41, %s1700_s19 }
  0x5a   : > { %434 = vrot.lane.b32.xlu0 %v1810_v35, %s1700_s19 }
  0x5b   : > { %440 = vrot.lane.b32.xlu2 %v1828_v44, %s1700_s19 }
  0x61   : > { %438 = vrot.lane.b32.xlu1 %v1818_v40, %s1700_s19 }
  0x62   : > { %442 = vrot.lane.b32.xlu0 %v1836_v47, %s1700_s19 }
  0x63   : > { %461 = vrot.lane.b32.xlu2 %v1750_v5, %s1701_s20 }
  0x69   : > { %489 = vrot.lane.b32.xlu1 %v1828_v44, %s1701_s20 }
  0x6a   : > { %463 = vrot.lane.b32.xlu0 %v1768_v14, %s1701_s20 }
  0x6b   : > { %491 = vrot.lane.b32.xlu2 %v1836_v47, %s1701_s20 }
  0x6d   : > { %v1866_v51 = vpop.permute.xlu2 %371 }
  0x71   : > { %487 = vrot.lane.b32.xlu1 %v1818_v40, %s1701_s20 }
  0x72   : > { %485 = vrot.lane.b32.xlu0 %v1822_v41, %s1701_s20 }
  0x73   : > { %481 = vrot.lane.b32.xlu2 %v1800_v31, %s1701_s20 }
  0x75   : > { %v1878_v58 = vpop.permute.xlu2 %373 }
  0x76   : > { %v398_v59 = vsel %vm395_vm1, %v1866_v51, %v1878_v58 }
  0x79   : > { %477 = vrot.lane.b32.xlu1 %v1792_v26, %s1701_s20 }
  0x7a   : > { %483 = vrot.lane.b32.xlu0 %v1810_v35, %s1701_s20 }
  0x7b   : > { %479 = vrot.lane.b32.xlu2 %v1804_v32, %s1701_s20 }
  0x7d   : > { %v1890_v1 = vpop.permute.xlu2 %379 }
  0x81   : > { %475 = vrot.lane.b32.xlu1 %v1782_v22, %s1701_s20 }
  0x82   : > { %473 = vrot.lane.b32.xlu0 %v1786_v23, %s1701_s20 }
  0x83   : > { %v1898_v6 = vpop.permute.xlu1 %367  ;;  %469 = vrot.lane.b32.xlu2 %v1762_v12, %s1701_s20 }
  0x84   : > { %v1900_v8 = vpop.permute.xlu0 %363 }
  0x85   : > { %v386_v15 = vpop.permute.xlu2 %385 }
  0x89   : > { %465 = vrot.lane.b32.xlu1 %v1747_v3, %s1701_s20 }
  0x8a   : > { %471 = vrot.lane.b32.xlu0 %v1774_v17, %s1701_s20 }
  0x8b   : > { %v1912_v19 = vpop.permute.xlu1 %369  ;;  %467 = vrot.lane.b32.xlu2 %v1764_v13, %s1701_s20 }
  0x8c   : > { %v1914_v21 = vpop.permute.xlu0 %365  ;;  %v397_v62 = vsel %vm395_vm1, %v1898_v6, %v1912_v19 }
  0x8d   : > { %v392_v24 = vpop.permute.xlu2 %391  ;;  %v396_v51 = vsel %vm395_vm1, %v1900_v8, %v1914_v21 }
  0x91   : > { %540 = vrot.lane.b32.xlu1 %v1836_v47, %s1702_s21 }
  0x92   : > { %538 = vrot.lane.b32.xlu0 %v1828_v44, %s1702_s21 }
  0x93   : > { %v378_v25 = vpop.permute.xlu1 %377  ;;  %534 = vrot.lane.b32.xlu2 %v1822_v41, %s1702_s21 }
  0x94   : > { %v376_v27 = vpop.permute.xlu0 %375 }
  0x95   : > { %v415_v28 = vpop.permute.xlu2 %414  ;;  %v399_v56 = vsel %vm395_vm1, %v376_v27, %v378_v25 }
  0x99   : > { %530 = vrot.lane.b32.xlu1 %v1800_v31, %s1702_s21 }
  0x9a   : > { %536 = vrot.lane.b32.xlu0 %v1818_v40, %s1702_s21 }
  0x9b   : > { %v384_v29 = vpop.permute.xlu1 %383  ;;  %532 = vrot.lane.b32.xlu2 %v1810_v35, %s1702_s21 }
  0x9c   : > { %v382_v30 = vpop.permute.xlu0 %381  ;;  %v401_v50 = vsel %vm395_vm1, %v384_v29, %v386_v15 }
  0x9d   : > { %v1930_v33 = vpop.permute.xlu2 %420  ;;  %v400_v53 = vsel %vm395_vm1, %v1890_v1, %v382_v30 }
  0xa1   : > { %528 = vrot.lane.b32.xlu1 %v1804_v32, %s1702_s21 }
  0xa2   : > { %526 = vrot.lane.b32.xlu0 %v1792_v26, %s1702_s21 }
  0xa3   : > { %v390_v34 = vpop.permute.xlu1 %389  ;;  %522 = vrot.lane.b32.xlu2 %v1786_v23, %s1702_s21 }
  0xa4   : > { %v388_v36 = vpop.permute.xlu0 %387 }
  0xa5   : > { %v1938_v37 = vpop.permute.xlu2 %426  ;;  %v402_v46 = vsel %vm395_vm1, %v388_v36, %v390_v34 }
  0xa9   : > { %518 = vrot.lane.b32.xlu1 %v1762_v12, %s1702_s21 }
  0xaa   : > { %524 = vrot.lane.b32.xlu0 %v1782_v22, %s1702_s21 }
  0xab   : > { %v413_v38 = vpop.permute.xlu1 %412  ;;  %520 = vrot.lane.b32.xlu2 %v1774_v17, %s1702_s21 }
  0xac   : > { %v394_v39 = vpop.permute.xlu0 %393  ;;  %v1945_v42 = vsel %vm444_vm0, %v413_v38, %v415_v28 }
  0xad   : > { %v403_v43 = vsel %vm395_vm1, %v392_v24, %v394_v39  ;;  %v433_v45 = vpop.permute.xlu2 %432 }
  0xae   : > { %1008 = vmatpush.bf16.msrb.mxu1 %v403_v43 }
  0xb1   : > { %516 = vrot.lane.b32.xlu1 %v1764_v13, %s1702_s21 }
  0xb2   : > { %514 = vrot.lane.b32.xlu0 %v1747_v3, %s1702_s21  ;;  %1009 = vmatpush.bf16.msrb.mxu1 %v402_v46  ;;  %v1594_v46 = vld [vmem:[%s2520_s1 + $0xb0] sm:$0xf0] }
  0xb3   : > { %v1955_v48 = vpop.permute.xlu1 %418  ;;  %636 = vrot.lane.b32.xlu2 %v1828_v44, %s1703_s22 }
  0xb4   : > { %v1957_v49 = vpop.permute.xlu0 %416 }
  0xb5   : > { %v441_v52 = vpop.permute.xlu2 %440  ;;  %v446_v30 = vsel %vm444_vm0, %v1957_v49, %v1955_v48 }
  0xb6   : > { %1010 = vmatpush.bf16.msrb.mxu1 %v401_v50 }
  0xb9   : > { %510 = vrot.lane.b32.xlu1 %v1750_v5, %s1702_s21 }
  0xba   : > { %638 = vrot.lane.b32.xlu0 %v1836_v47, %s1703_s22  ;;  %1011 = vmatpush.bf16.msrb.mxu1 %v400_v53 }
  0xbb   : > { %v425_v54 = vpop.permute.xlu1 %424  ;;  %512 = vrot.lane.b32.xlu2 %v1768_v14, %s1702_s21 }
  0xbc   : > { %v423_v55 = vpop.permute.xlu0 %422  ;;  %v448_v21 = vsel %vm444_vm0, %v425_v54, %v1938_v37  ;;  %v1426_v54 = vld [vmem:[%s2520_s1] sm:$0xf] }
  0xbd   : > { %v1971_v57 = vpop.permute.xlu2 %461  ;;  %v447_v27 = vsel %vm444_vm0, %v1930_v33, %v423_v55  ;;  %v1576_v55 = vld [vmem:[%s2520_s1 + $0x20] sm:$0xf0] }
  0xbe   : > { %1012 = vmatpush.bf16.msrb.mxu1 %v399_v56  ;;  %v1427_v56 = vor.u32 %v1576_v55, %v1426_v54 }
  0xc0   : > { %987 = vmatmul.bf16.vlgmr.msra.gmra.mxu0 %v1427_v56  ;;  %v1464_v56 = vld [vmem:[%s2520_s1 + $0x6c] sm:$0xf0] }
  0xc1   : > { %634 = vrot.lane.b32.xlu1 %v1818_v40, %s1703_s22 }
  0xc2   : > { %632 = vrot.lane.b32.xlu0 %v1822_v41, %s1703_s22  ;;  %1013 = vmatpush.bf16.msrb.mxu1 %v398_v59 }
  0xc3   : > { %v431_v60 = vpop.permute.xlu1 %430  ;;  %628 = vrot.lane.b32.xlu2 %v1800_v31, %s1703_s22 }
  0xc4   : > { %v429_v61 = vpop.permute.xlu0 %428 }
  0xc5   : > { %v492_v63 = vpop.permute.xlu2 %491  ;;  %v449_v18 = vsel %vm444_vm0, %v429_v61, %v431_v60 }
  0xc6   : > { %1014 = vmatpush.bf16.msrb.mxu1 %v397_v62 }
  0xc9   : > { %624 = vrot.lane.b32.xlu1 %v1792_v26, %s1703_s22 }
  0xca   : > { %630 = vrot.lane.b32.xlu0 %v1810_v35, %s1703_s22  ;;  %1015 = vmatpush.bf16.msrb.mxu1 %v396_v51 }
  0xcb   : > { %v437_v58 = vpop.permute.xlu1 %436  ;;  %626 = vrot.lane.b32.xlu2 %v1804_v32, %s1703_s22 }
  0xcc   : > { %v435_v0 = vpop.permute.xlu0 %434 }
  0xcd   : > { %v482_v1 = vpop.permute.xlu2 %481  ;;  %v450_v15 = vsel %vm444_vm0, %v433_v45, %v435_v0 }
  0xd1   : > { %687 = vrot.lane.b32.xlu1 %v1836_v47, %s1704_s23 }
  0xd2   : > { %685 = vrot.lane.b32.xlu0 %v1828_v44, %s1704_s23 }
  0xd3   : > { %v439_v2 = vpop.permute.xlu1 %438  ;;  %587 = vrot.lane.b32.xlu2 %v1828_v44, %s1705_s24 }
  0xd4   : > { %v443_v4 = vpop.permute.xlu0 %442  ;;  %v451_v8 = vsel %vm444_vm0, %v437_v58, %v439_v2  ;;  %v1534_v58 = vld [vmem:[%s2520_s1 + $0xd8] sm:$0xf] }
  0xd5   : > { %v452_v6 = vsel %vm444_vm0, %v441_v52, %v443_v4  ;;  %v480_v7 = vpop.permute.xlu2 %479 }
  0xd6   : > { %1037 = vmatpush.bf16.msra.mxu2 %v452_v6 }
  0xd9   : > { %620 = vrot.lane.b32.xlu1 %v1786_v23, %s1703_s22 }
  0xda   : > { %589 = vrot.lane.b32.xlu0 %v1836_v47, %s1705_s24  ;;  %1038 = vmatpush.bf16.msra.mxu2 %v451_v8  ;;  %v1585_v8 = vld [vmem:[%s2520_s1 + $0x68] sm:$0xf0] }
  0xdb   : > { %v490_v9 = vpop.permute.xlu1 %489  ;;  %622 = vrot.lane.b32.xlu2 %v1782_v22, %s1703_s22 }
  0xdc   : > { %v2006_v10 = vpop.permute.xlu0 %463  ;;  %v501_v11 = vsel %vm493_vm2, %v490_v9, %v492_v63 }
  0xdd   : > { %1066 = vmatpush.bf16.msra.mxu3 %v501_v11  ;;  %v470_v16 = vpop.permute.xlu2 %469  ;;  %v494_v61 = vsel %vm493_vm2, %v1971_v57, %v2006_v10  ;;  %v1603_v57 = vld [vmem:[%s2520_s1 + $0xf8] sm:$0xf0] }
  0xde   : > { %1039 = vmatpush.bf16.msra.mxu2 %v450_v15 }
  0xe1   : > { %683 = vrot.lane.b32.xlu1 %v1818_v40, %s1704_s23 }
  0xe2   : > { %681 = vrot.lane.b32.xlu0 %v1822_v41, %s1704_s23  ;;  %1040 = vmatpush.bf16.msra.mxu2 %v449_v18  ;;  %v1434_v18 = vld [vmem:[%s2520_s1 + $0x8] sm:$0xf] }
  0xe3   : > { %v488_v19 = vpop.permute.xlu1 %487  ;;  %583 = vrot.lane.b32.xlu2 %v1822_v41, %s1705_s24 }
  0xe4   : > { %v486_v20 = vpop.permute.xlu0 %485 }
  0xe5   : > { %v500_v24 = vsel %vm493_vm2, %v486_v20, %v488_v19  ;;  %v468_v25 = vpop.permute.xlu2 %467  ;;  %v1577_v19 = vld [vmem:[%s2520_s1 + $0x28] sm:$0xf0] }
  0xe6   : > { %1041 = vmatpush.bf16.msra.mxu2 %v448_v21  ;;  %1067 = vmatpush.bf16.msra.mxu3 %v500_v24  ;;  %v1435_v20 = vor.u32 %v1577_v19, %v1434_v18  ;;  %v1573_v21 = vld [vmem:[%s2520_s1 + $0xc] sm:$0xf]  ;;  %v1436_v24 = vld [vmem:[%s2520_s1 + $0x2c] sm:$0xf0] }
  0xe9   : > { %616 = vrot.lane.b32.xlu1 %v1762_v12, %s1703_s22 }
  0xea   : > { %585 = vrot.lane.b32.xlu0 %v1818_v40, %s1705_s24  ;;  %1042 = vmatpush.bf16.msra.mxu2 %v447_v27 }
  0xeb   : > { %v478_v28 = vpop.permute.xlu1 %477  ;;  %618 = vrot.lane.b32.xlu2 %v1774_v17, %s1703_s22 }
  0xec   : > { %v484_v29 = vpop.permute.xlu0 %483  ;;  %v498_v33 = vsel %vm493_vm2, %v478_v28, %v480_v7  ;;  %v1462_v7 = vld [vmem:[%s2520_s1 + $0x48] sm:$0xf]  ;;  %v1572_v28 = vld [vmem:[%s2520_s1 + $0x4] sm:$0xf] }
  0xed   : > { %v499_v34 = vsel %vm493_vm2, %v482_v1, %v484_v29  ;;  %v535_v36 = vpop.permute.xlu2 %534  ;;  %v1535_v1 = vor.u32 %v1603_v57, %v1534_v58  ;;  %v1463_v9 = vor.u32 %v1585_v8, %v1462_v7  ;;  %v1428_v29 = vld [vmem:[%s2520_s1 + $0x24] sm:$0xf0]  ;;  %v1587_v7 = vld [vmem:[%s2520_s1 + $0x78] sm:$0xf0] }
  0xee   : > { %1043 = vmatpush.bf16.msra.mxu2 %v446_v30  ;;  %1068 = vmatpush.bf16.msra.mxu3 %v499_v34  ;;  %v1431_v34 = vor.u32 %v1572_v28, %v1428_v29  ;;  %v1591_v8 = vld [vmem:[%s2520_s1 + $0x9c] sm:$0xf]  ;;  %v1542_v29 = vld [vmem:[%s2520_s1 + $0xe0] sm:$0xf] }
  0xef   : > { %992 = vmatmul.bf16.gmra.mxu0 %v1463_v9  ;;  %v1508_v9 = vld [vmem:[%s2520_s1 + $0xbc] sm:$0xf0] }
  0xf1   : > { %679 = vrot.lane.b32.xlu1 %v1810_v35, %s1704_s23 }
  0xf2   : > { %677 = vrot.lane.b32.xlu0 %v1800_v31, %s1704_s23  ;;  %1044 = vmatpush.bf16.msra.mxu2 %v1945_v42  ;;  %v1498_v42 = vld [vmem:[%s2520_s1 + $0x90] sm:$0xf] }
  0xf3   : > { %1069 = vmatpush.bf16.msra.mxu3 %v498_v33  ;;  %v476_v37 = vpop.permute.xlu1 %475  ;;  %579 = vrot.lane.b32.xlu2 %v1800_v31, %s1705_s24  ;;  %v1499_v49 = vor.u32 %v1594_v46, %v1498_v42  ;;  %v1470_v42 = vld [vmem:[%s2520_s1 + $0x50] sm:$0xf]  ;;  %v1586_v46 = vld [vmem:[%s2520_s1 + $0x70] sm:$0xf0] }
  0xf4   : > { %v474_v38 = vpop.permute.xlu0 %473 }
  0xf5   : > { %v497_v39 = vsel %vm493_vm2, %v474_v38, %v476_v37  ;;  %v533_v43 = vpop.permute.xlu2 %532  ;;  %997 = vmatmul.bf16.vlgmr.msra.gmra.mxu1 %v1499_v49  ;;  %1045 = vmatmul.bf16.vlgmr.msra.gmra.mxu2 %v1435_v20  ;;  %v1471_v49 = vor.u32 %v1586_v46, %v1470_v42 }
  0xf7   : > { %1070 = vmatpush.bf16.msra.mxu3 %v497_v39 }
  0xf9   : > { %612 = vrot.lane.b32.xlu1 %v1747_v3, %s1703_s22 }
  0xfa   : > { %581 = vrot.lane.b32.xlu0 %v1810_v35, %s1705_s24 }
  0xfb   : > { %v466_v45 = vpop.permute.xlu1 %465  ;;  %614 = vrot.lane.b32.xlu2 %v1764_v13, %s1703_s22 }
  0xfc   : > { %v472_v48 = vpop.permute.xlu0 %471  ;;  %v495_v53 = vsel %vm493_vm2, %v466_v45, %v468_v25  ;;  %v1439_v25 = vor.u32 %v1573_v21, %v1436_v24 }
  0xfd   : > { %v496_v50 = vsel %vm493_vm2, %v470_v16, %v472_v48  ;;  %v523_v52 = vpop.permute.xlu2 %522  ;;  %v1442_v48 = vld [vmem:[%s2520_s1 + $0x10] sm:$0xf] }
  0xfe   : > { %1071 = vmatpush.bf16.msra.mxu3 %v496_v50  ;;  %v1578_v50 = vld [vmem:[%s2520_s1 + $0x30] sm:$0xf0] }
 0x101   : > { %675 = vrot.lane.b32.xlu1 %v1804_v32, %s1704_s23 }
 0x102   : > { %673 = vrot.lane.b32.xlu0 %v1792_v26, %s1704_s23  ;;  %1072 = vmatpush.bf16.msra.mxu3 %v495_v53  ;;  %v1472_v53 = vld [vmem:[%s2520_s1 + $0x74] sm:$0xf0] }
 0x103   : > { %v541_v59 = vpop.permute.xlu1 %540  ;;  %575 = vrot.lane.b32.xlu2 %v1792_v26, %s1705_s24 }
 0x104   : > { %v539_v60 = vpop.permute.xlu0 %538 }
 0x105   : > { %v550_v62 = vsel %vm542_vm3, %v539_v60, %v541_v59  ;;  %v521_v63 = vpop.permute.xlu2 %520  ;;  %1002 = vmatmul.bf16.gmra.mxu1 %v1535_v1  ;;  %1050 = vmatmul.bf16.gmra.mxu2 %v1471_v49  ;;  %v1506_v1 = vld [vmem:[%s2520_s1 + $0x98] sm:$0xf] }
 0x106   : > { %1073 = vmatpush.bf16.msra.mxu3 %v494_v61  ;;  %1095 = vmatpush.bf16.msrb.mxu0 %v550_v62  ;;  %v1443_v61 = vor.u32 %v1578_v50, %v1442_v48 }
 0x109   : > { %608 = vrot.lane.b32.xlu1 %v1750_v5, %s1703_s22  ;;  %1074 = vmatmul.bf16.vlgmr.msra.gmra.mxu3 %v1439_v25 }
 0x10a   : > { %577 = vrot.lane.b32.xlu0 %v1804_v32, %s1705_s24 }
 0x10b   : > { %v531_v51 = vpop.permute.xlu1 %530  ;;  %610 = vrot.lane.b32.xlu2 %v1768_v14, %s1703_s22 }
 0x10c   : > { %v537_v0 = vpop.permute.xlu0 %536  ;;  %v548_v6 = vsel %vm542_vm3, %v531_v51, %v533_v43 }
 0x10d   : > { %v549_v2 = vsel %vm542_vm3, %v535_v36, %v537_v0  ;;  %v2086_v4 = vpop.permute.xlu2 %636 }
 0x10e   : > { %1096 = vmatpush.bf16.msrb.mxu0 %v549_v2  ;;  %v1595_v2 = vld [vmem:[%s2520_s1 + $0xb8] sm:$0xf0] }
 0x111   : > { %671 = vrot.lane.b32.xlu1 %v1782_v22, %s1704_s23 }
 0x112   : > { %669 = vrot.lane.b32.xlu0 %v1786_v23, %s1704_s23  ;;  %1097 = vmatpush.bf16.msrb.mxu0 %v548_v6  ;;  %v1507_v6 = vor.u32 %v1595_v2, %v1506_v1  ;;  %v217_v2 = vld [vmem:[%s2521_s2 + $0x30] sm:$0xff] }
 0x113   : > { %v529_v10 = vpop.permute.xlu1 %528  ;;  %571 = vrot.lane.b32.xlu2 %v1786_v23, %s1705_s24 }
 0x114   : > { %v527_v11 = vpop.permute.xlu0 %526 }
 0x115   : > { %v547_v15 = vsel %vm542_vm3, %v527_v11, %v529_v10  ;;  %v513_v16 = vpop.permute.xlu2 %512  ;;  %1016 = vmatmul.bf16.vlgmr.msrb.gmra.mxu1 %v1431_v34  ;;  %1055 = vmatmul.bf16.gmra.mxu2 %v1507_v6  ;;  %v1511_v10 = vor.u32 %v1591_v8, %v1508_v9  ;;  %v1514_v34 = vld [vmem:[%s2520_s1 + $0xa0] sm:$0xf]  ;;  %v218_v9 = vld [vmem:[%s2521_s2 + $0x38] sm:$0xff] }
 0x116   : > { %1098 = vmatpush.bf16.msrb.mxu0 %v547_v15  ;;  %v1500_v15 = vld [vmem:[%s2520_s1 + $0xb4] sm:$0xf0] }
 0x119   : > { %665 = vrot.lane.b32.xlu1 %v1762_v12, %s1704_s23 }
 0x11a   : > { %573 = vrot.lane.b32.xlu0 %v1782_v22, %s1705_s24 }
 0x11b   : > { %v519_v27 = vpop.permute.xlu1 %518  ;;  %667 = vrot.lane.b32.xlu2 %v1774_v17, %s1704_s23 }
 0x11c   : > { %v525_v30 = vpop.permute.xlu0 %524  ;;  %v545_v37 = vsel %vm542_vm3, %v519_v27, %v521_v63 }
 0x11d   : > { %v546_v36 = vsel %vm542_vm3, %v523_v52, %v525_v30  ;;  %v2127_v33 = vpop.permute.xlu2 %628  ;;  %v1582_v52 = vld [vmem:[%s2520_s1 + $0x54] sm:$0xf]  ;;  %v1604_v30 = vld [vmem:[%s2520_s1 + $0x100] sm:$0xf0] }
 0x11e   : > { %1099 = vmatpush.bf16.msrb.mxu0 %v546_v36  ;;  %v1475_v54 = vor.u32 %v1582_v52, %v1472_v53  ;;  %v1596_v36 = vld [vmem:[%s2520_s1 + $0xc0] sm:$0xf0] }
 0x11f   : > { %v1515_v48 = vor.u32 %v1596_v36, %v1514_v34 }
 0x120   : > { %1079 = vmatmul.bf16.gmra.mxu3 %v1475_v54 }
 0x121   : > { %569 = vrot.lane.b32.xlu1 %v1774_v17, %s1705_s24 }
 0x122   : > { %567 = vrot.lane.b32.xlu0 %v1762_v12, %s1705_s24  ;;  %1100 = vmatpush.bf16.msrb.mxu0 %v545_v37  ;;  %v1544_v37 = vld [vmem:[%s2520_s1 + $0x104] sm:$0xf0] }
 0x123   : > { %v517_v38 = vpop.permute.xlu1 %516  ;;  %661 = vrot.lane.b32.xlu2 %v1747_v3, %s1704_s23 }
 0x124   : > { %v515_v39 = vpop.permute.xlu0 %514 }
 0x125   : > { %v544_v43 = vsel %vm542_vm3, %v515_v39, %v517_v38  ;;  %v2137_v45 = vpop.permute.xlu2 %626  ;;  %v1707_v38 = vmov 0  }
 0x126   : > { %1101 = vmatpush.bf16.msrb.mxu0 %v544_v43  ;;  %1690 = vset.pattern.permute.xlu1 %v1707_v38 }
 0x127   : > { %1689 = vset.pattern.permute.xlu0 %v1707_v38  ;;  %1688 = vset.pattern.permute.xlu2 %v1707_v38 }
 0x129   : > { %734 = vrot.lane.b32.xlu1 %v1828_v44, %s1706_s9  ;;  %v1581_v44 = vld [vmem:[%s2520_s1 + $0x4c] sm:$0xf] }
 0x12a   : > { %663 = vrot.lane.b32.xlu0 %v1764_v13, %s1704_s23  ;;  %v1467_v62 = vor.u32 %v1581_v44, %v1464_v56 }
 0x12b   : > { %v511_v55 = vpop.permute.xlu1 %510  ;;  %736 = vrot.lane.b32.xlu2 %v1836_v47, %s1706_s9 }
 0x12c   : > { %v639_v59 = vpop.permute.xlu0 %638  ;;  %v543_v60 = vsel %vm542_vm3, %v511_v55, %v513_v16  ;;  %1021 = vmatmul.bf16.gmra.mxu1 %v1467_v62 }
 0x12d   : > { %v648_v63 = vsel %vm640_vm4, %v2086_v4, %v639_v59  ;;  %1102 = vmatpush.bf16.msrb.mxu0 %v543_v60  ;;  %v2172_v51 = vpop.permute.xlu2 %587  ;;  %v1478_v4 = vld [vmem:[%s2520_s1 + $0x58] sm:$0xf] }
 0x12e   : > { %1153 = vmatpush.bf16.msrb.mxu2 %v648_v63  ;;  %v1479_v18 = vor.u32 %v1587_v7, %v1478_v4  ;;  %v216_v4 = vld [vmem:[%s2521_s2 + $0x28] sm:$0xff] }
 0x130   : > { %1103 = vmatmul.bf16.vlgmr.msrb.gmra.mxu0 %v1443_v61  ;;  %1084 = vmatmul.bf16.gmra.mxu3 %v1511_v10 }
 0x131   : > { %565 = vrot.lane.b32.xlu1 %v1764_v13, %s1705_s24 }
 0x132   : > { %563 = vrot.lane.b32.xlu0 %v1747_v3, %s1705_s24 }
 0x133   : > { %v635_v58 = vpop.permute.xlu1 %634  ;;  %657 = vrot.lane.b32.xlu2 %v1750_v5, %s1704_s23 }
 0x134   : > { %v633_v57 = vpop.permute.xlu0 %632 }
 0x135   : > { %v647_v0 = vsel %vm640_vm4, %v633_v57, %v635_v58  ;;  %v623_v47 = vpop.permute.xlu2 %622 }
 0x136   : > { %1154 = vmatpush.bf16.msrb.mxu2 %v647_v0 }
 0x139   : > { %730 = vrot.lane.b32.xlu1 %v1822_v41, %s1706_s9  ;;  %v1590_v41 = vld [vmem:[%s2520_s1 + $0x94] sm:$0xf] }
 0x13a   : > { %659 = vrot.lane.b32.xlu0 %v1768_v14, %s1704_s23  ;;  %v1503_v19 = vor.u32 %v1590_v41, %v1500_v15 }
 0x13b   : > { %v625_v11 = vpop.permute.xlu1 %624  ;;  %732 = vrot.lane.b32.xlu2 %v1818_v40, %s1706_s9 }
 0x13c   : > { %v631_v16 = vpop.permute.xlu0 %630  ;;  %1026 = vmatmul.bf16.gmra.mxu1 %v1503_v19  ;;  %v645_v24 = vsel %vm640_vm4, %v625_v11, %v2137_v45  ;;  %v1536_v45 = vld [vmem:[%s2520_s1 + $0xfc] sm:$0xf0] }
 0x13d   : > { %v646_v20 = vsel %vm640_vm4, %v2127_v33, %v631_v16  ;;  %v584_v21 = vpop.permute.xlu2 %583  ;;  %v1543_v33 = vor.u32 %v1604_v30, %v1542_v29 }
 0x13e   : > { %1155 = vmatpush.bf16.msrb.mxu2 %v646_v20 }
 0x13f   : > { %1060 = vmatmul.bf16.gmra.mxu2 %v1543_v33 }
 0x140   : > { %1108 = vmatmul.bf16.gmra.mxu0 %v1479_v18 }
 0x141   : > { %561 = vrot.lane.b32.xlu1 %v1768_v14, %s1705_s24 }
 0x142   : > { %559 = vrot.lane.b32.xlu0 %v1750_v5, %s1705_s24  ;;  %1156 = vmatpush.bf16.msrb.mxu2 %v645_v24 }
 0x143   : > { %v688_v25 = vpop.permute.xlu1 %687  ;;  %726 = vrot.lane.b32.xlu2 %v1800_v31, %s1706_s9  ;;  %v1600_v31 = vld [vmem:[%s2520_s1 + $0xe4] sm:$0xf] }
 0x144   : > { %v686_v27 = vpop.permute.xlu0 %685  ;;  %v1547_v39 = vor.u32 %v1600_v31, %v1544_v37 }
 0x145   : > { %v697_v28 = vsel %vm689_vm5, %v686_v27, %v688_v25  ;;  %v619_v40 = vpop.permute.xlu2 %618  ;;  %v1450_v27 = vld [vmem:[%s2520_s1 + $0x18] sm:$0xf] }
 0x146   : > { %1182 = vmatpush.bf16.msrb.mxu3 %v697_v28  ;;  %v1579_v28 = vld [vmem:[%s2520_s1 + $0x38] sm:$0xf0] }
 0x147   : > { %1089 = vmatmul.bf16.gmra.mxu3 %v1547_v39  ;;  %v1451_v29 = vor.u32 %v1579_v28, %v1450_v27  ;;  %v1488_v27 = vld [vmem:[%s2520_s1 + $0x84] sm:$0xf0] }
 0x149   : > { %722 = vrot.lane.b32.xlu1 %v1792_v26, %s1706_s9  ;;  %v1599_v26 = vld [vmem:[%s2520_s1 + $0xdc] sm:$0xf] }
 0x14a   : > { %728 = vrot.lane.b32.xlu0 %v1810_v35, %s1706_s9  ;;  %v1539_v35 = vor.u32 %v1599_v26, %v1536_v45 }
 0x14b   : > { %v621_v43 = vpop.permute.xlu1 %620  ;;  %724 = vrot.lane.b32.xlu2 %v1804_v32, %s1706_s9  ;;  %v1550_v32 = vld [vmem:[%s2520_s1 + $0xe8] sm:$0xf] }
 0x14c   : > { %v590_v42 = vpop.permute.xlu0 %589  ;;  %v644_v46 = vsel %vm640_vm4, %v621_v43, %v623_v47  ;;  %1031 = vmatmul.bf16.gmra.mxu1 %v1539_v35  ;;  %v215_v47 = vld [vmem:[%s2521_s2 + $0x20] sm:$0xff] }
 0x14d   : > { %v599_v49 = vsel %vm591_vm6, %v2172_v51, %v590_v42  ;;  %1157 = vmatpush.bf16.msrb.mxu2 %v644_v46  ;;  %v580_v50 = vpop.permute.xlu2 %579  ;;  %v1486_v42 = vld [vmem:[%s2520_s1 + $0x60] sm:$0xf]  ;;  %v1588_v46 = vld [vmem:[%s2520_s1 + $0x80] sm:$0xf0] }
 0x14e   : > { %1124 = vmatpush.bf16.msra.mxu1 %v599_v49  ;;  %v2334_v49 = vpop.f32.mrf.mxu0 }
 0x150   : > { %1113 = vmatmul.bf16.gmra.mxu0 %v1515_v48  ;;  %v1487_v48 = vor.u32 %v1588_v46, %v1486_v42 }
 0x151   : > { %720 = vrot.lane.b32.xlu1 %v1782_v22, %s1706_s9  ;;  %v1605_v22 = vld [vmem:[%s2520_s1 + $0x108] sm:$0xf0] }
 0x152   : > { %718 = vrot.lane.b32.xlu0 %v1786_v23, %s1706_s9  ;;  %v1551_v56 = vor.u32 %v1605_v22, %v1550_v32 }
 0x153   : > { %v684_v52 = vpop.permute.xlu1 %683  ;;  %714 = vrot.lane.b32.xlu2 %v1762_v12, %s1706_s9 }
 0x154   : > { %v682_v53 = vpop.permute.xlu0 %681 }
 0x155   : > { %v696_v54 = vsel %vm689_vm5, %v682_v53, %v684_v52  ;;  %v615_v55 = vpop.permute.xlu2 %614 }
 0x156   : > { %1183 = vmatpush.bf16.msrb.mxu3 %v696_v54 }
 0x159   : > { %710 = vrot.lane.b32.xlu1 %v1747_v3, %s1706_s9 }
 0x15a   : > { %716 = vrot.lane.b32.xlu0 %v1774_v17, %s1706_s9  ;;  %v211_v17 = vld [vmem:[%s2521_s2] sm:$0xff] }
 0x15b   : > { %v617_v23 = vpop.permute.xlu1 %616  ;;  %712 = vrot.lane.b32.xlu2 %v1764_v13, %s1706_s9  ;;  %v213_v13 = vld [vmem:[%s2521_s2 + $0x10] sm:$0xff] }
 0x15c   : > { %v586_v44 = vpop.permute.xlu0 %585  ;;  %v643_v12 = vsel %vm640_vm4, %v617_v23, %v619_v40 }
 0x15d   : > { %v598_v59 = vsel %vm591_vm6, %v584_v21, %v586_v44  ;;  %1158 = vmatpush.bf16.msrb.mxu2 %v643_v12  ;;  %v576_v3 = vpop.permute.xlu2 %575 }
 0x15e   : > { %1125 = vmatpush.bf16.msra.mxu1 %v598_v59 }
 0x160   : > { %1118 = vmatmul.bf16.gmra.mxu0 %v1551_v56  ;;  %v2345_v56 = vpop.f32.mrf.mxu0 }
 0x161   : > { %708 = vrot.lane.b32.xlu1 %v1768_v14, %s1706_s9  ;;  %v212_v14 = vld [vmem:[%s2521_s2 + $0x8] sm:$0xff] }
 0x162   : > { %706 = vrot.lane.b32.xlu0 %v1750_v5, %s1706_s9  ;;  %v214_v5 = vld [vmem:[%s2521_s2 + $0x18] sm:$0xff] }
 0x163   : > { %v680_v60 = vpop.permute.xlu1 %679  ;;  %757 = vperm.xlu2 %1688, %v211_v17   ;;  %v1597_v17 = vld [vmem:[%s2520_s1 + $0xc8] sm:$0xf0] }
 0x164   : > { %v678_v61 = vpop.permute.xlu0 %677 }
 0x165   : > { %v695_v62 = vsel %vm689_vm5, %v678_v61, %v680_v60  ;;  %v611_v63 = vpop.permute.xlu2 %610 }
 0x166   : > { %1184 = vmatpush.bf16.msrb.mxu3 %v695_v62 }
 0x169   : > { %767 = vperm.xlu1 %1690, %v213_v13   ;;  %v1575_v13 = vld [vmem:[%s2520_s1 + $0x1c] sm:$0xf] }
 0x16a   : > { %762 = vperm.xlu0 %1689, %v212_v14  }
 0x16b   : > { %v613_v51 = vpop.permute.xlu1 %612  ;;  %772 = vperm.xlu2 %1688, %v214_v5  }
 0x16c   : > { %v582_v58 = vpop.permute.xlu0 %581  ;;  %v642_v57 = vsel %vm640_vm4, %v613_v51, %v615_v55 }
 0x16d   : > { %v597_v0 = vsel %vm591_vm6, %v580_v50, %v582_v58  ;;  %1159 = vmatpush.bf16.msrb.mxu2 %v642_v57  ;;  %v572_v1 = vpop.permute.xlu2 %571 }
 0x16e   : > { %1126 = vmatpush.bf16.msra.mxu1 %v597_v0 }
 0x171   : > { %777 = vperm.xlu1 %1690, %v215_v47   ;;  %v2367_v47 = vpop.f32.mrf.mxu0 }
 0x172   : > { %787 = vperm.xlu0 %1689, %v217_v2   ;;  %v2308_v41 = vpop.f32.mrf.mxu1 }
 0x173   : > { %v676_v6 = vpop.permute.xlu1 %675  ;;  %782 = vperm.xlu2 %1688, %v216_v4   ;;  %v1574_v4 = vld [vmem:[%s2520_s1 + $0x14] sm:$0xf] }
 0x174   : > { %v674_v7 = vpop.permute.xlu0 %673 }
 0x175   : > { %v694_v8 = vsel %vm689_vm5, %v674_v7, %v676_v6  ;;  %v668_v10 = vpop.permute.xlu2 %667  ;;  %v1444_v6 = vld [vmem:[%s2520_s1 + $0x34] sm:$0xf0] }
 0x176   : > { %1185 = vmatpush.bf16.msrb.mxu3 %v694_v8 }
 0x178   : > { %v2340_v32 = vpop.f32.mrf.mxu2 }
 0x179   : > { %792 = vperm.xlu1 %1690, %v218_v9  }
 0x17a   : > { %v2312_v21 = vpop.f32.mrf.mxu1 }
 0x17b   : > { %v609_v11 = vpop.permute.xlu1 %608 }
 0x17c   : > { %v578_v15 = vpop.permute.xlu0 %577  ;;  %v641_v16 = vsel %vm640_vm4, %v609_v11, %v611_v63  ;;  %v1452_v63 = vld [vmem:[%s2520_s1 + $0x3c] sm:$0xf0]  ;;  %v1447_v11 = vor.u32 %v1574_v4, %v1444_v6  ;;  %v1592_v6 = vld [vmem:[%s2520_s1 + $0xa4] sm:$0xf] }
 0x17d   : > { %v596_v18 = vsel %vm591_vm6, %v576_v3, %v578_v15  ;;  %1160 = vmatpush.bf16.msrb.mxu2 %v641_v16  ;;  %v662_v19 = vpop.permute.xlu2 %661  ;;  %v1522_v3 = vld [vmem:[%s2520_s1 + $0xa8] sm:$0xf]  ;;  %v1455_v0 = vor.u32 %v1575_v13, %v1452_v63 }
 0x17e   : > { %1127 = vmatpush.bf16.msra.mxu1 %v596_v18  ;;  %v1523_v61 = vor.u32 %v1597_v17, %v1522_v3  ;;  %v1558_v18 = vld [vmem:[%s2520_s1 + $0xf0] sm:$0xf] }
 0x180   : > { %1161 = vmatmul.bf16.vlgmr.msrb.gmra.mxu2 %v1451_v29  ;;  %v2355_v62 = vpop.f32.mrf.mxu2 }
 0x182   : > { %v2321_v34 = vpop.f32.mrf.mxu1 }
 0x183   : > { %v672_v20 = vpop.permute.xlu1 %671 }
 0x184   : > { %v670_v24 = vpop.permute.xlu0 %669 }
 0x185   : > { %v693_v25 = vsel %vm689_vm5, %v670_v24, %v672_v20  ;;  %v737_v40 = vpop.permute.xlu2 %736  ;;  %v995_v24 = vpop.f32.mrf.mxu0 }
 0x186   : > { %1186 = vmatpush.bf16.msrb.mxu3 %v693_v25  ;;  %v1584_v25 = vld [vmem:[%s2520_s1 + $0x64] sm:$0xf] }
 0x188   : > { %v2377_v8 = vpop.f32.mrf.mxu2 }
 0x18a   : > { %v2325_v39 = vpop.f32.mrf.mxu1 }
 0x18b   : > { %v666_v30 = vpop.permute.xlu1 %665 }
 0x18c   : > { %v574_v36 = vpop.permute.xlu0 %573  ;;  %v692_v33 = vsel %vm689_vm5, %v666_v30, %v668_v10  ;;  %v2342_v22 = vpop.f32.mrf.mxu3 }
 0x18d   : > { %v595_v31 = vsel %vm591_vm6, %v572_v1, %v574_v36  ;;  %1187 = vmatpush.bf16.msrb.mxu3 %v692_v33  ;;  %v658_v37 = vpop.permute.xlu2 %657  ;;  %v1491_v36 = vor.u32 %v1584_v25, %v1488_v27 }
 0x18e   : > { %1128 = vmatpush.bf16.msra.mxu1 %v595_v31 }
 0x190   : > { %1166 = vmatmul.bf16.gmra.mxu2 %v1487_v48  ;;  %v1053_v33 = vpop.f32.mrf.mxu2 }
 0x192   : > { %v2338_v54 = vpop.f32.mrf.mxu1 }
 0x193   : > { %v570_v38 = vpop.permute.xlu1 %569 }
 0x194   : > { %v568_v43 = vpop.permute.xlu0 %567  ;;  %v2363_v5 = vpop.f32.mrf.mxu3 }
 0x195   : > { %v594_v26 = vsel %vm591_vm6, %v568_v43, %v570_v38  ;;  %v733_v45 = vpop.permute.xlu2 %732 }
 0x196   : > { %1129 = vmatpush.bf16.msra.mxu1 %v594_v26  ;;  %v1583_v26 = vld [vmem:[%s2520_s1 + $0x5c] sm:$0xf] }
 0x19a   : > { %v2353_v60 = vpop.f32.mrf.mxu1 }
 0x19b   : > { %v735_v35 = vpop.permute.xlu1 %734 }
 0x19c   : > { %v664_v50 = vpop.permute.xlu0 %663  ;;  %v746_v52 = vsel %vm738_vm7, %v735_v35, %v737_v40 }
 0x19d   : > { %v691_v53 = vsel %vm689_vm5, %v662_v19, %v664_v50  ;;  %1211 = vmatpush.bf16.msra.mxu0 %v746_v52  ;;  %1663 = vmatpush.bf16.msra.mxu2 %v746_v52  ;;  %v727_v55 = vpop.permute.xlu2 %726  ;;  %v1606_v19 = vld [vmem:[%s2520_s1 + $0x110] sm:$0xf0] }
 0x19e   : > { %1188 = vmatpush.bf16.msrb.mxu3 %v691_v53  ;;  %v1559_v20 = vor.u32 %v1606_v19, %v1558_v18  ;;  %v1607_v18 = vld [vmem:[%s2520_s1 + $0x118] sm:$0xf0] }
 0x1a0   : > { %1171 = vmatmul.bf16.gmra.mxu2 %v1523_v61 }
 0x1a3   : > { %v566_v23 = vpop.permute.xlu1 %565  ;;  %v2380_v15 = vpop.f32.mrf.mxu3 }
 0x1a4   : > { %v564_v44 = vpop.permute.xlu0 %563 }
 0x1a5   : > { %v593_v12 = vsel %vm591_vm6, %v564_v44, %v566_v23  ;;  %v725_v59 = vpop.permute.xlu2 %724  ;;  %v2408_v23 = vpop.f32.mrf.mxu2 }
 0x1a6   : > { %1130 = vmatpush.bf16.msra.mxu1 %v593_v12 }
 0x1a9   : > { %v2369_v2 = vpop.f32.mrf.mxu1 }
 0x1ab   : > { %v731_v14 = vpop.permute.xlu1 %730 }
 0x1ac   : > { %v660_v51 = vpop.permute.xlu0 %659  ;;  %v745_v58 = vsel %vm738_vm7, %v731_v14, %v733_v45  ;;  %v1480_v45 = vld [vmem:[%s2520_s1 + $0x7c] sm:$0xf0] }
 0x1ad   : > { %v690_v57 = vsel %vm689_vm5, %v658_v37, %v660_v51  ;;  %1212 = vmatpush.bf16.msra.mxu0 %v745_v58  ;;  %1664 = vmatpush.bf16.msra.mxu2 %v745_v58  ;;  %v715_v1 = vpop.permute.xlu2 %714  ;;  %v1082_v37 = vpop.f32.mrf.mxu3  ;;  %v1483_v50 = vor.u32 %v1583_v26, %v1480_v45 }
 0x1ae   : > { %1189 = vmatpush.bf16.msrb.mxu3 %v690_v57  ;;  %v1104_v48 = vpop.f32.mrf.mxu0 }
 0x1b0   : > { %1176 = vmatmul.bf16.gmra.mxu2 %v1559_v20 }
 0x1b1   : > { %1190 = vmatmul.bf16.vlgmr.msrb.gmra.mxu3 %v1455_v0  ;;  %v1024_v40 = vpop.f32.mrf.mxu1 }
 0x1b3   : > { %v562_v7 = vpop.permute.xlu1 %561 }
 0x1b4   : > { %v560_v9 = vpop.permute.xlu0 %559 }
 0x1b5   : > { %v592_v10 = vsel %vm591_vm6, %v560_v9, %v562_v7  ;;  %v713_v16 = vpop.permute.xlu2 %712  ;;  %v2410_v12 = vpop.f32.mrf.mxu3  ;;  %v1516_v7 = vld [vmem:[%s2520_s1 + $0xc4] sm:$0xf0]  ;;  %v1458_v9 = vld [vmem:[%s2520_s1 + $0x20] sm:$0xf] }
 0x1b6   : > { %1131 = vmatpush.bf16.msra.mxu1 %v592_v10  ;;  %v2419_v63 = vpop.f32.mrf.mxu0  ;;  %v1519_v27 = vor.u32 %v1592_v6, %v1516_v7 }
 0x1b9   : > { %1132 = vmatmul.bf16.vlgmr.msra.gmra.mxu1 %v1447_v11  ;;  %v2406_v53 = vpop.f32.mrf.mxu1 }
 0x1bb   : > { %v723_v28 = vpop.permute.xlu1 %722 }
 0x1bc   : > { %v729_v29 = vpop.permute.xlu0 %728  ;;  %v743_v43 = vsel %vm738_vm7, %v723_v28, %v725_v59 }
 0x1bd   : > { %v744_v30 = vsel %vm738_vm7, %v727_v55, %v729_v29  ;;  %v758_v31 = vpop.permute.xlu2 %757  ;;  %v1087_v19 = vpop.f32.mrf.mxu3 }
 0x1be   : > { %1213 = vmatpush.bf16.msra.mxu0 %v744_v30  ;;  %1665 = vmatpush.bf16.msra.mxu2 %v744_v30  ;;  %v989_v38 = vadd.f32 %v2334_v49, %v758_v31  ;;  %v1109_v30 = vpop.f32.mrf.mxu0 }
 0x1c0   : > { %v1018_v42 = vadd.f32 %v2338_v54, %v989_v38  ;;  %v1593_v54 = vld [vmem:[%s2520_s1 + $0xac] sm:$0xf] }
 0x1c1   : > { %1195 = vmatmul.bf16.gmra.mxu3 %v1491_v36  ;;  %v1029_v57 = vpop.f32.mrf.mxu1  ;;  %v1602_v36 = vld [vmem:[%s2520_s1 + $0xf4] sm:$0xf] }
 0x1c2   : > { %1214 = vmatpush.bf16.msra.mxu0 %v743_v43  ;;  %1666 = vmatpush.bf16.msra.mxu2 %v743_v43  ;;  %v1047_v49 = vadd.f32 %v2340_v32, %v1018_v42  ;;  %v1524_v32 = vld [vmem:[%s2520_s1 + $0xcc] sm:$0xf0] }
 0x1c3   : > { %v721_v46 = vpop.permute.xlu1 %720  ;;  %v1527_v13 = vor.u32 %v1593_v54, %v1524_v32 }
 0x1c4   : > { %v719_v35 = vpop.permute.xlu0 %718  ;;  %v1076_v31 = vadd.f32 %v2342_v22, %v1047_v49 }
 0x1c5   : > { %v742_v52 = vsel %vm738_vm7, %v719_v35, %v721_v46  ;;  %v773_v55 = vpop.permute.xlu2 %772 }
 0x1c6   : > { %1215 = vmatpush.bf16.msra.mxu0 %v742_v52  ;;  %1667 = vmatpush.bf16.msra.mxu2 %v742_v52  ;;  %v996_v44 = vadd.f32 %v995_v24, %v773_v55  ;;  %v1105_v26 = vadd.f32 %v1104_v48, %v1076_v31  ;;  %v1601_v52 = vld [vmem:[%s2520_s1 + $0xec] sm:$0xf]  ;;  %v2461_v22 = vpop.f32.mrf.mxu0  ;;  %v1552_v48 = vld [vmem:[%s2520_s1 + $0x10c] sm:$0xf0] }
 0x1c8   : > { %v1025_v3 = vadd.f32 %v1024_v40, %v996_v44  ;;  %v1555_v44 = vor.u32 %v1601_v52, %v1552_v48 }
 0x1c9   : > { %1137 = vmatmul.bf16.gmra.mxu1 %v1483_v50 }
 0x1ca   : > { %v1054_v14 = vadd.f32 %v1053_v33, %v1025_v3  ;;  %v1560_v33 = vld [vmem:[%s2520_s1 + $0x114] sm:$0xf0] }
 0x1cb   : > { %v711_v59 = vpop.permute.xlu1 %710  ;;  %v1563_v45 = vor.u32 %v1602_v36, %v1560_v33 }
 0x1cc   : > { %v717_v17 = vpop.permute.xlu0 %716  ;;  %v2421_v51 = vadd.f32 %v1082_v37, %v1054_v14  ;;  %v740_v4 = vsel %vm738_vm7, %v711_v59, %v713_v16  ;;  %v1566_v16 = vld [vmem:[%s2520_s1 + $0xf8] sm:$0xf]  ;;  %v1032_v59 = vpop.f32.mrf.mxu1 }
 0x1cd   : > { %v741_v61 = vsel %vm738_vm7, %v715_v1, %v717_v17  ;;  %v783_v58 = vpop.permute.xlu2 %782  ;;  %v1058_v1 = vpop.f32.mrf.mxu2  ;;  %v1567_v40 = vor.u32 %v1607_v18, %v1566_v16 }
 0x1ce   : > { %1216 = vmatpush.bf16.msra.mxu0 %v741_v61  ;;  %1668 = vmatpush.bf16.msra.mxu2 %v741_v61  ;;  %v1001_v0 = vadd.f32 %v2312_v21, %v783_v58  ;;  %v1580_v21 = vld [vmem:[%s2520_s1 + $0x40] sm:$0xf0]  ;;  %v1114_v58 = vpop.f32.mrf.mxu0 }
 0x1cf   : > { %v1459_v28 = vor.u32 %v1580_v21, %v1458_v9 }
 0x1d0   : > { %v1030_v10 = vadd.f32 %v1029_v57, %v1001_v0 }
 0x1d1   : > { %1200 = vmatmul.bf16.gmra.mxu3 %v1527_v13 }
 0x1d2   : > { %1217 = vmatpush.bf16.msra.mxu0 %v740_v4  ;;  %1669 = vmatpush.bf16.msra.mxu2 %v740_v4  ;;  %v1059_v24 = vadd.f32 %v1058_v1, %v1030_v10 }
 0x1d3   : > { %v709_v11 = vpop.permute.xlu1 %708 }
 0x1d4   : > { %v707_v20 = vpop.permute.xlu0 %706  ;;  %v2444_v29 = vadd.f32 %v1087_v19, %v1059_v24  ;;  %v1034_v9 = vpop.f32.mrf.mxu1 }
 0x1d5   : > { %v739_v25 = vsel %vm738_vm7, %v707_v20, %v709_v11  ;;  %v1061_v61 = vpop.f32.mrf.mxu2 }
 0x1d6   : > { %1218 = vmatpush.bf16.msra.mxu0 %v739_v25  ;;  %1670 = vmatpush.bf16.msra.mxu2 %v739_v25  ;;  %v2488_v16 = vpop.f32.mrf.mxu0 }
 0x1d9   : > { %1142 = vmatmul.bf16.gmra.mxu1 %v1519_v27  ;;  %1219 = vmatmul.bf16.vlgmr.msra.gmra.mxu0 %v1459_v28 }
 0x1da   : > { %1234 = vmatmul.bf16.vlgmr.msra.gmra.mxu2 %v1567_v40 }
 0x1db   : > { %v768_v37 = vpop.permute.xlu1 %767 }
 0x1dc   : > { %v994_v38 = vadd.f32 %v2367_v47, %v768_v37  ;;  %v763_v43 = vpop.permute.xlu0 %762 }
 0x1dd   : > { %v991_v42 = vadd.f32 %v2345_v56, %v763_v43  ;;  %v1494_v56 = vld [vmem:[%s2520_s1 + $0x68] sm:$0xf]  ;;  %v1063_v6 = vpop.f32.mrf.mxu2 }
 0x1de   : > { %v1023_v46 = vadd.f32 %v2369_v2, %v994_v38  ;;  %v1119_v24 = vpop.f32.mrf.mxu0 }
 0x1df   : > { %v1020_v35 = vadd.f32 %v2353_v60, %v991_v42  ;;  %v1589_v60 = vld [vmem:[%s2520_s1 + $0x88] sm:$0xf0] }
 0x1e0   : > { %v1052_v50 = vadd.f32 %v2377_v8, %v1023_v46 }
 0x1e1   : > { %1205 = vmatmul.bf16.gmra.mxu3 %v1563_v45  ;;  %v1049_v47 = vadd.f32 %v2355_v62, %v1020_v35  ;;  %v1495_v62 = vor.u32 %v1589_v60, %v1494_v56 }
 0x1e3   : > { %v778_v2 = vpop.permute.xlu1 %777  ;;  %v1078_v8 = vadd.f32 %v2363_v5, %v1049_v47  ;;  %v1090_v5 = vpop.f32.mrf.mxu3 }
 0x1e4   : > { %v999_v49 = vadd.f32 %v2308_v41, %v778_v2  ;;  %v788_v55 = vpop.permute.xlu0 %787  ;;  %v1081_v41 = vadd.f32 %v2380_v15, %v1052_v50 }
 0x1e5   : > { %v1004_v54 = vadd.f32 %v2321_v34, %v788_v55  ;;  %v1107_v31 = vadd.f32 %v2419_v63, %v1078_v8 }
 0x1e6   : > { %v1028_v32 = vadd.f32 %v2406_v53, %v999_v49  ;;  %v1110_v34 = vadd.f32 %v1109_v30, %v1081_v41  ;;  %v1530_v53 = vld [vmem:[%s2520_s1 + $0xb0] sm:$0xf]  ;;  %v1121_v30 = vpop.f32.mrf.mxu0 }
 0x1e7   : > { %v1033_v3 = vadd.f32 %v1032_v59, %v1004_v54 }
 0x1e8   : > { %v1057_v17 = vadd.f32 %v2408_v23, %v1028_v32  ;;  %v1598_v23 = vld [vmem:[%s2520_s1 + $0xd0] sm:$0xf0] }
 0x1e9   : > { %1147 = vmatmul.bf16.gmra.mxu1 %v1555_v44  ;;  %1224 = vmatmul.bf16.gmra.mxu0 %v1495_v62  ;;  %v1062_v13 = vadd.f32 %v1061_v61, %v1033_v3  ;;  %v1531_v4 = vor.u32 %v1598_v23, %v1530_v53  ;;  %v1112_v62 = vadd.f32 %v2461_v22, %v2421_v51 }
 0x1ea   : > { %v1086_v14 = vadd.f32 %v2410_v12, %v1057_v17 }
 0x1eb   : > { %v1091_v57 = vadd.f32 %v1090_v5, %v1062_v13  ;;  %v1092_v15 = vpop.f32.mrf.mxu3  ;;  %v793_v50 = vpop.permute.xlu1 %792 }
 0x1ec   : > { %v2480_v0 = vadd.f32 %v1114_v58, %v1086_v14  ;;  %v1006_v48 = vadd.f32 %v2325_v39, %v793_v50 }
 0x1ed   : > { %v1120_v32 = vadd.f32 %v1119_v24, %v1091_v57 }
 0x1ee   : > { %v1035_v8 = vadd.f32 %v1034_v9, %v1006_v48 }
 0x1f0   : > { %v1064_v59 = vadd.f32 %v1063_v6, %v1035_v8 }
 0x1f2   : > { %v1093_v58 = vadd.f32 %v1092_v15, %v1064_v59 }
 0x1f9   : > { %1229 = vmatmul.bf16.gmra.mxu0 %v1531_v4 }
 0x203   : > { %v1162_v12 = vpop.f32.mrf.mxu2 }
 0x20b   : > { %v1164_v1 = vpop.f32.mrf.mxu2 }
 0x213   : > { %v1167_v7 = vpop.f32.mrf.mxu2 }
 0x21b   : > { %v1169_v10 = vpop.f32.mrf.mxu2 }
 0x223   : > { %v2490_v20 = vpop.f32.mrf.mxu2 }
 0x22b   : > { %v2492_v28 = vpop.f32.mrf.mxu2 }
 0x233   : > { %v1177_v37 = vpop.f32.mrf.mxu2 }
 0x234   : > { %v1191_v21 = vpop.f32.mrf.mxu3 }
 0x236   : > { %v1133_v11 = vpop.f32.mrf.mxu1 }
 0x237   : > { %v1134_v33 = vadd.f32 %v1133_v11, %v1105_v26 }
 0x239   : > { %v1163_v46 = vadd.f32 %v1162_v12, %v1134_v33  ;;  %v1122_v12 = vadd.f32 %v1121_v30, %v1093_v58 }
 0x23b   : > { %v1192_v52 = vadd.f32 %v1191_v21, %v1163_v46  ;;  %v1179_v2 = vpop.f32.mrf.mxu2 }
 0x23c   : > { %v1193_v18 = vpop.f32.mrf.mxu3 }
 0x23e   : > { %v1135_v19 = vpop.f32.mrf.mxu1 }
 0x23f   : > { %v1136_v43 = vadd.f32 %v1135_v19, %v1107_v31 }
 0x241   : > { %v1165_v35 = vadd.f32 %v1164_v1, %v1136_v43 }
 0x243   : > { %v1194_v56 = vadd.f32 %v1193_v18, %v1165_v35 }
 0x244   : > { %v1196_v25 = vpop.f32.mrf.mxu3 }
 0x246   : > { %v1138_v27 = vpop.f32.mrf.mxu1 }
 0x247   : > { %v1139_v39 = vadd.f32 %v1138_v27, %v1110_v34 }
 0x249   : > { %v1168_v14 = vadd.f32 %v1167_v7, %v1139_v39  ;;  %v1117_v7 = vadd.f32 %v2488_v16, %v2444_v29 }
 0x24b   : > { %v1197_v23 = vadd.f32 %v1196_v25, %v1168_v14 }
 0x24c   : > { %v1198_v40 = vpop.f32.mrf.mxu3 }
 0x24e   : > { %v1140_v36 = vpop.f32.mrf.mxu1 }
 0x24f   : > { %v1141_v3 = vadd.f32 %v1140_v36, %v1112_v62 }
 0x251   : > { %v1170_v53 = vadd.f32 %v1169_v10, %v1141_v3 }
 0x253   : > { %v1199_v1 = vadd.f32 %v1198_v40, %v1170_v53 }
 0x254   : > { %v2495_v38 = vpop.f32.mrf.mxu3 }
 0x256   : > { %v1143_v45 = vpop.f32.mrf.mxu1  ;;  %v1220_v42 = vpop.f32.mrf.mxu0 }
 0x257   : > { %v1221_v60 = vadd.f32 %v1220_v42, %v1192_v52  ;;  %v1144_v10 = vadd.f32 %v1143_v45, %v2480_v0 }
 0x259   : > { %v1240_v55 = vmax.f32 %v1221_v60, 0.0  ;;  %v1173_v33 = vadd.f32 %v2490_v20, %v1144_v10 }
 0x25b   : > { %v1202_v29 = vadd.f32 %v2495_v38, %v1173_v33 }
 0x25c   : > { %v1203_v47 = vpop.f32.mrf.mxu3 }
 0x25d   : > { %v1235_v41 = vpop.f32.mrf.mxu2 }
 0x25e   : > { %v1145_v26 = vpop.f32.mrf.mxu1  ;;  %v1222_v49 = vpop.f32.mrf.mxu0 }
 0x25f   : > { %v1223_v63 = vadd.f32 %v1222_v49, %v1194_v56  ;;  %v1146_v40 = vadd.f32 %v1145_v26, %v1117_v7 }
 0x261   : > { %v1241_v44 = vmax.f32 %v1223_v63, 0.0  ;;  %v1175_v43 = vadd.f32 %v2492_v28, %v1146_v40 }
 0x263   : > { %v1635_v54 = vpack.c.bf16 %v1241_v44, %v1240_v55  ;;  %v1204_v16 = vadd.f32 %v1203_v47, %v1175_v43 }
 0x264   : > { %v1206_v17 = vpop.f32.mrf.mxu3 }
 0x265   : > { %1636 = vst [vmem:[%s2502_s18] sm:$0xff] %v1635_v54   ;;  %v1237_v15 = vpop.f32.mrf.mxu2 }
 0x266   : > { %v1148_v61 = vpop.f32.mrf.mxu1  ;;  %v1225_v13 = vpop.f32.mrf.mxu0 }
 0x267   : > { %v1149_v5 = vadd.f32 %v1148_v61, %v1120_v32  ;;  %v1226_v9 = vadd.f32 %v1225_v13, %v1197_v23 }
 0x269   : > { %v1178_v4 = vadd.f32 %v1177_v37, %v1149_v5  ;;  %v1242_v11 = vmax.f32 %v1226_v9, 0.0 }
 0x26b   : > { %v1207_v57 = vadd.f32 %v1206_v17, %v1178_v4 }
 0x26c   : > { %v1208_v21 = vpop.f32.mrf.mxu3 }
 0x26d   : > { %v1236_v24 = vadd.f32 %v1235_v41, %v1207_v57 }
 0x26e   : > { %v1150_v51 = vpop.f32.mrf.mxu1  ;;  %v1227_v22 = vpop.f32.mrf.mxu0 }
 0x26f   : > { %v1151_v34 = vadd.f32 %v1150_v51, %v1122_v12  ;;  %v1228_v6 = vadd.f32 %v1227_v22, %v1199_v1  ;;  %v1246_v31 = vmax.f32 %v1236_v24, 0.0 }
 0x271   : > { %v1243_v18 = vmax.f32 %v1228_v6, 0.0  ;;  %v1180_v19 = vadd.f32 %v1179_v2, %v1151_v34 }
 0x273   : > { %v1640_v25 = vpack.c.bf16 %v1243_v18, %v1242_v11  ;;  %v1209_v27 = vadd.f32 %v1208_v21, %v1180_v19 }
 0x275   : > { %1652 = vst [vmem:[%s2502_s18 + $0x8] sm:$0xff] %v1640_v25   ;;  %v1238_v30 = vadd.f32 %v1237_v15, %v1209_v27 }
 0x276   : > { %v1230_v36 = vpop.f32.mrf.mxu0 }
 0x277   : > { %v1247_v37 = vmax.f32 %v1238_v30, 0.0  ;;  %v1231_v0 = vadd.f32 %v1230_v36, %v1202_v29 }
 0x279   : > { %v1650_v42 = vpack.c.bf16 %v1247_v37, %v1246_v31  ;;  %v1244_v35 = vmax.f32 %v1231_v0, 0.0 }
 0x27b   : > { %1654 = vst [vmem:[%s2502_s18 + $0x18] sm:$0xff] %v1650_v42  }
 0x27e   : > { %v1232_v45 = vpop.f32.mrf.mxu0 }
 0x27f   : > { %v1233_v46 = vadd.f32 %v1232_v45, %v1204_v16 }
 0x281   : > { %v1245_v50 = vmax.f32 %v1233_v46, 0.0 }
 0x283   : > { %v1645_v52 = vpack.c.bf16 %v1245_v50, %v1244_v35 }
 0x285   : > { %1653 = vst [vmem:[%s2502_s18 + $0x10] sm:$0xff] %v1645_v52  }
 0x286 PF: > { %s13_s12 = sadd.s32 1, %s1697_s12  }
 0x287   : > { %p10_p4 = scmp.ge.s32.totalorder %s13_s12, 4  }
 0x289   :  { %12 = sbr.rel (!%p10_p4) target bundleno = 1 (0x1), region = 62 }

// kernel: unet_forward.33
= control target key start
LH: loop header
LB: loop body
LE: loop exit
PB: predicated region body
PF: predicated region fallthrough
CT: control target
= control target key end

     0   :  { %s958_s12 = smov 0   ;;  %s1193_s0 = inlined_call_operand.vmem [shape: bf16[2,64,256], index: 0, kind: input, shape index: {}]   ;;  %s1194_s1 = inlined_call_operand.vmem [shape: bf16[128,256], index: 1, kind: input, shape index: {}]   ;;  %s1195_s2 = inlined_call_operand.vmem [shape: f32[128,1], index: 2, kind: input, shape index: {}]   ;;  %s1196_s3 = inlined_call_operand.vmem [shape: bf16[2,128,128], index: 3, kind: output, shape index: {}]  }
   0x1 LB: > { %s695_s13 = sadd.s32 4294967295, %s932_s12   ;;  %p699_p0 = scmp.ge.s32.totalorder %s932_s12, 1  ;;  %s932_s12 = sphi %s958_s12, %s13_s12  }
   0x2   : > { %p137_p1 = scmp.lt.s32.totalorder %s932_s12, 3 }
   0x4   : > { %p138_p2 = pnand %p699_p0, %p137_p1 }
   0x5   : > { %p161_p3 = scmp.lt.s32.totalorder (!%p138_p2), %s695_s13, 1  ;;  %s934_s18 = smov (!%p138_p2), 122  }
   0x6   : > { %141 = sbr.rel (%p138_p2) target bundleno = 389 (0x185), region = 32  ;;  %s935_s19 = smov (!%p138_p2), 127  }
   0x7   : > { %s936_s20 = smov (!%p138_p2), 123  }
   0xb   : > { %s1198_s13 = smov (!%p161_p3, %s695_s13), 1  ;;  %vm341_vm0 = vcmask 998400   ;;  %vm291_vm1 = vcmask 1039360   ;;  %v937_v38 = vmov 0   ;;  %v188_v41 = vld [vmem:[%s1195_s2 + $0x8] sm:$0xff]  ;;  %v187_v45 = vld [vmem:[%s1195_s2] sm:$0xff] }
   0xc   : > { %s818_s14 = sshll.u32 %s1198_s13, 6  ;;  %924 = vset.pattern.permute.xlu1 %v937_v38  ;;  %923 = vset.pattern.permute.xlu0 %v937_v38  ;;  %v190_v46 = vld [vmem:[%s1195_s2 + $0x18] sm:$0xff]  ;;  %v192_v56 = vld [vmem:[%s1195_s2 + $0x28] sm:$0xff]  ;;  %v193_v58 = vld [vmem:[%s1195_s2 + $0x30] sm:$0xff]  ;;  %vm316_vm2 = vcmask 1006592  }
   0xd   : > { %s974_s17 = scalar_lea.vmem %s1193_s0, %s818_s14  ;;  %925 = vset.pattern.permute.xlu2 %v937_v38  ;;  %v191_v38 = vld [vmem:[%s1195_s2 + $0x20] sm:$0xff]  ;;  %s1179_s23 = scalar_lea.vmem %s1196_s3, %s818_s14 }
   0xe   : > { %v746_v0 = vld [vmem:[%s974_s17 + $0x30] sm:$0xf]  ;;  %v847_v1 = vld [vmem:[%s974_s17 + $0x34] sm:$0xf0]  ;;  %v738_v3 = vld [vmem:[%s974_s17 + $0x20] sm:$0xf] }
   0xf   : > { %v747_v2 = vor.u32 %v847_v1, %v746_v0  ;;  %v845_v4 = vld [vmem:[%s974_s17 + $0x24] sm:$0xf0]  ;;  %v846_v6 = vld [vmem:[%s974_s17 + $0x34] sm:$0xf]  ;;  %v748_v7 = vld [vmem:[%s974_s17 + $0x38] sm:$0xf0] }
  0x10   : > { %v739_v5 = vor.u32 %v845_v4, %v738_v3  ;;  %v751_v8 = vor.u32 %v846_v6, %v748_v7  ;;  %v844_v9 = vld [vmem:[%s974_s17 + $0x24] sm:$0xf]  ;;  %v740_v10 = vld [vmem:[%s974_s17 + $0x28] sm:$0xf0]  ;;  %v730_v12 = vld [vmem:[%s974_s17 + $0x10] sm:$0xf] }
  0x11   : > { %337 = vrot.lane.b32.xlu1 %v747_v2, %s934_s18  ;;  %287 = vrot.lane.b32.xlu0 %v747_v2, %s935_s19  ;;  %v743_v11 = vor.u32 %v844_v9, %v740_v10  ;;  %v843_v13 = vld [vmem:[%s974_s17 + $0x14] sm:$0xf0]  ;;  %v842_v15 = vld [vmem:[%s974_s17 + $0x14] sm:$0xf] }
  0x12   : > { %283 = vrot.lane.b32.xlu2 %v739_v5, %s935_s19  ;;  %v731_v14 = vor.u32 %v843_v13, %v730_v12  ;;  %v732_v16 = vld [vmem:[%s974_s17 + $0x18] sm:$0xf0]  ;;  %v722_v18 = vld [vmem:[%s974_s17] sm:$0xf]  ;;  %v841_v19 = vld [vmem:[%s974_s17 + $0x4] sm:$0xf0] }
  0x13   : > { %v735_v17 = vor.u32 %v842_v15, %v732_v16  ;;  %v840_v20 = vld [vmem:[%s974_s17 + $0x4] sm:$0xf]  ;;  %v724_v21 = vld [vmem:[%s974_s17 + $0x8] sm:$0xf0]  ;;  %v723_v22 = vor.u32 %v841_v19, %v722_v18  ;;  %v718_v47 = vld [vmem:[%s974_s17 + $0x30] sm:$0xf] }
  0x14   : > { %v727_v23 = vor.u32 %v840_v20, %v724_v21  ;;  %v839_v48 = vld [vmem:[%s974_s17 + $0x34] sm:$0xf0]  ;;  %v714_v53 = vld [vmem:[%s974_s17 + $0x20] sm:$0xf]  ;;  %v838_v54 = vld [vmem:[%s974_s17 + $0x24] sm:$0xf0] }
  0x15   : > { %v719_v52 = vor.u32 %v839_v48, %v718_v47  ;;  %v715_v57 = vor.u32 %v838_v54, %v714_v53  ;;  %v710_v59 = vld [vmem:[%s974_s17 + $0x10] sm:$0xf]  ;;  %v837_v60 = vld [vmem:[%s974_s17 + $0x14] sm:$0xf0]  ;;  %v706_v1 = vld [vmem:[%s974_s17] sm:$0xf] }
  0x16   : > { %v711_v0 = vor.u32 %v837_v60, %v710_v59  ;;  %v821_v6 = vld [vmem:[%s1194_s1 + $0x4] sm:$0xf0]  ;;  %v195_v7 = vld [vmem:[%s1195_s2 + $0x40] sm:$0xff]  ;;  %v198_v18 = vld [vmem:[%s1195_s2 + $0x58] sm:$0xff] }
  0x17   : > { %v786_v9 = vld [vmem:[%s1194_s1 + $0x40] sm:$0xf]  ;;  %v829_v10 = vld [vmem:[%s1194_s1 + $0x44] sm:$0xf0]  ;;  %v197_v53 = vld [vmem:[%s1195_s2 + $0x50] sm:$0xff] }
  0x18   : > { %v787_v16 = vor.u32 %v829_v10, %v786_v9  ;;  %v199_v19 = vld [vmem:[%s1195_s2 + $0x60] sm:$0xff]  ;;  %v825_v48 = vld [vmem:[%s1194_s1 + $0x24] sm:$0xf0] }
  0x19   : > { %339 = vrot.lane.b32.xlu1 %v751_v8, %s934_s18  ;;  %289 = vrot.lane.b32.xlu0 %v751_v8, %s935_s19  ;;  %v770_v47 = vld [vmem:[%s1194_s1 + $0x20] sm:$0xf]  ;;  %v824_v54 = vld [vmem:[%s1194_s1 + $0x24] sm:$0xf] }
  0x1a   : > { %285 = vrot.lane.b32.xlu2 %v743_v11, %s935_s19 }
  0x21   : > { %333 = vrot.lane.b32.xlu0 %v739_v5, %s934_s18  ;;  %335 = vrot.lane.b32.xlu1 %v743_v11, %s934_s18 }
  0x22   : > { %279 = vrot.lane.b32.xlu2 %v731_v14, %s935_s19 }
  0x29   : > { %329 = vrot.lane.b32.xlu1 %v731_v14, %s934_s18  ;;  %281 = vrot.lane.b32.xlu0 %v735_v17, %s935_s19 }
  0x2a   : > { %331 = vrot.lane.b32.xlu2 %v735_v17, %s934_s18 }
  0x31   : > { %275 = vrot.lane.b32.xlu0 %v723_v22, %s935_s19  ;;  %277 = vrot.lane.b32.xlu1 %v727_v23, %s935_s19 }
  0x32   : > { %325 = vrot.lane.b32.xlu2 %v723_v22, %s934_s18 }
  0x39   : > { %327 = vrot.lane.b32.xlu0 %v727_v23, %s934_s18  ;;  %312 = vrot.lane.b32.xlu1 %v747_v2, %s936_s20  ;;  %v836_v2 = vld [vmem:[%s974_s17 + $0x4] sm:$0xf0] }
  0x3a   : > { %314 = vrot.lane.b32.xlu2 %v751_v8, %s936_s20  ;;  %v707_v8 = vor.u32 %v836_v2, %v706_v1 }
  0x41   : > { %308 = vrot.lane.b32.xlu0 %v739_v5, %s936_s20  ;;  %310 = vrot.lane.b32.xlu1 %v743_v11, %s936_s20  ;;  %v754_v5 = vld [vmem:[%s1194_s1] sm:$0xf]  ;;  %v196_v11 = vld [vmem:[%s1195_s2 + $0x48] sm:$0xff] }
  0x42   : > { %304 = vrot.lane.b32.xlu2 %v731_v14, %s936_s20  ;;  %v755_v15 = vor.u32 %v821_v6, %v754_v5  ;;  %v834_v5 = vld [vmem:[%s1194_s1 + $0x74] sm:$0xf]  ;;  %v812_v6 = vld [vmem:[%s1194_s1 + $0x78] sm:$0xf0] }
  0x49   : > { %306 = vrot.lane.b32.xlu0 %v735_v17, %s936_s20  ;;  %300 = vrot.lane.b32.xlu1 %v723_v22, %s936_s20  ;;  %v189_v17 = vld [vmem:[%s1195_s2 + $0x10] sm:$0xff] }
  0x4a   : > { %302 = vrot.lane.b32.xlu2 %v727_v23, %s936_s20 }
  0x51   : > { %357 = vperm.xlu1 %924, %v188_v41   ;;  %352 = vperm.xlu0 %923, %v187_v45   ;;  %v764_v41 = vld [vmem:[%s1194_s1 + $0x18] sm:$0xf0] }
  0x52   : > { %362 = vperm.xlu2 %925, %v189_v17  }
  0x59   : > { %367 = vperm.xlu1 %924, %v190_v46   ;;  %377 = vperm.xlu0 %923, %v192_v56   ;;  %v832_v56 = vld [vmem:[%s1194_s1 + $0x64] sm:$0xf] }
  0x5a   : > { %372 = vperm.xlu2 %925, %v191_v38  }
  0x61   : > { %382 = vperm.xlu1 %924, %v193_v58   ;;  %392 = vperm.xlu0 %923, %v195_v7   ;;  %v200_v58 = vld [vmem:[%s1195_s2 + $0x68] sm:$0xff] }
  0x69   : > { %397 = vperm.xlu1 %924, %v196_v11   ;;  %407 = vperm.xlu0 %923, %v198_v18  }
  0x6c   : > { %v284_v24 = vpop.permute.xlu2 %283 }
  0x71   : > { %412 = vperm.xlu1 %924, %v199_v19  }
  0x74   : > { %v286_v25 = vpop.permute.xlu2 %285 }
  0x75   : > { %v294_v33 = vsel %vm291_vm1, %v284_v24, %v286_v25  ;;  %v820_v24 = vld [vmem:[%s1194_s1 + $0x4] sm:$0xf]  ;;  %v756_v25 = vld [vmem:[%s1194_s1 + $0x8] sm:$0xf0] }
  0x7c   : > { %v280_v28 = vpop.permute.xlu2 %279 }
  0x83   : > { %v338_v26 = vpop.permute.xlu1 %337  ;;  %v288_v27 = vpop.permute.xlu0 %287 }
  0x84   : > { %v332_v34 = vpop.permute.xlu2 %331 }
  0x8b   : > { %v340_v29 = vpop.permute.xlu1 %339  ;;  %v290_v30 = vpop.permute.xlu0 %289 }
  0x8c   : > { %v295_v31 = vsel %vm291_vm1, %v288_v27, %v290_v30  ;;  %v345_v32 = vsel %vm341_vm0, %v338_v26, %v340_v29  ;;  %v326_v44 = vpop.permute.xlu2 %325  ;;  %v828_v26 = vld [vmem:[%s1194_s1 + $0x44] sm:$0xf]  ;;  %v788_v27 = vld [vmem:[%s1194_s1 + $0x48] sm:$0xf0]  ;;  %v759_v29 = vor.u32 %v820_v24, %v756_v25 }
  0x8d   : > { %510 = vmatpush.bf16.msra.mxu0 %v295_v31  ;;  %895 = vmatpush.bf16.msra.mxu2 %v295_v31  ;;  %v791_v30 = vor.u32 %v828_v26, %v788_v27  ;;  %v762_v31 = vld [vmem:[%s1194_s1 + $0x10] sm:$0xf] }
  0x8e   : > { %559 = vmatpush.bf16.msra.mxu1 %v345_v32  ;;  %903 = vmatpush.bf16.msra.mxu3 %v345_v32  ;;  %v823_v32 = vld [vmem:[%s1194_s1 + $0x14] sm:$0xf0] }
  0x91   : > { %511 = vmatpush.bf16.msra.mxu0 %v294_v33  ;;  %896 = vmatpush.bf16.msra.mxu2 %v294_v33  ;;  %v794_v33 = vld [vmem:[%s1194_s1 + $0x50] sm:$0xf] }
  0x93   : > { %v334_v35 = vpop.permute.xlu0 %333  ;;  %v336_v36 = vpop.permute.xlu1 %335 }
  0x94   : > { %v344_v37 = vsel %vm341_vm0, %v334_v35, %v336_v36  ;;  %v315_v55 = vpop.permute.xlu2 %314  ;;  %v202_v35 = vld [vmem:[%s1195_s2 + $0x78] sm:$0xff]  ;;  %v763_v36 = vor.u32 %v823_v32, %v762_v31 }
  0x95   : > { %560 = vmatpush.bf16.msra.mxu1 %v344_v37  ;;  %904 = vmatpush.bf16.msra.mxu3 %v344_v37 }
  0x96   : > { %427 = vperm.xlu1 %924, %v202_v35  }
  0x9b   : > { %v330_v39 = vpop.permute.xlu1 %329  ;;  %v282_v40 = vpop.permute.xlu0 %281 }
  0x9c   : > { %v293_v42 = vsel %vm291_vm1, %v280_v28, %v282_v40  ;;  %v343_v43 = vsel %vm341_vm0, %v330_v39, %v332_v34  ;;  %v305_v4 = vpop.permute.xlu2 %304  ;;  %v831_v34 = vld [vmem:[%s1194_s1 + $0x54] sm:$0xf0]  ;;  %v201_v39 = vld [vmem:[%s1195_s2 + $0x70] sm:$0xff] }
  0x9d   : > { %512 = vmatpush.bf16.msra.mxu0 %v293_v42  ;;  %897 = vmatpush.bf16.msra.mxu2 %v293_v42  ;;  %v795_v37 = vor.u32 %v831_v34, %v794_v33  ;;  %v822_v40 = vld [vmem:[%s1194_s1 + $0x14] sm:$0xf] }
  0x9e   : > { %561 = vmatpush.bf16.msra.mxu1 %v343_v43  ;;  %905 = vmatpush.bf16.msra.mxu3 %v343_v43  ;;  %v830_v42 = vld [vmem:[%s1194_s1 + $0x54] sm:$0xf]  ;;  %v796_v43 = vld [vmem:[%s1194_s1 + $0x58] sm:$0xf0]  ;;  %v767_v45 = vor.u32 %v822_v40, %v764_v41 }
  0x9f   : > { %422 = vperm.xlu0 %923, %v201_v39   ;;  %v799_v46 = vor.u32 %v830_v42, %v796_v43 }
  0xa3   : > { %v276_v49 = vpop.permute.xlu0 %275  ;;  %v278_v50 = vpop.permute.xlu1 %277 }
  0xa4   : > { %v292_v51 = vsel %vm291_vm1, %v276_v49, %v278_v50  ;;  %v303_v20 = vpop.permute.xlu2 %302  ;;  %v802_v49 = vld [vmem:[%s1194_s1 + $0x60] sm:$0xf]  ;;  %v833_v50 = vld [vmem:[%s1194_s1 + $0x64] sm:$0xf0] }
  0xa5   : > { %513 = vmatpush.bf16.msra.mxu0 %v292_v51  ;;  %898 = vmatpush.bf16.msra.mxu2 %v292_v51  ;;  %v771_v51 = vor.u32 %v825_v48, %v770_v47 }
  0xa9   : > { %514 = vmatpush.bf16.msra.mxu0 %v719_v52  ;;  %899 = vmatpush.bf16.msra.mxu2 %v719_v52  ;;  %v803_v52 = vor.u32 %v833_v50, %v802_v49 }
  0xab   : > { %v328_v61 = vpop.permute.xlu0 %327  ;;  %v313_v62 = vpop.permute.xlu1 %312 }
  0xac   : > { %v342_v63 = vsel %vm341_vm0, %v326_v44, %v328_v61  ;;  %v320_v3 = vsel %vm316_vm2, %v313_v62, %v315_v55  ;;  %v194_v44 = vld [vmem:[%s1195_s2 + $0x38] sm:$0xff]  ;;  %v772_v55 = vld [vmem:[%s1194_s1 + $0x28] sm:$0xf0]  ;;  %v778_v61 = vld [vmem:[%s1194_s1 + $0x30] sm:$0xf] }
  0xad   : > { %515 = vmatpush.bf16.msra.mxu0 %v715_v57  ;;  %900 = vmatpush.bf16.msra.mxu2 %v715_v57  ;;  %v804_v57 = vld [vmem:[%s1194_s1 + $0x68] sm:$0xf0]  ;;  %v775_v59 = vor.u32 %v824_v54, %v772_v55  ;;  %v827_v62 = vld [vmem:[%s1194_s1 + $0x34] sm:$0xf0] }
  0xae   : > { %562 = vmatpush.bf16.msra.mxu1 %v342_v63  ;;  %906 = vmatpush.bf16.msra.mxu3 %v342_v63  ;;  %v807_v60 = vor.u32 %v832_v56, %v804_v57  ;;  %v810_v63 = vld [vmem:[%s1194_s1 + $0x70] sm:$0xf]  ;;  %v779_v1 = vor.u32 %v827_v62, %v778_v61 }
  0xaf   : > { %387 = vperm.xlu2 %925, %v194_v44  }
  0xb1   : > { %516 = vmatpush.bf16.msra.mxu0 %v711_v0  ;;  %901 = vmatpush.bf16.msra.mxu2 %v711_v0  ;;  %v835_v0 = vld [vmem:[%s1194_s1 + $0x74] sm:$0xf0] }
  0xb2   : > { %563 = vmatpush.bf16.msra.mxu1 %v320_v3  ;;  %907 = vmatpush.bf16.msra.mxu3 %v320_v3  ;;  %v811_v2 = vor.u32 %v835_v0, %v810_v63  ;;  %v826_v3 = vld [vmem:[%s1194_s1 + $0x34] sm:$0xf] }
  0xb3   : > { %v309_v12 = vpop.permute.xlu0 %308  ;;  %v311_v13 = vpop.permute.xlu1 %310 }
  0xb4   : > { %v319_v14 = vsel %vm316_vm2, %v309_v12, %v311_v13 }
  0xb5   : > { %517 = vmatpush.bf16.msra.mxu0 %v707_v8  ;;  %902 = vmatpush.bf16.msra.mxu2 %v707_v8  ;;  %v815_v8 = vor.u32 %v834_v5, %v812_v6 }
  0xb6   : > { %564 = vmatpush.bf16.msra.mxu1 %v319_v14  ;;  %908 = vmatpush.bf16.msra.mxu3 %v319_v14  ;;  %v363_v14 = vpop.permute.xlu2 %362 }
  0xb7   : > { %402 = vperm.xlu2 %925, %v197_v53  }
  0xb8   : > { %518 = vmatmul.bf16.vlgmr.msra.gmra.mxu0 %v755_v15  ;;  %538 = vmatmul.bf16.vlgmr.msra.gmra.mxu2 %v787_v16 }
  0xbb   : > { %v307_v21 = vpop.permute.xlu0 %306  ;;  %v301_v22 = vpop.permute.xlu1 %300 }
  0xbc   : > { %v318_v23 = vsel %vm316_vm2, %v305_v4, %v307_v21  ;;  %v317_v28 = vsel %vm316_vm2, %v301_v22, %v303_v20  ;;  %v780_v4 = vld [vmem:[%s1194_s1 + $0x38] sm:$0xf0] }
  0xbd   : > { %565 = vmatpush.bf16.msra.mxu1 %v318_v23  ;;  %909 = vmatpush.bf16.msra.mxu3 %v318_v23  ;;  %v783_v7 = vor.u32 %v826_v3, %v780_v4 }
  0xbe   : > { %v373_v20 = vpop.permute.xlu2 %372 }
  0xbf   : > { %417 = vperm.xlu2 %925, %v200_v58  }
  0xc1   : > { %566 = vmatpush.bf16.msra.mxu1 %v317_v28  ;;  %910 = vmatpush.bf16.msra.mxu3 %v317_v28 }
  0xc3   : > { %v358_v9 = vpop.permute.xlu1 %357  ;;  %v353_v10 = vpop.permute.xlu0 %352 }
  0xc4   : > { %567 = vmatmul.bf16.vlgmr.msra.gmra.mxu1 %v759_v29  ;;  %587 = vmatmul.bf16.vlgmr.msra.gmra.mxu3 %v791_v30 }
  0xc8   : > { %523 = vmatmul.bf16.gmra.mxu0 %v763_v36  ;;  %543 = vmatmul.bf16.gmra.mxu2 %v795_v37 }
  0xcb   : > { %v368_v12 = vpop.permute.xlu1 %367  ;;  %v378_v16 = vpop.permute.xlu0 %377 }
  0xd3   : > { %v1172_v17 = vpop.permute.xlu1 %382  ;;  %v393_v25 = vpop.permute.xlu0 %392 }
  0xd4   : > { %572 = vmatmul.bf16.gmra.mxu1 %v767_v45  ;;  %592 = vmatmul.bf16.gmra.mxu3 %v799_v46 }
  0xd8   : > { %528 = vmatmul.bf16.gmra.mxu0 %v771_v51  ;;  %548 = vmatmul.bf16.gmra.mxu2 %v803_v52 }
  0xdb   : > { %v398_v29 = vpop.permute.xlu1 %397  ;;  %v408_v50 = vpop.permute.xlu0 %407 }
  0xe3   : > { %v413_v6 = vpop.permute.xlu1 %412 }
  0xe4   : > { %577 = vmatmul.bf16.gmra.mxu1 %v775_v59  ;;  %597 = vmatmul.bf16.gmra.mxu3 %v807_v60 }
  0xe8   : > { %533 = vmatmul.bf16.gmra.mxu0 %v779_v1  ;;  %553 = vmatmul.bf16.gmra.mxu2 %v811_v2 }
  0xf4   : > { %582 = vmatmul.bf16.gmra.mxu1 %v783_v7  ;;  %602 = vmatmul.bf16.gmra.mxu3 %v815_v8 }
 0x109   : > { %v388_v35 = vpop.permute.xlu2 %387 }
 0x111   : > { %v403_v46 = vpop.permute.xlu2 %402 }
 0x119   : > { %v418_v7 = vpop.permute.xlu2 %417 }
 0x135   : > { %v519_v11 = vpop.f32.mrf.mxu0 }
 0x136   : > { %v520_v22 = vadd.f32 %v519_v11, %v353_v10 }
 0x13b   : > { %v539_v13 = vpop.f32.mrf.mxu2 }
 0x13c   : > { %v540_v31 = vadd.f32 %v539_v13, %v393_v25 }
 0x13d   : > { %v521_v15 = vpop.f32.mrf.mxu0 }
 0x13e   : > { %v522_v24 = vadd.f32 %v521_v15, %v358_v9 }
 0x141   : > { %v568_v18 = vpop.f32.mrf.mxu1 }
 0x142   : > { %v569_v27 = vadd.f32 %v568_v18, %v520_v22 }
 0x143   : > { %v541_v19 = vpop.f32.mrf.mxu2 }
 0x144   : > { %v542_v34 = vadd.f32 %v541_v19, %v398_v29 }
 0x145   : > { %v524_v21 = vpop.f32.mrf.mxu0 }
 0x146   : > { %v525_v42 = vadd.f32 %v524_v21, %v363_v14 }
 0x147   : > { %v588_v23 = vpop.f32.mrf.mxu3 }
 0x148   : > { %v589_v37 = vadd.f32 %v588_v23, %v540_v31 }
 0x149   : > { %v570_v26 = vpop.f32.mrf.mxu1 }
 0x14a   : > { %v571_v28 = vadd.f32 %v570_v26, %v522_v24  ;;  %v428_v26 = vpop.permute.xlu1 %427 }
 0x14b   : > { %v544_v30 = vpop.f32.mrf.mxu2 }
 0x14c   : > { %v851_v32 = vpack.c.bf16 %v571_v28, %v569_v27  ;;  %v545_v51 = vadd.f32 %v544_v30, %v403_v46  ;;  %v423_v27 = vpop.permute.xlu0 %422 }
 0x14d   : > { %v526_v33 = vpop.f32.mrf.mxu0 }
 0x14e   : > { %852 = vst [vmem:[%s1179_s23] sm:$0xff] %v851_v32   ;;  %v527_v45 = vadd.f32 %v526_v33, %v368_v12 }
 0x14f   : > { %v590_v36 = vpop.f32.mrf.mxu3 }
 0x150   : > { %v591_v38 = vadd.f32 %v590_v36, %v542_v34 }
 0x151   : > { %v573_v39 = vpop.f32.mrf.mxu1 }
 0x152   : > { %v871_v40 = vpack.c.bf16 %v591_v38, %v589_v37  ;;  %v574_v48 = vadd.f32 %v573_v39, %v525_v42 }
 0x153   : > { %v546_v41 = vpop.f32.mrf.mxu2 }
 0x154   : > { %891 = vst [vmem:[%s1179_s23 + $0x20] sm:$0xff] %v871_v40   ;;  %v547_v54 = vadd.f32 %v546_v41, %v408_v50 }
 0x155   : > { %v529_v43 = vpop.f32.mrf.mxu0 }
 0x156   : > { %v530_v63 = vadd.f32 %v529_v43, %v373_v20 }
 0x157   : > { %v593_v44 = vpop.f32.mrf.mxu3 }
 0x158   : > { %v594_v56 = vadd.f32 %v593_v44, %v545_v51 }
 0x159   : > { %v575_v47 = vpop.f32.mrf.mxu1 }
 0x15a   : > { %v576_v49 = vadd.f32 %v575_v47, %v527_v45 }
 0x15b   : > { %v549_v53 = vpop.f32.mrf.mxu2 }
 0x15c   : > { %v856_v52 = vpack.c.bf16 %v576_v49, %v574_v48  ;;  %v550_v8 = vadd.f32 %v549_v53, %v413_v6 }
 0x15d   : > { %v531_v58 = vpop.f32.mrf.mxu0 }
 0x15e   : > { %888 = vst [vmem:[%s1179_s23 + $0x8] sm:$0xff] %v856_v52   ;;  %v532_v0 = vadd.f32 %v531_v58, %v378_v16 }
 0x15f   : > { %v595_v55 = vpop.f32.mrf.mxu3 }
 0x160   : > { %v596_v57 = vadd.f32 %v595_v55, %v547_v54 }
 0x161   : > { %v578_v59 = vpop.f32.mrf.mxu1 }
 0x162   : > { %v876_v60 = vpack.c.bf16 %v596_v57, %v594_v56  ;;  %v579_v2 = vadd.f32 %v578_v59, %v530_v63 }
 0x163   : > { %v551_v61 = vpop.f32.mrf.mxu2 }
 0x164   : > { %892 = vst [vmem:[%s1179_s23 + $0x28] sm:$0xff] %v876_v60   ;;  %v552_v9 = vadd.f32 %v551_v61, %v418_v7 }
 0x165   : > { %v534_v4 = vpop.f32.mrf.mxu0 }
 0x166   : > { %v535_v19 = vadd.f32 %v534_v4, %v1172_v17 }
 0x167   : > { %v598_v62 = vpop.f32.mrf.mxu3 }
 0x168   : > { %v599_v11 = vadd.f32 %v598_v62, %v550_v8 }
 0x169   : > { %v580_v1 = vpop.f32.mrf.mxu1 }
 0x16a   : > { %v581_v3 = vadd.f32 %v580_v1, %v532_v0 }
 0x16b   : > { %v554_v13 = vpop.f32.mrf.mxu2 }
 0x16c   : > { %v861_v5 = vpack.c.bf16 %v581_v3, %v579_v2  ;;  %v555_v28 = vadd.f32 %v554_v13, %v423_v27 }
 0x16d   : > { %v536_v16 = vpop.f32.mrf.mxu0 }
 0x16e   : > { %889 = vst [vmem:[%s1179_s23 + $0x10] sm:$0xff] %v861_v5   ;;  %v537_v20 = vadd.f32 %v536_v16, %v388_v35 }
 0x16f   : > { %v600_v10 = vpop.f32.mrf.mxu3 }
 0x170   : > { %v601_v12 = vadd.f32 %v600_v10, %v552_v9 }
 0x171   : > { %v583_v14 = vpop.f32.mrf.mxu1 }
 0x172   : > { %v881_v15 = vpack.c.bf16 %v601_v12, %v599_v11  ;;  %v584_v22 = vadd.f32 %v583_v14, %v535_v19 }
 0x173   : > { %v556_v24 = vpop.f32.mrf.mxu2 }
 0x174   : > { %893 = vst [vmem:[%s1179_s23 + $0x30] sm:$0xff] %v881_v15   ;;  %v557_v29 = vadd.f32 %v556_v24, %v428_v26 }
 0x177   : > { %v603_v18 = vpop.f32.mrf.mxu3 }
 0x178   : > { %v604_v31 = vadd.f32 %v603_v18, %v555_v28 }
 0x179   : > { %v585_v21 = vpop.f32.mrf.mxu1 }
 0x17a   : > { %v586_v23 = vadd.f32 %v585_v21, %v537_v20 }
 0x17c   : > { %v866_v25 = vpack.c.bf16 %v586_v23, %v584_v22 }
 0x17e   : > { %890 = vst [vmem:[%s1179_s23 + $0x18] sm:$0xff] %v866_v25  }
 0x17f   : > { %v605_v30 = vpop.f32.mrf.mxu3 }
 0x180   : > { %v606_v32 = vadd.f32 %v605_v30, %v557_v29 }
 0x182   : > { %v886_v33 = vpack.c.bf16 %v606_v32, %v604_v31 }
 0x184   : > { %894 = vst [vmem:[%s1179_s23 + $0x38] sm:$0xff] %v886_v33  }
 0x185 PF: > { %s13_s12 = sadd.s32 1, %s932_s12  }
 0x186   : > { %p10_p4 = scmp.ge.s32.totalorder %s13_s12, 4  }
 0x188   :  { %12 = sbr.rel (!%p10_p4) target bundleno = 1 (0x1), region = 62 }

// kernel: unet_forward.34
= control target key start
LH: loop header
LB: loop body
LE: loop exit
PB: predicated region body
PF: predicated region fallthrough
CT: control target
= control target key end

     0   :  { %s896_s12 = smov 0   ;;  %s1167_s0 = inlined_call_operand.vmem [shape: bf16[2,64,256], index: 0, kind: input, shape index: {}]   ;;  %s1168_s1 = inlined_call_operand.vmem [shape: bf16[32,576], index: 1, kind: input, shape index: {}]   ;;  %s1169_s2 = inlined_call_operand.vmem [shape: f32[32,1], index: 2, kind: input, shape index: {}]   ;;  %s1170_s3 = inlined_call_operand.vmem [shape: bf16[2,32,128], index: 3, kind: output, shape index: {}]  }
   0x1 LB: > { %s699_s13 = sadd.s32 4294967295, %s865_s12   ;;  %p703_p0 = scmp.ge.s32.totalorder %s865_s12, 1  ;;  %s865_s12 = sphi %s896_s12, %s13_s12  }
   0x2   : > { %p137_p1 = scmp.lt.s32.totalorder %s865_s12, 3 }
   0x4   : > { %p138_p2 = pnand %p703_p0, %p137_p1 }
   0x5   : > { %p161_p3 = scmp.lt.s32.totalorder (!%p138_p2), %s699_s13, 1  ;;  %s867_s18 = smov (!%p138_p2), 118  }
   0x6   : > { %141 = sbr.rel (%p138_p2) target bundleno = 446 (0x1be), region = 32  ;;  %s868_s19 = smov (!%p138_p2), 127  }
   0x7   : > { %s869_s20 = smov (!%p138_p2), 116   ;;  %s870_s21 = smov (!%p138_p2), 107  }
   0x8   : > { %s871_s22 = smov (!%p138_p2), 126   ;;  %s872_s23 = smov (!%p138_p2), 117  }
   0x9   : > { %s873_s24 = smov (!%p138_p2), 108   ;;  %s874_s25 = smov (!%p138_p2), 106  }
   0xb   : > { %s1172_s13 = smov (!%p161_p3, %s699_s13), 1  ;;  %vm326_vm0 = vcmask 965632   ;;  %vm276_vm1 = vcmask 1039360   ;;  %vm376_vm2 = vcmask 949248   ;;  %vm426_vm3 = vcmask 875520  }
   0xc   : > { %s800_s14 = sshll.u32 %s1172_s13, 6  ;;  %vm301_vm4 = vcmask 1031168   ;;  %vm351_vm5 = vcmask 957440   ;;  %vm401_vm6 = vcmask 883712   ;;  %vm451_vm7 = vcmask 867328  }
   0xd   : > { %s910_s17 = scalar_lea.vmem %s1167_s0, %s800_s14  ;;  %vm530_vm8 = vcmask 523264  }
   0xe   : > { %v750_v0 = vld [vmem:[%s910_s17 + $0x30] sm:$0xf]  ;;  %v823_v1 = vld [vmem:[%s910_s17 + $0x34] sm:$0xf0]  ;;  %v742_v3 = vld [vmem:[%s910_s17 + $0x20] sm:$0xf] }
   0xf   : > { %v914_v2 = vor.u32 %v823_v1, %v750_v0  ;;  %v821_v4 = vld [vmem:[%s910_s17 + $0x24] sm:$0xf0]  ;;  %v822_v6 = vld [vmem:[%s910_s17 + $0x34] sm:$0xf]  ;;  %v752_v7 = vld [vmem:[%s910_s17 + $0x38] sm:$0xf0] }
  0x10   : > { %v918_v5 = vor.u32 %v821_v4, %v742_v3  ;;  %v928_v8 = vor.u32 %v822_v6, %v752_v7  ;;  %v820_v9 = vld [vmem:[%s910_s17 + $0x24] sm:$0xf]  ;;  %v744_v10 = vld [vmem:[%s910_s17 + $0x28] sm:$0xf0]  ;;  %v734_v12 = vld [vmem:[%s910_s17 + $0x10] sm:$0xf] }
  0x11   : > { %322 = vrot.lane.b32.xlu1 %v914_v2, %s867_s18  ;;  %272 = vrot.lane.b32.xlu0 %v914_v2, %s868_s19  ;;  %v932_v11 = vor.u32 %v820_v9, %v744_v10  ;;  %v819_v13 = vld [vmem:[%s910_s17 + $0x14] sm:$0xf0]  ;;  %v818_v15 = vld [vmem:[%s910_s17 + $0x14] sm:$0xf] }
  0x12   : > { %268 = vrot.lane.b32.xlu2 %v918_v5, %s868_s19  ;;  %v948_v14 = vor.u32 %v819_v13, %v734_v12  ;;  %v736_v16 = vld [vmem:[%s910_s17 + $0x18] sm:$0xf0]  ;;  %v726_v18 = vld [vmem:[%s910_s17] sm:$0xf]  ;;  %v817_v19 = vld [vmem:[%s910_s17 + $0x4] sm:$0xf0] }
  0x13   : > { %v952_v17 = vor.u32 %v818_v15, %v736_v16  ;;  %v816_v20 = vld [vmem:[%s910_s17 + $0x4] sm:$0xf]  ;;  %v728_v21 = vld [vmem:[%s910_s17 + $0x8] sm:$0xf0]  ;;  %v974_v22 = vor.u32 %v817_v19, %v726_v18  ;;  %v722_v10 = vld [vmem:[%s910_s17 + $0x30] sm:$0xf] }
  0x14   : > { %v976_v23 = vor.u32 %v816_v20, %v728_v21  ;;  %v814_v15 = vld [vmem:[%s910_s17 + $0x24] sm:$0xf0]  ;;  %v714_v21 = vld [vmem:[%s910_s17 + $0x10] sm:$0xf] }
  0x19   : > { %324 = vrot.lane.b32.xlu1 %v928_v8, %s867_s18  ;;  %274 = vrot.lane.b32.xlu0 %v928_v8, %s868_s19 }
  0x1a   : > { %270 = vrot.lane.b32.xlu2 %v932_v11, %s868_s19 }
  0x21   : > { %318 = vrot.lane.b32.xlu0 %v918_v5, %s867_s18  ;;  %320 = vrot.lane.b32.xlu1 %v932_v11, %s867_s18 }
  0x22   : > { %372 = vrot.lane.b32.xlu2 %v914_v2, %s869_s20 }
  0x29   : > { %374 = vrot.lane.b32.xlu0 %v928_v8, %s869_s20  ;;  %264 = vrot.lane.b32.xlu1 %v948_v14, %s868_s19 }
  0x2a   : > { %266 = vrot.lane.b32.xlu2 %v952_v17, %s868_s19 }
  0x31   : > { %314 = vrot.lane.b32.xlu0 %v948_v14, %s867_s18  ;;  %316 = vrot.lane.b32.xlu1 %v952_v17, %s867_s18 }
  0x32   : > { %422 = vrot.lane.b32.xlu2 %v914_v2, %s870_s21 }
  0x39   : > { %424 = vrot.lane.b32.xlu0 %v928_v8, %s870_s21  ;;  %368 = vrot.lane.b32.xlu1 %v918_v5, %s869_s20 }
  0x3a   : > { %370 = vrot.lane.b32.xlu2 %v932_v11, %s869_s20 }
  0x41   : > { %260 = vrot.lane.b32.xlu0 %v974_v22, %s868_s19  ;;  %262 = vrot.lane.b32.xlu1 %v976_v23, %s868_s19 }
  0x42   : > { %310 = vrot.lane.b32.xlu2 %v974_v22, %s867_s18 }
  0x49   : > { %312 = vrot.lane.b32.xlu0 %v976_v23, %s867_s18  ;;  %418 = vrot.lane.b32.xlu1 %v918_v5, %s870_s21 }
  0x4a   : > { %420 = vrot.lane.b32.xlu2 %v932_v11, %s870_s21 }
  0x51   : > { %364 = vrot.lane.b32.xlu0 %v948_v14, %s869_s20  ;;  %366 = vrot.lane.b32.xlu1 %v952_v17, %s869_s20 }
  0x52   : > { %297 = vrot.lane.b32.xlu2 %v914_v2, %s871_s22 }
  0x59   : > { %299 = vrot.lane.b32.xlu0 %v928_v8, %s871_s22  ;;  %414 = vrot.lane.b32.xlu1 %v948_v14, %s870_s21 }
  0x5a   : > { %416 = vrot.lane.b32.xlu2 %v952_v17, %s870_s21 }
  0x61   : > { %360 = vrot.lane.b32.xlu0 %v974_v22, %s869_s20  ;;  %362 = vrot.lane.b32.xlu1 %v976_v23, %s869_s20 }
  0x62   : > { %293 = vrot.lane.b32.xlu2 %v918_v5, %s871_s22 }
  0x69   : > { %295 = vrot.lane.b32.xlu0 %v932_v11, %s871_s22  ;;  %410 = vrot.lane.b32.xlu1 %v974_v22, %s870_s21 }
  0x6a   : > { %412 = vrot.lane.b32.xlu2 %v976_v23, %s870_s21 }
  0x6c   : > { %v269_v24 = vpop.permute.xlu2 %268 }
  0x71   : > { %347 = vrot.lane.b32.xlu0 %v914_v2, %s872_s23  ;;  %349 = vrot.lane.b32.xlu1 %v928_v8, %s872_s23 }
  0x72   : > { %289 = vrot.lane.b32.xlu2 %v948_v14, %s871_s22 }
  0x74   : > { %v271_v25 = vpop.permute.xlu2 %270 }
  0x75   : > { %v279_v35 = vsel %vm276_vm1, %v269_v24, %v271_v25  ;;  %v710_v25 = vld [vmem:[%s910_s17] sm:$0xf] }
  0x79   : > { %291 = vrot.lane.b32.xlu0 %v952_v17, %s871_s22  ;;  %397 = vrot.lane.b32.xlu1 %v914_v2, %s873_s24 }
  0x7a   : > { %399 = vrot.lane.b32.xlu2 %v928_v8, %s873_s24 }
  0x7c   : > { %v373_v26 = vpop.permute.xlu2 %372 }
  0x81   : > { %343 = vrot.lane.b32.xlu0 %v918_v5, %s872_s23  ;;  %345 = vrot.lane.b32.xlu1 %v932_v11, %s872_s23 }
  0x82   : > { %285 = vrot.lane.b32.xlu2 %v974_v22, %s871_s22 }
  0x83   : > { %v323_v27 = vpop.permute.xlu1 %322  ;;  %v273_v28 = vpop.permute.xlu0 %272 }
  0x84   : > { %v267_v29 = vpop.permute.xlu2 %266 }
  0x89   : > { %287 = vrot.lane.b32.xlu0 %v976_v23, %s871_s22  ;;  %393 = vrot.lane.b32.xlu1 %v918_v5, %s873_s24 }
  0x8a   : > { %395 = vrot.lane.b32.xlu2 %v932_v11, %s873_s24 }
  0x8b   : > { %v325_v30 = vpop.permute.xlu1 %324  ;;  %v275_v31 = vpop.permute.xlu0 %274 }
  0x8c   : > { %v280_v32 = vsel %vm276_vm1, %v273_v28, %v275_v31  ;;  %v330_v33 = vsel %vm326_vm0, %v323_v27, %v325_v30  ;;  %v423_v34 = vpop.permute.xlu2 %422  ;;  %v758_v31 = vld [vmem:[%s1168_s1] sm:$0xf] }
  0x8d   : > { %537 = vmatpush.bf16.msra.mxu0 %v280_v32  ;;  %556 = vmatpush.bf16.msra.mxu1 %v330_v33  ;;  %v804_v32 = vld [vmem:[%s1168_s1 + $0x10] sm:$0xf0] }
  0x8e   : > { %v759_v33 = vor.u32 %v804_v32, %v758_v31  ;;  %v806_v32 = vld [vmem:[%s1168_s1 + $0x20] sm:$0xf0] }
  0x91   : > { %538 = vmatpush.bf16.msra.mxu0 %v279_v35  ;;  %339 = vrot.lane.b32.xlu0 %v948_v14, %s872_s23 }
  0x92   : > { %341 = vrot.lane.b32.xlu1 %v952_v17, %s872_s23  ;;  %389 = vrot.lane.b32.xlu2 %v948_v14, %s873_s24 }
  0x93   : > { %v319_v36 = vpop.permute.xlu0 %318  ;;  %v321_v37 = vpop.permute.xlu1 %320 }
  0x94   : > { %v329_v38 = vsel %vm326_vm0, %v319_v36, %v321_v37  ;;  %v371_v39 = vpop.permute.xlu2 %370 }
  0x95   : > { %557 = vmatpush.bf16.msra.mxu1 %v329_v38 }
  0x99   : > { %391 = vrot.lane.b32.xlu0 %v952_v17, %s873_s24 }
  0x9a   : > { %335 = vrot.lane.b32.xlu1 %v974_v22, %s872_s23  ;;  %337 = vrot.lane.b32.xlu2 %v976_v23, %s872_s23 }
  0x9b   : > { %v375_v40 = vpop.permute.xlu0 %374  ;;  %v265_v41 = vpop.permute.xlu1 %264 }
  0x9c   : > { %v380_v42 = vsel %vm376_vm2, %v373_v26, %v375_v40  ;;  %v278_v43 = vsel %vm276_vm1, %v265_v41, %v267_v29  ;;  %v311_v44 = vpop.permute.xlu2 %310  ;;  %v812_v26 = vld [vmem:[%s910_s17 + $0x4] sm:$0xf0] }
  0x9d   : > { %575 = vmatpush.bf16.msra.mxu2 %v380_v42  ;;  %539 = vmatpush.bf16.msra.mxu0 %v278_v43  ;;  %v711_v27 = vor.u32 %v812_v26, %v710_v25  ;;  %v778_v42 = vld [vmem:[%s1168_s1 + $0x28] sm:$0xf]  ;;  %v809_v43 = vld [vmem:[%s1168_s1 + $0x38] sm:$0xf0] }
  0x9e   : > { %v788_v25 = vld [vmem:[%s1168_s1 + $0x44] sm:$0xf0] }
  0xa1   : > { %385 = vrot.lane.b32.xlu0 %v974_v22, %s873_s24 }
  0xa2   : > { %387 = vrot.lane.b32.xlu1 %v976_v23, %s873_s24  ;;  %447 = vrot.lane.b32.xlu2 %v914_v2, %s874_s25  ;;  %s801_s24 = sshll.u32 %s1172_s13, 4 }
  0xa3   : > { %v315_v45 = vpop.permute.xlu0 %314  ;;  %v317_v46 = vpop.permute.xlu1 %316  ;;  %s170_s27 = scalar_lea.vmem %s1170_s3, %s801_s24 }
  0xa4   : > { %v328_v47 = vsel %vm326_vm0, %v315_v45, %v317_v46  ;;  %v421_v48 = vpop.permute.xlu2 %420  ;;  %v779_v45 = vor.u32 %v809_v43, %v778_v42  ;;  %v802_v46 = vld [vmem:[%s1168_s1 + $0x4] sm:$0xf] }
  0xa5   : > { %558 = vmatpush.bf16.msra.mxu1 %v328_v47  ;;  %v760_v47 = vld [vmem:[%s1168_s1 + $0x14] sm:$0xf0] }
  0xa9   : > { %449 = vrot.lane.b32.xlu0 %v928_v8, %s874_s25 }
  0xaa   : > { %443 = vrot.lane.b32.xlu1 %v918_v5, %s874_s25  ;;  %445 = vrot.lane.b32.xlu2 %v932_v11, %s874_s25  ;;  %v815_v11 = vld [vmem:[%s910_s17 + $0x34] sm:$0xf0] }
  0xab   : > { %v425_v49 = vpop.permute.xlu0 %424  ;;  %v369_v50 = vpop.permute.xlu1 %368  ;;  %v723_v13 = vor.u32 %v815_v11, %v722_v10  ;;  %v803_v10 = vld [vmem:[%s1168_s1 + $0xc] sm:$0xf]  ;;  %v768_v11 = vld [vmem:[%s1168_s1 + $0x1c] sm:$0xf0] }
  0xac   : > { %v430_v51 = vsel %vm426_vm3, %v423_v34, %v425_v49  ;;  %v379_v52 = vsel %vm376_vm2, %v369_v50, %v371_v39  ;;  %v298_v53 = vpop.permute.xlu2 %297  ;;  %v184_v49 = vld [vmem:[%s1169_s2] sm:$0xff] }
  0xad   : > { %594 = vmatpush.bf16.msra.mxu3 %v430_v51  ;;  %576 = vmatpush.bf16.msra.mxu2 %v379_v52 }
  0xb1   : > { %439 = vrot.lane.b32.xlu0 %v948_v14, %s874_s25  ;;  %v718_v14 = vld [vmem:[%s910_s17 + $0x20] sm:$0xf] }
  0xb2   : > { %441 = vrot.lane.b32.xlu1 %v952_v17, %s874_s25  ;;  %435 = vrot.lane.b32.xlu2 %v974_v22, %s874_s25  ;;  %v719_v16 = vor.u32 %v814_v15, %v718_v14  ;;  %v813_v22 = vld [vmem:[%s910_s17 + $0x14] sm:$0xf0]  ;;  %v771_v15 = vor.u32 %v803_v10, %v768_v11 }
  0xb3   : > { %v261_v54 = vpop.permute.xlu0 %260  ;;  %v263_v55 = vpop.permute.xlu1 %262 }
  0xb4   : > { %v277_v56 = vsel %vm276_vm1, %v261_v54, %v263_v55  ;;  %v417_v57 = vpop.permute.xlu2 %416  ;;  %v763_v54 = vor.u32 %v802_v46, %v760_v47 }
  0xb5   : > { %540 = vmatpush.bf16.msra.mxu0 %v277_v56 }
  0xb9   : > { %437 = vrot.lane.b32.xlu0 %v976_v23, %s874_s25  ;;  %541 = vmatpush.bf16.msra.mxu0 %v723_v13  ;;  %v715_v23 = vor.u32 %v813_v22, %v714_v21 }
  0xbb   : > { %v313_v58 = vpop.permute.xlu0 %312  ;;  %v419_v59 = vpop.permute.xlu1 %418 }
  0xbc   : > { %v327_v60 = vsel %vm326_vm0, %v311_v44, %v313_v58  ;;  %v429_v61 = vsel %vm426_vm3, %v419_v59, %v421_v48  ;;  %v294_v62 = vpop.permute.xlu2 %293  ;;  %v875_v48 = vmov 0   ;;  %v807_v59 = vld [vmem:[%s1168_s1 + $0x2c] sm:$0xf] }
  0xbd   : > { %559 = vmatpush.bf16.msra.mxu1 %v327_v60  ;;  %595 = vmatpush.bf16.msra.mxu3 %v429_v61  ;;  %v780_v61 = vld [vmem:[%s1168_s1 + $0x3c] sm:$0xf0] }
  0xbe   : > { %542 = vmatpush.bf16.msra.mxu0 %v719_v16  ;;  %856 = vset.pattern.permute.xlu1 %v875_v48  ;;  %v786_v16 = vld [vmem:[%s1168_s1 + $0x30] sm:$0xf] }
  0xbf   : > { %858 = vset.pattern.permute.xlu0 %v875_v48  ;;  %462 = vperm.xlu1 %856, %v184_v49  }
  0xc0   : > { %857 = vset.pattern.permute.xlu2 %v875_v48 }
  0xc2   : > { %543 = vmatpush.bf16.msra.mxu0 %v715_v23 }
  0xc3   : > { %v365_v63 = vpop.permute.xlu0 %364  ;;  %v367_v0 = vpop.permute.xlu1 %366 }
  0xc4   : > { %v378_v1 = vsel %vm376_vm2, %v365_v63, %v367_v0  ;;  %v413_v6 = vpop.permute.xlu2 %412  ;;  %v187_v63 = vld [vmem:[%s1169_s2 + $0x18] sm:$0xff]  ;;  %v766_v0 = vld [vmem:[%s1168_s1 + $0x8] sm:$0xf] }
  0xc5   : > { %577 = vmatpush.bf16.msra.mxu2 %v378_v1  ;;  %v805_v1 = vld [vmem:[%s1168_s1 + $0x18] sm:$0xf0] }
  0xc6   : > { %544 = vmatpush.bf16.msra.mxu0 %v711_v27 }
  0xc7   : > { %477 = vperm.xlu1 %856, %v187_v63  }
  0xc9   : > { %545 = vmatmul.bf16.vlgmr.msra.gmra.mxu0 %v759_v33  ;;  %v794_v33 = vld [vmem:[%s1168_s1 + $0x38] sm:$0xf] }
  0xcb   : > { %v300_v2 = vpop.permute.xlu0 %299  ;;  %v415_v3 = vpop.permute.xlu1 %414 }
  0xcc   : > { %v305_v4 = vsel %vm301_vm4, %v298_v53, %v300_v2  ;;  %v428_v5 = vsel %vm426_vm3, %v415_v3, %v417_v57  ;;  %v290_v12 = vpop.permute.xlu2 %289 }
  0xcd   : > { %560 = vmatpush.bf16.msra.mxu1 %v305_v4  ;;  %596 = vmatpush.bf16.msra.mxu3 %v428_v5  ;;  %v783_v5 = vor.u32 %v807_v59, %v780_v61 }
  0xd3   : > { %v361_v7 = vpop.permute.xlu0 %360  ;;  %v363_v8 = vpop.permute.xlu1 %362 }
  0xd4   : > { %v377_v9 = vsel %vm376_vm2, %v361_v7, %v363_v8  ;;  %v400_v24 = vpop.permute.xlu2 %399  ;;  %v767_v7 = vor.u32 %v805_v1, %v766_v0  ;;  %v185_v8 = vld [vmem:[%s1169_s2 + $0x8] sm:$0xff] }
  0xd5   : > { %578 = vmatpush.bf16.msra.mxu2 %v377_v9  ;;  %467 = vperm.xlu2 %857, %v185_v8  }
  0xd9   : > { %550 = vmatmul.bf16.gmra.mxu0 %v779_v45 }
  0xdb   : > { %v296_v17 = vpop.permute.xlu0 %295  ;;  %v411_v18 = vpop.permute.xlu1 %410 }
  0xdc   : > { %v304_v19 = vsel %vm301_vm4, %v294_v62, %v296_v17  ;;  %v427_v20 = vsel %vm426_vm3, %v411_v18, %v413_v6  ;;  %v286_v34 = vpop.permute.xlu2 %285  ;;  %v186_v62 = vld [vmem:[%s1169_s2 + $0x10] sm:$0xff]  ;;  %v810_v17 = vld [vmem:[%s1168_s1 + $0x40] sm:$0xf0] }
  0xdd   : > { %561 = vmatpush.bf16.msra.mxu1 %v304_v19  ;;  %597 = vmatpush.bf16.msra.mxu3 %v427_v20  ;;  %v787_v22 = vor.u32 %v810_v17, %v786_v16 }
  0xde   : > { %472 = vperm.xlu0 %858, %v186_v62  }
  0xe3   : > { %v348_v28 = vpop.permute.xlu0 %347  ;;  %v350_v29 = vpop.permute.xlu1 %349 }
  0xe4   : > { %v355_v30 = vsel %vm351_vm5, %v348_v28, %v350_v29  ;;  %v396_v44 = vpop.permute.xlu2 %395 }
  0xe5   : > { %579 = vmatpush.bf16.msra.mxu2 %v355_v30  ;;  %v774_v30 = vld [vmem:[%s1168_s1 + $0x10] sm:$0xf] }
  0xeb   : > { %v292_v35 = vpop.permute.xlu0 %291  ;;  %v398_v36 = vpop.permute.xlu1 %397 }
  0xec   : > { %v303_v37 = vsel %vm301_vm4, %v290_v12, %v292_v35  ;;  %v405_v38 = vsel %vm401_vm6, %v398_v36, %v400_v24  ;;  %v390_v55 = vpop.permute.xlu2 %389  ;;  %v808_v24 = vld [vmem:[%s1168_s1 + $0x34] sm:$0xf] }
  0xed   : > { %562 = vmatpush.bf16.msra.mxu1 %v303_v37  ;;  %598 = vmatpush.bf16.msra.mxu3 %v405_v38  ;;  %v791_v28 = vor.u32 %v808_v24, %v788_v25  ;;  %v775_v37 = vor.u32 %v806_v32, %v774_v30 }
  0xf3   : > { %v344_v39 = vpop.permute.xlu0 %343  ;;  %v346_v40 = vpop.permute.xlu1 %345 }
  0xf4   : > { %v354_v41 = vsel %vm351_vm5, %v344_v39, %v346_v40  ;;  %v338_v60 = vpop.permute.xlu2 %337 }
  0xf5   : > { %580 = vmatpush.bf16.msra.mxu2 %v354_v41 }
  0xfb   : > { %v288_v50 = vpop.permute.xlu0 %287  ;;  %v394_v51 = vpop.permute.xlu1 %393 }
  0xfc   : > { %v302_v52 = vsel %vm301_vm4, %v286_v34, %v288_v50  ;;  %v404_v53 = vsel %vm401_vm6, %v394_v51, %v396_v44  ;;  %v448_v9 = vpop.permute.xlu2 %447  ;;  %v811_v34 = vld [vmem:[%s1168_s1 + $0x48] sm:$0xf0] }
  0xfd   : > { %563 = vmatpush.bf16.msra.mxu1 %v302_v52  ;;  %599 = vmatpush.bf16.msra.mxu3 %v404_v53  ;;  %v795_v38 = vor.u32 %v811_v34, %v794_v33 }
 0x100   : > { %564 = vmatmul.bf16.vlgmr.msra.gmra.mxu1 %v763_v54 }
 0x103   : > { %v340_v56 = vpop.permute.xlu0 %339 }
 0x104   : > { %v342_v57 = vpop.permute.xlu1 %341  ;;  %v446_v19 = vpop.permute.xlu2 %445 }
 0x105   : > { %v353_v58 = vsel %vm351_vm5, %v340_v56, %v342_v57 }
 0x106   : > { %581 = vmatpush.bf16.msra.mxu2 %v353_v58 }
 0x10b   : > { %v392_v2 = vpop.permute.xlu0 %391 }
 0x10c   : > { %v336_v3 = vpop.permute.xlu1 %335  ;;  %v403_v4 = vsel %vm401_vm6, %v390_v55, %v392_v2  ;;  %v436_v31 = vpop.permute.xlu2 %435 }
 0x10d   : > { %600 = vmatpush.bf16.msra.mxu3 %v403_v4  ;;  %v352_v6 = vsel %vm351_vm5, %v336_v3, %v338_v60 }
 0x10e   : > { %582 = vmatpush.bf16.msra.mxu2 %v352_v6 }
 0x110   : > { %569 = vmatmul.bf16.gmra.mxu1 %v783_v5 }
 0x111   : > { %583 = vmatmul.bf16.vlgmr.msra.gmra.mxu2 %v767_v7 }
 0x113   : > { %v386_v12 = vpop.permute.xlu0 %385 }
 0x114   : > { %v388_v13 = vpop.permute.xlu1 %387 }
 0x115   : > { %v402_v14 = vsel %vm401_vm6, %v386_v12, %v388_v13 }
 0x116   : > { %601 = vmatpush.bf16.msra.mxu3 %v402_v14 }
 0x119   : > { %602 = vmatmul.bf16.vlgmr.msra.gmra.mxu3 %v771_v15 }
 0x11b   : > { %v450_v18 = vpop.permute.xlu0 %449 }
 0x11c   : > { %v455_v20 = vsel %vm451_vm7, %v448_v9, %v450_v18  ;;  %v444_v21 = vpop.permute.xlu1 %443 }
 0x11d   : > { %617 = vmatpush.bf16.msrb.mxu0 %v455_v20  ;;  %835 = vmatpush.bf16.msrb.mxu1 %v455_v20  ;;  %v454_v23 = vsel %vm451_vm7, %v444_v21, %v446_v19 }
 0x121   : > { %588 = vmatmul.bf16.gmra.mxu2 %v787_v22  ;;  %618 = vmatpush.bf16.msrb.mxu0 %v454_v23 }
 0x122   : > { %836 = vmatpush.bf16.msrb.mxu1 %v454_v23 }
 0x123   : > { %v440_v26 = vpop.permute.xlu0 %439 }
 0x124   : > { %v442_v27 = vpop.permute.xlu1 %441 }
 0x125   : > { %v453_v29 = vsel %vm451_vm7, %v440_v26, %v442_v27 }
 0x126   : > { %619 = vmatpush.bf16.msrb.mxu0 %v453_v29  ;;  %837 = vmatpush.bf16.msrb.mxu1 %v453_v29 }
 0x129   : > { %607 = vmatmul.bf16.gmra.mxu3 %v791_v28 }
 0x12b   : > { %v438_v35 = vpop.permute.xlu0 %437 }
 0x12c   : > { %v452_v36 = vsel %vm451_vm7, %v436_v31, %v438_v35 }
 0x12d   : > { %620 = vmatpush.bf16.msrb.mxu0 %v452_v36  ;;  %838 = vmatpush.bf16.msrb.mxu1 %v452_v36 }
 0x12f   : > { %v468_v54 = vpop.permute.xlu2 %467 }
 0x130   : > { %796 = vmatmul.msk.bf16.vlgmr.msrb.gmra.mxu0 %vm530_vm8, %v775_v37  ;;  %797 = vmatmul.msk.bf16.vlgmr.msrb.gmra.mxu1 %vm530_vm8, %v795_v38 }
 0x131   : > { %v463_v48 = vpop.permute.xlu1 %462 }
 0x139   : > { %v478_v57 = vpop.permute.xlu1 %477 }
 0x146   : > { %v546_v39 = vpop.f32.mrf.mxu0 }
 0x147   : > { %v547_v56 = vadd.f32 %v546_v39, %v463_v48 }
 0x14e   : > { %v548_v41 = vpop.f32.mrf.mxu0 }
 0x14f   : > { %v549_v58 = vadd.f32 %v548_v41, %v468_v54 }
 0x150   : > { %v473_v53 = vpop.permute.xlu0 %472 }
 0x156   : > { %v551_v44 = vpop.f32.mrf.mxu0 }
 0x157   : > { %v552_v55 = vadd.f32 %v551_v44, %v473_v53 }
 0x15e   : > { %v553_v50 = vpop.f32.mrf.mxu0 }
 0x15f   : > { %v554_v61 = vadd.f32 %v553_v50, %v478_v57 }
 0x17d   : > { %v565_v40 = vpop.f32.mrf.mxu1 }
 0x17e   : > { %v566_v0 = vadd.f32 %v565_v40, %v547_v56 }
 0x185   : > { %v567_v42 = vpop.f32.mrf.mxu1 }
 0x186   : > { %v568_v3 = vadd.f32 %v567_v42, %v549_v58 }
 0x18d   : > { %v570_v45 = vpop.f32.mrf.mxu1 }
 0x18e   : > { %v571_v60 = vadd.f32 %v570_v45, %v552_v55 }
 0x194   : > { %v584_v43 = vpop.f32.mrf.mxu2 }
 0x195   : > { %v572_v51 = vpop.f32.mrf.mxu1  ;;  %v585_v2 = vadd.f32 %v584_v43, %v566_v0 }
 0x196   : > { %v573_v6 = vadd.f32 %v572_v51, %v554_v61 }
 0x19c   : > { %v603_v46 = vpop.f32.mrf.mxu3  ;;  %v586_v47 = vpop.f32.mrf.mxu2 }
 0x19d   : > { %v604_v7 = vadd.f32 %v603_v46, %v585_v2  ;;  %v587_v8 = vadd.f32 %v586_v47, %v568_v3 }
 0x1a4   : > { %v605_v49 = vpop.f32.mrf.mxu3  ;;  %v589_v52 = vpop.f32.mrf.mxu2 }
 0x1a5   : > { %v590_v1 = vadd.f32 %v589_v52, %v571_v60  ;;  %v606_v10 = vadd.f32 %v605_v49, %v587_v8 }
 0x1ac   : > { %v608_v59 = vpop.f32.mrf.mxu3  ;;  %v591_v4 = vpop.f32.mrf.mxu2 }
 0x1ad   : > { %v622_v62 = vpop.f32.mrf.mxu0  ;;  %v627_v63 = vpop.f32.mrf.mxu1  ;;  %v609_v5 = vadd.f32 %v608_v59, %v590_v1  ;;  %v592_v9 = vadd.f32 %v591_v4, %v573_v6 }
 0x1ae   : > { %v623_v11 = vadd.f32 %v622_v62, %v604_v7 }
 0x1af   : > { %v628_v13 = vadd.f32 %v627_v63, %v609_v5 }
 0x1b0   : > { %v632_v19 = vmax.f32 %v623_v11, 0.0 }
 0x1b1   : > { %v634_v21 = vmax.f32 %v628_v13, 0.0 }
 0x1b4   : > { %v610_v12 = vpop.f32.mrf.mxu3 }
 0x1b5   : > { %v611_v14 = vadd.f32 %v610_v12, %v592_v9  ;;  %v624_v15 = vpop.f32.mrf.mxu0  ;;  %v629_v16 = vpop.f32.mrf.mxu1 }
 0x1b6   : > { %v625_v17 = vadd.f32 %v624_v15, %v606_v10 }
 0x1b7   : > { %v630_v18 = vadd.f32 %v629_v16, %v611_v14 }
 0x1b8   : > { %v633_v20 = vmax.f32 %v625_v17, 0.0 }
 0x1b9   : > { %v635_v22 = vmax.f32 %v630_v18, 0.0 }
 0x1ba   : > { %v827_v23 = vpack.c.bf16 %v633_v20, %v632_v19 }
 0x1bb   : > { %v832_v24 = vpack.c.bf16 %v635_v22, %v634_v21 }
 0x1bc   : > { %828 = vst [vmem:[%s170_s27] sm:$0xff] %v827_v23  }
 0x1bd   : > { %834 = vst [vmem:[%s170_s27 + $0x8] sm:$0xff] %v832_v24  }
 0x1be PF: > { %s13_s12 = sadd.s32 1, %s865_s12  }
 0x1bf   : > { %p10_p4 = scmp.ge.s32.totalorder %s13_s12, 4  }
 0x1c1   :  { %12 = sbr.rel (!%p10_p4) target bundleno = 1 (0x1), region = 62 }

// kernel: unet_forward.36
= control target key start
LH: loop header
LB: loop body
LE: loop exit
PB: predicated region body
PF: predicated region fallthrough
CT: control target
= control target key end

     0   :  { %s583_s12 = smov 0   ;;  %s659_s0 = inlined_call_operand.vmem [shape: bf16[2,32,256], index: 0, kind: input, shape index: {}]   ;;  %s660_s1 = inlined_call_operand.vmem [shape: bf16[64,128], index: 1, kind: input, shape index: {}]   ;;  %s661_s2 = inlined_call_operand.vmem [shape: f32[64,1], index: 2, kind: input, shape index: {}]   ;;  %s662_s3 = inlined_call_operand.vmem [shape: bf16[2,64,128], index: 3, kind: output, shape index: {}]  }
   0x1 LB: > { %s426_s13 = sadd.s32 4294967295, %s557_s12   ;;  %p430_p0 = scmp.ge.s32.totalorder %s557_s12, 1  ;;  %s557_s12 = sphi %s583_s12, %s13_s12  }
   0x2   : > { %p137_p1 = scmp.lt.s32.totalorder %s557_s12, 3 }
   0x4   : > { %p138_p2 = pnand %p430_p0, %p137_p1 }
   0x5   : > { %p161_p3 = scmp.lt.s32.totalorder (!%p138_p2), %s426_s13, 1  ;;  %s559_s18 = smov (!%p138_p2), 118  }
   0x6   : > { %141 = sbr.rel (%p138_p2) target bundleno = 319 (0x13f), region = 32  ;;  %s560_s19 = smov (!%p138_p2), 119  }
   0x7   : > { %s561_s20 = smov (!%p138_p2), 127  }
   0xb   : > { %s664_s13 = smov (!%p161_p3, %s426_s13), 1  ;;  %v180_v13 = vld [vmem:[%s661_s2 + $0x8] sm:$0xff]  ;;  %v562_v15 = vmov 0   ;;  %vm257_vm0 = vcmask 965632   ;;  %v182_v21 = vld [vmem:[%s661_s2 + $0x18] sm:$0xff]  ;;  %v179_v22 = vld [vmem:[%s661_s2] sm:$0xff] }
   0xc   : > { %s477_s14 = sshll.u32 %s664_s13, 5  ;;  %549 = vset.pattern.permute.xlu1 %v562_v15  ;;  %548 = vset.pattern.permute.xlu0 %v562_v15  ;;  %v181_v23 = vld [vmem:[%s661_s2 + $0x10] sm:$0xff]  ;;  %vm244_vm1 = vcmask 973824   ;;  %v184_v30 = vld [vmem:[%s661_s2 + $0x28] sm:$0xff]  ;;  %v183_v31 = vld [vmem:[%s661_s2 + $0x20] sm:$0xff]  ;;  %vm231_vm2 = vcmask 1039360  }
   0xd   : > { %s599_s17 = scalar_lea.vmem %s659_s0, %s477_s14  ;;  %550 = vset.pattern.permute.xlu2 %v562_v15  ;;  %v185_v29 = vld [vmem:[%s661_s2 + $0x30] sm:$0xff]  ;;  %v186_v37 = vld [vmem:[%s661_s2 + $0x38] sm:$0xff]  ;;  %v479_v45 = vld [vmem:[%s660_s1] sm:$0xff]  ;;  %s170_s23 = scalar_lea.vmem %s662_s3, %s477_s14 }
   0xe   : > { %v453_v0 = vld [vmem:[%s599_s17 + $0x10] sm:$0xf]  ;;  %v488_v1 = vld [vmem:[%s599_s17 + $0x14] sm:$0xf0]  ;;  %v445_v2 = vld [vmem:[%s599_s17] sm:$0xf] }
   0xf   : > { %v454_v3 = vor.u32 %v488_v1, %v453_v0  ;;  %v486_v4 = vld [vmem:[%s599_s17 + $0x4] sm:$0xf0]  ;;  %v487_v6 = vld [vmem:[%s599_s17 + $0x14] sm:$0xf]  ;;  %v455_v7 = vld [vmem:[%s599_s17 + $0x18] sm:$0xf0] }
  0x10   : > { %v446_v5 = vor.u32 %v486_v4, %v445_v2  ;;  %v485_v8 = vld [vmem:[%s599_s17 + $0x4] sm:$0xf]  ;;  %v447_v9 = vld [vmem:[%s599_s17 + $0x8] sm:$0xf0]  ;;  %v458_v10 = vor.u32 %v487_v6, %v455_v7  ;;  %v441_v39 = vld [vmem:[%s599_s17 + $0x10] sm:$0xf] }
  0x11   : > { %253 = vrot.lane.b32.xlu0 %v454_v3, %s559_s18  ;;  %240 = vrot.lane.b32.xlu2 %v454_v3, %s560_s19  ;;  %v450_v11 = vor.u32 %v485_v8, %v447_v9  ;;  %v484_v40 = vld [vmem:[%s599_s17 + $0x14] sm:$0xf0]  ;;  %v437_v42 = vld [vmem:[%s599_s17] sm:$0xf] }
  0x12   : > { %249 = vrot.lane.b32.xlu1 %v446_v5, %s559_s18  ;;  %v442_v41 = vor.u32 %v484_v40, %v441_v39  ;;  %v483_v43 = vld [vmem:[%s599_s17 + $0x4] sm:$0xf0]  ;;  %v481_v47 = vld [vmem:[%s660_s1 + $0x10] sm:$0xff]  ;;  %v482_v48 = vld [vmem:[%s660_s1 + $0x18] sm:$0xff] }
  0x13   : > { %v438_v44 = vor.u32 %v483_v43, %v437_v42  ;;  %v480_v46 = vld [vmem:[%s660_s1 + $0x8] sm:$0xff] }
  0x19   : > { %255 = vrot.lane.b32.xlu0 %v458_v10, %s559_s18  ;;  %242 = vrot.lane.b32.xlu2 %v458_v10, %s560_s19 }
  0x1a   : > { %251 = vrot.lane.b32.xlu1 %v450_v11, %s559_s18 }
  0x21   : > { %236 = vrot.lane.b32.xlu0 %v446_v5, %s560_s19  ;;  %227 = vrot.lane.b32.xlu2 %v454_v3, %s561_s20 }
  0x22   : > { %238 = vrot.lane.b32.xlu1 %v450_v11, %s560_s19 }
  0x29   : > { %229 = vrot.lane.b32.xlu0 %v458_v10, %s561_s20  ;;  %225 = vrot.lane.b32.xlu2 %v450_v11, %s561_s20 }
  0x2a   : > { %223 = vrot.lane.b32.xlu1 %v446_v5, %s561_s20 }
  0x31   : > { %264 = vperm.xlu0 %548, %v179_v22   ;;  %274 = vperm.xlu2 %550, %v181_v23  }
  0x32   : > { %269 = vperm.xlu1 %549, %v180_v13  }
  0x39   : > { %289 = vperm.xlu0 %548, %v184_v30   ;;  %284 = vperm.xlu2 %550, %v183_v31  }
  0x3a   : > { %279 = vperm.xlu1 %549, %v182_v21  }
  0x41   : > { %299 = vperm.xlu2 %550, %v186_v37  }
  0x42   : > { %294 = vperm.xlu1 %549, %v185_v29  }
  0x6b   : > { %v241_v12 = vpop.permute.xlu2 %240 }
  0x73   : > { %v243_v17 = vpop.permute.xlu2 %242 }
  0x74   : > { %v246_v27 = vsel %vm244_vm1, %v241_v12, %v243_v17 }
  0x7b   : > { %v228_v25 = vpop.permute.xlu2 %227 }
  0x83   : > { %v254_v14 = vpop.permute.xlu0 %253  ;;  %v226_v34 = vpop.permute.xlu2 %225 }
  0x84   : > { %v250_v16 = vpop.permute.xlu1 %249 }
  0x8b   : > { %v256_v18 = vpop.permute.xlu0 %255  ;;  %v275_v49 = vpop.permute.xlu2 %274 }
  0x8c   : > { %v259_v19 = vsel %vm257_vm0, %v254_v14, %v256_v18  ;;  %v252_v20 = vpop.permute.xlu1 %251 }
  0x8d   : > { %326 = vmatpush.bf16.msra.mxu0 %v259_v19  ;;  %512 = vmatpush.bf16.msra.mxu1 %v259_v19  ;;  %v258_v24 = vsel %vm257_vm0, %v250_v16, %v252_v20 }
  0x8e   : > { %513 = vmatpush.bf16.msra.mxu2 %v259_v19  ;;  %514 = vmatpush.bf16.msra.mxu3 %v259_v19 }
  0x91   : > { %327 = vmatpush.bf16.msra.mxu0 %v258_v24  ;;  %515 = vmatpush.bf16.msra.mxu1 %v258_v24 }
  0x92   : > { %516 = vmatpush.bf16.msra.mxu2 %v258_v24  ;;  %517 = vmatpush.bf16.msra.mxu3 %v258_v24 }
  0x93   : > { %v237_v26 = vpop.permute.xlu0 %236  ;;  %v285_v53 = vpop.permute.xlu2 %284 }
  0x94   : > { %v239_v28 = vpop.permute.xlu1 %238 }
  0x95   : > { %328 = vmatpush.bf16.msra.mxu0 %v246_v27  ;;  %518 = vmatpush.bf16.msra.mxu1 %v246_v27  ;;  %v245_v32 = vsel %vm244_vm1, %v237_v26, %v239_v28 }
  0x96   : > { %519 = vmatpush.bf16.msra.mxu2 %v246_v27  ;;  %520 = vmatpush.bf16.msra.mxu3 %v246_v27 }
  0x99   : > { %329 = vmatpush.bf16.msra.mxu0 %v245_v32  ;;  %521 = vmatpush.bf16.msra.mxu1 %v245_v32 }
  0x9a   : > { %522 = vmatpush.bf16.msra.mxu2 %v245_v32  ;;  %523 = vmatpush.bf16.msra.mxu3 %v245_v32 }
  0x9b   : > { %v230_v33 = vpop.permute.xlu0 %229  ;;  %v300_v2 = vpop.permute.xlu2 %299 }
  0x9c   : > { %v233_v35 = vsel %vm231_vm2, %v228_v25, %v230_v33  ;;  %v224_v36 = vpop.permute.xlu1 %223 }
  0x9d   : > { %330 = vmatpush.bf16.msra.mxu0 %v233_v35  ;;  %524 = vmatpush.bf16.msra.mxu1 %v233_v35  ;;  %v232_v38 = vsel %vm231_vm2, %v224_v36, %v226_v34 }
  0x9e   : > { %525 = vmatpush.bf16.msra.mxu2 %v233_v35  ;;  %526 = vmatpush.bf16.msra.mxu3 %v233_v35 }
  0xa1   : > { %331 = vmatpush.bf16.msra.mxu0 %v232_v38  ;;  %527 = vmatpush.bf16.msra.mxu1 %v232_v38 }
  0xa2   : > { %528 = vmatpush.bf16.msra.mxu2 %v232_v38  ;;  %529 = vmatpush.bf16.msra.mxu3 %v232_v38 }
  0xa3   : > { %v265_v55 = vpop.permute.xlu0 %264 }
  0xa4   : > { %v270_v50 = vpop.permute.xlu1 %269 }
  0xa5   : > { %332 = vmatpush.bf16.msra.mxu0 %v442_v41  ;;  %530 = vmatpush.bf16.msra.mxu1 %v442_v41 }
  0xa6   : > { %531 = vmatpush.bf16.msra.mxu2 %v442_v41  ;;  %532 = vmatpush.bf16.msra.mxu3 %v442_v41 }
  0xa9   : > { %333 = vmatpush.bf16.msra.mxu0 %v438_v44  ;;  %533 = vmatpush.bf16.msra.mxu1 %v438_v44 }
  0xaa   : > { %534 = vmatpush.bf16.msra.mxu2 %v438_v44  ;;  %535 = vmatpush.bf16.msra.mxu3 %v438_v44 }
  0xab   : > { %v290_v4 = vpop.permute.xlu0 %289 }
  0xac   : > { %334 = vmatmul.bf16.vlgmr.msra.gmra.mxu0 %v479_v45  ;;  %339 = vmatmul.bf16.vlgmr.msra.gmra.mxu1 %v480_v46  ;;  %v280_v54 = vpop.permute.xlu1 %279 }
  0xad   : > { %344 = vmatmul.bf16.vlgmr.msra.gmra.mxu2 %v481_v47  ;;  %349 = vmatmul.bf16.vlgmr.msra.gmra.mxu3 %v482_v48 }
  0xb4   : > { %v295_v3 = vpop.permute.xlu1 %294 }
 0x129   : > { %v335_v51 = vpop.f32.mrf.mxu0  ;;  %v340_v52 = vpop.f32.mrf.mxu1 }
 0x12a   : > { %v336_v60 = vadd.f32 %v335_v51, %v265_v55  ;;  %v341_v61 = vadd.f32 %v340_v52, %v275_v49 }
 0x130   : > { %v345_v56 = vpop.f32.mrf.mxu2  ;;  %v350_v57 = vpop.f32.mrf.mxu3 }
 0x131   : > { %v337_v58 = vpop.f32.mrf.mxu0  ;;  %v342_v59 = vpop.f32.mrf.mxu1  ;;  %v346_v7 = vadd.f32 %v345_v56, %v285_v53  ;;  %v351_v8 = vadd.f32 %v350_v57, %v295_v3 }
 0x132   : > { %v338_v62 = vadd.f32 %v337_v58, %v270_v50  ;;  %v343_v63 = vadd.f32 %v342_v59, %v280_v54 }
 0x134   : > { %v492_v0 = vpack.c.bf16 %v338_v62, %v336_v60  ;;  %v497_v1 = vpack.c.bf16 %v343_v63, %v341_v61 }
 0x136   : > { %493 = vst [vmem:[%s170_s23] sm:$0xff] %v492_v0  }
 0x137   : > { %509 = vst [vmem:[%s170_s23 + $0x8] sm:$0xff] %v497_v1  }
 0x138   : > { %v347_v5 = vpop.f32.mrf.mxu2  ;;  %v352_v6 = vpop.f32.mrf.mxu3 }
 0x139   : > { %v348_v9 = vadd.f32 %v347_v5, %v290_v4  ;;  %v353_v10 = vadd.f32 %v352_v6, %v300_v2 }
 0x13b   : > { %v502_v11 = vpack.c.bf16 %v348_v9, %v346_v7  ;;  %v507_v12 = vpack.c.bf16 %v353_v10, %v351_v8 }
 0x13d   : > { %510 = vst [vmem:[%s170_s23 + $0x10] sm:$0xff] %v502_v11  }
 0x13e   : > { %511 = vst [vmem:[%s170_s23 + $0x18] sm:$0xff] %v507_v12  }
 0x13f PF: > { %s13_s12 = sadd.s32 1, %s557_s12  }
 0x140   : > { %p10_p4 = scmp.ge.s32.totalorder %s13_s12, 4  }
 0x142   :  { %12 = sbr.rel (!%p10_p4) target bundleno = 1 (0x1), region = 62 }

// kernel: unet_forward.37
= control target key start
LH: loop header
LB: loop body
LE: loop exit
PB: predicated region body
PF: predicated region fallthrough
CT: control target
= control target key end

     0   :  { %s871_s12 = smov 0   ;;  %s1247_s0 = inlined_call_operand.vmem [shape: bf16[2,32,512], index: 0, kind: input, shape index: {}]   ;;  %s1248_s1 = inlined_call_operand.vmem [shape: bf16[16,288], index: 1, kind: input, shape index: {}]   ;;  %s1249_s2 = inlined_call_operand.vmem [shape: f32[16,1], index: 2, kind: input, shape index: {}]   ;;  %s1250_s3 = inlined_call_operand.vmem [shape: bf16[2,16,384], index: 3, kind: output, shape index: {}]  }
   0x1 LB: > { %s714_s13 = sadd.s32 4294967295, %s840_s12   ;;  %p718_p0 = scmp.ge.s32.totalorder %s840_s12, 1  ;;  %s840_s12 = sphi %s871_s12, %s13_s12  }
   0x2   : > { %p137_p1 = scmp.lt.s32.totalorder %s840_s12, 3 }
   0x4   : > { %p138_p2 = pnand %p718_p0, %p137_p1 }
   0x5   : > { %p161_p3 = scmp.lt.s32.totalorder (!%p138_p2), %s714_s13, 1  ;;  %s842_s18 = smov (!%p138_p2), 91  }
   0x6   : > { %141 = sbr.rel (%p138_p2) target bundleno = 451 (0x1c3), region = 32  ;;  %s843_s19 = smov (!%p138_p2), 110  }
   0x7   : > { %s844_s20 = smov (!%p138_p2), 126   ;;  %s845_s21 = smov (!%p138_p2), 92  }
   0x8   : > { %s846_s22 = smov (!%p138_p2), 90   ;;  %s847_s23 = smov (!%p138_p2), 127  }
   0x9   : > { %s848_s24 = smov (!%p138_p2), 108   ;;  %s849_s25 = smov (!%p138_p2), 109  }
   0xb   : > { %s1252_s13 = smov (!%p161_p3, %s714_s13), 1  ;;  %vm332_vm0 = vcmask 900096   ;;  %vm448_vm1 = vcmask 744448   ;;  %vm303_vm2 = vcmask 1031168   ;;  %vm419_vm3 = vcmask 752640  }
   0xc   : > { %s795_s14 = sshll.u32 %s1252_s13, 6  ;;  %vm477_vm4 = vcmask 736256   ;;  %vm274_vm5 = vcmask 1039360   ;;  %vm390_vm6 = vcmask 883712   ;;  %vm515_vm7 = vcmask 261120  }
   0xd   : > { %s885_s17 = scalar_lea.vmem %s1247_s0, %s795_s14  ;;  %vm361_vm8 = vcmask 891904  }
   0xe   : > { %v809_v0 = vld [vmem:[%s885_s17 + $0x24] sm:$0xf]  ;;  %v766_v1 = vld [vmem:[%s885_s17 + $0x30] sm:$0xf0]  ;;  %v772_v6 = vld [vmem:[%s885_s17 + $0x28] sm:$0xf] }
   0xf   : > { %v805_v2 = vld [vmem:[%s885_s17 + $0x4] sm:$0xf]  ;;  %v890_v3 = vor.u32 %v809_v0, %v766_v1  ;;  %v750_v4 = vld [vmem:[%s885_s17 + $0x10] sm:$0xf0]  ;;  %v812_v7 = vld [vmem:[%s885_s17 + $0x34] sm:$0xf0] }
  0x10   : > { %v893_v5 = vor.u32 %v805_v2, %v750_v4  ;;  %v756_v8 = vld [vmem:[%s885_s17 + $0x8] sm:$0xf]  ;;  %v808_v9 = vld [vmem:[%s885_s17 + $0x14] sm:$0xf0]  ;;  %v905_v10 = vor.u32 %v812_v7, %v772_v6  ;;  %v764_v12 = vld [vmem:[%s885_s17 + $0x20] sm:$0xf] }
  0x11   : > { %442 = vrot.lane.b32.xlu1 %v890_v3, %s842_s18  ;;  %326 = vrot.lane.b32.xlu0 %v890_v3, %s843_s19  ;;  %v907_v11 = vor.u32 %v808_v9, %v756_v8  ;;  %v811_v13 = vld [vmem:[%s885_s17 + $0x2c] sm:$0xf0]  ;;  %v748_v15 = vld [vmem:[%s885_s17] sm:$0xf] }
  0x12   : > { %318 = vrot.lane.b32.xlu2 %v893_v5, %s843_s19  ;;  %v917_v14 = vor.u32 %v811_v13, %v764_v12  ;;  %v807_v16 = vld [vmem:[%s885_s17 + $0xc] sm:$0xf0]  ;;  %v810_v18 = vld [vmem:[%s885_s17 + $0x2c] sm:$0xf]  ;;  %v774_v19 = vld [vmem:[%s885_s17 + $0x38] sm:$0xf0] }
  0x13   : > { %v933_v17 = vor.u32 %v807_v16, %v748_v15  ;;  %v967_v20 = vor.u32 %v810_v18, %v774_v19  ;;  %v806_v21 = vld [vmem:[%s885_s17 + $0xc] sm:$0xf]  ;;  %v758_v22 = vld [vmem:[%s885_s17 + $0x18] sm:$0xf0]  ;;  %v802_v16 = vld [vmem:[%s885_s17 + $0x24] sm:$0xf] }
  0x14   : > { %v991_v24 = vor.u32 %v806_v21, %v758_v22 }
  0x19   : > { %444 = vrot.lane.b32.xlu1 %v905_v10, %s842_s18  ;;  %328 = vrot.lane.b32.xlu0 %v905_v10, %s843_s19 }
  0x1a   : > { %320 = vrot.lane.b32.xlu2 %v907_v11, %s843_s19 }
  0x21   : > { %440 = vrot.lane.b32.xlu0 %v917_v14, %s842_s18  ;;  %434 = vrot.lane.b32.xlu1 %v893_v5, %s842_s18 }
  0x22   : > { %436 = vrot.lane.b32.xlu2 %v907_v11, %s842_s18 }
  0x29   : > { %297 = vrot.lane.b32.xlu0 %v890_v3, %s844_s20  ;;  %299 = vrot.lane.b32.xlu1 %v905_v10, %s844_s20 }
  0x2a   : > { %324 = vrot.lane.b32.xlu2 %v917_v14, %s843_s19 }
  0x31   : > { %432 = vrot.lane.b32.xlu0 %v933_v17, %s842_s18  ;;  %413 = vrot.lane.b32.xlu1 %v890_v3, %s845_s21 }
  0x32   : > { %415 = vrot.lane.b32.xlu2 %v905_v10, %s845_s21 }
  0x39   : > { %469 = vrot.lane.b32.xlu0 %v917_v14, %s846_s22  ;;  %471 = vrot.lane.b32.xlu1 %v890_v3, %s846_s22 }
  0x3a   : > { %289 = vrot.lane.b32.xlu2 %v893_v5, %s844_s20 }
  0x41   : > { %291 = vrot.lane.b32.xlu0 %v907_v11, %s844_s20  ;;  %316 = vrot.lane.b32.xlu1 %v933_v17, %s843_s19 }
  0x42   : > { %411 = vrot.lane.b32.xlu2 %v917_v14, %s845_s21 }
  0x49   : > { %405 = vrot.lane.b32.xlu0 %v893_v5, %s845_s21  ;;  %407 = vrot.lane.b32.xlu1 %v907_v11, %s845_s21 }
  0x4a   : > { %461 = vrot.lane.b32.xlu2 %v933_v17, %s846_s22 }
  0x51   : > { %463 = vrot.lane.b32.xlu0 %v893_v5, %s846_s22  ;;  %268 = vrot.lane.b32.xlu1 %v890_v3, %s847_s23 }
  0x52   : > { %270 = vrot.lane.b32.xlu2 %v905_v10, %s847_s23 }
  0x59   : > { %295 = vrot.lane.b32.xlu0 %v917_v14, %s844_s20  ;;  %403 = vrot.lane.b32.xlu1 %v933_v17, %s845_s21 }
  0x5a   : > { %446 = vrot.lane.b32.xlu2 %v967_v20, %s842_s18 }
  0x61   : > { %384 = vrot.lane.b32.xlu0 %v890_v3, %s848_s24  ;;  %386 = vrot.lane.b32.xlu1 %v905_v10, %s848_s24 }
  0x62   : > { %260 = vrot.lane.b32.xlu2 %v893_v5, %s847_s23 }
  0x69   : > { %262 = vrot.lane.b32.xlu0 %v907_v11, %s847_s23  ;;  %287 = vrot.lane.b32.xlu1 %v933_v17, %s844_s20 }
  0x6a   : > { %330 = vrot.lane.b32.xlu2 %v967_v20, %s843_s19 }
  0x6c   : > { %v989_v23 = vpop.permute.xlu2 %318 }
  0x71   : > { %382 = vrot.lane.b32.xlu0 %v917_v14, %s848_s24  ;;  %438 = vrot.lane.b32.xlu1 %v991_v24, %s842_s18 }
  0x72   : > { %376 = vrot.lane.b32.xlu2 %v893_v5, %s848_s24 }
  0x74   : > { %v999_v25 = vpop.permute.xlu2 %320 }
  0x75   : > { %v334_v35 = vsel %vm332_vm0, %v989_v23, %v999_v25 }
  0x79   : > { %378 = vrot.lane.b32.xlu0 %v907_v11, %s848_s24  ;;  %266 = vrot.lane.b32.xlu1 %v917_v14, %s847_s23 }
  0x7a   : > { %322 = vrot.lane.b32.xlu2 %v991_v24, %s843_s19 }
  0x7c   : > { %v1007_v26 = vpop.permute.xlu2 %436 }
  0x81   : > { %374 = vrot.lane.b32.xlu0 %v933_v17, %s848_s24  ;;  %417 = vrot.lane.b32.xlu1 %v967_v20, %s845_s21 }
  0x82   : > { %355 = vrot.lane.b32.xlu2 %v890_v3, %s849_s25 }
  0x83   : > { %v1015_v27 = vpop.permute.xlu1 %442  ;;  %v327_v28 = vpop.permute.xlu0 %326 }
  0x84   : > { %v325_v29 = vpop.permute.xlu2 %324 }
  0x85   : > { %v336_v30 = vsel %vm332_vm0, %v325_v29, %v327_v28  ;;  %v726_v29 = vld [vmem:[%s885_s17 + $0x10] sm:$0xf0] }
  0x86   : > { %519 = vmatpush.bf16.msra.mxu0 %v336_v30 }
  0x89   : > { %357 = vrot.lane.b32.xlu0 %v905_v10, %s849_s25  ;;  %258 = vrot.lane.b32.xlu1 %v933_v17, %s847_s23 }
  0x8a   : > { %301 = vrot.lane.b32.xlu2 %v967_v20, %s844_s20 }
  0x8b   : > { %v1024_v31 = vpop.permute.xlu1 %444  ;;  %v1026_v32 = vpop.permute.xlu0 %328 }
  0x8c   : > { %v1028_v33 = vpop.permute.xlu2 %415  ;;  %v337_v34 = vsel %vm332_vm0, %v327_v28, %v1026_v32  ;;  %v453_v2 = vsel %vm448_vm1, %v1015_v27, %v1024_v31  ;;  %v799_v28 = vld [vmem:[%s885_s17 + $0x4] sm:$0xf] }
  0x8d   : > { %561 = vmatpush.bf16.msra.mxu3 %v337_v34 }
  0x91   : > { %353 = vrot.lane.b32.xlu0 %v917_v14, %s849_s25  ;;  %409 = vrot.lane.b32.xlu1 %v991_v24, %s845_s21 }
  0x92   : > { %347 = vrot.lane.b32.xlu2 %v893_v5, %s849_s25  ;;  %562 = vmatpush.bf16.msra.mxu3 %v334_v35 }
  0x93   : > { %v441_v36 = vpop.permute.xlu0 %440  ;;  %v435_v37 = vpop.permute.xlu1 %434 }
  0x94   : > { %v1041_v38 = vpop.permute.xlu2 %289  ;;  %v452_v39 = vsel %vm448_vm1, %v441_v36, %v1015_v27  ;;  %v450_v4 = vsel %vm448_vm1, %v435_v37, %v1007_v26  ;;  %v798_v27 = vld [vmem:[%s1248_s1 + $0x10] sm:$0xf0] }
  0x95   : > { %533 = vmatpush.bf16.msra.mxu1 %v452_v39  ;;  %v780_v39 = vld [vmem:[%s1248_s1] sm:$0xf] }
  0x99   : > { %349 = vrot.lane.b32.xlu0 %v907_v11, %s849_s25  ;;  %293 = vrot.lane.b32.xlu1 %v991_v24, %s844_s20 }
  0x9a   : > { %345 = vrot.lane.b32.xlu2 %v933_v17, %s849_s25  ;;  %v738_v17 = vld [vmem:[%s885_s17 + $0x30] sm:$0xf0] }
  0x9b   : > { %v298_v40 = vpop.permute.xlu0 %297  ;;  %v1051_v41 = vpop.permute.xlu1 %299 }
  0x9c   : > { %v412_v42 = vpop.permute.xlu2 %411  ;;  %v308_v43 = vsel %vm303_vm2, %v298_v40, %v1051_v41 }
  0x9d   : > { %563 = vmatpush.bf16.msra.mxu3 %v308_v43 }
  0xa1   : > { %388 = vrot.lane.b32.xlu0 %v967_v20, %s848_s24  ;;  %272 = vrot.lane.b32.xlu1 %v967_v20, %s847_s23 }
  0xa2   : > { %380 = vrot.lane.b32.xlu2 %v991_v24, %s848_s24 }
  0xa3   : > { %v433_v44 = vpop.permute.xlu0 %432  ;;  %v414_v45 = vpop.permute.xlu1 %413 }
  0xa4   : > { %v462_v46 = vpop.permute.xlu2 %461  ;;  %v449_v47 = vsel %vm448_vm1, %v433_v44, %v435_v37  ;;  %v423_v48 = vsel %vm419_vm3, %v412_v42, %v414_v45 }
  0xa5   : > { %534 = vmatpush.bf16.msra.mxu1 %v449_v47 }
  0xa9   : > { %264 = vrot.lane.b32.xlu0 %v991_v24, %s847_s23  ;;  %359 = vrot.lane.b32.xlu1 %v967_v20, %s849_s25 }
  0xaa   : > { %473 = vrot.lane.b32.xlu2 %v905_v10, %s846_s22  ;;  %535 = vmatpush.bf16.msra.mxu1 %v423_v48  ;;  %v424_v10 = vsel %vm419_vm3, %v414_v45, %v1028_v33 }
  0xab   : > { %v470_v49 = vpop.permute.xlu0 %469  ;;  %v1069_v50 = vpop.permute.xlu1 %471 }
  0xac   : > { %v1071_v51 = vpop.permute.xlu2 %270  ;;  %v481_v52 = vsel %vm477_vm4, %v470_v49, %v1069_v50 }
  0xad   : > { %553 = vmatpush.bf16.msra.mxu2 %v481_v52 }
  0xb1   : > { %475 = vrot.lane.b32.xlu0 %v967_v20, %s846_s22  ;;  %351 = vrot.lane.b32.xlu1 %v991_v24, %s849_s25 }
  0xb2   : > { %465 = vrot.lane.b32.xlu2 %v907_v11, %s846_s22 }
  0xb3   : > { %v1081_v53 = vpop.permute.xlu0 %291  ;;  %v317_v54 = vpop.permute.xlu1 %316 }
  0xb4   : > { %v1083_v55 = vpop.permute.xlu2 %446  ;;  %v333_v56 = vsel %vm332_vm0, %v317_v54, %v989_v23  ;;  %v305_v57 = vsel %vm303_vm2, %v1041_v38, %v1081_v53  ;;  %v741_v23 = vor.u32 %v802_v16, %v738_v17 }
  0xb5   : > { %520 = vmatpush.bf16.msra.mxu0 %v333_v56  ;;  %564 = vmatpush.bf16.msra.mxu3 %v305_v57  ;;  %v803_v56 = vld [vmem:[%s885_s17 + $0x2c] sm:$0xf0] }
  0xb9   : > { %467 = vrot.lane.b32.xlu0 %v991_v24, %s846_s22  ;;  %v788_v24 = vld [vmem:[%s1248_s1 + $0x8] sm:$0xf] }
  0xba   : > { %v1145_v30 = vor.u32 %v798_v27, %v788_v24 }
  0xbb   : > { %v406_v58 = vpop.permute.xlu0 %405  ;;  %v1092_v59 = vpop.permute.xlu1 %407 }
  0xbc   : > { %v1094_v60 = vpop.permute.xlu2 %260  ;;  %v421_v11 = vsel %vm419_vm3, %v406_v58, %v1092_v59 }
  0xc3   : > { %v1096_v61 = vpop.permute.xlu0 %463  ;;  %v1098_v62 = vpop.permute.xlu1 %268 }
  0xc4   : > { %v331_v63 = vpop.permute.xlu2 %330  ;;  %v478_v0 = vsel %vm477_vm4, %v462_v46, %v1096_v61  ;;  %v279_v1 = vsel %vm274_vm5, %v1098_v62, %v1071_v51 }
  0xc5   : > { %554 = vmatpush.bf16.msra.mxu2 %v478_v0  ;;  %565 = vmatpush.bf16.msra.mxu3 %v279_v1  ;;  %v1110_v3 = vsel %vm332_vm0, %v1026_v32, %v331_v63  ;;  %v729_v32 = vor.u32 %v799_v28, %v726_v29  ;;  %v176_v1 = vld [vmem:[%s1249_s2] sm:$0xff]  ;;  %v744_v29 = vld [vmem:[%s885_s17 + $0x28] sm:$0xf] }
  0xc8   : > { %790 = vmatmul.msk.bf16.vlgmr.msra.gmra.mxu2 %vm515_vm7, %v1145_v30 }
  0xc9   : > { %575 = vmatpush.bf16.msrb.mxu2 %v453_v2  ;;  %v724_v2 = vld [vmem:[%s885_s17] sm:$0xf] }
  0xcb   : > { %v296_v5 = vpop.permute.xlu0 %295  ;;  %v404_v6 = vpop.permute.xlu1 %403 }
  0xcc   : > { %v377_v7 = vpop.permute.xlu2 %376  ;;  %v307_v8 = vsel %vm303_vm2, %v296_v5, %v298_v40  ;;  %v420_v9 = vsel %vm419_vm3, %v404_v6, %v406_v58  ;;  %v797_v40 = vld [vmem:[%s1248_s1 + $0x8] sm:$0xf0]  ;;  %v850_v5 = vmov 0  }
  0xcd   : > { %576 = vmatpush.bf16.msrb.mxu2 %v450_v4  ;;  %521 = vmatpush.bf16.msra.mxu0 %v307_v8  ;;  %v1161_v42 = vor.u32 %v797_v40, %v780_v39  ;;  %v800_v4 = vld [vmem:[%s885_s17 + $0xc] sm:$0xf0] }
  0xce   : > { %536 = vmatpush.bf16.msra.mxu1 %v420_v9  ;;  %831 = vset.pattern.permute.xlu1 %v850_v5 }
  0xcf   : > { %832 = vset.pattern.permute.xlu2 %v850_v5  ;;  %492 = vperm.xlu1 %831, %v176_v1  }
  0xd0   : > { %833 = vset.pattern.permute.xlu0 %v850_v5 }
  0xd1   : > { %577 = vmatpush.bf16.msrb.mxu2 %v424_v10 }
  0xd3   : > { %v385_v12 = vpop.permute.xlu0 %384  ;;  %v1120_v13 = vpop.permute.xlu1 %386 }
  0xd4   : > { %v1122_v14 = vpop.permute.xlu2 %322  ;;  %v395_v15 = vsel %vm390_vm6, %v385_v12, %v1120_v13 }
  0xd5   : > { %578 = vmatpush.bf16.msrb.mxu2 %v421_v11 }
  0xd9   : > { %579 = vmatpush.bf16.msrb.mxu2 %v395_v15  ;;  %v782_v15 = vld [vmem:[%s1248_s1 + $0xc] sm:$0xf0] }
  0xdb   : > { %v1128_v18 = vpop.permute.xlu0 %262  ;;  %v288_v19 = vpop.permute.xlu1 %287 }
  0xdc   : > { %v1130_v20 = vpop.permute.xlu2 %355  ;;  %v304_v21 = vsel %vm303_vm2, %v288_v19, %v1041_v38  ;;  %v276_v22 = vsel %vm274_vm5, %v1094_v60, %v1128_v18  ;;  %v454_v38 = vsel %vm448_vm1, %v1024_v31, %v1083_v55  ;;  %v736_v55 = vld [vmem:[%s885_s17 + $0x20] sm:$0xf] }
  0xdd   : > { %522 = vmatpush.bf16.msra.mxu0 %v304_v21  ;;  %566 = vmatpush.bf16.msra.mxu3 %v276_v22  ;;  %v335_v22 = vsel %vm332_vm0, %v999_v25, %v1122_v14 }
  0xe1   : > { %567 = vmatpush.bf16.msra.mxu3 %v741_v23 }
  0xe3   : > { %v383_v34 = vpop.permute.xlu0 %382  ;;  %v439_v35 = vpop.permute.xlu1 %438 }
  0xe4   : > { %v1149_v36 = vpop.permute.xlu2 %301  ;;  %v394_v37 = vsel %vm390_vm6, %v383_v34, %v385_v12  ;;  %v451_v43 = vsel %vm448_vm1, %v1007_v26, %v439_v35  ;;  %v796_v12 = vld [vmem:[%s1248_s1 + $0x4] sm:$0xf] }
  0xe5   : > { %537 = vmatpush.bf16.msra.mxu1 %v394_v37  ;;  %568 = vmatpush.bf16.msra.mxu3 %v729_v32  ;;  %v309_v23 = vsel %vm303_vm2, %v1051_v41, %v1149_v36  ;;  %v804_v32 = vld [vmem:[%s885_s17 + $0x34] sm:$0xf0]  ;;  %v732_v36 = vld [vmem:[%s885_s17 + $0x8] sm:$0xf] }
  0xe6   : > { %v745_v35 = vor.u32 %v804_v32, %v744_v29  ;;  %v801_v37 = vld [vmem:[%s885_s17 + $0x14] sm:$0xf0]  ;;  %s813_s17 = smul.u32 24, %s1252_s13 }
  0xe8   : > { %569 = vmatmul.bf16.vlgmr.msra.gmra.mxu3 %v1161_v42  ;;  %s170_s20 = scalar_lea.vmem %s1250_s3, %s813_s17 }
  0xe9   : > { %617 = vmatpush.bf16.msrb.mxu3 %v454_v38  ;;  %v733_v38 = vor.u32 %v801_v37, %v732_v36 }
  0xeb   : > { %v1166_v44 = vpop.permute.xlu0 %378  ;;  %v267_v31 = vpop.permute.xlu1 %266 }
  0xec   : > { %v348_v45 = vpop.permute.xlu2 %347  ;;  %v278_v46 = vsel %vm274_vm5, %v267_v31, %v1098_v62  ;;  %v392_v47 = vsel %vm390_vm6, %v377_v7, %v1166_v44 }
  0xed   : > { %618 = vmatpush.bf16.msrb.mxu3 %v451_v43  ;;  %523 = vmatpush.bf16.msra.mxu0 %v278_v46 }
  0xee   : > { %580 = vmatpush.bf16.msrb.mxu2 %v392_v47 }
  0xf3   : > { %v375_v48 = vpop.permute.xlu0 %374  ;;  %v418_v49 = vpop.permute.xlu1 %417 }
  0xf4   : > { %v346_v26 = vpop.permute.xlu2 %345  ;;  %v391_v52 = vsel %vm390_vm6, %v375_v48, %v377_v7  ;;  %v425_v54 = vsel %vm419_vm3, %v1028_v33, %v418_v49  ;;  %v737_v33 = vor.u32 %v803_v56, %v736_v55 }
  0xf5   : > { %538 = vmatpush.bf16.msra.mxu1 %v391_v52  ;;  %619 = vmatpush.bf16.msrb.mxu3 %v425_v54  ;;  %v362_v16 = vsel %vm361_vm8, %v346_v26, %v348_v45 }
  0xfb   : > { %v1177_v57 = vpop.permute.xlu0 %357  ;;  %v259_v58 = vpop.permute.xlu1 %258 }
  0xfc   : > { %v381_v62 = vpop.permute.xlu2 %380  ;;  %v275_v63 = vsel %vm274_vm5, %v259_v58, %v1094_v60  ;;  %v366_v0 = vsel %vm361_vm8, %v1130_v20, %v1177_v57  ;;  %v725_v60 = vor.u32 %v800_v4, %v724_v2 }
  0xfd   : > { %524 = vmatpush.bf16.msra.mxu0 %v275_v63  ;;  %581 = vmatpush.bf16.msrb.mxu2 %v366_v0  ;;  %v393_v41 = vsel %vm390_vm6, %v1166_v44, %v381_v62 }
 0x101   : > { %525 = vmatpush.bf16.msra.mxu0 %v737_v33 }
 0x103   : > { %v354_v6 = vpop.permute.xlu0 %353  ;;  %v410_v7 = vpop.permute.xlu1 %409 }
 0x104   : > { %v474_v8 = vpop.permute.xlu2 %473  ;;  %v365_v9 = vsel %vm361_vm8, %v354_v6, %v1130_v20  ;;  %v422_v10 = vsel %vm419_vm3, %v1092_v59, %v410_v7  ;;  %v785_v59 = vor.u32 %v796_v12, %v782_v15 }
 0x105   : > { %526 = vmatpush.bf16.msra.mxu0 %v725_v60  ;;  %539 = vmatpush.bf16.msra.mxu1 %v365_v9  ;;  %v482_v11 = vsel %vm477_vm4, %v1069_v50, %v474_v8 }
 0x106   : > { %620 = vmatpush.bf16.msrb.mxu3 %v422_v10 }
 0x108   : > { %527 = vmatmul.bf16.vlgmr.msra.gmra.mxu0 %v1161_v42 }
 0x109   : > { %595 = vmatpush.bf16.msrb.mxu0 %v482_v11  ;;  %540 = vmatpush.bf16.msra.mxu1 %v362_v16 }
 0x10b   : > { %v350_v17 = vpop.permute.xlu0 %349  ;;  %v294_v50 = vpop.permute.xlu1 %293 }
 0x10c   : > { %v466_v19 = vpop.permute.xlu2 %465  ;;  %v363_v20 = vsel %vm361_vm8, %v348_v45, %v350_v17  ;;  %541 = vmatmul.bf16.vlgmr.msra.gmra.mxu1 %v785_v59  ;;  %v306_v14 = vsel %vm303_vm2, %v1081_v53, %v294_v50 }
 0x10d   : > { %603 = vmatpush.bf16.msrb.mxu1 %v1110_v3  ;;  %582 = vmatpush.bf16.msrb.mxu2 %v363_v20  ;;  %v479_v21 = vsel %vm477_vm4, %v1096_v61, %v466_v19  ;;  %v177_v3 = vld [vmem:[%s1249_s2 + $0x8] sm:$0xff] }
 0x10e   : > { %596 = vmatpush.bf16.msrb.mxu0 %v479_v21  ;;  %497 = vperm.xlu2 %832, %v177_v3  }
 0x110   : > { %583 = vmatmul.bf16.vlgmr.msrb.gmra.mxu2 %v785_v59 }
 0x111   : > { %604 = vmatpush.bf16.msrb.mxu1 %v335_v22 }
 0x113   : > { %v389_v61 = vpop.permute.xlu0 %388  ;;  %v273_v24 = vpop.permute.xlu1 %272 }
 0x114   : > { %v396_v25 = vsel %vm390_vm6, %v1120_v13, %v389_v61  ;;  %v280_v27 = vsel %vm274_vm5, %v1071_v51, %v273_v24 }
 0x115   : > { %605 = vmatpush.bf16.msrb.mxu1 %v309_v23  ;;  %621 = vmatpush.bf16.msrb.mxu3 %v396_v25 }
 0x118   : > { %791 = vmatmul.msk.bf16.vlgmr.msrb.gmra.mxu0 %vm515_vm7, %v1145_v30 }
 0x119   : > { %606 = vmatpush.bf16.msrb.mxu1 %v306_v14  ;;  %622 = vmatpush.bf16.msrb.mxu3 %v393_v41 }
 0x11b   : > { %v265_v28 = vpop.permute.xlu0 %264  ;;  %v360_v13 = vpop.permute.xlu1 %359 }
 0x11c   : > { %v367_v53 = vsel %vm361_vm8, %v1177_v57, %v360_v13  ;;  %v277_v34 = vsel %vm274_vm5, %v1128_v18, %v265_v28 }
 0x11d   : > { %607 = vmatpush.bf16.msrb.mxu1 %v280_v27  ;;  %623 = vmatpush.bf16.msrb.mxu3 %v367_v53 }
 0x121   : > { %608 = vmatpush.bf16.msrb.mxu1 %v277_v34 }
 0x123   : > { %v476_v39 = vpop.permute.xlu0 %475  ;;  %v352_v51 = vpop.permute.xlu1 %351 }
 0x124   : > { %v483_v40 = vsel %vm477_vm4, %v474_v8, %v476_v39  ;;  %v364_v43 = vsel %vm361_vm8, %v350_v17, %v352_v51 }
 0x125   : > { %609 = vmatpush.bf16.msrb.mxu1 %v745_v35  ;;  %624 = vmatpush.bf16.msrb.mxu3 %v364_v43 }
 0x126   : > { %637 = vmatpush.bf16.msra.mxu2 %v483_v40 }
 0x128   : > { %625 = vmatmul.bf16.vlgmr.msrb.gmra.mxu3 %v785_v59 }
 0x129   : > { %610 = vmatpush.bf16.msrb.mxu1 %v733_v38 }
 0x12b   : > { %v468_v18 = vpop.permute.xlu0 %467 }
 0x12c   : > { %611 = vmatmul.bf16.vlgmr.msrb.gmra.mxu1 %v1161_v42  ;;  %v480_v44 = vsel %vm477_vm4, %v466_v19, %v468_v18 }
 0x12d   : > { %638 = vmatpush.bf16.msra.mxu2 %v480_v44 }
 0x130   : > { %792 = vmatmul.msk.bf16.vlgmr.msra.gmra.mxu2 %vm515_vm7, %v1145_v30 }
 0x141   : > { %v493_v47 = vpop.permute.xlu1 %492 }
 0x14b   : > { %v556_v31 = vpop.f32.mrf.mxu2 }
 0x153   : > { %v558_v46 = vpop.f32.mrf.mxu2 }
 0x168   : > { %v498_v56 = vpop.permute.xlu2 %497 }
 0x16b   : > { %v570_v48 = vpop.f32.mrf.mxu3 }
 0x16c   : > { %v571_v55 = vadd.f32 %v570_v48, %v493_v47 }
 0x173   : > { %v572_v63 = vpop.f32.mrf.mxu3 }
 0x174   : > { %v573_v5 = vadd.f32 %v572_v63, %v498_v56 }
 0x185   : > { %v528_v45 = vpop.f32.mrf.mxu0 }
 0x186   : > { %v529_v26 = vadd.f32 %v528_v45, %v493_v47 }
 0x189   : > { %v542_v49 = vpop.f32.mrf.mxu1 }
 0x18a   : > { %v543_v54 = vadd.f32 %v542_v49, %v529_v26 }
 0x18c   : > { %v557_v58 = vadd.f32 %v556_v31, %v543_v54 }
 0x18d   : > { %v530_v52 = vpop.f32.mrf.mxu0 }
 0x18e   : > { %v531_v57 = vadd.f32 %v530_v52, %v498_v56  ;;  %v645_v1 = vmax.f32 %v557_v58, 0.0 }
 0x191   : > { %v544_v30 = vpop.f32.mrf.mxu1 }
 0x192   : > { %v545_v4 = vadd.f32 %v544_v30, %v531_v57 }
 0x193   : > { %v584_v42 = vpop.f32.mrf.mxu2 }
 0x194   : > { %v585_v62 = vadd.f32 %v584_v42, %v571_v55  ;;  %v559_v7 = vadd.f32 %v558_v46, %v545_v4 }
 0x195   : > { %v598_v0 = vpop.f32.mrf.mxu0 }
 0x196   : > { %v599_v33 = vadd.f32 %v598_v0, %v585_v62  ;;  %v648_v11 = vmax.f32 %v559_v7, 0.0 }
 0x198   : > { %v646_v2 = vmax.f32 %v599_v33, 0.0 }
 0x19a   : > { %v651_v60 = vpack.c.bf16 %v646_v2, %v645_v1 }
 0x19b   : > { %v586_v6 = vpop.f32.mrf.mxu2 }
 0x19c   : > { %655 = vst [vmem:[%s170_s20] sm:$0xff] %v651_v60  ;;  %v587_v8 = vadd.f32 %v586_v6, %v573_v5 }
 0x19d   : > { %v600_v9 = vpop.f32.mrf.mxu0 }
 0x19e   : > { %v601_v10 = vadd.f32 %v600_v9, %v587_v8 }
 0x1a0   : > { %v649_v12 = vmax.f32 %v601_v10, 0.0 }
 0x1a2   : > { %v653_v15 = vpack.c.bf16 %v649_v12, %v648_v11 }
 0x1a4   : > { %657 = vst [vmem:[%s170_s20 + $0xc] sm:$0xff] %v653_v15 }
 0x1a9   : > { %v612_v16 = vpop.f32.mrf.mxu1 }
 0x1aa   : > { %v613_v59 = vadd.f32 %v612_v16, %v493_v47 }
 0x1ab   : > { %v626_v17 = vpop.f32.mrf.mxu3 }
 0x1ac   : > { %v627_v50 = vadd.f32 %v626_v17, %v613_v59 }
 0x1b1   : > { %v614_v21 = vpop.f32.mrf.mxu1 }
 0x1b2   : > { %v615_v61 = vadd.f32 %v614_v21, %v498_v56 }
 0x1b3   : > { %v640_v19 = vpop.f32.mrf.mxu2  ;;  %v628_v3 = vpop.f32.mrf.mxu3 }
 0x1b4   : > { %v641_v20 = vadd.f32 %v640_v19, %v627_v50  ;;  %v629_v24 = vadd.f32 %v628_v3, %v615_v61 }
 0x1b6   : > { %v647_v22 = vmax.f32 %v641_v20, 0.0 }
 0x1b8   : > { %v652_v23 = vpack.c.bf16 %v647_v22, %v647_v22 }
 0x1ba   : > { %656 = vst [vmem:[%s170_s20 + $0x8] sm:$0xf] %v652_v23 }
 0x1bb   : > { %v642_v25 = vpop.f32.mrf.mxu2 }
 0x1bc   : > { %v643_v14 = vadd.f32 %v642_v25, %v629_v24 }
 0x1be   : > { %v650_v41 = vmax.f32 %v643_v14, 0.0 }
 0x1c0   : > { %v654_v27 = vpack.c.bf16 %v650_v41, %v650_v41 }
 0x1c2   : > { %658 = vst [vmem:[%s170_s20 + $0x14] sm:$0xf] %v654_v27 }
 0x1c3 PF: > { %s13_s12 = sadd.s32 1, %s840_s12  }
 0x1c4   : > { %p10_p4 = scmp.ge.s32.totalorder %s13_s12, 4  }
 0x1c6   :  { %12 = sbr.rel (!%p10_p4) target bundleno = 1 (0x1), region = 62 }

// kernel: unet_forward.39
= control target key start
LH: loop header
LB: loop body
LE: loop exit
PB: predicated region body
PF: predicated region fallthrough
CT: control target
= control target key end

     0   :  { %s620_s12 = smov 0   ;;  %s711_s0 = inlined_call_operand.vmem [shape: bf16[2,16,512], index: 0, kind: input, shape index: {}]   ;;  %s712_s1 = inlined_call_operand.vmem [shape: bf16[16,144], index: 1, kind: input, shape index: {}]   ;;  %s713_s2 = inlined_call_operand.vmem [shape: f32[16,1], index: 2, kind: input, shape index: {}]   ;;  %s714_s3 = inlined_call_operand.vmem [shape: f32[2,16,384], index: 3, kind: output, shape index: {}]  }
   0x1 LB: > { %s504_s13 = sadd.s32 4294967295, %s589_s12   ;;  %p508_p0 = scmp.ge.s32.totalorder %s589_s12, 1  ;;  %s589_s12 = sphi %s620_s12, %s13_s12  }
   0x2   : > { %p137_p1 = scmp.lt.s32.totalorder %s589_s12, 3 }
   0x4   : > { %p138_p2 = pnand %p508_p0, %p137_p1 }
   0x5   : > { %p161_p3 = scmp.lt.s32.totalorder (!%p138_p2), %s504_s13, 1  ;;  %s591_s18 = smov (!%p138_p2), 91  }
   0x6   : > { %141 = sbr.rel (%p138_p2) target bundleno = 361 (0x169), region = 32  ;;  %s592_s19 = smov (!%p138_p2), 92  }
   0x7   : > { %s593_s20 = smov (!%p138_p2), 108   ;;  %s594_s21 = smov (!%p138_p2), 109  }
   0x8   : > { %s595_s22 = smov (!%p138_p2), 90   ;;  %s596_s23 = smov (!%p138_p2), 110  }
   0x9   : > { %s597_s24 = smov (!%p138_p2), 126   ;;  %s598_s25 = smov (!%p138_p2), 127  }
   0xb   : > { %s716_s13 = smov (!%p161_p3, %s504_s13), 1  ;;  %vm314_vm0 = vcmask 744448   ;;  %vm299_vm1 = vcmask 752640   ;;  %vm284_vm2 = vcmask 883712   ;;  %vm329_vm3 = vcmask 736256   ;;  %v175_v56 = vld [vmem:[%s713_s2 + $0x8] sm:$0xff] }
   0xc   : > { %s553_s14 = sshll.u32 %s716_s13, 5  ;;  %vm269_vm4 = vcmask 891904   ;;  %v554_v35 = vld [vmem:[%s712_s1 + $0x4] sm:$0xf]  ;;  %v544_v36 = vld [vmem:[%s712_s1 + $0x8] sm:$0xf0] }
   0xd   : > { %s634_s17 = scalar_lea.vmem %s711_s0, %s553_s14  ;;  %v660_v37 = vor.u32 %v554_v35, %v544_v36  ;;  %vm355_vm5 = vcmask 130048   ;;  %vm254_vm6 = vcmask 900096   ;;  %vm239_vm7 = vcmask 1031168   ;;  %v174_v57 = vld [vmem:[%s713_s2] sm:$0xff]  ;;  %s563_s11 = smul.u32 48, %s716_s13 }
   0xe   : > { %v526_v0 = vld [vmem:[%s634_s17] sm:$0xf]  ;;  %v561_v1 = vld [vmem:[%s634_s17 + $0xc] sm:$0xf0]  ;;  %v559_v2 = vld [vmem:[%s634_s17 + $0x4] sm:$0xf] }
   0xf   : > { %v527_v3 = vor.u32 %v561_v1, %v526_v0  ;;  %v528_v4 = vld [vmem:[%s634_s17 + $0x10] sm:$0xf0]  ;;  %v560_v6 = vld [vmem:[%s634_s17 + $0xc] sm:$0xf]  ;;  %v536_v7 = vld [vmem:[%s634_s17 + $0x18] sm:$0xf0]  ;;  %s170_s16 = scalar_lea.vmem %s714_s3, %s563_s11 }
  0x10   : > { %v531_v5 = vor.u32 %v559_v2, %v528_v4  ;;  %v534_v8 = vld [vmem:[%s634_s17 + $0x8] sm:$0xf]  ;;  %v562_v9 = vld [vmem:[%s634_s17 + $0x14] sm:$0xf0]  ;;  %v539_v10 = vor.u32 %v560_v6, %v536_v7  ;;  %v599_v58 = vmov 0   ;;  %vm224_vm8 = vcmask 1039360  }
  0x11   : > { %306 = vrot.lane.b32.xlu2 %v527_v3, %s591_s18  ;;  %v535_v11 = vor.u32 %v562_v9, %v534_v8  ;;  %582 = vset.pattern.permute.xlu0 %v599_v58  ;;  %v556_v60 = vld [vmem:[%s634_s17 + $0x4] sm:$0xf]  ;;  %v516_v61 = vld [vmem:[%s634_s17 + $0x10] sm:$0xf0]  ;;  %v555_v4 = vld [vmem:[%s712_s1 + $0x4] sm:$0xf0] }
  0x12   : > { %293 = vrot.lane.b32.xlu1 %v531_v5, %s592_s19  ;;  %308 = vrot.lane.b32.xlu0 %v531_v5, %s591_s18  ;;  %v519_v2 = vor.u32 %v556_v60, %v516_v61 }
  0x13   : > { %581 = vset.pattern.permute.xlu2 %v599_v58 }
  0x19   : > { %312 = vrot.lane.b32.xlu2 %v539_v10, %s591_s18 }
  0x1a   : > { %295 = vrot.lane.b32.xlu1 %v535_v11, %s592_s19  ;;  %310 = vrot.lane.b32.xlu0 %v535_v11, %s591_s18 }
  0x21   : > { %291 = vrot.lane.b32.xlu2 %v527_v3, %s592_s19 }
  0x22   : > { %280 = vrot.lane.b32.xlu1 %v535_v11, %s593_s20  ;;  %278 = vrot.lane.b32.xlu0 %v531_v5, %s593_s20 }
  0x29   : > { %265 = vrot.lane.b32.xlu2 %v535_v11, %s594_s21 }
  0x2a   : > { %263 = vrot.lane.b32.xlu1 %v531_v5, %s594_s21  ;;  %297 = vrot.lane.b32.xlu0 %v539_v10, %s592_s19 }
  0x31   : > { %323 = vrot.lane.b32.xlu2 %v531_v5, %s595_s22 }
  0x32   : > { %282 = vrot.lane.b32.xlu1 %v539_v10, %s593_s20  ;;  %276 = vrot.lane.b32.xlu0 %v527_v3, %s593_s20 }
  0x39   : > { %250 = vrot.lane.b32.xlu2 %v535_v11, %s596_s23 }
  0x3a   : > { %248 = vrot.lane.b32.xlu1 %v531_v5, %s596_s23  ;;  %325 = vrot.lane.b32.xlu0 %v535_v11, %s595_s22 }
  0x41   : > { %321 = vrot.lane.b32.xlu2 %v527_v3, %s595_s22 }
  0x42   : > { %267 = vrot.lane.b32.xlu1 %v539_v10, %s594_s21  ;;  %261 = vrot.lane.b32.xlu0 %v527_v3, %s594_s21 }
  0x49   : > { %246 = vrot.lane.b32.xlu2 %v527_v3, %s596_s23 }
  0x4a   : > { %235 = vrot.lane.b32.xlu1 %v535_v11, %s597_s24  ;;  %233 = vrot.lane.b32.xlu0 %v531_v5, %s597_s24 }
  0x51   : > { %220 = vrot.lane.b32.xlu2 %v535_v11, %s598_s25  ;;  %v514_v11 = vld [vmem:[%s634_s17] sm:$0xf] }
  0x52   : > { %218 = vrot.lane.b32.xlu1 %v531_v5, %s598_s25  ;;  %252 = vrot.lane.b32.xlu0 %v539_v10, %s596_s23 }
  0x59   : > { %216 = vrot.lane.b32.xlu2 %v527_v3, %s598_s25 }
  0x5a   : > { %237 = vrot.lane.b32.xlu1 %v539_v10, %s597_s24  ;;  %231 = vrot.lane.b32.xlu0 %v527_v3, %s597_s24  ;;  %v542_v3 = vld [vmem:[%s712_s1] sm:$0xf] }
  0x5b   : > { %v543_v5 = vor.u32 %v555_v4, %v542_v3 }
  0x61   : > { %338 = vperm.xlu2 %581, %v174_v57  }
  0x62   : > { %327 = vrot.lane.b32.xlu1 %v539_v10, %s595_s22  ;;  %222 = vrot.lane.b32.xlu0 %v539_v10, %s598_s25 }
  0x6a   : > { %343 = vperm.xlu0 %582, %v175_v56  }
  0x6b   : > { %v307_v12 = vpop.permute.xlu2 %306 }
  0x73   : > { %v313_v13 = vpop.permute.xlu2 %312 }
  0x7b   : > { %v292_v14 = vpop.permute.xlu2 %291 }
  0x83   : > { %v266_v15 = vpop.permute.xlu2 %265 }
  0x84   : > { %v294_v16 = vpop.permute.xlu1 %293  ;;  %v309_v17 = vpop.permute.xlu0 %308 }
  0x85   : > { %v315_v18 = vsel %vm314_vm0, %v307_v12, %v309_v17  ;;  %v300_v19 = vsel %vm299_vm1, %v292_v14, %v294_v16  ;;  %v557_v12 = vld [vmem:[%s634_s17 + $0xc] sm:$0xf0] }
  0x86   : > { %359 = vmatpush.bf16.msra.mxu0 %v315_v18  ;;  %v515_v14 = vor.u32 %v557_v12, %v514_v11  ;;  %v558_v18 = vld [vmem:[%s634_s17 + $0x14] sm:$0xf0] }
  0x8a   : > { %360 = vmatpush.bf16.msra.mxu0 %v300_v19 }
  0x8b   : > { %v324_v20 = vpop.permute.xlu2 %323 }
  0x8c   : > { %v296_v21 = vpop.permute.xlu1 %295  ;;  %v311_v22 = vpop.permute.xlu0 %310 }
  0x8d   : > { %v316_v23 = vsel %vm314_vm0, %v309_v17, %v311_v22  ;;  %v301_v24 = vsel %vm299_vm1, %v294_v16, %v296_v21  ;;  %v317_v34 = vsel %vm314_vm0, %v311_v22, %v313_v13  ;;  %v522_v17 = vld [vmem:[%s634_s17 + $0x8] sm:$0xf] }
  0x8e   : > { %387 = vmatpush.bf16.msra.mxu2 %v316_v23 }
  0x92   : > { %388 = vmatpush.bf16.msra.mxu2 %v301_v24 }
  0x93   : > { %v648_v25 = vpop.permute.xlu2 %250 }
  0x94   : > { %v281_v26 = vpop.permute.xlu1 %280  ;;  %v279_v27 = vpop.permute.xlu0 %278 }
  0x95   : > { %v286_v28 = vsel %vm284_vm2, %v279_v27, %v281_v26 }
  0x96   : > { %389 = vmatpush.bf16.msra.mxu2 %v286_v28 }
  0x9b   : > { %v322_v29 = vpop.permute.xlu2 %321 }
  0x9c   : > { %v264_v30 = vpop.permute.xlu1 %263  ;;  %v298_v31 = vpop.permute.xlu0 %297  ;;  %v330_v32 = vsel %vm329_vm3, %v322_v29, %v324_v20 }
  0x9d   : > { %380 = vmatpush.bf16.msra.mxu1 %v330_v32  ;;  %v271_v33 = vsel %vm269_vm4, %v264_v30, %v266_v15  ;;  %v302_v38 = vsel %vm299_vm1, %v296_v21, %v298_v31  ;;  %v523_v21 = vor.u32 %v558_v18, %v522_v17 }
  0x9e   : > { %390 = vmatpush.bf16.msra.mxu2 %v271_v33 }
  0xa0   : > { %548 = vmatmul.msk.bf16.vlgmr.msra.gmra.mxu1 %vm355_vm5, %v660_v37 }
  0xa1   : > { %415 = vmatpush.bf16.msrb.mxu1 %v317_v34 }
  0xa3   : > { %v247_v51 = vpop.permute.xlu2 %246 }
  0xa4   : > { %v283_v39 = vpop.permute.xlu1 %282  ;;  %v277_v40 = vpop.permute.xlu0 %276 }
  0xa5   : > { %416 = vmatpush.bf16.msrb.mxu1 %v302_v38  ;;  %v285_v41 = vsel %vm284_vm2, %v277_v40, %v279_v27  ;;  %v287_v42 = vsel %vm284_vm2, %v281_v26, %v283_v39 }
  0xa6   : > { %361 = vmatpush.bf16.msra.mxu0 %v285_v41 }
  0xa9   : > { %417 = vmatpush.bf16.msrb.mxu1 %v287_v42 }
  0xab   : > { %v221_v59 = vpop.permute.xlu2 %220 }
  0xac   : > { %v249_v43 = vpop.permute.xlu1 %248  ;;  %v326_v44 = vpop.permute.xlu0 %325 }
  0xad   : > { %v256_v45 = vsel %vm254_vm6, %v249_v43, %v648_v25  ;;  %v331_v46 = vsel %vm329_vm3, %v324_v20, %v326_v44  ;;  %v255_v52 = vsel %vm254_vm6, %v247_v51, %v249_v43 }
  0xae   : > { %391 = vmatpush.bf16.msra.mxu2 %v256_v45  ;;  %408 = vmatpush.bf16.msra.mxu3 %v331_v46 }
  0xb1   : > { %549 = vmatmul.msk.bf16.vlgmr.msra.gmra.mxu3 %vm355_vm5, %v660_v37 }
  0xb3   : > { %v217_v10 = vpop.permute.xlu2 %216 }
  0xb4   : > { %v268_v47 = vpop.permute.xlu1 %267  ;;  %v262_v48 = vpop.permute.xlu0 %261 }
  0xb5   : > { %v270_v49 = vsel %vm269_vm4, %v262_v48, %v264_v30  ;;  %v272_v50 = vsel %vm269_vm4, %v266_v15, %v268_v47 }
  0xb6   : > { %362 = vmatpush.bf16.msra.mxu0 %v270_v49  ;;  %418 = vmatpush.bf16.msrb.mxu1 %v272_v50 }
  0xba   : > { %363 = vmatpush.bf16.msra.mxu0 %v255_v52 }
  0xbb   : > { %v339_v24 = vpop.permute.xlu2 %338 }
  0xbc   : > { %v236_v53 = vpop.permute.xlu1 %235  ;;  %v234_v54 = vpop.permute.xlu0 %233 }
  0xbd   : > { %v241_v55 = vsel %vm239_vm7, %v234_v54, %v236_v53 }
  0xbe   : > { %392 = vmatpush.bf16.msra.mxu2 %v241_v55 }
  0xc4   : > { %v219_v62 = vpop.permute.xlu1 %218  ;;  %v253_v63 = vpop.permute.xlu0 %252 }
  0xc5   : > { %v226_v0 = vsel %vm224_vm8, %v219_v62, %v221_v59  ;;  %v257_v1 = vsel %vm254_vm6, %v648_v25, %v253_v63  ;;  %v225_v13 = vsel %vm224_vm8, %v217_v10, %v219_v62 }
  0xc6   : > { %393 = vmatpush.bf16.msra.mxu2 %v226_v0  ;;  %419 = vmatpush.bf16.msrb.mxu1 %v257_v1 }
  0xca   : > { %394 = vmatpush.bf16.msra.mxu2 %v519_v2 }
  0xcc   : > { %v238_v6 = vpop.permute.xlu1 %237  ;;  %v232_v7 = vpop.permute.xlu0 %231 }
  0xcd   : > { %395 = vmatmul.bf16.vlgmr.msra.gmra.mxu2 %v543_v5  ;;  %v240_v8 = vsel %vm239_vm7, %v232_v7, %v234_v54  ;;  %v242_v9 = vsel %vm239_vm7, %v236_v53, %v238_v6 }
  0xce   : > { %364 = vmatpush.bf16.msra.mxu0 %v240_v8  ;;  %420 = vmatpush.bf16.msrb.mxu1 %v242_v9 }
  0xd2   : > { %365 = vmatpush.bf16.msra.mxu0 %v225_v13 }
  0xd4   : > { %v328_v15 = vpop.permute.xlu1 %327  ;;  %v223_v16 = vpop.permute.xlu0 %222 }
  0xd5   : > { %v332_v19 = vsel %vm329_vm3, %v326_v44, %v328_v15  ;;  %v227_v20 = vsel %vm224_vm8, %v221_v59, %v223_v16 }
  0xd6   : > { %366 = vmatpush.bf16.msra.mxu0 %v515_v14  ;;  %436 = vmatpush.bf16.msrb.mxu3 %v332_v19 }
  0xd7   : > { %421 = vmatpush.bf16.msrb.mxu1 %v227_v20 }
  0xd9   : > { %367 = vmatmul.bf16.vlgmr.msra.gmra.mxu0 %v543_v5  ;;  %550 = vmatmul.msk.bf16.vlgmr.msrb.gmra.mxu3 %vm355_vm5, %v660_v37 }
  0xdb   : > { %422 = vmatpush.bf16.msrb.mxu1 %v523_v21 }
  0xdc   : > { %v344_v31 = vpop.permute.xlu0 %343 }
  0xde   : > { %423 = vmatmul.bf16.vlgmr.msrb.gmra.mxu1 %v543_v5 }
 0x11d   : > { %v382_v22 = vpop.f32.mrf.mxu1 }
 0x125   : > { %v384_v28 = vpop.f32.mrf.mxu1 }
 0x134   : > { %v410_v23 = vpop.f32.mrf.mxu3 }
 0x13c   : > { %v412_v29 = vpop.f32.mrf.mxu3 }
 0x150   : > { %v396_v25 = vpop.f32.mrf.mxu2 }
 0x151   : > { %v397_v26 = vadd.f32 %v396_v25, %v339_v24 }
 0x153   : > { %v411_v27 = vadd.f32 %v410_v23, %v397_v26 }
 0x155   : > { %444 = vst [vmem:[%s170_s16 + $0x8] sm:$0xff] %v411_v27 }
 0x156   : > { %v368_v30 = vpop.f32.mrf.mxu0 }
 0x157   : > { %v369_v32 = vadd.f32 %v368_v30, %v339_v24 }
 0x158   : > { %v398_v33 = vpop.f32.mrf.mxu2 }
 0x159   : > { %v383_v34 = vadd.f32 %v382_v22, %v369_v32  ;;  %v399_v35 = vadd.f32 %v398_v33, %v344_v31 }
 0x15b   : > { %443 = vst [vmem:[%s170_s16] sm:$0xff] %v383_v34  ;;  %v413_v36 = vadd.f32 %v412_v29, %v399_v35  ;;  %v424_v37 = vpop.f32.mrf.mxu1 }
 0x15c   : > { %v425_v38 = vadd.f32 %v424_v37, %v339_v24  ;;  %v438_v39 = vpop.f32.mrf.mxu3 }
 0x15d   : > { %447 = vst [vmem:[%s170_s16 + $0x20] sm:$0xff] %v413_v36 }
 0x15e   : > { %v370_v40 = vpop.f32.mrf.mxu0  ;;  %v439_v41 = vadd.f32 %v438_v39, %v425_v38 }
 0x15f   : > { %v371_v42 = vadd.f32 %v370_v40, %v344_v31 }
 0x160   : > { %445 = vst [vmem:[%s170_s16 + $0x10] sm:$0xff] %v439_v41 }
 0x161   : > { %v385_v43 = vadd.f32 %v384_v28, %v371_v42 }
 0x163   : > { %446 = vst [vmem:[%s170_s16 + $0x18] sm:$0xff] %v385_v43  ;;  %v426_v44 = vpop.f32.mrf.mxu1 }
 0x164   : > { %v427_v45 = vadd.f32 %v426_v44, %v344_v31  ;;  %v440_v46 = vpop.f32.mrf.mxu3 }
 0x166   : > { %v441_v47 = vadd.f32 %v440_v46, %v427_v45 }
 0x168   : > { %448 = vst [vmem:[%s170_s16 + $0x28] sm:$0xff] %v441_v47 }
 0x169 PF: > { %s13_s12 = sadd.s32 1, %s589_s12  }
 0x16a   : > { %p10_p4 = scmp.ge.s32.totalorder %s13_s12, 4  }
 0x16c   :  { %12 = sbr.rel (!%p10_p4) target bundleno = 1 (0x1), region = 62 }

</bundles_post_ra>
